<compile_context>
chip_gen: v7x
topology: tpu7x:2x2x1
jax: 0.10.0
libtpu: 0.0.40
codegen_flags: <defaults>
</compile_context>

<pallas_src>
import functools

import jax
import jax.numpy as jnp
from jax import lax
from jax.experimental import pallas as pl
from jax.experimental.pallas import tpu as pltpu

EPS = 1e-5


def _fused_block_kernel(p1_ref, w1c_ref, ga_ref, ba_ref, keep_ref, rmask_ref,
                        w2_ref, g2_ref, b2_ref, out_ref, buf_ref,
                        *, wpad, inv_r, halo):
    """conv1(3x3)+1x1-shortcut -> BN(+ReLU) -> conv2(3x3) -> BN -> +idn -> ReLU.

    All intermediates stay on-chip.  Rows are the flattened padded grid
    N*(H+2)*(W+2); padding rows of p1 are exactly zero, so BN sums over all rows
    equal sums over the real pixels (inv_r = 1/(N*H*W)).
    """
    rp = p1_ref.shape[0]                      # padded row count N*(H+2)*(W+2)
    cout = out_ref.shape[1]
    kwidth = 2 * cout                         # fused lane width (conv1 | shortcut) = 128

    # ---- conv1 + 1x1 shortcut as ONE (rp, 32) x (32, 128) MXU matmul -------------
    acc1 = jnp.dot(p1_ref[...], w1c_ref[...], preferred_element_type=jnp.float32)

    # ---- single-pass training-mode BN over the real rows -------------------------
    s1 = jnp.sum(acc1, axis=0, keepdims=True)
    s2 = jnp.sum(acc1 * acc1, axis=0, keepdims=True)
    mean = s1 * inv_r
    var = s2 * inv_r - mean * mean            # biased variance, one reduction pass
    scale = lax.rsqrt(var + EPS) * ga_ref[...]
    shift = ba_ref[...] - mean * scale
    y = acc1 * scale + shift
    # ReLU only on conv1 lanes: keep==0 -> max(y, 0); keep==1 -> y (shortcut lanes).
    y = jnp.maximum(y, y * keep_ref[...])
    # Zero the spatial-padding rows so the conv2 taps read exact zero padding.
    y = y * rmask_ref[...]
    idn = y[:, cout:]                         # shortcut branch (conv1x1 -> BN), (rp, cout)

    # ---- stage y into a zero-haloed VMEM buffer for the shifted conv2 taps --------
    buf_ref[...] = jnp.zeros(buf_ref.shape, jnp.float32)
    buf_ref[halo:halo + rp, :] = y

    # ---- conv2 = 9 statically shifted (rp,128)x(128,cout) dots, f32 accumulate ----
    # (rows [cout:128) of every w2 tap are zero, so the shortcut lanes contribute 0)
    acc2 = jnp.zeros((rp, cout), jnp.float32)
    for t in range(9):
        ky, kx = t // 3, t % 3
        off = halo + (ky - 1) * wpad + (kx - 1)
        tap = buf_ref[off:off + rp, :]
        w2_t = w2_ref[t * kwidth:(t + 1) * kwidth, :]
        acc2 = acc2 + jnp.dot(tap, w2_t, preferred_element_type=jnp.float32)

    # ---- BN2 (stats over real rows only, via the row mask), residual add, ReLU ----
    macc2 = acc2 * rmask_ref[...]
    s1b = jnp.sum(macc2, axis=0, keepdims=True)
    s2b = jnp.sum(macc2 * macc2, axis=0, keepdims=True)   # mask^2 == mask
    mean2 = s1b * inv_r
    var2 = s2b * inv_r - mean2 * mean2
    scale2 = lax.rsqrt(var2 + EPS) * g2_ref[...]
    shift2 = b2_ref[...] - mean2 * scale2
    out_ref[...] = jnp.maximum(acc2 * scale2 + shift2 + idn, 0.0)


def _im2col_3x3(x_pad, H, W):
    """(N, H+2, W+2, C) -> (N, H, W, 9*C); tap order ky-major, kx, channel."""
    cols = [x_pad[:, dy:dy + H, dx:dx + W, :] for dy in range(3) for dx in range(3)]
    return jnp.concatenate(cols, axis=-1)


@jax.jit
def resnet_basic_block(x_nchw, params):
    """x_nchw: (N, Cin, H, W) float32. Returns (N, Cout, H, W). stride = 1."""
    N, Cin, H, W = x_nchw.shape
    Cout = params["w1"].shape[0]
    # Design assumes the fused (conv1 | shortcut) channel dim fills one 128-lane vreg.
    assert 2 * Cout == 128, "kernel layout assumes out_channels == 64"
    f32 = jnp.float32
    Hp, Wp = H + 2, W + 2
    R, Rp = N * H * W, N * Hp * Wp
    K1 = 9 * Cin
    K1p = ((K1 + 7) // 8) * 8                 # contraction dim 27 -> 32 (sublane aligned)
    halo = ((Wp + 1 + 7) // 8) * 8            # zero halo rows >= Wp+1, sublane aligned

    # ---------------- plain-JAX layout plumbing (tiny arrays, fused by XLA) --------
    x_nhwc = jnp.transpose(x_nchw, (0, 2, 3, 1))
    x_pad = jnp.pad(x_nhwc, ((0, 0), (1, 1), (1, 1), (0, 0)))
    p1_real = _im2col_3x3(x_pad, H, W)                                 # (N, H, W, 27)
    # im2col laid out on the zero-padded output grid: padding rows stay exactly zero.
    p1 = jnp.zeros((N, Hp, Wp, K1p), f32)
    p1 = p1.at[:, 1:H + 1, 1:W + 1, :K1].set(p1_real).reshape(Rp, K1p)

    # conv1 weight (OIHW -> (9*Cin, Cout)); 1x1 shortcut weight embedded in the
    # centre-tap rows (the centre tap IS x) -> one fused (K1p, 128) RHS.
    w1_flat = jnp.transpose(params["w1"], (2, 3, 1, 0)).reshape(K1, Cout)
    wd_flat = jnp.transpose(params["wd"], (2, 3, 1, 0)).reshape(Cin, Cout)
    wd_embed = jnp.zeros((K1, Cout), f32).at[4 * Cin:5 * Cin, :].set(wd_flat)
    w1c = jnp.zeros((K1p, 2 * Cout), f32)
    w1c = w1c.at[:K1, :].set(jnp.concatenate([w1_flat, wd_embed], axis=1))

    ga = jnp.concatenate([params["g1"], params["gd"]]).reshape(1, 2 * Cout)
    ba = jnp.concatenate([params["b1"], params["bd"]]).reshape(1, 2 * Cout)

    # 0 on conv1 lanes (ReLU), 1 on shortcut lanes (pass-through) -> one mul + one max.
    keep = jnp.concatenate([jnp.zeros((1, Cout), f32), jnp.ones((1, Cout), f32)], axis=1)
    # 1 on real pixels, 0 on the spatial padding ring.
    rmask = jnp.zeros((N, Hp, Wp, 1), f32)
    rmask = rmask.at[:, 1:H + 1, 1:W + 1, :].set(1.0).reshape(Rp, 1)

    # conv2 weights per tap, rows padded to 128 so shortcut lanes contribute nothing.
    w2_tap = jnp.transpose(params["w2"], (2, 3, 1, 0)).reshape(9, Cout, Cout)
    w2 = jnp.zeros((9, 2 * Cout, Cout), f32).at[:, :Cout, :].set(w2_tap)
    w2 = w2.reshape(9 * 2 * Cout, Cout)
    g2 = params["g2"].reshape(1, Cout)
    b2 = params["b2"].reshape(1, Cout)

    # ---------------- the single fused kernel --------------------------------------
    kernel = functools.partial(_fused_block_kernel, wpad=Wp, inv_r=1.0 / R, halo=halo)
    vmem = pl.BlockSpec(memory_space=pltpu.MemorySpace.VMEM)
    out_flat = pl.pallas_call(
        kernel,
        out_shape=jax.ShapeDtypeStruct((Rp, Cout), f32),
        in_specs=[vmem] * 9,
        out_specs=vmem,
        scratch_shapes=[pltpu.VMEM((Rp + 2 * halo, 2 * Cout), f32)],
    )(p1, w1c, ga, ba, keep, rmask, w2, g2, b2)

    y = out_flat.reshape(N, Hp, Wp, Cout)[:, 1:H + 1, 1:W + 1, :]
    return jnp.transpose(y, (0, 3, 1, 2))


# ----------------------------- pure-JAX reference ---------------------------
def ref_forward(x, p):
    def conv(x, w, pad):
        return lax.conv_general_dilated(
            x, w, (1, 1), ((pad, pad), (pad, pad)),
            dimension_numbers=("NCHW", "OIHW", "NCHW"))

    def bn(x, g, b):
        mean = x.mean(axis=(0, 2, 3), keepdims=True)
        var = ((x - mean) ** 2).mean(axis=(0, 2, 3), keepdims=True)
        return ((x - mean) / jnp.sqrt(var + EPS)) * g.reshape(1, -1, 1, 1) \
               + b.reshape(1, -1, 1, 1)

    out = jax.nn.relu(bn(conv(x, p["w1"], 1), p["g1"], p["b1"]))
    out = bn(conv(out, p["w2"], 1), p["g2"], p["b2"])
    idn = bn(conv(x, p["wd"], 0), p["gd"], p["bd"])
    return jax.nn.relu(out + idn)


if __name__ == "__main__":
    N, Cin, Cout, H, W = 2, 3, 64, 16, 16

    key = jax.random.PRNGKey(0)
    k1, k2, k3, kx = jax.random.split(key, 4)
    params = {
        "w1": jax.random.normal(k1, (Cout, Cin, 3, 3), jnp.float32) * 0.1,
        "w2": jax.random.normal(k2, (Cout, Cout, 3, 3), jnp.float32) * 0.05,
        "wd": jax.random.normal(k3, (Cout, Cin, 1, 1), jnp.float32) * 0.1,
        # PyTorch BatchNorm2d default init: weight = 1, bias = 0
        "g1": jnp.ones((Cout,), jnp.float32), "b1": jnp.zeros((Cout,), jnp.float32),
        "g2": jnp.ones((Cout,), jnp.float32), "b2": jnp.zeros((Cout,), jnp.float32),
        "gd": jnp.ones((Cout,), jnp.float32), "bd": jnp.zeros((Cout,), jnp.float32),
    }
    x = jax.random.normal(kx, (N, Cin, H, W), jnp.float32)

    y = jax.block_until_ready(resnet_basic_block(x, params))
    y_ref = jax.block_until_ready(ref_forward(x, params))

    assert y.shape == (N, Cout, H, W), y.shape
    assert jnp.allclose(y, y_ref, atol=1e-3, rtol=1e-3), \
        float(jnp.max(jnp.abs(y - y_ref)))
    print("KERNEL_OK")
</pallas_src>

<mosaic_0001>
module attributes {stable_mosaic.version = 11 : i64} {
  func.func @_fused_block_kernel(%arg0: memref<648x32xf32, #tpu.memory_space<vmem>>, %arg1: memref<32x128xf32, #tpu.memory_space<vmem>>, %arg2: memref<1x128xf32, #tpu.memory_space<vmem>>, %arg3: memref<1x128xf32, #tpu.memory_space<vmem>>, %arg4: memref<1x128xf32, #tpu.memory_space<vmem>>, %arg5: memref<648x1xf32, #tpu.memory_space<vmem>>, %arg6: memref<1152x64xf32, #tpu.memory_space<vmem>>, %arg7: memref<1x64xf32, #tpu.memory_space<vmem>>, %arg8: memref<1x64xf32, #tpu.memory_space<vmem>>, %arg9: memref<648x64xf32, #tpu.memory_space<vmem>>, %arg10: memref<696x128xf32, #tpu.memory_space<vmem>>) attributes {dimension_semantics = [], scalar_prefetch = 0 : i64, scratch_operands = 1 : i64, tpu.core_type = #tpu.core_type<tc>} {
    %c0 = arith.constant 0 : index
    %c0_0 = arith.constant 0 : index
    %0 = vector.load %arg0[%c0, %c0_0] : memref<648x32xf32, #tpu.memory_space<vmem>>, vector<648x32xf32>
    %c0_1 = arith.constant 0 : index
    %c0_2 = arith.constant 0 : index
    %1 = vector.load %arg1[%c0_1, %c0_2] : memref<32x128xf32, #tpu.memory_space<vmem>>, vector<32x128xf32>
    %cst = arith.constant dense<0.000000e+00> : vector<648x128xf32>
    %2 = tpu.matmul %0, %1, %cst {dimension_numbers = #tpu.dot_dimension_numbers<[1], [0], [0], [1], [0, 0, 1, 1], [], []>} : vector<648x32xf32>, vector<32x128xf32>, vector<648x128xf32> -> vector<648x128xf32>
    %cst_3 = arith.constant dense<0.000000e+00> : vector<128xf32>
    %3 = vector.multi_reduction <add>, %2, %cst_3 [0] : vector<648x128xf32> to vector<128xf32>
    %4 = vector.shape_cast %3 : vector<128xf32> to vector<1x128xf32>
    %5 = arith.mulf %2, %2 : vector<648x128xf32>
    %cst_4 = arith.constant dense<0.000000e+00> : vector<128xf32>
    %6 = vector.multi_reduction <add>, %5, %cst_4 [0] : vector<648x128xf32> to vector<128xf32>
    %7 = vector.shape_cast %6 : vector<128xf32> to vector<1x128xf32>
    %cst_5 = arith.constant 0.001953125 : f32
    %8 = vector.broadcast %cst_5 : f32 to vector<1x128xf32>
    %9 = arith.mulf %4, %8 : vector<1x128xf32>
    %cst_6 = arith.constant 0.001953125 : f32
    %10 = vector.broadcast %cst_6 : f32 to vector<1x128xf32>
    %11 = arith.mulf %7, %10 : vector<1x128xf32>
    %12 = arith.mulf %9, %9 : vector<1x128xf32>
    %13 = arith.subf %11, %12 : vector<1x128xf32>
    %cst_7 = arith.constant 9.99999974E-6 : f32
    %14 = vector.broadcast %cst_7 : f32 to vector<1x128xf32>
    %15 = arith.addf %13, %14 : vector<1x128xf32>
    %16 = math.rsqrt %15 : vector<1x128xf32>
    %c0_8 = arith.constant 0 : index
    %c0_9 = arith.constant 0 : index
    %17 = vector.load %arg2[%c0_8, %c0_9] : memref<1x128xf32, #tpu.memory_space<vmem>>, vector<1x128xf32>
    %18 = arith.mulf %16, %17 : vector<1x128xf32>
    %c0_10 = arith.constant 0 : index
    %c0_11 = arith.constant 0 : index
    %19 = vector.load %arg3[%c0_10, %c0_11] : memref<1x128xf32, #tpu.memory_space<vmem>>, vector<1x128xf32>
    %20 = arith.mulf %9, %18 : vector<1x128xf32>
    %21 = arith.subf %19, %20 : vector<1x128xf32>
    %22 = vector.broadcast %18 : vector<1x128xf32> to vector<648x128xf32>
    %23 = arith.mulf %2, %22 : vector<648x128xf32>
    %24 = vector.broadcast %21 : vector<1x128xf32> to vector<648x128xf32>
    %25 = arith.addf %23, %24 : vector<648x128xf32>
    %c0_12 = arith.constant 0 : index
    %c0_13 = arith.constant 0 : index
    %26 = vector.load %arg4[%c0_12, %c0_13] : memref<1x128xf32, #tpu.memory_space<vmem>>, vector<1x128xf32>
    %27 = vector.broadcast %26 : vector<1x128xf32> to vector<648x128xf32>
    %28 = arith.mulf %25, %27 : vector<648x128xf32>
    %29 = arith.maximumf %25, %28 : vector<648x128xf32>
    %c0_14 = arith.constant 0 : index
    %c0_15 = arith.constant 0 : index
    %30 = vector.load %arg5[%c0_14, %c0_15] : memref<648x1xf32, #tpu.memory_space<vmem>>, vector<648x1xf32>
    %31 = vector.broadcast %30 : vector<648x1xf32> to vector<648x128xf32>
    %32 = arith.mulf %29, %31 : vector<648x128xf32>
    %33 = vector.extract_strided_slice %32 {offsets = [0, 64], sizes = [648, 64], strides = [1, 1]} : vector<648x128xf32> to vector<648x64xf32>
    %cst_16 = arith.constant 0.000000e+00 : f32
    %34 = vector.broadcast %cst_16 : f32 to vector<696x128xf32>
    %c0_17 = arith.constant 0 : index
    %c0_18 = arith.constant 0 : index
    %35 = vector.load %arg10[%c0_17, %c0_18] : memref<696x128xf32, #tpu.memory_space<vmem>>, vector<696x128xf32>
    tpu.vector_store %arg10[%c0_17, %c0_18], %34 {strides = array<i32>} : memref<696x128xf32, #tpu.memory_space<vmem>>, vector<696x128xf32>,
    %c24 = arith.constant 24 : index
    %c0_19 = arith.constant 0 : index
    %36 = vector.load %arg10[%c24, %c0_19] : memref<696x128xf32, #tpu.memory_space<vmem>>, vector<648x128xf32>
    tpu.vector_store %arg10[%c24, %c0_19], %32 {strides = array<i32>} : memref<696x128xf32, #tpu.memory_space<vmem>>, vector<648x128xf32>,
    %cst_20 = arith.constant 0.000000e+00 : f32
    %37 = vector.broadcast %cst_20 : f32 to vector<648x64xf32>
    %c5 = arith.constant 5 : index
    %c0_21 = arith.constant 0 : index
    %38 = vector.load %arg10[%c5, %c0_21] : memref<696x128xf32, #tpu.memory_space<vmem>>, vector<648x128xf32>
    %c0_22 = arith.constant 0 : index
    %c0_23 = arith.constant 0 : index
    %39 = vector.load %arg6[%c0_22, %c0_23] : memref<1152x64xf32, #tpu.memory_space<vmem>>, vector<128x64xf32>
    %cst_24 = arith.constant dense<0.000000e+00> : vector<648x64xf32>
    %40 = tpu.matmul %38, %39, %cst_24 {dimension_numbers = #tpu.dot_dimension_numbers<[1], [0], [0], [1], [0, 0, 1, 1], [], []>} : vector<648x128xf32>, vector<128x64xf32>, vector<648x64xf32> -> vector<648x64xf32>
    %41 = arith.addf %37, %40 : vector<648x64xf32>
    %c6 = arith.constant 6 : index
    %c0_25 = arith.constant 0 : index
    %42 = vector.load %arg10[%c6, %c0_25] : memref<696x128xf32, #tpu.memory_space<vmem>>, vector<648x128xf32>
    %c128 = arith.constant 128 : index
    %c0_26 = arith.constant 0 : index
    %43 = vector.load %arg6[%c128, %c0_26] : memref<1152x64xf32, #tpu.memory_space<vmem>>, vector<128x64xf32>
    %cst_27 = arith.constant dense<0.000000e+00> : vector<648x64xf32>
    %44 = tpu.matmul %42, %43, %cst_27 {dimension_numbers = #tpu.dot_dimension_numbers<[1], [0], [0], [1], [0, 0, 1, 1], [], []>} : vector<648x128xf32>, vector<128x64xf32>, vector<648x64xf32> -> vector<648x64xf32>
    %45 = arith.addf %41, %44 : vector<648x64xf32>
    %c7 = arith.constant 7 : index
    %c0_28 = arith.constant 0 : index
    %46 = vector.load %arg10[%c7, %c0_28] : memref<696x128xf32, #tpu.memory_space<vmem>>, vector<648x128xf32>
    %c256 = arith.constant 256 : index
    %c0_29 = arith.constant 0 : index
    %47 = vector.load %arg6[%c256, %c0_29] : memref<1152x64xf32, #tpu.memory_space<vmem>>, vector<128x64xf32>
    %cst_30 = arith.constant dense<0.000000e+00> : vector<648x64xf32>
    %48 = tpu.matmul %46, %47, %cst_30 {dimension_numbers = #tpu.dot_dimension_numbers<[1], [0], [0], [1], [0, 0, 1, 1], [], []>} : vector<648x128xf32>, vector<128x64xf32>, vector<648x64xf32> -> vector<648x64xf32>
    %49 = arith.addf %45, %48 : vector<648x64xf32>
    %c23 = arith.constant 23 : index
    %c0_31 = arith.constant 0 : index
    %50 = vector.load %arg10[%c23, %c0_31] : memref<696x128xf32, #tpu.memory_space<vmem>>, vector<648x128xf32>
    %c384 = arith.constant 384 : index
    %c0_32 = arith.constant 0 : index
    %51 = vector.load %arg6[%c384, %c0_32] : memref<1152x64xf32, #tpu.memory_space<vmem>>, vector<128x64xf32>
    %cst_33 = arith.constant dense<0.000000e+00> : vector<648x64xf32>
    %52 = tpu.matmul %50, %51, %cst_33 {dimension_numbers = #tpu.dot_dimension_numbers<[1], [0], [0], [1], [0, 0, 1, 1], [], []>} : vector<648x128xf32>, vector<128x64xf32>, vector<648x64xf32> -> vector<648x64xf32>
    %53 = arith.addf %49, %52 : vector<648x64xf32>
    %c24_34 = arith.constant 24 : index
    %c0_35 = arith.constant 0 : index
    %54 = vector.load %arg10[%c24_34, %c0_35] : memref<696x128xf32, #tpu.memory_space<vmem>>, vector<648x128xf32>
    %c512 = arith.constant 512 : index
    %c0_36 = arith.constant 0 : index
    %55 = vector.load %arg6[%c512, %c0_36] : memref<1152x64xf32, #tpu.memory_space<vmem>>, vector<128x64xf32>
    %cst_37 = arith.constant dense<0.000000e+00> : vector<648x64xf32>
    %56 = tpu.matmul %54, %55, %cst_37 {dimension_numbers = #tpu.dot_dimension_numbers<[1], [0], [0], [1], [0, 0, 1, 1], [], []>} : vector<648x128xf32>, vector<128x64xf32>, vector<648x64xf32> -> vector<648x64xf32>
    %57 = arith.addf %53, %56 : vector<648x64xf32>
    %c25 = arith.constant 25 : index
    %c0_38 = arith.constant 0 : index
    %58 = vector.load %arg10[%c25, %c0_38] : memref<696x128xf32, #tpu.memory_space<vmem>>, vector<648x128xf32>
    %c640 = arith.constant 640 : index
    %c0_39 = arith.constant 0 : index
    %59 = vector.load %arg6[%c640, %c0_39] : memref<1152x64xf32, #tpu.memory_space<vmem>>, vector<128x64xf32>
    %cst_40 = arith.constant dense<0.000000e+00> : vector<648x64xf32>
    %60 = tpu.matmul %58, %59, %cst_40 {dimension_numbers = #tpu.dot_dimension_numbers<[1], [0], [0], [1], [0, 0, 1, 1], [], []>} : vector<648x128xf32>, vector<128x64xf32>, vector<648x64xf32> -> vector<648x64xf32>
    %61 = arith.addf %57, %60 : vector<648x64xf32>
    %c41 = arith.constant 41 : index
    %c0_41 = arith.constant 0 : index
    %62 = vector.load %arg10[%c41, %c0_41] : memref<696x128xf32, #tpu.memory_space<vmem>>, vector<648x128xf32>
    %c768 = arith.constant 768 : index
    %c0_42 = arith.constant 0 : index
    %63 = vector.load %arg6[%c768, %c0_42] : memref<1152x64xf32, #tpu.memory_space<vmem>>, vector<128x64xf32>
    %cst_43 = arith.constant dense<0.000000e+00> : vector<648x64xf32>
    %64 = tpu.matmul %62, %63, %cst_43 {dimension_numbers = #tpu.dot_dimension_numbers<[1], [0], [0], [1], [0, 0, 1, 1], [], []>} : vector<648x128xf32>, vector<128x64xf32>, vector<648x64xf32> -> vector<648x64xf32>
    %65 = arith.addf %61, %64 : vector<648x64xf32>
    %c42 = arith.constant 42 : index
    %c0_44 = arith.constant 0 : index
    %66 = vector.load %arg10[%c42, %c0_44] : memref<696x128xf32, #tpu.memory_space<vmem>>, vector<648x128xf32>
    %c896 = arith.constant 896 : index
    %c0_45 = arith.constant 0 : index
    %67 = vector.load %arg6[%c896, %c0_45] : memref<1152x64xf32, #tpu.memory_space<vmem>>, vector<128x64xf32>
    %cst_46 = arith.constant dense<0.000000e+00> : vector<648x64xf32>
    %68 = tpu.matmul %66, %67, %cst_46 {dimension_numbers = #tpu.dot_dimension_numbers<[1], [0], [0], [1], [0, 0, 1, 1], [], []>} : vector<648x128xf32>, vector<128x64xf32>, vector<648x64xf32> -> vector<648x64xf32>
    %69 = arith.addf %65, %68 : vector<648x64xf32>
    %c43 = arith.constant 43 : index
    %c0_47 = arith.constant 0 : index
    %70 = vector.load %arg10[%c43, %c0_47] : memref<696x128xf32, #tpu.memory_space<vmem>>, vector<648x128xf32>
    %c1024 = arith.constant 1024 : index
    %c0_48 = arith.constant 0 : index
    %71 = vector.load %arg6[%c1024, %c0_48] : memref<1152x64xf32, #tpu.memory_space<vmem>>, vector<128x64xf32>
    %cst_49 = arith.constant dense<0.000000e+00> : vector<648x64xf32>
    %72 = tpu.matmul %70, %71, %cst_49 {dimension_numbers = #tpu.dot_dimension_numbers<[1], [0], [0], [1], [0, 0, 1, 1], [], []>} : vector<648x128xf32>, vector<128x64xf32>, vector<648x64xf32> -> vector<648x64xf32>
    %73 = arith.addf %69, %72 : vector<648x64xf32>
    %c0_50 = arith.constant 0 : index
    %c0_51 = arith.constant 0 : index
    %74 = vector.load %arg5[%c0_50, %c0_51] : memref<648x1xf32, #tpu.memory_space<vmem>>, vector<648x1xf32>
    %75 = vector.broadcast %74 : vector<648x1xf32> to vector<648x64xf32>
    %76 = arith.mulf %73, %75 : vector<648x64xf32>
    %cst_52 = arith.constant dense<0.000000e+00> : vector<64xf32>
    %77 = vector.multi_reduction <add>, %76, %cst_52 [0] : vector<648x64xf32> to vector<64xf32>
    %78 = vector.shape_cast %77 : vector<64xf32> to vector<1x64xf32>
    %79 = arith.mulf %76, %76 : vector<648x64xf32>
    %cst_53 = arith.constant dense<0.000000e+00> : vector<64xf32>
    %80 = vector.multi_reduction <add>, %79, %cst_53 [0] : vector<648x64xf32> to vector<64xf32>
    %81 = vector.shape_cast %80 : vector<64xf32> to vector<1x64xf32>
    %cst_54 = arith.constant 0.001953125 : f32
    %82 = vector.broadcast %cst_54 : f32 to vector<1x64xf32>
    %83 = arith.mulf %78, %82 : vector<1x64xf32>
    %cst_55 = arith.constant 0.001953125 : f32
    %84 = vector.broadcast %cst_55 : f32 to vector<1x64xf32>
    %85 = arith.mulf %81, %84 : vector<1x64xf32>
    %86 = arith.mulf %83, %83 : vector<1x64xf32>
    %87 = arith.subf %85, %86 : vector<1x64xf32>
    %cst_56 = arith.constant 9.99999974E-6 : f32
    %88 = vector.broadcast %cst_56 : f32 to vector<1x64xf32>
    %89 = arith.addf %87, %88 : vector<1x64xf32>
    %90 = math.rsqrt %89 : vector<1x64xf32>
    %c0_57 = arith.constant 0 : index
    %c0_58 = arith.constant 0 : index
    %91 = vector.load %arg7[%c0_57, %c0_58] : memref<1x64xf32, #tpu.memory_space<vmem>>, vector<1x64xf32>
    %92 = arith.mulf %90, %91 : vector<1x64xf32>
    %c0_59 = arith.constant 0 : index
    %c0_60 = arith.constant 0 : index
    %93 = vector.load %arg8[%c0_59, %c0_60] : memref<1x64xf32, #tpu.memory_space<vmem>>, vector<1x64xf32>
    %94 = arith.mulf %83, %92 : vector<1x64xf32>
    %95 = arith.subf %93, %94 : vector<1x64xf32>
    %96 = vector.broadcast %92 : vector<1x64xf32> to vector<648x64xf32>
    %97 = arith.mulf %73, %96 : vector<648x64xf32>
    %98 = vector.broadcast %95 : vector<1x64xf32> to vector<648x64xf32>
    %99 = arith.addf %97, %98 : vector<648x64xf32>
    %100 = arith.addf %99, %33 : vector<648x64xf32>
    %cst_61 = arith.constant 0.000000e+00 : f32
    %101 = vector.broadcast %cst_61 : f32 to vector<648x64xf32>
    %102 = arith.maximumf %100, %101 : vector<648x64xf32>
    %c0_62 = arith.constant 0 : index
    %c0_63 = arith.constant 0 : index
    %103 = vector.load %arg9[%c0_62, %c0_63] : memref<648x64xf32, #tpu.memory_space<vmem>>, vector<648x64xf32>
    tpu.vector_store %arg9[%c0_62, %c0_63], %102 {strides = array<i32>} : memref<648x64xf32, #tpu.memory_space<vmem>>, vector<648x64xf32>,
    return
  }
}

</mosaic_0001>

<bundles_post_ra>
// kernel: resnet_basic_block.1
= control target key start
LH: loop header
LB: loop body
LE: loop exit
PB: predicated region body
PF: predicated region fallthrough
CT: control target
= control target key end

     0   :  { %v22744_v0 = vmov 0.0|0.0   ;;  %vm14817_vm0 = vmmov 0   ;;  %v22753_v4 = vmov 0.0   ;;  %vm117_vm1 = vcmask 261120   ;;  %s22734_s1 = inlined_call_operand.vmem [shape: f32[32,128], index: 1, kind: input, shape index: {}]   ;;  %s22735_s0 = inlined_call_operand.vmem [shape: f32[648,32], index: 0, kind: input, shape index: {}]   ;;  %s22736_s5 = inlined_call_operand.vmem [shape: f32[648,1], index: 5, kind: input, shape index: {}]   ;;  %s22737_s6 = inlined_call_operand.vmem [shape: f32[1152,64], index: 6, kind: input, shape index: {}]   ;;  %s22738_s2 = inlined_call_operand.vmem [shape: f32[1,128], index: 2, kind: input, shape index: {}]   ;;  %s22739_s3 = inlined_call_operand.vmem [shape: f32[1,128], index: 3, kind: input, shape index: {}]   ;;  %s22740_s4 = inlined_call_operand.vmem [shape: f32[1,128], index: 4, kind: input, shape index: {}]   ;;  %s22741_s7 = inlined_call_operand.vmem [shape: f32[1,64], index: 7, kind: input, shape index: {}]   ;;  %s22742_s8 = inlined_call_operand.vmem [shape: f32[1,64], index: 8, kind: input, shape index: {}]   ;;  %s22743_s9 = inlined_call_operand.vmem [shape: f32[648,64], index: 9, kind: output, shape index: {}]  }
   0x1   :  { %13344 = vmatprep.subr.bf16.mxu0 %v22744_v0  ;;  %v113_v1 = vld [vmem:[%s22734_s1] sm:$0xff]  ;;  %v114_v2 = vld [vmem:[%s22734_s1 + $0x8] sm:$0xff]  ;;  %v115_v3 = vld [vmem:[%s22734_s1 + $0x10] sm:$0xff]  ;;  %10626 = vmatprep.mubr.msk.f32.mxu0 %vm14817_vm0, %v22753_v4  ;;  %2003 = vst [vmem:[#allocation2] sm:$0xff] %v22753_v4  ;;  %v14819_v10 = vmov 0   ;;  %vm8408_vm2 = vcmask 523264  }
   0x2   :  { %2004 = vst [vmem:[#allocation2 + $0x8] sm:$0xff] %v22753_v4  ;;  %2005 = vst [vmem:[#allocation2 + $0x10] sm:$0xff] %v22753_v4  ;;  %v13345_v5 = vpack.c.bf16 %v114_v2, %v113_v1  ;;  %v116_v6 = vld [vmem:[%s22734_s1 + $0x18] sm:$0xff]  ;;  %13566 = vmatprep.subr.bf16.mxu1 %v22744_v0  ;;  %12010 = vmatprep.mubr.msk.f32.mxu1 %vm14817_vm0, %v22753_v4  ;;  %v32_v8 = vld [vmem:[%s22735_s0] sm:$0xff] }
   0x3   :  { %2087 = vst [vmem:[#allocation2 + $0x2a0] sm:$0xff] %v22753_v4  ;;  %2088 = vst [vmem:[#allocation2 + $0x2a8] sm:$0xff] %v22753_v4  ;;  %v13348_v7 = vpack.c.bf16 %v116_v6, %v115_v3  ;;  %v33_v9 = vld [vmem:[%s22735_s0 + $0x8] sm:$0xff]  ;;  %14802 = vset.pattern.permute.xlu0 %v14819_v10  ;;  %v14909_v11 = vld [vmem:[%s22736_s5 + $0x18] sm:$0xff]  ;;  %14803 = vset.pattern.permute.xlu1 %v14819_v10 }
   0x4   :  { %2089 = vst [vmem:[#allocation2 + $0x2b0] sm:$0xff] %v22753_v4  ;;  %13346 = vmatpush3.bf16.msra.mxu0 %v13345_v5  ;;  %1534 = vperm.xlu0 %14802, %v14909_v11   ;;  %v14916_v12 = vld [vmem:[%s22736_s5 + $0x20] sm:$0xff]  ;;  %v34_v13 = vld [vmem:[%s22735_s0 + $0x10] sm:$0xff]  ;;  %v14928_v14 = vld [vmem:[%s22736_s5 + $0x28] sm:$0xff] }
   0x5   :  { %13347 = vmatprep.subr.bf16.mxu0 %v22744_v0  ;;  %v14933_v15 = vld [vmem:[%s22736_s5 + $0x38] sm:$0xff]  ;;  %1544 = vperm.xlu1 %14803, %v14928_v14   ;;  %v14946_v17 = vld [vmem:[%s22736_s5 + $0x30] sm:$0xff]  ;;  %v14951_v18 = vld [vmem:[%s22736_s5 + $0x48] sm:$0xff] }
   0x6   :  { %v35_v16 = vld [vmem:[%s22735_s0 + $0x18] sm:$0xff]  ;;  %v36_v19 = vld [vmem:[%s22735_s0 + $0x20] sm:$0xff]  ;;  %v37_v22 = vld [vmem:[%s22735_s0 + $0x28] sm:$0xff] }
   0x7   :  { %v14964_v20 = vld [vmem:[%s22736_s5 + $0x40] sm:$0xff]  ;;  %v14969_v21 = vld [vmem:[%s22736_s5 + $0x58] sm:$0xff]  ;;  %v14982_v23 = vld [vmem:[%s22736_s5 + $0x50] sm:$0xff] }
   0x8   :  { %13349 = vmatpush3.bf16.msra.mxu0 %v13348_v7  ;;  %1539 = vperm.xlu0 %14802, %v14916_v12   ;;  %v14987_v24 = vld [vmem:[%s22736_s5 + $0x68] sm:$0xff]  ;;  %v38_v25 = vld [vmem:[%s22735_s0 + $0x30] sm:$0xff]  ;;  %v15000_v26 = vld [vmem:[%s22736_s5 + $0x60] sm:$0xff] }
   0x9   :  { %13350 = vmatprep.subr.bf16.mxu0 %v22744_v0  ;;  %1549 = vperm.xlu1 %14803, %v14946_v17   ;;  %v15005_v27 = vld [vmem:[%s22736_s5 + $0x78] sm:$0xff]  ;;  %v15018_v29 = vld [vmem:[%s22736_s5 + $0x70] sm:$0xff]  ;;  %v15023_v30 = vld [vmem:[%s22736_s5 + $0x88] sm:$0xff] }
   0xa   :  { %v39_v28 = vld [vmem:[%s22735_s0 + $0x38] sm:$0xff]  ;;  %v40_v31 = vld [vmem:[%s22735_s0 + $0x40] sm:$0xff]  ;;  %v41_v34 = vld [vmem:[%s22735_s0 + $0x48] sm:$0xff] }
   0xb   :  { %10627 = vmatmul.mubr.msk.f32.vlgmr.msra.gmra.mrb[0].mxu0 %vm117_vm1, %v32_v8  ;;  %v15036_v32 = vld [vmem:[%s22736_s5 + $0x80] sm:$0xff]  ;;  %v15041_v33 = vld [vmem:[%s22736_s5 + $0x98] sm:$0xff]  ;;  %v15054_v35 = vld [vmem:[%s22736_s5 + $0x90] sm:$0xff] }
   0xc   :  { %10629 = vmatprep.mubr.msk.f32.mxu0 %vm14817_vm0, %v22753_v4  ;;  %1554 = vperm.xlu0 %14802, %v14933_v15   ;;  %v15059_v36 = vld [vmem:[%s22736_s5 + $0xa8] sm:$0xff]  ;;  %v42_v37 = vld [vmem:[%s22735_s0 + $0x50] sm:$0xff]  ;;  %v15072_v38 = vld [vmem:[%s22736_s5 + $0xa0] sm:$0xff] }
   0xd   :  { %1559 = vperm.xlu1 %14803, %v14964_v20   ;;  %v15077_v39 = vld [vmem:[%s22736_s5 + $0xb8] sm:$0xff]  ;;  %v15090_v41 = vld [vmem:[%s22736_s5 + $0xb0] sm:$0xff]  ;;  %v15095_v42 = vld [vmem:[%s22736_s5 + $0xc8] sm:$0xff] }
   0xe   :  { %v43_v40 = vld [vmem:[%s22735_s0 + $0x58] sm:$0xff]  ;;  %v44_v43 = vld [vmem:[%s22735_s0 + $0x60] sm:$0xff]  ;;  %v45_v46 = vld [vmem:[%s22735_s0 + $0x68] sm:$0xff] }
   0xf   :  { %10630 = vmatmul.mubr.msk.f32.gmra.mrb[2].mxu0 %vm117_vm1, %v33_v9  ;;  %v15108_v44 = vld [vmem:[%s22736_s5 + $0xc0] sm:$0xff]  ;;  %v15113_v45 = vld [vmem:[%s22736_s5 + $0xd8] sm:$0xff]  ;;  %v15126_v47 = vld [vmem:[%s22736_s5 + $0xd0] sm:$0xff] }
  0x10   :  { %10632 = vmatprep.mubr.msk.f32.mxu0 %vm14817_vm0, %v22753_v4  ;;  %1564 = vperm.xlu0 %14802, %v14951_v18   ;;  %v15131_v48 = vld [vmem:[%s22736_s5 + $0xe8] sm:$0xff]  ;;  %v46_v49 = vld [vmem:[%s22735_s0 + $0x70] sm:$0xff]  ;;  %v15144_v50 = vld [vmem:[%s22736_s5 + $0xe0] sm:$0xff] }
  0x11   :  { %1569 = vperm.xlu1 %14803, %v14982_v23   ;;  %v15149_v51 = vld [vmem:[%s22736_s5 + $0xf8] sm:$0xff]  ;;  %v15162_v53 = vld [vmem:[%s22736_s5 + $0xf0] sm:$0xff]  ;;  %v15167_v54 = vld [vmem:[%s22736_s5 + $0x108] sm:$0xff] }
  0x12   :  { %v47_v52 = vld [vmem:[%s22735_s0 + $0x78] sm:$0xff]  ;;  %v48_v55 = vld [vmem:[%s22735_s0 + $0x80] sm:$0xff]  ;;  %v49_v58 = vld [vmem:[%s22735_s0 + $0x88] sm:$0xff] }
  0x13   :  { %10633 = vmatmul.mubr.msk.f32.gmra.mrb[4].mxu0 %vm117_vm1, %v34_v13  ;;  %v15180_v56 = vld [vmem:[%s22736_s5 + $0x100] sm:$0xff]  ;;  %v15185_v57 = vld [vmem:[%s22736_s5 + $0x118] sm:$0xff]  ;;  %v15198_v59 = vld [vmem:[%s22736_s5 + $0x110] sm:$0xff] }
  0x14   :  { %10635 = vmatprep.mubr.msk.f32.mxu0 %vm14817_vm0, %v22753_v4  ;;  %1574 = vperm.xlu0 %14802, %v14969_v21   ;;  %v15203_v60 = vld [vmem:[%s22736_s5 + $0x128] sm:$0xff]  ;;  %v50_v61 = vld [vmem:[%s22735_s0 + $0x90] sm:$0xff]  ;;  %v1472_v62 = vld [vmem:[%s22736_s5 + $0x120] sm:$0xff] }
  0x15   :  { %1579 = vperm.xlu1 %14803, %v15000_v26   ;;  %v1475_v63 = vld [vmem:[%s22736_s5 + $0x138] sm:$0xff]  ;;  %v1474_v2 = vld [vmem:[%s22736_s5 + $0x130] sm:$0xff]  ;;  %v15231_v3 = vld [vmem:[%s22736_s5] sm:$0xff] }
  0x16   :  { %v51_v1 = vld [vmem:[%s22735_s0 + $0x98] sm:$0xff]  ;;  %v52_v5 = vld [vmem:[%s22735_s0 + $0xa0] sm:$0xff]  ;;  %v15246_v7 = vld [vmem:[%s22736_s5 + $0x8] sm:$0xff] }
  0x17   :  { %10636 = vmatmul.mubr.msk.f32.gmra.mrb[6].mxu0 %vm117_vm1, %v35_v16  ;;  %v1476_v6 = vld [vmem:[%s22736_s5 + $0x140] sm:$0xff]  ;;  %v53_v8 = vld [vmem:[%s22735_s0 + $0xa8] sm:$0xff]  ;;  %v15263_v10 = vld [vmem:[%s22736_s5 + $0x10] sm:$0xff] }
  0x18   :  { %10638 = vmatprep.mubr.msk.f32.mxu0 %vm14817_vm0, %v22753_v4  ;;  %1584 = vperm.xlu0 %14802, %v14987_v24   ;;  %v15258_v9 = vld [vmem:[%s22736_s5 + $0x148] sm:$0xff]  ;;  %v54_v13 = vld [vmem:[%s22735_s0 + $0xb0] sm:$0xff]  ;;  %v55_v16 = vld [vmem:[%s22735_s0 + $0xb8] sm:$0xff] }
  0x19   :  { %1589 = vperm.xlu1 %14803, %v15018_v29  }
  0x1b   :  { %10639 = vmatmul.mubr.msk.f32.gmra.mrb[8].mxu0 %vm117_vm1, %v36_v19  ;;  %v15281_v19 = vld [vmem:[%s22736_s5 + $0x150] sm:$0xff] }
  0x1c   :  { %10641 = vmatprep.mubr.msk.f32.mxu0 %vm14817_vm0, %v22753_v4  ;;  %1594 = vperm.xlu0 %14802, %v15005_v27  }
  0x1d   :  { %1599 = vperm.xlu1 %14803, %v15036_v32  }
  0x1f   :  { %10642 = vmatmul.mubr.msk.f32.gmra.mrb[10].mxu0 %vm117_vm1, %v37_v22  ;;  %v1480_v22 = vld [vmem:[%s22736_s5 + $0x160] sm:$0xff] }
  0x20   :  { %10644 = vmatprep.mubr.msk.f32.mxu0 %vm14817_vm0, %v22753_v4  ;;  %1604 = vperm.xlu0 %14802, %v15023_v30  }
  0x21   :  { %1609 = vperm.xlu1 %14803, %v15054_v35  }
  0x23   :  { %10645 = vmatmul.mubr.msk.f32.gmra.mrb[12].mxu0 %vm117_vm1, %v38_v25  ;;  %v56_v25 = vld [vmem:[%s22735_s0 + $0xc0] sm:$0xff] }
  0x24   :  { %10647 = vmatprep.mubr.msk.f32.mxu0 %vm14817_vm0, %v22753_v4  ;;  %1614 = vperm.xlu0 %14802, %v15041_v33  }
  0x25   :  { %1619 = vperm.xlu1 %14803, %v15072_v38  }
  0x27   :  { %10648 = vmatmul.mubr.msk.f32.gmra.mrb[14].mxu0 %vm117_vm1, %v39_v28  ;;  %v15296_v28 = vld [vmem:[%s22736_s5 + $0x158] sm:$0xff] }
  0x28   :  { %10650 = vmatprep.mubr.msk.f32.mxu0 %vm14817_vm0, %v22753_v4  ;;  %1624 = vperm.xlu0 %14802, %v15059_v36  }
  0x29   :  { %1629 = vperm.xlu1 %14803, %v15090_v41  }
  0x2b   :  { %10651 = vmatmul.mubr.msk.f32.gmra.mrb[16].mxu0 %vm117_vm1, %v40_v31  ;;  %v1482_v31 = vld [vmem:[%s22736_s5 + $0x170] sm:$0xff] }
  0x2c   :  { %10653 = vmatprep.mubr.msk.f32.mxu0 %vm14817_vm0, %v22753_v4  ;;  %1634 = vperm.xlu0 %14802, %v15077_v39  }
  0x2d   :  { %1639 = vperm.xlu1 %14803, %v15108_v44  }
  0x2f   :  { %10654 = vmatmul.mubr.msk.f32.gmra.mrb[18].mxu0 %vm117_vm1, %v41_v34  ;;  %v57_v34 = vld [vmem:[%s22735_s0 + $0xc8] sm:$0xff] }
  0x30   :  { %10656 = vmatprep.mubr.msk.f32.mxu0 %vm14817_vm0, %v22753_v4  ;;  %1644 = vperm.xlu0 %14802, %v15095_v42  }
  0x31   :  { %1649 = vperm.xlu1 %14803, %v15126_v47  }
  0x33   :  { %10657 = vmatmul.mubr.msk.f32.gmra.mrb[20].mxu0 %vm117_vm1, %v42_v37  ;;  %v15311_v37 = vld [vmem:[%s22736_s5 + $0x168] sm:$0xff] }
  0x34   :  { %10659 = vmatprep.mubr.msk.f32.mxu0 %vm14817_vm0, %v22753_v4  ;;  %1654 = vperm.xlu0 %14802, %v15113_v45  }
  0x35   :  { %1659 = vperm.xlu1 %14803, %v15144_v50  }
  0x37   :  { %10660 = vmatmul.mubr.msk.f32.gmra.mrb[22].mxu0 %vm117_vm1, %v43_v40  ;;  %v1484_v40 = vld [vmem:[%s22736_s5 + $0x180] sm:$0xff] }
  0x38   :  { %10662 = vmatprep.mubr.msk.f32.mxu0 %vm14817_vm0, %v22753_v4  ;;  %1664 = vperm.xlu0 %14802, %v15131_v48  }
  0x39   :  { %1669 = vperm.xlu1 %14803, %v15162_v53  }
  0x3b   :  { %10663 = vmatmul.mubr.msk.f32.gmra.mrb[24].mxu0 %vm117_vm1, %v44_v43  ;;  %v58_v43 = vld [vmem:[%s22735_s0 + $0xd0] sm:$0xff] }
  0x3c   :  { %10665 = vmatprep.mubr.msk.f32.mxu0 %vm14817_vm0, %v22753_v4  ;;  %1674 = vperm.xlu0 %14802, %v15149_v51  }
  0x3d   :  { %1679 = vperm.xlu1 %14803, %v15180_v56  }
  0x3f   :  { %10666 = vmatmul.mubr.msk.f32.gmra.mrb[26].mxu0 %vm117_vm1, %v45_v46  ;;  %v15326_v46 = vld [vmem:[%s22736_s5 + $0x178] sm:$0xff] }
  0x40   :  { %10668 = vmatprep.mubr.msk.f32.mxu0 %vm14817_vm0, %v22753_v4  ;;  %1684 = vperm.xlu0 %14802, %v15167_v54  }
  0x41   :  { %1689 = vperm.xlu1 %14803, %v15198_v59  }
  0x43   :  { %10669 = vmatmul.mubr.msk.f32.gmra.mrb[28].mxu0 %vm117_vm1, %v46_v49  ;;  %v1486_v49 = vld [vmem:[%s22736_s5 + $0x190] sm:$0xff] }
  0x44   :  { %10671 = vmatprep.mubr.msk.f32.mxu0 %vm14817_vm0, %v22753_v4  ;;  %1694 = vperm.xlu0 %14802, %v15185_v57  }
  0x45   :  { %1699 = vperm.xlu1 %14803, %v1472_v62   ;;  %v15356_v62 = vld [vmem:[%s22736_s5 + $0x198] sm:$0xff] }
  0x47   :  { %10672 = vmatmul.mubr.msk.f32.gmra.mrb[30].mxu0 %vm117_vm1, %v47_v52  ;;  %v59_v52 = vld [vmem:[%s22735_s0 + $0xd8] sm:$0xff] }
  0x48   :  { %10674 = vmatprep.mubr.msk.f32.mxu0 %vm14817_vm0, %v22753_v4  ;;  %1704 = vperm.xlu0 %14802, %v15203_v60  }
  0x49   :  { %1709 = vperm.xlu1 %14803, %v1474_v2   ;;  %v15371_v2 = vld [vmem:[%s22736_s5 + $0x1a8] sm:$0xff] }
  0x4b   :  { %10675 = vmatmul.mubr.msk.f32.gmra.mrb[32].mxu0 %vm117_vm1, %v48_v55  ;;  %v15341_v55 = vld [vmem:[%s22736_s5 + $0x188] sm:$0xff] }
  0x4c   :  { %10677 = vmatprep.mubr.msk.f32.mxu0 %vm14817_vm0, %v22753_v4  ;;  %1714 = vperm.xlu0 %14802, %v1475_v63   ;;  %v1490_v63 = vld [vmem:[%s22736_s5 + $0x1b0] sm:$0xff] }
  0x4d   :  { %1719 = vperm.xlu1 %14803, %v1476_v6   ;;  %v62_v6 = vld [vmem:[%s22735_s0 + $0xf0] sm:$0xff] }
  0x4f   :  { %10678 = vmatmul.mubr.msk.f32.gmra.mrb[34].mxu0 %vm117_vm1, %v49_v58  ;;  %v1488_v58 = vld [vmem:[%s22736_s5 + $0x1a0] sm:$0xff] }
  0x50   :  { %10680 = vmatprep.mubr.msk.f32.mxu0 %vm14817_vm0, %v22753_v4  ;;  %1519 = vperm.xlu0 %14802, %v15231_v3  }
  0x51   :  { %1724 = vperm.xlu1 %14803, %v15258_v9  }
  0x53   :  { %10681 = vmatmul.mubr.msk.f32.gmra.mrb[36].mxu0 %vm117_vm1, %v50_v61  ;;  %v60_v61 = vld [vmem:[%s22735_s0 + $0xe0] sm:$0xff] }
  0x54   :  { %10683 = vmatprep.mubr.msk.f32.mxu0 %vm14817_vm0, %v22753_v4  ;;  %1524 = vperm.xlu0 %14802, %v15246_v7  }
  0x55   :  { %1729 = vperm.xlu1 %14803, %v15281_v19  }
  0x57   :  { %10684 = vmatmul.mubr.msk.f32.gmra.mrb[38].mxu0 %vm117_vm1, %v51_v1  ;;  %v61_v1 = vld [vmem:[%s22735_s0 + $0xe8] sm:$0xff] }
  0x58   :  { %10686 = vmatprep.mubr.msk.f32.mxu0 %vm14817_vm0, %v22753_v4  ;;  %1529 = vperm.xlu0 %14802, %v15263_v10  }
  0x59   :  { %1734 = vperm.xlu1 %14803, %v15296_v28  }
  0x5b   :  { %10687 = vmatmul.mubr.msk.f32.gmra.mrb[40].mxu0 %vm117_vm1, %v52_v5  ;;  %v1492_v5 = vld [vmem:[%s22736_s5 + $0x1c0] sm:$0xff] }
  0x5c   :  { %10689 = vmatprep.mubr.msk.f32.mxu0 %vm14817_vm0, %v22753_v4  ;;  %1739 = vperm.xlu0 %14802, %v1480_v22   ;;  %v15401_v22 = vld [vmem:[%s22736_s5 + $0x1c8] sm:$0xff] }
  0x5d   :  { %1744 = vperm.xlu1 %14803, %v15311_v37  }
  0x5f   :  { %10690 = vmatmul.mubr.msk.f32.gmra.mrb[42].mxu0 %vm117_vm1, %v53_v8  ;;  %v15386_v8 = vld [vmem:[%s22736_s5 + $0x1b8] sm:$0xff] }
  0x60   :  { %10692 = vmatprep.mubr.msk.f32.mxu0 %vm14817_vm0, %v22753_v4  ;;  %1749 = vperm.xlu0 %14802, %v1482_v31   ;;  %v64_v31 = vld [vmem:[%s22735_s0 + $0x100] sm:$0xff] }
  0x61   :  { %1754 = vperm.xlu1 %14803, %v15326_v46  }
  0x63   :  { %10693 = vmatmul.mubr.msk.f32.gmra.mrb[44].mxu0 %vm117_vm1, %v54_v13  ;;  %v1494_v13 = vld [vmem:[%s22736_s5 + $0x1d0] sm:$0xff] }
  0x64   :  { %10695 = vmatprep.mubr.msk.f32.mxu0 %vm14817_vm0, %v22753_v4  ;;  %1759 = vperm.xlu0 %14802, %v1484_v40   ;;  %v1498_v40 = vld [vmem:[%s22736_s5 + $0x1f0] sm:$0xff] }
  0x65   :  { %1764 = vperm.xlu1 %14803, %v15341_v55  }
  0x67   :  { %10696 = vmatmul.mubr.msk.f32.gmra.mrb[46].mxu0 %vm117_vm1, %v55_v16  ;;  %v63_v16 = vld [vmem:[%s22735_s0 + $0xf8] sm:$0xff] }
  0x68   :  { %10698 = vmatprep.mubr.msk.f32.mxu0 %vm14817_vm0, %v22753_v4  ;;  %1769 = vperm.xlu0 %14802, %v1486_v49   ;;  %v15431_v49 = vld [vmem:[%s22736_s5 + $0x1e8] sm:$0xff] }
  0x69   :  { %1774 = vperm.xlu1 %14803, %v15356_v62  }
  0x6b   :  { %10699 = vmatmul.mubr.msk.f32.gmra.mrb[48].mxu0 %vm117_vm1, %v56_v25  ;;  %v1496_v25 = vld [vmem:[%s22736_s5 + $0x1e0] sm:$0xff] }
  0x6c   :  { %10701 = vmatprep.mubr.msk.f32.mxu0 %vm14817_vm0, %v22753_v4  ;;  %1779 = vperm.xlu0 %14802, %v1488_v58   ;;  %v66_v58 = vld [vmem:[%s22735_s0 + $0x110] sm:$0xff] }
  0x6d   :  { %1784 = vperm.xlu1 %14803, %v15371_v2  }
  0x6f   :  { %10702 = vmatmul.mubr.msk.f32.gmra.mrb[50].mxu0 %vm117_vm1, %v57_v34  ;;  %v15416_v34 = vld [vmem:[%s22736_s5 + $0x1d8] sm:$0xff] }
  0x70   :  { %10704 = vmatprep.mubr.msk.f32.mxu0 %vm14817_vm0, %v22753_v4  ;;  %1789 = vperm.xlu0 %14802, %v1490_v63   ;;  %v15451_v63 = vld [vmem:[%s22736_s5 + $0x210] sm:$0xff] }
  0x71   :  { %1794 = vperm.xlu1 %14803, %v15386_v8  }
  0x73   :  { %10705 = vmatmul.mubr.msk.f32.gmra.mrb[52].mxu0 %vm117_vm1, %v58_v43  ;;  %v65_v43 = vld [vmem:[%s22735_s0 + $0x108] sm:$0xff] }
  0x74   :  { %10707 = vmatprep.mubr.msk.f32.mxu0 %vm14817_vm0, %v22753_v4  ;;  %1799 = vperm.xlu0 %14802, %v1492_v5  }
  0x75   :  { %1804 = vperm.xlu1 %14803, %v15401_v22  }
  0x77   :  { %10708 = vmatmul.mubr.msk.f32.gmra.mrb[54].mxu0 %vm117_vm1, %v59_v52  ;;  %v1500_v52 = vld [vmem:[%s22736_s5 + $0x200] sm:$0xff] }
  0x78   :  { %10710 = vmatprep.mubr.msk.f32.mxu0 %vm14817_vm0, %v22753_v4  ;;  %1809 = vperm.xlu0 %14802, %v1494_v13   ;;  %v15471_v13 = vld [vmem:[%s22736_s5 + $0x220] sm:$0xff] }
  0x79   :  { %1814 = vperm.xlu1 %14803, %v15416_v34  }
  0x7b   :  { %10711 = vmatmul.mubr.msk.f32.gmra.mrb[56].mxu0 %vm117_vm1, %v60_v61  ;;  %v15446_v61 = vld [vmem:[%s22736_s5 + $0x1f8] sm:$0xff] }
  0x7c   :  { %10713 = vmatprep.mubr.msk.f32.mxu0 %vm14817_vm0, %v22753_v4  ;;  %1819 = vperm.xlu0 %14802, %v1496_v25   ;;  %v15484_v25 = vld [vmem:[%s22736_s5 + $0x218] sm:$0xff] }
  0x7d   :  { %1824 = vperm.xlu1 %14803, %v15431_v49  }
  0x7f   :  { %10714 = vmatmul.mubr.msk.f32.gmra.mrb[58].mxu0 %vm117_vm1, %v61_v1  ;;  %v67_v1 = vld [vmem:[%s22735_s0 + $0x118] sm:$0xff] }
  0x80   :  { %10716 = vmatprep.mubr.msk.f32.mxu0 %vm14817_vm0, %v22753_v4  ;;  %1829 = vperm.xlu0 %14802, %v1498_v40  }
  0x81   :  { %1834 = vperm.xlu1 %14803, %v15446_v61  }
  0x83   :  { %10717 = vmatmul.mubr.msk.f32.gmra.mrb[60].mxu0 %vm117_vm1, %v62_v6  ;;  %v15461_v5 = vpop.permute.xlu0 %1534  ;;  %v15466_v6 = vld [vmem:[%s22736_s5 + $0x208] sm:$0xff] }
  0x84   :  { %10719 = vmatprep.mubr.msk.f32.mxu0 %vm14817_vm0, %v22753_v4  ;;  %1839 = vperm.xlu0 %14802, %v1500_v52   ;;  %23088 = vst [vmem:[#allocation3_spill] sm:$0xff] %v15461_v5  ;;  %v15501_v52 = vpop.permute.xlu1 %1544  ;;  %v15546_v5 = vld [vmem:[%s22736_s5 + $0x248] sm:$0xff] }
  0x85   :  { %1844 = vperm.xlu1 %14803, %v15466_v6   ;;  %23091 = vst [vmem:[#allocation6_spill] sm:$0xff] %v15501_v52  ;;  %v15526_v52 = vld [vmem:[%s22736_s5 + $0x238] sm:$0xff]  ;;  %23096 = vst [vmem:[#allocation11_spill] sm:$0xff] %v15546_v5 }
  0x87   :  { %10720 = vmatmul.mubr.msk.f32.gmra.mrb[62].mxu0 %vm117_vm1, %v63_v16  ;;  %v68_v16 = vld [vmem:[%s22735_s0 + $0x120] sm:$0xff]  ;;  %v15491_v40 = vpop.permute.xlu0 %1539 }
  0x88   :  { %10722 = vmatprep.mubr.msk.f32.mxu0 %vm14817_vm0, %v22753_v4  ;;  %1849 = vperm.xlu0 %14802, %v15451_v63   ;;  %23090 = vst [vmem:[#allocation5_spill] sm:$0xff] %v15491_v40  ;;  %v15531_v40 = vld [vmem:[%s22736_s5 + $0x250] sm:$0xff] }
  0x89   :  { %1854 = vperm.xlu1 %14803, %v15484_v25   ;;  %23094 = vst [vmem:[#allocation9_spill] sm:$0xff] %v15531_v40 }
  0x8b   :  { %10723 = vmatmul.mubr.msk.f32.gmra.mrb[64].mxu0 %vm117_vm1, %v64_v31  ;;  %v15489_v31 = vld [vmem:[%s22736_s5 + $0x230] sm:$0xff]  ;;  %v15521_v0 = vpop.permute.xlu0 %1554 }
  0x8c   :  { %10725 = vmatprep.mubr.msk.f32.mxu0 %vm14817_vm0, %v22753_v4  ;;  %1859 = vperm.xlu0 %14802, %v15471_v13   ;;  %23089 = vst [vmem:[#allocation4_spill] sm:$0xff] %v15489_v31  ;;  %23093 = vst [vmem:[#allocation8_spill] sm:$0xff] %v15521_v0  ;;  %v71_v0 = vld [vmem:[%s22735_s0 + $0x138] sm:$0xff] }
  0x8f   :  { %10726 = vmatmul.mubr.msk.f32.gmra.mrb[66].mxu0 %vm117_vm1, %v65_v43  ;;  %v69_v43 = vld [vmem:[%s22735_s0 + $0x128] sm:$0xff] }
  0x90   :  { %10728 = vmatprep.mubr.msk.f32.mxu0 %vm14817_vm0, %v22753_v4  ;;  %1869 = vperm.xlu0 %14802, %v15489_v31   ;;  %v15568_v31 = vld [vmem:[%s22736_s5 + $0x258] sm:$0xff] }
  0x91   :  { %23100 = vst [vmem:[#allocation15_spill] sm:$0xff] %v15568_v31 }
  0x93   :  { %10729 = vmatmul.mubr.msk.f32.gmra.mrb[68].mxu0 %vm117_vm1, %v66_v58  ;;  %v15506_v58 = vld [vmem:[%s22736_s5 + $0x228] sm:$0xff] }
  0x94   :  { %10731 = vmatprep.mubr.msk.f32.mxu0 %vm14817_vm0, %v22753_v4  ;;  %1864 = vperm.xlu1 %14803, %v15506_v58  }
  0x97   :  { %10732 = vmatmul.mubr.msk.f32.gmra.mrb[70].mxu0 %vm117_vm1, %v67_v1  ;;  %v15511_v1 = vld [vmem:[%s22736_s5 + $0x240] sm:$0xff] }
  0x98   :  { %10734 = vmatprep.mubr.msk.f32.mxu0 %vm14817_vm0, %v22753_v4  ;;  %23092 = vst [vmem:[#allocation7_spill] sm:$0xff] %v15511_v1  ;;  %1879 = vperm.xlu0 %14802, %v15511_v1  }
  0x99   :  { %1874 = vperm.xlu1 %14803, %v15526_v52  }
  0x9b   :  { %10735 = vmatmul.mubr.msk.f32.gmra.mrb[72].mxu0 %vm117_vm1, %v68_v16  ;;  %v70_v16 = vld [vmem:[%s22735_s0 + $0x130] sm:$0xff] }
  0x9c   :  { %10737 = vmatprep.mubr.msk.f32.mxu0 %vm14817_vm0, %v22753_v4  ;;  %1889 = vperm.xlu0 %14802, %v15531_v40   ;;  %v15553_v40 = vpop.permute.xlu0 %1564 }
  0x9d   :  { %23098 = vst [vmem:[#allocation13_spill] sm:$0xff] %v15553_v40  ;;  %1884 = vperm.xlu1 %14803, %v15546_v5   ;;  %v15573_v40 = vld [vmem:[%s22736_s5 + $0x270] sm:$0xff] }
  0x9e   :  { %23101 = vst [vmem:[#allocation16_spill] sm:$0xff] %v15573_v40 }
  0x9f   :  { %10738 = vmatmul.mubr.msk.f32.gmra.mrb[74].mxu0 %vm117_vm1, %v69_v43  ;;  %v15533_v43 = vpop.permute.xlu1 %1549 }
  0xa0   :  { %10740 = vmatprep.mubr.msk.f32.mxu0 %vm14817_vm0, %v22753_v4  ;;  %23095 = vst [vmem:[#allocation10_spill] sm:$0xff] %v15533_v43  ;;  %v15551_v43 = vld [vmem:[%s22736_s5 + $0x260] sm:$0xff] }
  0xa1   :  { %23097 = vst [vmem:[#allocation12_spill] sm:$0xff] %v15551_v43  ;;  %1899 = vperm.xlu0 %14802, %v15551_v43   ;;  %1894 = vperm.xlu1 %14803, %v15568_v31   ;;  %v15588_v43 = vld [vmem:[%s22736_s5 + $0x268] sm:$0xff]  ;;  %v15608_v31 = vld [vmem:[%s22736_s5 + $0x278] sm:$0xff] }
  0xa3   :  { %10741 = vmatmul.mubr.msk.f32.gmra.mrb[76].mxu0 %vm117_vm1, %v70_v16  ;;  %v72_v16 = vld [vmem:[%s22735_s0 + $0x140] sm:$0xff]  ;;  %v15563_v1 = vpop.permute.xlu1 %1559 }
  0xa4   :  { %10743 = vmatprep.mubr.msk.f32.mxu0 %vm14817_vm0, %v22753_v4  ;;  %23099 = vst [vmem:[#allocation14_spill] sm:$0xff] %v15563_v1  ;;  %v15583_v1 = vpop.permute.xlu0 %1574 }
  0xa5   :  { %1909 = vperm.xlu0 %14802, %v15573_v40   ;;  %23102 = vst [vmem:[#allocation17_spill] sm:$0xff] %v15583_v1  ;;  %v15593_v40 = vld [vmem:[%s22736_s5 + $0x280] sm:$0xff]  ;;  %1904 = vperm.xlu1 %14803, %v15588_v43   ;;  %v74_v1 = vld [vmem:[%s22735_s0 + $0x150] sm:$0xff] }
  0xa7   :  { %10744 = vmatmul.mubr.msk.f32.gmra.mrb[78].mxu0 %vm117_vm1, %v71_v0  ;;  %v73_v0 = vld [vmem:[%s22735_s0 + $0x148] sm:$0xff] }
  0xa8   :  { %10746 = vmatprep.mubr.msk.f32.mxu0 %vm14817_vm0, %v22753_v4  ;;  %v15610_v5 = vpop.permute.xlu0 %1584 }
  0xa9   :  { %1919 = vperm.xlu0 %14802, %v15593_v40   ;;  %23104 = vst [vmem:[#allocation19_spill] sm:$0xff] %v15610_v5  ;;  %1914 = vperm.xlu1 %14803, %v15608_v31  }
  0xab   :  { %10747 = vmatmul.mubr.msk.f32.gmra.mrb[80].mxu0 %vm117_vm1, %v72_v16  ;;  %v15595_v16 = vpop.permute.xlu1 %1569 }
  0xac   :  { %10749 = vmatprep.mubr.msk.f32.mxu0 %vm14817_vm0, %v22753_v4  ;;  %23103 = vst [vmem:[#allocation18_spill] sm:$0xff] %v15595_v16 }
  0xad   :  { %7929 = vperm.xlu0 %14802, %v15246_v7   ;;  %7924 = vperm.xlu1 %14803, %v15231_v3   ;;  %v76_v7 = vld [vmem:[%s22735_s0 + $0x160] sm:$0xff] }
  0xaf   :  { %10750 = vmatmul.mubr.msk.f32.gmra.mrb[82].mxu0 %vm117_vm1, %v73_v0  ;;  %v75_v0 = vld [vmem:[%s22735_s0 + $0x158] sm:$0xff]  ;;  %v15620_v16 = vpop.permute.xlu1 %1579 }
  0xb0   :  { %10752 = vmatprep.mubr.msk.f32.mxu0 %vm14817_vm0, %v22753_v4  ;;  %23105 = vst [vmem:[#allocation20_spill] sm:$0xff] %v15620_v16 }
  0xb1   :  { %7939 = vperm.xlu0 %14802, %v14909_v11   ;;  %7934 = vperm.xlu1 %14803, %v15263_v10   ;;  %v77_v11 = vld [vmem:[%s22735_s0 + $0x168] sm:$0xff] }
  0xb3   :  { %10753 = vmatmul.mubr.msk.f32.gmra.mrb[84].mxu0 %vm117_vm1, %v74_v1  ;;  %v15630_v1 = vpop.permute.xlu0 %1594  ;;  %v15632_v5 = vpop.permute.xlu1 %1589 }
  0xb4   :  { %10755 = vmatprep.mubr.msk.f32.mxu0 %vm14817_vm0, %v22753_v4  ;;  %23106 = vst [vmem:[#allocation21_spill] sm:$0xff] %v15630_v1  ;;  %23107 = vst [vmem:[#allocation22_spill] sm:$0xff] %v15632_v5 }
  0xb5   :  { %7949 = vperm.xlu0 %14802, %v14928_v14   ;;  %7944 = vperm.xlu1 %14803, %v14916_v12   ;;  %v78_v14 = vld [vmem:[%s22735_s0 + $0x170] sm:$0xff]  ;;  %v79_v12 = vld [vmem:[%s22735_s0 + $0x178] sm:$0xff] }
  0xb7   :  { %10756 = vmatmul.mubr.msk.f32.gmra.mrb[86].mxu0 %vm117_vm1, %v75_v0  ;;  %v15642_v3 = vpop.permute.xlu0 %1604  ;;  %v15652_v10 = vpop.permute.xlu1 %1599 }
  0xb8   :  { %10758 = vmatprep.mubr.msk.f32.mxu0 %vm14817_vm0, %v22753_v4  ;;  %23108 = vst [vmem:[#allocation23_spill] sm:$0xff] %v15642_v3  ;;  %23109 = vst [vmem:[#allocation24_spill] sm:$0xff] %v15652_v10 }
  0xb9   :  { %7959 = vperm.xlu0 %14802, %v14933_v15   ;;  %7954 = vperm.xlu1 %14803, %v14946_v17   ;;  %v80_v17 = vld [vmem:[%s22735_s0 + $0x180] sm:$0xff] }
  0xbb   :  { %10759 = vmatmul.mubr.msk.f32.gmra.mrb[88].mxu0 %vm117_vm1, %v76_v7  ;;  %v15662_v15 = vpop.permute.xlu0 %1614  ;;  %v15664_v0 = vpop.permute.xlu1 %1609 }
  0xbc   :  { %10761 = vmatprep.mubr.msk.f32.mxu0 %vm14817_vm0, %v22753_v4  ;;  %23110 = vst [vmem:[#allocation25_spill] sm:$0xff] %v15662_v15  ;;  %23111 = vst [vmem:[#allocation26_spill] sm:$0xff] %v15664_v0 }
  0xbd   :  { %7969 = vperm.xlu0 %14802, %v14951_v18   ;;  %7964 = vperm.xlu1 %14803, %v14964_v20   ;;  %v81_v20 = vld [vmem:[%s22735_s0 + $0x188] sm:$0xff] }
  0xbf   :  { %10762 = vmatmul.mubr.msk.f32.gmra.mrb[90].mxu0 %vm117_vm1, %v77_v11  ;;  %v15674_v18 = vpop.permute.xlu0 %1624 }
  0xc0   :  { %10764 = vmatprep.mubr.msk.f32.mxu0 %vm14817_vm0, %v22753_v4  ;;  %23112 = vst [vmem:[#allocation27_spill] sm:$0xff] %v15674_v18 }
  0xc1   :  { %7979 = vperm.xlu0 %14802, %v14969_v21   ;;  %7974 = vperm.xlu1 %14803, %v14982_v23   ;;  %v15684_v21 = vpop.permute.xlu1 %1619  ;;  %v82_v23 = vld [vmem:[%s22735_s0 + $0x190] sm:$0xff] }
  0xc2   :  { %23113 = vst [vmem:[#allocation28_spill] sm:$0xff] %v15684_v21 }
  0xc3   :  { %10765 = vmatmul.mubr.msk.f32.gmra.mrb[92].mxu0 %vm117_vm1, %v78_v14 }
  0xc4   :  { %10767 = vmatprep.mubr.msk.f32.mxu0 %vm14817_vm0, %v22753_v4 }
  0xc5   :  { %7989 = vperm.xlu0 %14802, %v14987_v24   ;;  %7984 = vperm.xlu1 %14803, %v15000_v26   ;;  %v15694_v24 = vpop.permute.xlu0 %1634  ;;  %v15696_v7 = vpop.permute.xlu1 %1629  ;;  %v83_v26 = vld [vmem:[%s22735_s0 + $0x198] sm:$0xff] }
  0xc6   :  { %23114 = vst [vmem:[#allocation29_spill] sm:$0xff] %v15694_v24  ;;  %23115 = vst [vmem:[#allocation30_spill] sm:$0xff] %v15696_v7 }
  0xc7   :  { %10768 = vmatmul.mubr.msk.f32.gmra.mrb[94].mxu0 %vm117_vm1, %v79_v12 }
  0xc8   :  { %10770 = vmatprep.mubr.msk.f32.mxu0 %vm14817_vm0, %v22753_v4 }
  0xc9   :  { %7999 = vperm.xlu0 %14802, %v15005_v27   ;;  %7994 = vperm.xlu1 %14803, %v15018_v29   ;;  %v15706_v27 = vpop.permute.xlu0 %1644  ;;  %v84_v29 = vld [vmem:[%s22735_s0 + $0x1a0] sm:$0xff] }
  0xca   :  { %23116 = vst [vmem:[#allocation31_spill] sm:$0xff] %v15706_v27 }
  0xcb   :  { %10771 = vmatmul.mubr.msk.f32.gmra.mrb[96].mxu0 %vm117_vm1, %v80_v17 }
  0xcc   :  { %10773 = vmatprep.mubr.msk.f32.mxu0 %vm14817_vm0, %v22753_v4 }
  0xcd   :  { %8009 = vperm.xlu0 %14802, %v15023_v30   ;;  %8004 = vperm.xlu1 %14803, %v15036_v32   ;;  %v15716_v30 = vpop.permute.xlu1 %1639  ;;  %v85_v32 = vld [vmem:[%s22735_s0 + $0x1a8] sm:$0xff] }
  0xce   :  { %23117 = vst [vmem:[#allocation32_spill] sm:$0xff] %v15716_v30 }
  0xcf   :  { %10774 = vmatmul.mubr.msk.f32.gmra.mrb[98].mxu0 %vm117_vm1, %v81_v20 }
  0xd0   :  { %10776 = vmatprep.mubr.msk.f32.mxu0 %vm14817_vm0, %v22753_v4 }
  0xd1   :  { %8019 = vperm.xlu0 %14802, %v15041_v33   ;;  %8014 = vperm.xlu1 %14803, %v15054_v35   ;;  %v15726_v33 = vpop.permute.xlu0 %1654  ;;  %v15730_v14 = vpop.permute.xlu1 %1649 }
  0xd2   :  { %23118 = vst [vmem:[#allocation33_spill] sm:$0xff] %v15726_v33  ;;  %23119 = vst [vmem:[#allocation34_spill] sm:$0xff] %v15730_v14 }
  0xd3   :  { %10777 = vmatmul.mubr.msk.f32.gmra.mrb[100].mxu0 %vm117_vm1, %v82_v23 }
  0xd4   :  { %10779 = vmatprep.mubr.msk.f32.mxu0 %vm14817_vm0, %v22753_v4 }
  0xd5   :  { %8029 = vperm.xlu0 %14802, %v15059_v36   ;;  %8024 = vperm.xlu1 %14803, %v15072_v38   ;;  %v86_v36 = vld [vmem:[%s22735_s0 + $0x1b0] sm:$0xff]  ;;  %v15742_v17 = vpop.permute.xlu0 %1664 }
  0xd6   :  { %23120 = vst [vmem:[#allocation35_spill] sm:$0xff] %v15742_v17 }
  0xd7   :  { %10780 = vmatmul.mubr.msk.f32.gmra.mrb[102].mxu0 %vm117_vm1, %v83_v26 }
  0xd8   :  { %10782 = vmatprep.mubr.msk.f32.mxu0 %vm14817_vm0, %v22753_v4 }
  0xd9   :  { %8039 = vperm.xlu0 %14802, %v15077_v39   ;;  %8034 = vperm.xlu1 %14803, %v15090_v41   ;;  %v87_v41 = vld [vmem:[%s22735_s0 + $0x1b8] sm:$0xff] }
  0xdb   :  { %10783 = vmatmul.mubr.msk.f32.gmra.mrb[104].mxu0 %vm117_vm1, %v84_v29 }
  0xdc   :  { %10785 = vmatprep.mubr.msk.f32.mxu0 %vm14817_vm0, %v22753_v4 }
  0xdd   :  { %8049 = vperm.xlu0 %14802, %v15095_v42   ;;  %v15758_v42 = vpop.permute.xlu1 %1659  ;;  %8044 = vperm.xlu1 %14803, %v15108_v44  }
  0xde   :  { %v15728_v11 = vpop.f32.mrb[0].mxu0  ;;  %23121 = vst [vmem:[#allocation36_spill] sm:$0xff] %v15758_v42 }
  0xdf   :  { %v10628_v35 = vpop.f32.mrb[1].mxu0  ;;  %10786 = vmatmul.mubr.msk.f32.gmra.mrb[106].mxu0 %vm117_vm1, %v85_v32  ;;  %v917_v38 = vmul.f32 %v15728_v11, %v15728_v11 }
  0xe0   :  { %10788 = vmatprep.mubr.msk.f32.mxu0 %vm14817_vm0, %v22753_v4 }
  0xe1   :  { %8059 = vperm.xlu0 %14802, %v15113_v45   ;;  %v15777_v45 = vpop.permute.xlu1 %1669  ;;  %8054 = vperm.xlu1 %14803, %v15126_v47  }
  0xe2   :  { %v15740_v12 = vpop.f32.mrb[2].mxu0  ;;  %23123 = vst [vmem:[#allocation38_spill] sm:$0xff] %v15777_v45 }
  0xe3   :  { %v831_v39 = vadd.f32 %v15740_v12, %v15728_v11  ;;  %v918_v20 = vmul.f32 %v15740_v12, %v15740_v12  ;;  %v10631_v23 = vpop.f32.mrb[3].mxu0  ;;  %10789 = vmatmul.mubr.msk.f32.gmra.mrb[108].mxu0 %vm117_vm1, %v86_v36 }
  0xe4   :  { %10791 = vmatprep.mubr.msk.f32.mxu0 %vm14817_vm0, %v22753_v4 }
  0xe5   :  { %v998_v26 = vadd.f32 %v918_v20, %v917_v38  ;;  %v88_v38 = vld [vmem:[%s22735_s0 + $0x1c0] sm:$0xff]  ;;  %v15773_v20 = vpop.permute.xlu0 %1674  ;;  %8069 = vperm.xlu0 %14802, %v15131_v48   ;;  %8064 = vperm.xlu1 %14803, %v15144_v50  }
  0xe6   :  { %v15760_v29 = vpop.f32.mrb[4].mxu0  ;;  %23122 = vst [vmem:[#allocation37_spill] sm:$0xff] %v15773_v20 }
  0xe7   :  { %v832_v32 = vadd.f32 %v831_v39, %v15760_v29  ;;  %v919_v35 = vmul.f32 %v15760_v29, %v15760_v29  ;;  %v10634_v36 = vpop.f32.mrb[5].mxu0  ;;  %10792 = vmatmul.mubr.msk.f32.gmra.mrb[110].mxu0 %vm117_vm1, %v87_v41 }
  0xe8   :  { %10794 = vmatprep.mubr.msk.f32.mxu0 %vm14817_vm0, %v22753_v4 }
  0xe9   :  { %v999_v44 = vadd.f32 %v998_v26, %v919_v35  ;;  %v89_v26 = vld [vmem:[%s22735_s0 + $0x1c8] sm:$0xff]  ;;  %v15792_v47 = vpop.permute.xlu0 %1684  ;;  %8079 = vperm.xlu0 %14802, %v15149_v51   ;;  %8074 = vperm.xlu1 %14803, %v15162_v53  }
  0xea   :  { %v15775_v23 = vpop.f32.mrb[6].mxu0  ;;  %23124 = vst [vmem:[#allocation39_spill] sm:$0xff] %v15792_v47 }
  0xeb   :  { %v833_v39 = vadd.f32 %v832_v32, %v15775_v23  ;;  %v920_v41 = vmul.f32 %v15775_v23, %v15775_v23  ;;  %v10637_v36 = vpop.f32.mrb[7].mxu0  ;;  %10795 = vmatmul.mubr.msk.f32.gmra.mrb[112].mxu0 %vm117_vm1, %v88_v38 }
  0xec   :  { %10797 = vmatprep.mubr.msk.f32.mxu0 %vm14817_vm0, %v22753_v4 }
  0xed   :  { %v1000_v35 = vadd.f32 %v999_v44, %v920_v41  ;;  %v90_v44 = vld [vmem:[%s22735_s0 + $0x1d0] sm:$0xff]  ;;  %v15805_v41 = vpop.permute.xlu1 %1679  ;;  %8089 = vperm.xlu0 %14802, %v15167_v54   ;;  %8084 = vperm.xlu1 %14803, %v15180_v56  }
  0xee   :  { %v15790_v45 = vpop.f32.mrb[8].mxu0  ;;  %23125 = vst [vmem:[#allocation40_spill] sm:$0xff] %v15805_v41 }
  0xef   :  { %v834_v48 = vadd.f32 %v833_v39, %v15790_v45  ;;  %v921_v32 = vmul.f32 %v15790_v45, %v15790_v45  ;;  %v10640_v38 = vpop.f32.mrb[9].mxu0  ;;  %10798 = vmatmul.mubr.msk.f32.gmra.mrb[114].mxu0 %vm117_vm1, %v89_v26 }
  0xf0   :  { %10800 = vmatprep.mubr.msk.f32.mxu0 %vm14817_vm0, %v22753_v4 }
  0xf1   :  { %v1001_v50 = vadd.f32 %v1000_v35, %v921_v32  ;;  %v91_v35 = vld [vmem:[%s22735_s0 + $0x1d8] sm:$0xff]  ;;  %v15820_v32 = vpop.permute.xlu0 %1694  ;;  %v15824_v54 = vpop.permute.xlu1 %1689  ;;  %8099 = vperm.xlu0 %14802, %v15185_v57   ;;  %8094 = vperm.xlu1 %14803, %v15198_v59  }
  0xf2   :  { %v15807_v36 = vpop.f32.mrb[10].mxu0  ;;  %23126 = vst [vmem:[#allocation41_spill] sm:$0xff] %v15820_v32  ;;  %23127 = vst [vmem:[#allocation42_spill] sm:$0xff] %v15824_v54 }
  0xf3   :  { %v835_v51 = vadd.f32 %v834_v48, %v15807_v36  ;;  %v922_v39 = vmul.f32 %v15807_v36, %v15807_v36  ;;  %v10643_v26 = vpop.f32.mrb[11].mxu0  ;;  %10801 = vmatmul.mubr.msk.f32.gmra.mrb[116].mxu0 %vm117_vm1, %v90_v44 }
  0xf4   :  { %10803 = vmatprep.mubr.msk.f32.mxu0 %vm14817_vm0, %v22753_v4 }
  0xf5   :  { %v1002_v53 = vadd.f32 %v1001_v50, %v922_v39  ;;  %v92_v50 = vld [vmem:[%s22735_s0 + $0x1e0] sm:$0xff]  ;;  %v15839_v56 = vpop.permute.xlu0 %1704  ;;  %8109 = vperm.xlu0 %14802, %v15203_v60  }
  0xf6   :  { %v15822_v38 = vpop.f32.mrb[12].mxu0  ;;  %23128 = vst [vmem:[#allocation43_spill] sm:$0xff] %v15839_v56  ;;  %v7877_v60 = vld [vmem:[%s22736_s5 + $0x120] sm:$0xff] }
  0xf7   :  { %v836_v48 = vadd.f32 %v835_v51, %v15822_v38  ;;  %v923_v44 = vmul.f32 %v15822_v38, %v15822_v38  ;;  %v10646_v26 = vpop.f32.mrb[13].mxu0  ;;  %10804 = vmatmul.mubr.msk.f32.gmra.mrb[118].mxu0 %vm117_vm1, %v91_v35  ;;  %8104 = vperm.xlu1 %14803, %v7877_v60  }
  0xf8   :  { %10806 = vmatprep.mubr.msk.f32.mxu0 %vm14817_vm0, %v22753_v4 }
  0xf9   :  { %v1003_v39 = vadd.f32 %v1002_v53, %v923_v44  ;;  %v93_v53 = vld [vmem:[%s22735_s0 + $0x1e8] sm:$0xff]  ;;  %v15852_v44 = vpop.permute.xlu1 %1699  ;;  %v15871_v47 = vpop.permute.xlu0 %1714 }
  0xfa   :  { %v15837_v41 = vpop.f32.mrb[14].mxu0  ;;  %23129 = vst [vmem:[#allocation44_spill] sm:$0xff] %v15852_v44  ;;  %23131 = vst [vmem:[#allocation45_spill] sm:$0xff] %v15871_v47 }
  0xfb   :  { %v837_v57 = vadd.f32 %v836_v48, %v15837_v41  ;;  %v924_v51 = vmul.f32 %v15837_v41, %v15837_v41  ;;  %v10649_v35 = vpop.f32.mrb[15].mxu0  ;;  %10807 = vmatmul.mubr.msk.f32.gmra.mrb[120].mxu0 %vm117_vm1, %v92_v50  ;;  %v7880_v48 = vld [vmem:[%s22736_s5 + $0x138] sm:$0xff] }
  0xfc   :  { %10809 = vmatprep.mubr.msk.f32.mxu0 %vm14817_vm0, %v22753_v4  ;;  %8119 = vperm.xlu0 %14802, %v7880_v48  }
  0xfd   :  { %v1004_v59 = vadd.f32 %v1003_v39, %v924_v51  ;;  %v23130_v39 = vmov 0.0   ;;  %v94_v51 = vld [vmem:[%s22735_s0 + $0x1f0] sm:$0xff]  ;;  %v15878_v48 = vpop.permute.xlu1 %1709 }
  0xfe   :  { %v15860_v26 = vpop.f32.mrb[16].mxu0  ;;  %23132 = vst [vmem:[#allocation46_spill] sm:$0xff] %v15878_v48 }
  0xff   :  { %v838_v50 = vadd.f32 %v837_v57, %v15860_v26  ;;  %v925_v35 = vmul.f32 %v15860_v26, %v15860_v26  ;;  %v10652_v4 = vpop.f32.mrb[17].mxu0  ;;  %10810 = vmatmul.mubr.msk.f32.gmra.mrb[122].mxu0 %vm117_vm1, %v93_v53  ;;  %v7879_v57 = vld [vmem:[%s22736_s5 + $0x130] sm:$0xff] }
 0x100   :  { %10812 = vmatprep.mubr.msk.f32.mxu0 %vm14817_vm0, %v23130_v39  ;;  %8114 = vperm.xlu1 %14803, %v7879_v57  }
 0x101   :  { %v1005_v20 = vadd.f32 %v1004_v59, %v925_v35  ;;  %8129 = vperm.xlu0 %14802, %v15258_v9   ;;  %v95_v59 = vld [vmem:[%s22735_s0 + $0x1f8] sm:$0xff]  ;;  %v7881_v9 = vld [vmem:[%s22736_s5 + $0x140] sm:$0xff] }
 0x102   :  { %v15876_v60 = vpop.f32.mrb[18].mxu0 }
 0x103   :  { %v839_v4 = vadd.f32 %v838_v50, %v15876_v60  ;;  %v926_v53 = vmul.f32 %v15876_v60, %v15876_v60  ;;  %v10655_v42 = vpop.f32.mrb[19].mxu0  ;;  %10813 = vmatmul.mubr.msk.f32.gmra.mrb[124].mxu0 %vm117_vm1, %v94_v51  ;;  %v15895_v50 = vpop.permute.xlu0 %1519 }
 0x104   :  { %10815 = vmatprep.mubr.msk.f32.mxu0 %vm14817_vm0, %v23130_v39  ;;  %23133 = vst [vmem:[#allocation47_spill] sm:$0xff] %v15895_v50  ;;  %8124 = vperm.xlu1 %14803, %v7881_v9  }
 0x105   :  { %v1006_v35 = vadd.f32 %v1005_v20, %v926_v53  ;;  %8139 = vperm.xlu0 %14802, %v15296_v28   ;;  %v96_v20 = vld [vmem:[%s22735_s0 + $0x200] sm:$0xff]  ;;  %v15907_v53 = vpop.permute.xlu1 %1719 }
 0x106   :  { %v15893_v57 = vpop.f32.mrb[20].mxu0  ;;  %23134 = vst [vmem:[#allocation48_spill] sm:$0xff] %v15907_v53 }
 0x107   :  { %v840_v42 = vadd.f32 %v839_v4, %v15893_v57  ;;  %v927_v51 = vmul.f32 %v15893_v57, %v15893_v57  ;;  %v10658_v48 = vpop.f32.mrb[21].mxu0  ;;  %10816 = vmatmul.mubr.msk.f32.gmra.mrb[126].mxu0 %vm117_vm1, %v95_v59  ;;  %v97_v59 = vld [vmem:[%s22735_s0 + $0x208] sm:$0xff] }
 0x108   :  { %10818 = vmatprep.mubr.msk.f32.mxu0 %vm14817_vm0, %v23130_v39  ;;  %8134 = vperm.xlu1 %14803, %v15281_v19   ;;  %v15917_v39 = vld [vmem:[#allocation2] sm:$0xff]  ;;  %v15924_v19 = vpop.permute.xlu0 %1524 }
 0x109   :  { %v1007_v9 = vadd.f32 %v1006_v35, %v927_v51  ;;  %8149 = vperm.xlu0 %14802, %v15311_v37   ;;  %23135 = vst [vmem:[#allocation49_spill] sm:$0xff] %v15924_v19  ;;  %v7885_v35 = vld [vmem:[%s22736_s5 + $0x160] sm:$0xff]  ;;  %v15931_v51 = vpop.permute.xlu1 %1724 }
 0x10a   :  { %v15909_v47 = vpop.f32.mrb[22].mxu0  ;;  %23136 = vst [vmem:[#allocation50_spill] sm:$0xff] %v15931_v51 }
 0x10b   :  { %v841_v28 = vadd.f32 %v840_v42, %v15909_v47  ;;  %v928_v48 = vmul.f32 %v15909_v47, %v15909_v47  ;;  %v10661_v4 = vpop.f32.mrb[23].mxu0  ;;  %10819 = vmatmul.mubr.msk.f32.gmra.mrb[128].mxu0 %vm117_vm1, %v96_v20 }
 0x10c   :  { %10821 = vmatprep.mubr.msk.f32.mxu0 %vm14817_vm0, %v15917_v39  ;;  %8144 = vperm.xlu1 %14803, %v7885_v35  }
 0x10d   :  { %v1008_v37 = vadd.f32 %v1007_v9, %v928_v48  ;;  %8159 = vperm.xlu0 %14802, %v15326_v46   ;;  %v98_v9 = vld [vmem:[%s22735_s0 + $0x210] sm:$0xff] }
 0x10e   :  { %v15929_v42 = vpop.f32.mrb[24].mxu0  ;;  %v7887_v46 = vld [vmem:[%s22736_s5 + $0x170] sm:$0xff] }
 0x10f   :  { %v842_v20 = vadd.f32 %v841_v28, %v15929_v42  ;;  %v929_v4 = vmul.f32 %v15929_v42, %v15929_v42  ;;  %v10664_v53 = vpop.f32.mrb[25].mxu0  ;;  %10822 = vmatmul.mubr.msk.f32.gmra.mrb[130].mxu0 %vm117_vm1, %v97_v59  ;;  %v15948_v28 = vpop.permute.xlu0 %1529 }
 0x110   :  { %10824 = vmatprep.mubr.msk.f32.mxu0 %vm14817_vm0, %v15917_v39  ;;  %23137 = vst [vmem:[#allocation51_spill] sm:$0xff] %v15948_v28  ;;  %8154 = vperm.xlu1 %14803, %v7887_v46  }
 0x111   :  { %v1009_v48 = vadd.f32 %v1008_v37, %v929_v4  ;;  %8169 = vperm.xlu0 %14802, %v15341_v55   ;;  %v99_v37 = vld [vmem:[%s22735_s0 + $0x218] sm:$0xff]  ;;  %v15960_v4 = vpop.permute.xlu1 %1729  ;;  %v7889_v55 = vld [vmem:[%s22736_s5 + $0x180] sm:$0xff] }
 0x112   :  { %v15946_v35 = vpop.f32.mrb[26].mxu0  ;;  %23138 = vst [vmem:[#allocation52_spill] sm:$0xff] %v15960_v4 }
 0x113   :  { %v843_v53 = vadd.f32 %v842_v20, %v15946_v35  ;;  %v930_v59 = vmul.f32 %v15946_v35, %v15946_v35  ;;  %v10667_v51 = vpop.f32.mrb[27].mxu0  ;;  %10825 = vmatmul.mubr.msk.f32.gmra.mrb[132].mxu0 %vm117_vm1, %v98_v9 }
 0x114   :  { %10827 = vmatprep.mubr.msk.f32.mxu0 %vm14817_vm0, %v15917_v39  ;;  %8164 = vperm.xlu1 %14803, %v7889_v55  }
 0x115   :  { %v1010_v46 = vadd.f32 %v1009_v48, %v930_v59  ;;  %8179 = vperm.xlu0 %14802, %v15356_v62   ;;  %v100_v48 = vld [vmem:[%s22735_s0 + $0x220] sm:$0xff]  ;;  %v15977_v59 = vpop.permute.xlu0 %1739  ;;  %v7891_v62 = vld [vmem:[%s22736_s5 + $0x190] sm:$0xff]  ;;  %v15984_v4 = vpop.permute.xlu1 %1734 }
 0x116   :  { %v15965_v20 = vpop.f32.mrb[28].mxu0  ;;  %23139 = vst [vmem:[#allocation53_spill] sm:$0xff] %v15977_v59  ;;  %23140 = vst [vmem:[#allocation54_spill] sm:$0xff] %v15984_v4  ;;  %v104_v4 = vld [vmem:[%s22735_s0 + $0x240] sm:$0xff] }
 0x117   :  { %v844_v51 = vadd.f32 %v843_v53, %v15965_v20  ;;  %v931_v9 = vmul.f32 %v15965_v20, %v15965_v20  ;;  %v10670_v44 = vpop.f32.mrb[29].mxu0  ;;  %10828 = vmatmul.mubr.msk.f32.gmra.mrb[134].mxu0 %vm117_vm1, %v99_v37 }
 0x118   :  { %10830 = vmatprep.mubr.msk.f32.mxu0 %vm14817_vm0, %v15917_v39  ;;  %8174 = vperm.xlu1 %14803, %v7891_v62  }
 0x119   :  { %v1011_v55 = vadd.f32 %v1010_v46, %v931_v9  ;;  %8189 = vperm.xlu0 %14802, %v15371_v2   ;;  %v101_v46 = vld [vmem:[%s22735_s0 + $0x228] sm:$0xff]  ;;  %v7893_v2 = vld [vmem:[%s22736_s5 + $0x1a0] sm:$0xff] }
 0x11a   :  { %v15982_v53 = vpop.f32.mrb[30].mxu0 }
 0x11b   :  { %v845_v44 = vadd.f32 %v844_v51, %v15982_v53  ;;  %v932_v37 = vmul.f32 %v15982_v53, %v15982_v53  ;;  %v10673_v56 = vpop.f32.mrb[31].mxu0  ;;  %10831 = vmatmul.mubr.msk.f32.gmra.mrb[136].mxu0 %vm117_vm1, %v100_v48  ;;  %v16001_v51 = vpop.permute.xlu0 %1749 }
 0x11c   :  { %10833 = vmatprep.mubr.msk.f32.mxu0 %vm14817_vm0, %v15917_v39  ;;  %23141 = vst [vmem:[#allocation55_spill] sm:$0xff] %v16001_v51  ;;  %8184 = vperm.xlu1 %14803, %v7893_v2  }
 0x11d   :  { %v1012_v9 = vadd.f32 %v1011_v55, %v932_v37  ;;  %8199 = vperm.xlu0 %14802, %v15386_v8   ;;  %v102_v55 = vld [vmem:[%s22735_s0 + $0x230] sm:$0xff]  ;;  %v16013_v37 = vpop.permute.xlu1 %1744 }
 0x11e   :  { %v15999_v62 = vpop.f32.mrb[32].mxu0  ;;  %23142 = vst [vmem:[#allocation56_spill] sm:$0xff] %v16013_v37  ;;  %v7895_v8 = vld [vmem:[%s22736_s5 + $0x1b0] sm:$0xff] }
 0x11f   :  { %v846_v56 = vadd.f32 %v845_v44, %v15999_v62  ;;  %v933_v48 = vmul.f32 %v15999_v62, %v15999_v62  ;;  %v10676_v59 = vpop.f32.mrb[33].mxu0  ;;  %10834 = vmatmul.mubr.msk.f32.gmra.mrb[138].mxu0 %vm117_vm1, %v101_v46 }
 0x120   :  { %10836 = vmatprep.mubr.msk.f32.mxu0 %vm14817_vm0, %v15917_v39  ;;  %8194 = vperm.xlu1 %14803, %v7895_v8  }
 0x121   :  { %v1013_v2 = vadd.f32 %v1012_v9, %v933_v48  ;;  %8209 = vperm.xlu0 %14802, %v15401_v22   ;;  %v103_v9 = vld [vmem:[%s22735_s0 + $0x238] sm:$0xff]  ;;  %v16030_v48 = vpop.permute.xlu0 %1759  ;;  %v7897_v22 = vld [vmem:[%s22736_s5 + $0x1c0] sm:$0xff]  ;;  %v16037_v37 = vpop.permute.xlu1 %1754 }
 0x122   :  { %v16018_v44 = vpop.f32.mrb[34].mxu0  ;;  %23143 = vst [vmem:[#allocation57_spill] sm:$0xff] %v16030_v48  ;;  %23144 = vst [vmem:[#allocation58_spill] sm:$0xff] %v16037_v37 }
 0x123   :  { %v847_v59 = vadd.f32 %v846_v56, %v16018_v44  ;;  %v934_v46 = vmul.f32 %v16018_v44, %v16018_v44  ;;  %v10679_v51 = vpop.f32.mrb[35].mxu0  ;;  %10837 = vmatmul.mubr.msk.f32.gmra.mrb[140].mxu0 %vm117_vm1, %v102_v55  ;;  %v2350_v55 = vld [vmem:[%s22737_s6 + $0x88] sm:$0xff] }
 0x124   :  { %10839 = vmatprep.mubr.msk.f32.mxu0 %vm14817_vm0, %v15917_v39  ;;  %v2349_v51 = vld [vmem:[%s22737_s6 + $0x80] sm:$0xff]  ;;  %8204 = vperm.xlu1 %14803, %v7897_v22  }
 0x125   :  { %v1014_v8 = vadd.f32 %v1013_v2, %v934_v46  ;;  %8219 = vperm.xlu0 %14802, %v15416_v34   ;;  %v13351_v37 = vpack.c.bf16 %v2350_v55, %v2349_v51  ;;  %v7899_v34 = vld [vmem:[%s22736_s5 + $0x1d0] sm:$0xff]  ;;  %v16060_v22 = vpop.permute.xlu0 %1769  ;;  %v16073_v55 = vpop.permute.xlu1 %1764 }
 0x126   :  { %v16035_v56 = vpop.f32.mrb[36].mxu0  ;;  %23145 = vst [vmem:[#allocation59_spill] sm:$0xff] %v16060_v22  ;;  %23147 = vst [vmem:[#allocation60_spill] sm:$0xff] %v16073_v55 }
 0x127   :  { %v848_v2 = vadd.f32 %v847_v59, %v16035_v56  ;;  %v935_v46 = vmul.f32 %v16035_v56, %v16035_v56  ;;  %v10682_v48 = vpop.f32.mrb[37].mxu0  ;;  %10840 = vmatmul.mubr.msk.f32.gmra.mrb[142].mxu0 %vm117_vm1, %v103_v9 }
 0x128   :  { %10842 = vmatprep.mubr.msk.f32.mxu0 %vm14817_vm0, %v15917_v39  ;;  %13352 = vmatpush3.bf16.msra.mxu0 %v13351_v37  ;;  %v23146_v37 = vmov 0.0|0.0  }
 0x129   :  { %v1015_v17 = vadd.f32 %v1014_v8, %v935_v46  ;;  %8214 = vperm.xlu1 %14803, %v7899_v34   ;;  %8229 = vperm.xlu0 %14802, %v15431_v49   ;;  %v105_v8 = vld [vmem:[%s22735_s0 + $0x248] sm:$0xff]  ;;  %v16097_v22 = vpop.permute.xlu1 %1774 }
 0x12a   :  { %v16058_v59 = vpop.f32.mrb[38].mxu0  ;;  %13353 = vmatprep.subr.bf16.mxu0 %v23146_v37  ;;  %23150 = vst [vmem:[#allocation63_spill] sm:$0xff] %v16097_v22 }
 0x12b   :  { %v849_v9 = vadd.f32 %v848_v2, %v16058_v59  ;;  %v936_v48 = vmul.f32 %v16058_v59, %v16058_v59  ;;  %v10685_v51 = vpop.f32.mrb[39].mxu0  ;;  %10843 = vmatmul.mubr.msk.f32.gmra.mrb[144].mxu0 %vm117_vm1, %v104_v4  ;;  %v7901_v2 = vld [vmem:[%s22736_s5 + $0x1e0] sm:$0xff] }
 0x12c   :  { %10845 = vmatprep.mubr.msk.f32.mxu0 %vm14817_vm0, %v15917_v39 }
 0x12d   :  { %v1016_v49 = vadd.f32 %v1015_v17, %v936_v48  ;;  %8224 = vperm.xlu1 %14803, %v7901_v2   ;;  %8239 = vperm.xlu0 %14802, %v15446_v61   ;;  %v106_v17 = vld [vmem:[%s22735_s0 + $0x250] sm:$0xff]  ;;  %v16090_v48 = vpop.permute.xlu0 %1779 }
 0x12e   :  { %v16078_v46 = vpop.f32.mrb[40].mxu0  ;;  %23148 = vst [vmem:[#allocation61_spill] sm:$0xff] %v16090_v48  ;;  %v7903_v61 = vld [vmem:[%s22736_s5 + $0x1f0] sm:$0xff] }
 0x12f   :  { %v850_v4 = vadd.f32 %v849_v9, %v16078_v46  ;;  %v937_v34 = vmul.f32 %v16078_v46, %v16078_v46  ;;  %v10688_v51 = vpop.f32.mrb[41].mxu0  ;;  %10846 = vmatmul.mubr.msk.f32.gmra.mrb[146].mxu0 %vm117_vm1, %v105_v8 }
 0x130   :  { %10848 = vmatprep.mubr.msk.f32.mxu0 %vm14817_vm0, %v15917_v39 }
 0x131   :  { %v1017_v2 = vadd.f32 %v1016_v49, %v937_v34  ;;  %8234 = vperm.xlu1 %14803, %v7903_v61   ;;  %8249 = vperm.xlu0 %14802, %v15466_v6   ;;  %v107_v49 = vld [vmem:[%s22735_s0 + $0x258] sm:$0xff]  ;;  %v7905_v6 = vld [vmem:[%s22736_s5 + $0x200] sm:$0xff] }
 0x132   :  { %v16095_v9 = vpop.f32.mrb[42].mxu0 }
 0x133   :  { %23149 = vst [vmem:[#allocation62_spill] sm:$0xff] %v16095_v9  ;;  %v851_v8 = vadd.f32 %v850_v4, %v16095_v9  ;;  %v938_v51 = vmul.f32 %v16095_v9, %v16095_v9  ;;  %v10691_v55 = vpop.f32.mrb[43].mxu0  ;;  %10849 = vmatmul.mubr.msk.f32.gmra.mrb[148].mxu0 %vm117_vm1, %v106_v17  ;;  %v16114_v4 = vpop.permute.xlu0 %1789 }
 0x134   :  { %10851 = vmatprep.mubr.msk.f32.mxu0 %vm14817_vm0, %v15917_v39  ;;  %23151 = vst [vmem:[#allocation64_spill] sm:$0xff] %v16114_v4 }
 0x135   :  { %v1018_v34 = vadd.f32 %v1017_v2, %v938_v51  ;;  %8244 = vperm.xlu1 %14803, %v7905_v6   ;;  %8259 = vperm.xlu0 %14802, %v15484_v25   ;;  %v108_v2 = vld [vmem:[%s22735_s0 + $0x260] sm:$0xff]  ;;  %v16126_v51 = vpop.permute.xlu1 %1784 }
 0x136   :  { %v16112_v61 = vpop.f32.mrb[44].mxu0  ;;  %23152 = vst [vmem:[#allocation65_spill] sm:$0xff] %v16126_v51 }
 0x137   :  { %v852_v55 = vadd.f32 %v851_v8, %v16112_v61  ;;  %v939_v17 = vmul.f32 %v16112_v61, %v16112_v61  ;;  %v10694_v48 = vpop.f32.mrb[45].mxu0  ;;  %10852 = vmatmul.mubr.msk.f32.gmra.mrb[150].mxu0 %vm117_vm1, %v107_v49  ;;  %v109_v49 = vld [vmem:[%s22735_s0 + $0x268] sm:$0xff] }
 0x138   :  { %10854 = vmatprep.mubr.msk.f32.mxu0 %vm14817_vm0, %v15917_v39 }
 0x139   :  { %v1019_v6 = vadd.f32 %v1018_v34, %v939_v17  ;;  %8254 = vperm.xlu1 %14803, %v15451_v63   ;;  %8269 = vperm.xlu0 %14802, %v15506_v58   ;;  %v16141_v34 = vpop.permute.xlu0 %1799  ;;  %v16145_v58 = vpop.permute.xlu1 %1794 }
 0x13a   :  { %v16128_v4 = vpop.f32.mrb[46].mxu0  ;;  %23154 = vst [vmem:[#allocation67_spill] sm:$0xff] %v16141_v34  ;;  %23156 = vst [vmem:[#allocation69_spill] sm:$0xff] %v16145_v58 }
 0x13b   :  { %23153 = vst [vmem:[#allocation66_spill] sm:$0xff] %v16128_v4  ;;  %v853_v25 = vadd.f32 %v852_v55, %v16128_v4  ;;  %v940_v48 = vmul.f32 %v16128_v4, %v16128_v4  ;;  %v10697_v8 = vpop.f32.mrb[47].mxu0  ;;  %10855 = vmatmul.mubr.msk.f32.gmra.mrb[152].mxu0 %vm117_vm1, %v108_v2 }
 0x13c   :  { %10857 = vmatprep.mubr.msk.f32.mxu0 %vm14817_vm0, %v15917_v39 }
 0x13d   :  { %v1020_v63 = vadd.f32 %v1019_v6, %v940_v48  ;;  %8264 = vperm.xlu1 %14803, %v15471_v13   ;;  %8279 = vperm.xlu0 %14802, %v15526_v52   ;;  %v110_v6 = vld [vmem:[%s22735_s0 + $0x270] sm:$0xff]  ;;  %v16160_v13 = vpop.permute.xlu0 %1809  ;;  %v23159_v52 = vld [vmem:[#allocation4_spill] sm:$0xff] }
 0x13e   :  { %v16143_v17 = vpop.f32.mrb[48].mxu0  ;;  %23158 = vst [vmem:[#allocation71_spill] sm:$0xff] %v16160_v13 }
 0x13f   :  { %23155 = vst [vmem:[#allocation68_spill] sm:$0xff] %v16143_v17  ;;  %v854_v55 = vadd.f32 %v853_v25, %v16143_v17  ;;  %v941_v2 = vmul.f32 %v16143_v17, %v16143_v17  ;;  %v10700_v8 = vpop.f32.mrb[49].mxu0  ;;  %10858 = vmatmul.mubr.msk.f32.gmra.mrb[154].mxu0 %vm117_vm1, %v109_v49  ;;  %v23160_v25 = vld [vmem:[#allocation11_spill] sm:$0xff] }
 0x140   :  { %10860 = vmatprep.mubr.msk.f32.mxu0 %vm14817_vm0, %v15917_v39 }
 0x141   :  { %v1021_v48 = vadd.f32 %v1020_v63, %v941_v2  ;;  %8274 = vperm.xlu1 %14803, %v23159_v52   ;;  %8289 = vperm.xlu0 %14802, %v23160_v25   ;;  %v111_v63 = vld [vmem:[%s22735_s0 + $0x278] sm:$0xff]  ;;  %v16173_v2 = vpop.permute.xlu1 %1804 }
 0x142   :  { %v16158_v34 = vpop.f32.mrb[50].mxu0  ;;  %23161 = vst [vmem:[#allocation4_spill] sm:$0xff] %v16173_v2  ;;  %v23163_v25 = vld [vmem:[#allocation7_spill] sm:$0xff] }
 0x143   :  { %23157 = vst [vmem:[#allocation70_spill] sm:$0xff] %v16158_v34  ;;  %v855_v8 = vadd.f32 %v854_v55, %v16158_v34  ;;  %v942_v49 = vmul.f32 %v16158_v34, %v16158_v34  ;;  %v10703_v58 = vpop.f32.mrb[51].mxu0  ;;  %10861 = vmatmul.mubr.msk.f32.gmra.mrb[156].mxu0 %vm117_vm1, %v110_v6  ;;  %v23164_v55 = vld [vmem:[#allocation15_spill] sm:$0xff] }
 0x144   :  { %10863 = vmatprep.mubr.msk.f32.mxu0 %vm14817_vm0, %v15917_v39 }
 0x145   :  { %v1022_v52 = vadd.f32 %v1021_v48, %v942_v49  ;;  %8284 = vperm.xlu1 %14803, %v23163_v25   ;;  %8299 = vperm.xlu0 %14802, %v23164_v55   ;;  %v112_v48 = vld [vmem:[%s22735_s0 + $0x280] sm:$0xff]  ;;  %v16188_v49 = vpop.permute.xlu0 %1819  ;;  %v16192_v55 = vpop.permute.xlu1 %1814 }
 0x146   :  { %v16175_v13 = vpop.f32.mrb[52].mxu0  ;;  %23165 = vst [vmem:[#allocation7_spill] sm:$0xff] %v16188_v49  ;;  %23167 = vst [vmem:[#allocation72_spill] sm:$0xff] %v16192_v55 }
 0x147   :  { %23162 = vst [vmem:[#allocation11_spill] sm:$0xff] %v16175_v13  ;;  %v856_v58 = vadd.f32 %v855_v8, %v16175_v13  ;;  %v943_v6 = vmul.f32 %v16175_v13, %v16175_v13  ;;  %v10706_v51 = vpop.f32.mrb[53].mxu0  ;;  %10864 = vmatmul.mubr.msk.f32.gmra.mrb[158].mxu0 %vm117_vm1, %v111_v63  ;;  %v23168_v8 = vld [vmem:[#allocation9_spill] sm:$0xff] }
 0x148   :  { %10866 = vmatprep.mubr.msk.f32.mxu0 %vm14817_vm0, %v15917_v39 }
 0x149   :  { %v1023_v25 = vadd.f32 %v1022_v52, %v943_v6  ;;  %8294 = vperm.xlu1 %14803, %v23168_v8   ;;  %8309 = vperm.xlu0 %14802, %v15588_v43   ;;  %v2351_v6 = vld [vmem:[%s22737_s6 + $0x90] sm:$0xff]  ;;  %v2352_v43 = vld [vmem:[%s22737_s6 + $0x98] sm:$0xff] }
 0x14a   :  { %v16190_v2 = vpop.f32.mrb[54].mxu0  ;;  %v13354_v49 = vpack.c.bf16 %v2352_v43, %v2351_v6 }
 0x14b   :  { %23166 = vst [vmem:[#allocation15_spill] sm:$0xff] %v16190_v2  ;;  %v857_v51 = vadd.f32 %v856_v58, %v16190_v2  ;;  %v944_v63 = vmul.f32 %v16190_v2, %v16190_v2  ;;  %v10709_v22 = vpop.f32.mrb[55].mxu0  ;;  %10867 = vmatmul.mubr.msk.f32.gmra.mrb[160].mxu0 %vm117_vm1, %v112_v48  ;;  %v16210_v58 = vpop.permute.xlu0 %1829 }
 0x14c   :  { %10901 = vmatprep.mubr.msk.f32.mxu0 %vm14817_vm0, %v15917_v39  ;;  %23170 = vst [vmem:[#allocation73_spill] sm:$0xff] %v16210_v58  ;;  %v23171_v22 = vld [vmem:[#allocation12_spill] sm:$0xff]  ;;  %13355 = vmatpush3.bf16.msra.mxu0 %v13354_v49 }
 0x14d   :  { %v1024_v52 = vadd.f32 %v1023_v25, %v944_v63  ;;  %8304 = vperm.xlu1 %14803, %v23171_v22   ;;  %8319 = vperm.xlu0 %14802, %v15608_v31   ;;  %v16217_v63 = vpop.permute.xlu1 %1824  ;;  %v23174_v58 = vld [vmem:[#allocation16_spill] sm:$0xff] }
 0x14e   :  { %v16208_v8 = vpop.f32.mrb[56].mxu0  ;;  %23172 = vst [vmem:[#allocation12_spill] sm:$0xff] %v16217_v63  ;;  %13356 = vmatprep.subr.bf16.mxu0 %v23146_v37 }
 0x14f   :  { %23169 = vst [vmem:[#allocation9_spill] sm:$0xff] %v16208_v8  ;;  %v858_v39 = vadd.f32 %v857_v51, %v16208_v8  ;;  %v945_v48 = vmul.f32 %v16208_v8, %v16208_v8  ;;  %v10712_v25 = vpop.f32.mrb[57].mxu0 }
 0x151   :  { %v1025_v55 = vadd.f32 %v1024_v52, %v945_v48  ;;  %8314 = vperm.xlu1 %14803, %v23174_v58   ;;  %v16228_v25 = vpop.permute.xlu1 %1834 }
 0x152   :  { %v16220_v54 = vpop.f32.mrb[58].mxu0  ;;  %23176 = vst [vmem:[#allocation75_spill] sm:$0xff] %v16228_v25 }
 0x153   :  { %23173 = vst [vmem:[#allocation74_spill] sm:$0xff] %v16220_v54  ;;  %v859_v6 = vadd.f32 %v858_v39, %v16220_v54  ;;  %v946_v31 = vmul.f32 %v16220_v54, %v16220_v54  ;;  %v10715_v51 = vpop.f32.mrb[59].mxu0 }
 0x155   :  { %v1026_v43 = vadd.f32 %v1025_v55, %v946_v31  ;;  %8324 = vperm.xlu1 %14803, %v15593_v40  }
 0x156   :  { %v16226_v22 = vpop.f32.mrb[60].mxu0 }
 0x157   :  { %23175 = vst [vmem:[#allocation16_spill] sm:$0xff] %v16226_v22  ;;  %v860_v49 = vadd.f32 %v859_v6, %v16226_v22  ;;  %v947_v52 = vmul.f32 %v16226_v22, %v16226_v22  ;;  %v10718_v48 = vpop.f32.mrb[61].mxu0 }
 0x159   :  { %v1027_v58 = vadd.f32 %v1026_v43, %v947_v52 }
 0x15a   :  { %v16234_v63 = vpop.f32.mrb[62].mxu0 }
 0x15b   :  { %23177 = vst [vmem:[#allocation76_spill] sm:$0xff] %v16234_v63  ;;  %v861_v39 = vadd.f32 %v860_v49, %v16234_v63  ;;  %v948_v55 = vmul.f32 %v16234_v63, %v16234_v63  ;;  %v10721_v31 = vpop.f32.mrb[63].mxu0 }
 0x15d   :  { %v1028_v51 = vadd.f32 %v1027_v58, %v948_v55 }
 0x15e   :  { %v16239_v32 = vpop.f32.mrb[64].mxu0 }
 0x15f   :  { %23178 = vst [vmem:[#allocation77_spill] sm:$0xff] %v16239_v32  ;;  %v862_v40 = vadd.f32 %v861_v39, %v16239_v32  ;;  %v949_v6 = vmul.f32 %v16239_v32, %v16239_v32  ;;  %v10724_v25 = vpop.f32.mrb[65].mxu0 }
 0x161   :  { %v1029_v22 = vadd.f32 %v1028_v51, %v949_v6 }
 0x162   :  { %v16244_v48 = vpop.f32.mrb[66].mxu0 }
 0x163   :  { %23179 = vst [vmem:[#allocation78_spill] sm:$0xff] %v16244_v48  ;;  %v863_v43 = vadd.f32 %v862_v40, %v16244_v48  ;;  %v950_v49 = vmul.f32 %v16244_v48, %v16244_v48  ;;  %v10727_v52 = vpop.f32.mrb[67].mxu0 }
 0x165   :  { %v1030_v63 = vadd.f32 %v1029_v22, %v950_v49 }
 0x166   :  { %v16249_v31 = vpop.f32.mrb[68].mxu0 }
 0x167   :  { %v864_v58 = vadd.f32 %v863_v43, %v16249_v31  ;;  %v951_v39 = vmul.f32 %v16249_v31, %v16249_v31  ;;  %v10730_v55 = vpop.f32.mrb[69].mxu0 }
 0x169   :  { %v1031_v32 = vadd.f32 %v1030_v63, %v951_v39 }
 0x16a   :  { %v16254_v25 = vpop.f32.mrb[70].mxu0 }
 0x16b   :  { %v865_v51 = vadd.f32 %v864_v58, %v16254_v25  ;;  %v952_v40 = vmul.f32 %v16254_v25, %v16254_v25  ;;  %v10733_v6 = vpop.f32.mrb[71].mxu0 }
 0x16d   :  { %v1032_v48 = vadd.f32 %v1031_v32, %v952_v40  ;;  %v2353_v32 = vld [vmem:[%s22737_s6 + $0xa0] sm:$0xff] }
 0x16e   :  { %v16259_v52 = vpop.f32.mrb[72].mxu0 }
 0x16f   :  { %v866_v22 = vadd.f32 %v865_v51, %v16259_v52  ;;  %v953_v43 = vmul.f32 %v16259_v52, %v16259_v52  ;;  %v10736_v49 = vpop.f32.mrb[73].mxu0  ;;  %v2354_v51 = vld [vmem:[%s22737_s6 + $0xa8] sm:$0xff] }
 0x171   :  { %v1033_v14 = vadd.f32 %v1032_v48, %v953_v43  ;;  %v13357_v48 = vpack.c.bf16 %v2354_v51, %v2353_v32 }
 0x172   :  { %v16264_v55 = vpop.f32.mrb[74].mxu0 }
 0x173   :  { %v867_v63 = vadd.f32 %v866_v22, %v16264_v55  ;;  %v954_v58 = vmul.f32 %v16264_v55, %v16264_v55  ;;  %v10739_v39 = vpop.f32.mrb[75].mxu0  ;;  %13358 = vmatpush3.bf16.msra.mxu0 %v13357_v48 }
 0x174   :  { %13359 = vmatprep.subr.bf16.mxu0 %v23146_v37 }
 0x175   :  { %v1034_v33 = vadd.f32 %v1033_v14, %v954_v58 }
 0x176   :  { %v16275_v40 = vpop.f32.mrb[76].mxu0 }
 0x177   :  { %v868_v6 = vadd.f32 %v867_v63, %v16275_v40  ;;  %v955_v22 = vmul.f32 %v16275_v40, %v16275_v40  ;;  %v10742_v43 = vpop.f32.mrb[77].mxu0 }
 0x179   :  { %v1035_v49 = vadd.f32 %v1034_v33, %v955_v22 }
 0x17a   :  { %v16281_v14 = vpop.f32.mrb[78].mxu0 }
 0x17b   :  { %v869_v58 = vadd.f32 %v868_v6, %v16281_v14  ;;  %v956_v39 = vmul.f32 %v16281_v14, %v16281_v14  ;;  %v10745_v30 = vpop.f32.mrb[79].mxu0 }
 0x17d   :  { %v1036_v27 = vadd.f32 %v1035_v49, %v956_v39 }
 0x17e   :  { %v16286_v32 = vpop.f32.mrb[80].mxu0 }
 0x17f   :  { %v870_v63 = vadd.f32 %v869_v58, %v16286_v32  ;;  %v957_v51 = vmul.f32 %v16286_v32, %v16286_v32  ;;  %v10748_v48 = vpop.f32.mrb[81].mxu0 }
 0x181   :  { %v1037_v33 = vadd.f32 %v1036_v27, %v957_v51 }
 0x182   :  { %v16291_v22 = vpop.f32.mrb[82].mxu0 }
 0x183   :  { %v871_v43 = vadd.f32 %v870_v63, %v16291_v22  ;;  %v958_v6 = vmul.f32 %v16291_v22, %v16291_v22  ;;  %v10751_v24 = vpop.f32.mrb[83].mxu0 }
 0x185   :  { %v1038_v18 = vadd.f32 %v1037_v33, %v958_v6 }
 0x186   :  { %v16296_v30 = vpop.f32.mrb[84].mxu0 }
 0x187   :  { %v872_v49 = vadd.f32 %v871_v43, %v16296_v30  ;;  %v959_v58 = vmul.f32 %v16296_v30, %v16296_v30  ;;  %v10754_v39 = vpop.f32.mrb[85].mxu0 }
 0x189   :  { %v1039_v8 = vadd.f32 %v1038_v18, %v959_v58 }
 0x18a   :  { %v16301_v48 = vpop.f32.mrb[86].mxu0 }
 0x18b   :  { %v873_v27 = vadd.f32 %v872_v49, %v16301_v48  ;;  %v960_v63 = vmul.f32 %v16301_v48, %v16301_v48  ;;  %v10757_v51 = vpop.f32.mrb[87].mxu0 }
 0x18d   :  { %v1040_v54 = vadd.f32 %v1039_v8, %v960_v63 }
 0x18e   :  { %v16306_v24 = vpop.f32.mrb[88].mxu0 }
 0x18f   :  { %v874_v33 = vadd.f32 %v873_v27, %v16306_v24  ;;  %v961_v43 = vmul.f32 %v16306_v24, %v16306_v24  ;;  %v10760_v6 = vpop.f32.mrb[89].mxu0 }
 0x191   :  { %v1041_v13 = vadd.f32 %v1040_v54, %v961_v43 }
 0x192   :  { %v16311_v39 = vpop.f32.mrb[90].mxu0 }
 0x193   :  { %v875_v18 = vadd.f32 %v874_v33, %v16311_v39  ;;  %v962_v49 = vmul.f32 %v16311_v39, %v16311_v39  ;;  %v10763_v58 = vpop.f32.mrb[91].mxu0 }
 0x195   :  { %v1042_v2 = vadd.f32 %v1041_v13, %v962_v49 }
 0x196   :  { %v16316_v51 = vpop.f32.mrb[92].mxu0 }
 0x197   :  { %v876_v8 = vadd.f32 %v875_v18, %v16316_v51  ;;  %v963_v27 = vmul.f32 %v16316_v51, %v16316_v51  ;;  %v10766_v63 = vpop.f32.mrb[93].mxu0 }
 0x199   :  { %v1043_v17 = vadd.f32 %v1042_v2, %v963_v27 }
 0x19a   :  { %v16321_v6 = vpop.f32.mrb[94].mxu0 }
 0x19b   :  { %v877_v54 = vadd.f32 %v876_v8, %v16321_v6  ;;  %v964_v33 = vmul.f32 %v16321_v6, %v16321_v6  ;;  %v10769_v43 = vpop.f32.mrb[95].mxu0 }
 0x19d   :  { %v1044_v34 = vadd.f32 %v1043_v17, %v964_v33 }
 0x19e   :  { %v16326_v58 = vpop.f32.mrb[96].mxu0 }
 0x19f   :  { %v878_v13 = vadd.f32 %v877_v54, %v16326_v58  ;;  %v965_v18 = vmul.f32 %v16326_v58, %v16326_v58  ;;  %v10772_v49 = vpop.f32.mrb[97].mxu0 }
 0x1a1   :  { %v1045_v4 = vadd.f32 %v1044_v34, %v965_v18 }
 0x1a2   :  { %v16331_v63 = vpop.f32.mrb[98].mxu0 }
 0x1a3   :  { %v879_v2 = vadd.f32 %v878_v13, %v16331_v63  ;;  %v966_v8 = vmul.f32 %v16331_v63, %v16331_v63  ;;  %v10775_v27 = vpop.f32.mrb[99].mxu0 }
 0x1a5   :  { %v1046_v9 = vadd.f32 %v1045_v4, %v966_v8 }
 0x1a6   :  { %v16336_v43 = vpop.f32.mrb[100].mxu0 }
 0x1a7   :  { %v880_v17 = vadd.f32 %v879_v2, %v16336_v43  ;;  %v967_v54 = vmul.f32 %v16336_v43, %v16336_v43  ;;  %v10778_v33 = vpop.f32.mrb[101].mxu0 }
 0x1a9   :  { %v1047_v7 = vadd.f32 %v1046_v9, %v967_v54 }
 0x1aa   :  { %v16341_v49 = vpop.f32.mrb[102].mxu0 }
 0x1ab   :  { %v881_v34 = vadd.f32 %v880_v17, %v16341_v49  ;;  %v968_v13 = vmul.f32 %v16341_v49, %v16341_v49  ;;  %v10781_v18 = vpop.f32.mrb[103].mxu0 }
 0x1ad   :  { %v1048_v21 = vadd.f32 %v1047_v7, %v968_v13 }
 0x1ae   :  { %v16346_v27 = vpop.f32.mrb[104].mxu0 }
 0x1af   :  { %23180 = vst [vmem:[#allocation79_spill] sm:$0xff] %v16346_v27  ;;  %v882_v4 = vadd.f32 %v881_v34, %v16346_v27  ;;  %v969_v2 = vmul.f32 %v16346_v27, %v16346_v27  ;;  %v10784_v8 = vpop.f32.mrb[105].mxu0 }
 0x1b1   :  { %v1049_v15 = vadd.f32 %v1048_v21, %v969_v2 }
 0x1b2   :  { %v16351_v33 = vpop.f32.mrb[106].mxu0 }
 0x1b3   :  { %23181 = vst [vmem:[#allocation80_spill] sm:$0xff] %v16351_v33  ;;  %v883_v9 = vadd.f32 %v882_v4, %v16351_v33  ;;  %v970_v17 = vmul.f32 %v16351_v33, %v16351_v33  ;;  %v10787_v54 = vpop.f32.mrb[107].mxu0 }
 0x1b5   :  { %v1050_v0 = vadd.f32 %v1049_v15, %v970_v17 }
 0x1b6   :  { %v16356_v18 = vpop.f32.mrb[108].mxu0 }
 0x1b7   :  { %23182 = vst [vmem:[#allocation81_spill] sm:$0xff] %v16356_v18  ;;  %v884_v7 = vadd.f32 %v883_v9, %v16356_v18  ;;  %v971_v34 = vmul.f32 %v16356_v18, %v16356_v18  ;;  %v10790_v13 = vpop.f32.mrb[109].mxu0 }
 0x1b9   :  { %v1051_v3 = vadd.f32 %v1050_v0, %v971_v34 }
 0x1ba   :  { %v16361_v8 = vpop.f32.mrb[110].mxu0 }
 0x1bb   :  { %23183 = vst [vmem:[#allocation82_spill] sm:$0xff] %v16361_v8  ;;  %v885_v21 = vadd.f32 %v884_v7, %v16361_v8  ;;  %v972_v4 = vmul.f32 %v16361_v8, %v16361_v8  ;;  %v10793_v2 = vpop.f32.mrb[111].mxu0 }
 0x1bd   :  { %v1052_v10 = vadd.f32 %v1051_v3, %v972_v4 }
 0x1be   :  { %v16366_v54 = vpop.f32.mrb[112].mxu0 }
 0x1bf   :  { %23184 = vst [vmem:[#allocation83_spill] sm:$0xff] %v16366_v54  ;;  %v886_v15 = vadd.f32 %v885_v21, %v16366_v54  ;;  %v973_v9 = vmul.f32 %v16366_v54, %v16366_v54  ;;  %v10796_v17 = vpop.f32.mrb[113].mxu0 }
 0x1c1   :  { %v1053_v1 = vadd.f32 %v1052_v10, %v973_v9 }
 0x1c2   :  { %v16371_v13 = vpop.f32.mrb[114].mxu0 }
 0x1c3   :  { %23185 = vst [vmem:[#allocation84_spill] sm:$0xff] %v16371_v13  ;;  %v887_v0 = vadd.f32 %v886_v15, %v16371_v13  ;;  %v974_v7 = vmul.f32 %v16371_v13, %v16371_v13  ;;  %v10799_v34 = vpop.f32.mrb[115].mxu0 }
 0x1c5   :  { %v1054_v5 = vadd.f32 %v1053_v1, %v974_v7 }
 0x1c6   :  { %v16376_v2 = vpop.f32.mrb[116].mxu0 }
 0x1c7   :  { %23186 = vst [vmem:[#allocation85_spill] sm:$0xff] %v16376_v2  ;;  %v888_v3 = vadd.f32 %v887_v0, %v16376_v2  ;;  %v975_v21 = vmul.f32 %v16376_v2, %v16376_v2  ;;  %v10802_v4 = vpop.f32.mrb[117].mxu0 }
 0x1c9   :  { %v1055_v16 = vadd.f32 %v1054_v5, %v975_v21 }
 0x1ca   :  { %v16381_v17 = vpop.f32.mrb[118].mxu0 }
 0x1cb   :  { %23187 = vst [vmem:[#allocation86_spill] sm:$0xff] %v16381_v17  ;;  %v889_v10 = vadd.f32 %v888_v3, %v16381_v17  ;;  %v976_v15 = vmul.f32 %v16381_v17, %v16381_v17  ;;  %v10805_v9 = vpop.f32.mrb[119].mxu0 }
 0x1cd   :  { %v1056_v28 = vadd.f32 %v1055_v16, %v976_v15 }
 0x1ce   :  { %v16386_v34 = vpop.f32.mrb[120].mxu0 }
 0x1cf   :  { %23188 = vst [vmem:[#allocation87_spill] sm:$0xff] %v16386_v34  ;;  %v890_v1 = vadd.f32 %v889_v10, %v16386_v34  ;;  %v977_v0 = vmul.f32 %v16386_v34, %v16386_v34  ;;  %v10808_v7 = vpop.f32.mrb[121].mxu0 }
 0x1d1   :  { %v1057_v19 = vadd.f32 %v1056_v28, %v977_v0 }
 0x1d2   :  { %v16391_v4 = vpop.f32.mrb[122].mxu0 }
 0x1d3   :  { %23189 = vst [vmem:[#allocation88_spill] sm:$0xff] %v16391_v4  ;;  %v891_v5 = vadd.f32 %v890_v1, %v16391_v4  ;;  %v978_v3 = vmul.f32 %v16391_v4, %v16391_v4  ;;  %v10811_v21 = vpop.f32.mrb[123].mxu0 }
 0x1d5   :  { %v1058_v50 = vadd.f32 %v1057_v19, %v978_v3 }
 0x1d6   :  { %v16396_v9 = vpop.f32.mrb[124].mxu0 }
 0x1d7   :  { %23190 = vst [vmem:[#allocation89_spill] sm:$0xff] %v16396_v9  ;;  %v892_v16 = vadd.f32 %v891_v5, %v16396_v9  ;;  %v979_v10 = vmul.f32 %v16396_v9, %v16396_v9  ;;  %v10814_v15 = vpop.f32.mrb[125].mxu0 }
 0x1d9   :  { %v1059_v34 = vadd.f32 %v1058_v50, %v979_v10 }
 0x1da   :  { %v16401_v7 = vpop.f32.mrb[126].mxu0 }
 0x1db   :  { %23191 = vst [vmem:[#allocation90_spill] sm:$0xff] %v16401_v7  ;;  %v893_v28 = vadd.f32 %v892_v16, %v16401_v7  ;;  %v980_v1 = vmul.f32 %v16401_v7, %v16401_v7  ;;  %v10817_v0 = vpop.f32.mrb[127].mxu0 }
 0x1dd   :  { %v1060_v4 = vadd.f32 %v1059_v34, %v980_v1 }
 0x1de   :  { %v16406_v21 = vpop.f32.mrb[128].mxu0 }
 0x1df   :  { %23192 = vst [vmem:[#allocation91_spill] sm:$0xff] %v16406_v21  ;;  %v894_v19 = vadd.f32 %v893_v28, %v16406_v21  ;;  %v981_v5 = vmul.f32 %v16406_v21, %v16406_v21  ;;  %v10820_v3 = vpop.f32.mrb[129].mxu0 }
 0x1e1   :  { %v1061_v9 = vadd.f32 %v1060_v4, %v981_v5 }
 0x1e2   :  { %v16411_v15 = vpop.f32.mrb[130].mxu0 }
 0x1e3   :  { %23193 = vst [vmem:[#allocation92_spill] sm:$0xff] %v16411_v15  ;;  %v895_v50 = vadd.f32 %v894_v19, %v16411_v15  ;;  %v982_v16 = vmul.f32 %v16411_v15, %v16411_v15  ;;  %v10823_v10 = vpop.f32.mrb[131].mxu0 }
 0x1e5   :  { %v1062_v7 = vadd.f32 %v1061_v9, %v982_v16  ;;  %v4682_v9 = vld [vmem:[%s22737_s6 + $0x200] sm:$0xff] }
 0x1e6   :  { %v16416_v0 = vpop.f32.mrb[132].mxu0 }
 0x1e7   :  { %23194 = vst [vmem:[#allocation93_spill] sm:$0xff] %v16416_v0  ;;  %v896_v34 = vadd.f32 %v895_v50, %v16416_v0  ;;  %v983_v28 = vmul.f32 %v16416_v0, %v16416_v0  ;;  %v10826_v1 = vpop.f32.mrb[133].mxu0  ;;  %v4683_v50 = vld [vmem:[%s22737_s6 + $0x208] sm:$0xff] }
 0x1e9   :  { %v1063_v21 = vadd.f32 %v1062_v7, %v983_v28  ;;  %v16437_v28 = vpack.c.bf16 %v4683_v50, %v4682_v9 }
 0x1ea   :  { %v16421_v3 = vpop.f32.mrb[134].mxu0 }
 0x1eb   :  { %23195 = vst [vmem:[#allocation94_spill] sm:$0xff] %v16421_v3  ;;  %v897_v4 = vadd.f32 %v896_v34, %v16421_v3  ;;  %v984_v19 = vmul.f32 %v16421_v3, %v16421_v3  ;;  %v10829_v5 = vpop.f32.mrb[135].mxu0  ;;  %23197 = vst [vmem:[#allocation96_spill] sm:$0xff] %v16437_v28  ;;  %13574 = vmatpush3.bf16.msra.mxu1 %v16437_v28  ;;  %v4686_v28 = vld [vmem:[%s22737_s6 + $0x220] sm:$0xff] }
 0x1ec   :  { %13567 = vmatprep.subr.bf16.mxu1 %v23146_v37 }
 0x1ed   :  { %v1064_v15 = vadd.f32 %v1063_v21, %v984_v19  ;;  %v4684_v19 = vld [vmem:[%s22737_s6 + $0x210] sm:$0xff] }
 0x1ee   :  { %v16426_v10 = vpop.f32.mrb[136].mxu0 }
 0x1ef   :  { %23196 = vst [vmem:[#allocation95_spill] sm:$0xff] %v16426_v10  ;;  %v898_v7 = vadd.f32 %v897_v4, %v16426_v10  ;;  %v985_v16 = vmul.f32 %v16426_v10, %v16426_v10  ;;  %v10832_v34 = vpop.f32.mrb[137].mxu0  ;;  %v4685_v4 = vld [vmem:[%s22737_s6 + $0x218] sm:$0xff] }
 0x1f0   :  { %v16452_v50 = vpack.c.bf16 %v4685_v4, %v4684_v19  ;;  %v2356_v10 = vld [vmem:[%s22737_s6 + $0xb8] sm:$0xff] }
 0x1f1   :  { %v1065_v1 = vadd.f32 %v1064_v15, %v985_v16 }
 0x1f2   :  { %v16440_v21 = vpop.f32.mrb[138].mxu0  ;;  %23199 = vst [vmem:[#allocation98_spill] sm:$0xff] %v16452_v50  ;;  %13575 = vmatpush3.bf16.msra.mxu1 %v16452_v50  ;;  %v2355_v50 = vld [vmem:[%s22737_s6 + $0xb0] sm:$0xff] }
 0x1f3   :  { %23198 = vst [vmem:[#allocation97_spill] sm:$0xff] %v16440_v21  ;;  %v899_v5 = vadd.f32 %v898_v7, %v16440_v21  ;;  %v986_v9 = vmul.f32 %v16440_v21, %v16440_v21  ;;  %v10835_v15 = vpop.f32.mrb[139].mxu0  ;;  %13568 = vmatprep.subr.bf16.mxu1 %v23146_v37  ;;  %v4687_v7 = vld [vmem:[%s22737_s6 + $0x228] sm:$0xff] }
 0x1f4   :  { %v16467_v4 = vpack.c.bf16 %v4687_v7, %v4686_v28  ;;  %v4688_v28 = vld [vmem:[%s22737_s6 + $0x230] sm:$0xff] }
 0x1f5   :  { %v1066_v16 = vadd.f32 %v1065_v1, %v986_v9 }
 0x1f6   :  { %v16455_v34 = vpop.f32.mrb[140].mxu0  ;;  %23201 = vst [vmem:[#allocation100_spill] sm:$0xff] %v16467_v4  ;;  %13576 = vmatpush3.bf16.msra.mxu1 %v16467_v4 }
 0x1f7   :  { %23200 = vst [vmem:[#allocation99_spill] sm:$0xff] %v16455_v34  ;;  %v900_v21 = vadd.f32 %v899_v5, %v16455_v34  ;;  %v987_v19 = vmul.f32 %v16455_v34, %v16455_v34  ;;  %v10838_v1 = vpop.f32.mrb[141].mxu0  ;;  %13569 = vmatprep.subr.bf16.mxu1 %v23146_v37 }
 0x1f8   :  { %v4689_v1 = vld [vmem:[%s22737_s6 + $0x238] sm:$0xff] }
 0x1f9   :  { %v1067_v9 = vadd.f32 %v1066_v16, %v987_v19  ;;  %v13360_v19 = vpack.c.bf16 %v2356_v10, %v2355_v50  ;;  %v16488_v4 = vpack.c.bf16 %v4689_v1, %v4688_v28  ;;  %v2358_v10 = vld [vmem:[%s22737_s6 + $0xc8] sm:$0xff]  ;;  %v4690_v50 = vld [vmem:[%s22737_s6 + $0x240] sm:$0xff] }
 0x1fa   :  { %v16470_v15 = vpop.f32.mrb[142].mxu0 }
 0x1fb   :  { %23202 = vst [vmem:[#allocation101_spill] sm:$0xff] %v16470_v15  ;;  %v901_v5 = vadd.f32 %v900_v21, %v16470_v15  ;;  %v988_v16 = vmul.f32 %v16470_v15, %v16470_v15  ;;  %v10841_v7 = vpop.f32.mrb[143].mxu0  ;;  %23203 = vst [vmem:[#allocation102_spill] sm:$0xff] %v16488_v4  ;;  %13361 = vmatpush3.bf16.msra.mxu0 %v13360_v19  ;;  %v2357_v21 = vld [vmem:[%s22737_s6 + $0xc0] sm:$0xff]  ;;  %13577 = vmatpush3.bf16.msra.mxu1 %v16488_v4  ;;  %v4691_v19 = vld [vmem:[%s22737_s6 + $0x248] sm:$0xff] }
 0x1fc   :  { %13362 = vmatprep.subr.bf16.mxu0 %v23146_v37  ;;  %v13363_v7 = vpack.c.bf16 %v2358_v10, %v2357_v21  ;;  %13570 = vmatprep.subr.bf16.mxu1 %v23146_v37  ;;  %v16510_v1 = vpack.c.bf16 %v4691_v19, %v4690_v50  ;;  %v2360_v21 = vld [vmem:[%s22737_s6 + $0xd8] sm:$0xff]  ;;  %v4692_v10 = vld [vmem:[%s22737_s6 + $0x250] sm:$0xff] }
 0x1fd   :  { %v1068_v34 = vadd.f32 %v1067_v9, %v988_v16 }
 0x1fe   :  { %v16490_v3 = vpop.f32.mrb[144].mxu0  ;;  %23205 = vst [vmem:[#allocation104_spill] sm:$0xff] %v16510_v1 }
 0x1ff   :  { %23204 = vst [vmem:[#allocation103_spill] sm:$0xff] %v16490_v3  ;;  %v902_v9 = vadd.f32 %v901_v5, %v16490_v3  ;;  %v989_v28 = vmul.f32 %v16490_v3, %v16490_v3  ;;  %v10844_v16 = vpop.f32.mrb[145].mxu0  ;;  %13364 = vmatpush3.bf16.msra.mxu0 %v13363_v7  ;;  %v2359_v5 = vld [vmem:[%s22737_s6 + $0xd0] sm:$0xff]  ;;  %13578 = vmatpush3.bf16.msra.mxu1 %v16510_v1  ;;  %v4693_v7 = vld [vmem:[%s22737_s6 + $0x258] sm:$0xff] }
 0x200   :  { %13365 = vmatprep.subr.bf16.mxu0 %v23146_v37  ;;  %v13366_v16 = vpack.c.bf16 %v2360_v21, %v2359_v5  ;;  %13571 = vmatprep.subr.bf16.mxu1 %v23146_v37  ;;  %v16532_v19 = vpack.c.bf16 %v4693_v7, %v4692_v10  ;;  %v2362_v5 = vld [vmem:[%s22737_s6 + $0xe8] sm:$0xff]  ;;  %v4694_v21 = vld [vmem:[%s22737_s6 + $0x260] sm:$0xff] }
 0x201   :  { %v1069_v4 = vadd.f32 %v1068_v34, %v989_v28 }
 0x202   :  { %v16512_v15 = vpop.f32.mrb[146].mxu0  ;;  %23207 = vst [vmem:[#allocation106_spill] sm:$0xff] %v16532_v19 }
 0x203   :  { %23206 = vst [vmem:[#allocation105_spill] sm:$0xff] %v16512_v15  ;;  %v903_v34 = vadd.f32 %v902_v9, %v16512_v15  ;;  %v990_v50 = vmul.f32 %v16512_v15, %v16512_v15  ;;  %v10847_v28 = vpop.f32.mrb[147].mxu0  ;;  %13367 = vmatpush3.bf16.msra.mxu0 %v13366_v16  ;;  %v2361_v9 = vld [vmem:[%s22737_s6 + $0xe0] sm:$0xff]  ;;  %13579 = vmatpush3.bf16.msra.mxu1 %v16532_v19  ;;  %v4695_v16 = vld [vmem:[%s22737_s6 + $0x268] sm:$0xff] }
 0x204   :  { %13368 = vmatprep.subr.bf16.mxu0 %v23146_v37  ;;  %v13369_v28 = vpack.c.bf16 %v2362_v5, %v2361_v9  ;;  %13572 = vmatprep.subr.bf16.mxu1 %v23146_v37  ;;  %v16554_v7 = vpack.c.bf16 %v4695_v16, %v4694_v21  ;;  %v2364_v9 = vld [vmem:[%s22737_s6 + $0xf8] sm:$0xff]  ;;  %v4696_v5 = vld [vmem:[%s22737_s6 + $0x270] sm:$0xff] }
 0x205   :  { %v1070_v1 = vadd.f32 %v1069_v4, %v990_v50 }
 0x206   :  { %v16534_v3 = vpop.f32.mrb[148].mxu0  ;;  %23209 = vst [vmem:[#allocation108_spill] sm:$0xff] %v16554_v7 }
 0x207   :  { %23208 = vst [vmem:[#allocation107_spill] sm:$0xff] %v16534_v3  ;;  %v904_v4 = vadd.f32 %v903_v34, %v16534_v3  ;;  %v991_v10 = vmul.f32 %v16534_v3, %v16534_v3  ;;  %v10850_v50 = vpop.f32.mrb[149].mxu0  ;;  %13370 = vmatpush3.bf16.msra.mxu0 %v13369_v28  ;;  %v2363_v34 = vld [vmem:[%s22737_s6 + $0xf0] sm:$0xff]  ;;  %13580 = vmatpush3.bf16.msra.mxu1 %v16554_v7  ;;  %v4697_v28 = vld [vmem:[%s22737_s6 + $0x278] sm:$0xff] }
 0x208   :  { %13371 = vmatprep.subr.bf16.mxu0 %v23146_v37  ;;  %v13372_v50 = vpack.c.bf16 %v2364_v9, %v2363_v34  ;;  %13573 = vmatprep.subr.bf16.mxu1 %v23146_v37  ;;  %v16576_v16 = vpack.c.bf16 %v4697_v28, %v4696_v5  ;;  %v16586_v28 = vld [vmem:[#allocation2] sm:$0xff] }
 0x209   :  { %v1071_v19 = vadd.f32 %v1070_v1, %v991_v10  ;;  %23213 = vst [vmem:[#allocation112_spill] sm:$0xff] %v16586_v28 }
 0x20a   :  { %v16556_v15 = vpop.f32.mrb[150].mxu0  ;;  %23211 = vst [vmem:[#allocation110_spill] sm:$0xff] %v16576_v16 }
 0x20b   :  { %23210 = vst [vmem:[#allocation109_spill] sm:$0xff] %v16556_v15  ;;  %v905_v1 = vadd.f32 %v904_v4, %v16556_v15  ;;  %v992_v21 = vmul.f32 %v16556_v15, %v16556_v15  ;;  %v10853_v10 = vpop.f32.mrb[151].mxu0  ;;  %13373 = vmatpush3.bf16.msra.mxu0 %v13372_v50  ;;  %13581 = vmatpush3.bf16.msra.mxu1 %v16576_v16 }
 0x20c   :  { %13374 = vmatprep.subr.bf16.mxu0 %v23146_v37  ;;  %v2268_v10 = vld [vmem:[#allocation2 + $0x6] sm:$0xff]  ;;  %13470 = vmatprep.subr.bf16.mxu1 %v23146_v37 }
 0x20d   :  { %v1072_v7 = vadd.f32 %v1071_v19, %v992_v21  ;;  %v2269_v19 = vld [vmem:[#allocation2 + $0xe] sm:$0xff] }
 0x20e   :  { %v16578_v3 = vpop.f32.mrb[152].mxu0  ;;  %10902 = vmatmul.mubr.f32.vlgmr.msra.gmra.mrb[162].mxu0 %v2268_v10 }
 0x20f   :  { %23212 = vst [vmem:[#allocation111_spill] sm:$0xff] %v16578_v3  ;;  %v906_v4 = vadd.f32 %v905_v1, %v16578_v3  ;;  %v993_v34 = vmul.f32 %v16578_v3, %v16578_v3  ;;  %v10856_v9 = vpop.f32.mrb[153].mxu0  ;;  %10904 = vmatprep.mubr.msk.f32.mxu0 %vm14817_vm0, %v16586_v28 }
 0x211   :  { %v1073_v5 = vadd.f32 %v1072_v7, %v993_v34 }
 0x212   :  { %v16590_v21 = vpop.f32.mrb[154].mxu0  ;;  %10905 = vmatmul.mubr.f32.gmra.mrb[164].mxu0 %v2269_v19 }
 0x213   :  { %23214 = vst [vmem:[#allocation113_spill] sm:$0xff] %v16590_v21  ;;  %v907_v50 = vadd.f32 %v906_v4, %v16590_v21  ;;  %v994_v1 = vmul.f32 %v16590_v21, %v16590_v21  ;;  %v10859_v16 = vpop.f32.mrb[155].mxu0  ;;  %10907 = vmatprep.mubr.msk.f32.mxu0 %vm14817_vm0, %v16586_v28 }
 0x215   :  { %v1074_v9 = vadd.f32 %v1073_v5, %v994_v1 }
 0x216   :  { %v16597_v7 = vpop.f32.mrb[156].mxu0 }
 0x217   :  { %23215 = vst [vmem:[#allocation114_spill] sm:$0xff] %v16597_v7  ;;  %v908_v34 = vadd.f32 %v907_v50, %v16597_v7  ;;  %v995_v10 = vmul.f32 %v16597_v7, %v16597_v7  ;;  %v10862_v37 = vpop.f32.mrb[157].mxu0 }
 0x219   :  { %v1075_v3 = vadd.f32 %v1074_v9, %v995_v10 }
 0x21a   :  { %v16602_v15 = vpop.f32.mrb[158].mxu0 }
 0x21b   :  { %23216 = vst [vmem:[#allocation115_spill] sm:$0xff] %v16602_v15  ;;  %v909_v4 = vadd.f32 %v908_v34, %v16602_v15  ;;  %v996_v16 = vmul.f32 %v16602_v15, %v16602_v15  ;;  %v10865_v5 = vpop.f32.mrb[159].mxu0 }
 0x21d   :  { %v1076_v19 = vadd.f32 %v1075_v3, %v996_v16 }
 0x21e   :  { %v827_v1 = vpop.f32.mrb[160].mxu0 }
 0x21f   :  { %v910_v28 = vadd.f32 %v909_v4, %v827_v1  ;;  %v997_v21 = vmul.f32 %v827_v1, %v827_v1  ;;  %v10868_v0 = vpop.f32.mrb[161].mxu0 }
 0x220   :  { %v1095_v0 = vlaneseq }
 0x221   :  { %v911_v17 = vrot.slane %v910_v28, 4  ;;  %v1077_v50 = vadd.f32 %v1076_v19, %v997_v21  ;;  %v16607_v21 = vpop.permute.xlu0 %1839 }
 0x222   :  { %v1096_v27 = vshrl.u32 %v1095_v0, 7  ;;  %23217 = vst [vmem:[#allocation116_spill] sm:$0xff] %v16607_v21  ;;  %v23245_v21 = vld [vmem:[#allocation89_spill] sm:$0xff] }
 0x223   :  { %v912_v2 = vadd.f32 %v911_v17, %v910_v28  ;;  %v1078_v13 = vrot.slane %v1077_v50, 4  ;;  %v16609_v17 = vpop.permute.xlu1 %1844  ;;  %v16629_v28 = vld [vmem:[%s22737_s6 + $0x290] sm:$0xff] }
 0x224   :  { %23218 = vst [vmem:[#allocation117_spill] sm:$0xff] %v16609_v17  ;;  %23222 = vst [vmem:[#allocation121_spill] sm:$0xff] %v16629_v28  ;;  %v23246_v17 = vld [vmem:[#allocation90_spill] sm:$0xff]  ;;  %v23248_v28 = vld [vmem:[#allocation91_spill] sm:$0xff] }
 0x225   :  { %v913_v7 = vrot.slane %v912_v2, 2  ;;  %v1079_v37 = vadd.f32 %v1078_v13, %v1077_v50  ;;  %v1090_v13 = vld [vmem:[%s22738_s2] sm:$0x1]  ;;  %v16639_v19 = vpop.permute.xlu0 %1849 }
 0x226   :  { %23224 = vst [vmem:[#allocation123_spill] sm:$0xff] %v16639_v19  ;;  %v23243_v19 = vld [vmem:[#allocation87_spill] sm:$0xff] }
 0x227   :  { %v914_v9 = vadd.f32 %v913_v7, %v912_v2  ;;  %v1080_v10 = vrot.slane %v1079_v37, 2  ;;  %v16614_v2 = vsub.s32 0, %v1096_v27  ;;  %v16634_v27 = vld [vmem:[%s22737_s6 + $0x298] sm:$0xff]  ;;  %v1092_v7 = vld [vmem:[%s22739_s3] sm:$0x1] }
 0x228   :  { %23223 = vst [vmem:[#allocation122_spill] sm:$0xff] %v16634_v27  ;;  %v23250_v27 = vld [vmem:[#allocation92_spill] sm:$0xff] }
 0x229   :  { %v915_v54 = vrot.slane %v914_v9, 1  ;;  %v1081_v8 = vadd.f32 %v1080_v10, %v1079_v37  ;;  %23219 = vst [vmem:[#allocation118_spill] sm:$0xff] %v16614_v2 }
 0x22b   :  { %v916_v34 = vadd.f32 %v915_v54, %v914_v9  ;;  %v1082_v18 = vrot.slane %v1081_v8, 1  ;;  %v16644_v9 = vpop.permute.xlu1 %1854 }
 0x22c   :  { %23226 = vst [vmem:[#allocation125_spill] sm:$0xff] %v16644_v9  ;;  %v23244_v9 = vld [vmem:[#allocation88_spill] sm:$0xff] }
 0x22d   :  { %v1083_v33 = vadd.f32 %v1082_v18, %v1081_v8  ;;  %v1084_v15 = vmul.f32 0.001953125, %v916_v34  ;;  %v16624_v8 = vld [vmem:[%s22737_s6 + $0x288] sm:$0xff] }
 0x22e   :  { %23221 = vst [vmem:[#allocation120_spill] sm:$0xff] %v16624_v8  ;;  %v23254_v8 = vld [vmem:[#allocation94_spill] sm:$0xff] }
 0x22f   :  { %v1085_v5 = vmul.f32 0.001953125, %v1083_v33  ;;  %v1086_v3 = vmul.f32 %v1084_v15, %v1084_v15  ;;  %v16619_v33 = vld [vmem:[%s22737_s6 + $0x280] sm:$0xff] }
 0x230   :  { %23220 = vst [vmem:[#allocation119_spill] sm:$0xff] %v16619_v33  ;;  %v23252_v33 = vld [vmem:[#allocation93_spill] sm:$0xff] }
 0x231   :  { %v1087_v16 = vsub.f32 %v1085_v5, %v1086_v3 }
 0x233   :  { %v1088_v4 = vadd.f32 1e-05, %v1087_v16 }
 0x235   :  { %14804 = vrsqrt.f32 %v1088_v4 }
 0x23f   :  { %v14805_v54 = vpop.eup %14804 }
 0x240   :  { %v1091_v18 = vmul.f32 %v14805_v54, %v1090_v13  ;;  %v16711_v54 = vpop.permute.xlu0 %1859 }
 0x241   :  { %23229 = vst [vmem:[#allocation128_spill] sm:$0xff] %v16711_v54  ;;  %v23241_v54 = vld [vmem:[#allocation85_spill] sm:$0xff] }
 0x242   :  { %v1093_v50 = vmul.f32 %v1091_v18, %v1084_v15  ;;  %v16642_v37 = vrot.slane %v1091_v18, %v16614_v2 }
 0x244   :  { %23225 = vst [vmem:[#allocation124_spill] sm:$0xff] %v16642_v37  ;;  %v1094_v5 = vsub.f32 %v1092_v7, %v1093_v50  ;;  %v1179_v3 = vmul.f32 %v16642_v37, %v827_v1  ;;  %v16653_v16 = vmul.f32 %v16642_v37, %v15728_v11  ;;  %v16657_v15 = vmul.f32 %v16642_v37, %v15740_v12  ;;  %v16728_v7 = vpop.permute.xlu1 %1864 }
 0x245   :  { %v16661_v4 = vmul.f32 %v16642_v37, %v15760_v29  ;;  %v16665_v0 = vmul.f32 %v16642_v37, %v15775_v23  ;;  %v16669_v13 = vmul.f32 %v16642_v37, %v15790_v45  ;;  %v16673_v11 = vmul.f32 %v16642_v37, %v15807_v36  ;;  %v16693_v45 = vld [vmem:[%s22740_s4] ss:$0 sm:$0xff]  ;;  %23231 = vst [vmem:[#allocation130_spill] sm:$0xff] %v16728_v7  ;;  %v23242_v7 = vld [vmem:[#allocation86_spill] sm:$0xff]  ;;  %s14820_s4 = smov 64  }
 0x246   :  { %v16676_v1 = vrot.slane %v1094_v5, %v16614_v2  ;;  %v16680_v12 = vmul.f32 %v16642_v37, %v15822_v38  ;;  %v16684_v29 = vmul.f32 %v16642_v37, %v15837_v41  ;;  %v16688_v23 = vmul.f32 %v16642_v37, %v15860_v26  ;;  %23228 = vst [vmem:[#allocation127_spill] sm:$0xff] %v16693_v45 }
 0x247   :  { %v16697_v36 = vmul.f32 %v16642_v37, %v15876_v60  ;;  %v16701_v38 = vmul.f32 %v16642_v37, %v15893_v57  ;;  %v16705_v41 = vmul.f32 %v16642_v37, %v15909_v47  ;;  %v16709_v26 = vmul.f32 %v16642_v37, %v15929_v42 }
 0x248   :  { %23227 = vst [vmem:[#allocation126_spill] sm:$0xff] %v16676_v1  ;;  %v16714_v18 = vadd.f32 %v16676_v1, %v1179_v3  ;;  %v16718_v60 = vmul.f32 %v16642_v37, %v15946_v35  ;;  %v16722_v57 = vmul.f32 %v16642_v37, %v15965_v20  ;;  %v16726_v47 = vmul.f32 %v16642_v37, %v15982_v53 }
 0x249   :  { %v16732_v42 = vmul.f32 %v16642_v37, %v15999_v62  ;;  %v16736_v50 = vmul.f32 %v16642_v37, %v16018_v44  ;;  %v16740_v35 = vmul.f32 %v16642_v37, %v16035_v56  ;;  %v16744_v20 = vmul.f32 %v16642_v37, %v16058_v59 }
 0x24a   :  { %23230 = vst [vmem:[#allocation129_spill] sm:$0xff] %v16714_v18  ;;  %v16748_v53 = vmul.f32 %v16693_v45, %v16714_v18  ;;  %v16752_v62 = vmul.f32 %v16642_v37, %v16078_v46  ;;  %v16756_v44 = vmul.f32 %v16642_v37, %v16112_v61  ;;  %v16760_v56 = vmul.f32 %v16642_v37, %v16249_v31  ;;  %v16808_v31 = vpop.permute.xlu0 %1869  ;;  %v23238_v18 = vld [vmem:[#allocation82_spill] sm:$0xff]  ;;  %v23256_v45 = vld [vmem:[#allocation95_spill] sm:$0xff] }
 0x24b   :  { %v16764_v59 = vmul.f32 %v16642_v37, %v16254_v25  ;;  %v16768_v5 = vmul.f32 %v16642_v37, %v16259_v52  ;;  %v16772_v46 = vmul.f32 %v16642_v37, %v16264_v55  ;;  %v16776_v61 = vmul.f32 %v16642_v37, %v16275_v40  ;;  %23233 = vst [vmem:[#allocation132_spill] sm:$0xff] %v16808_v31  ;;  %v23239_v31 = vld [vmem:[#allocation83_spill] sm:$0xff] }
 0x24c   :  { %23232 = vst [vmem:[#allocation131_spill] sm:$0xff] %v16748_v53  ;;  %v16782_v3 = vmul.f32 %v16642_v37, %v16281_v14  ;;  %v16786_v25 = vmul.f32 %v16642_v37, %v16286_v32  ;;  %v16790_v52 = vmul.f32 %v16642_v37, %v16291_v22  ;;  %v16794_v55 = vmul.f32 %v16642_v37, %v16296_v30 }
 0x24d   :  { %v16798_v40 = vmul.f32 %v16642_v37, %v16301_v48  ;;  %v16802_v14 = vmul.f32 %v16642_v37, %v16306_v24  ;;  %v16806_v32 = vmul.f32 %v16642_v37, %v16311_v39  ;;  %v16812_v22 = vmul.f32 %v16642_v37, %v16316_v51  ;;  %v16826_v39 = vpop.permute.xlu1 %1874 }
 0x24e   :  { %v16816_v30 = vmul.f32 %v16642_v37, %v16321_v6  ;;  %v16820_v48 = vmul.f32 %v16642_v37, %v16326_v58  ;;  %v16824_v24 = vmul.f32 %v16642_v37, %v16331_v63  ;;  %23234 = vst [vmem:[#allocation133_spill] sm:$0xff] %v16826_v39  ;;  %v16830_v34 = vmul.f32 %v16642_v37, %v16336_v43  ;;  %v23235_v6 = vld [vmem:[#allocation79_spill] sm:$0xff]  ;;  %v23236_v58 = vld [vmem:[#allocation80_spill] sm:$0xff]  ;;  %v23237_v63 = vld [vmem:[#allocation81_spill] sm:$0xff] }
 0x24f   :  { %v16834_v51 = vmul.f32 %v16642_v37, %v16341_v49  ;;  %v16838_v10 = vmul.f32 %v16642_v37, %v23235_v6  ;;  %v16842_v2 = vmul.f32 %v16642_v37, %v23236_v58  ;;  %v16846_v53 = vmul.f32 %v16642_v37, %v23237_v63  ;;  %v23240_v39 = vld [vmem:[#allocation84_spill] sm:$0xff] }
 0x250   :  { %v16850_v43 = vmul.f32 %v16642_v37, %v23238_v18  ;;  %v16854_v49 = vmul.f32 %v16642_v37, %v23239_v31  ;;  %v16858_v6 = vmul.f32 %v16642_v37, %v23240_v39  ;;  %v16862_v58 = vmul.f32 %v16642_v37, %v23241_v54 }
 0x251   :  { %v16866_v63 = vmul.f32 %v16642_v37, %v23242_v7  ;;  %v16870_v18 = vmul.f32 %v16642_v37, %v23243_v19  ;;  %v16874_v31 = vmul.f32 %v16642_v37, %v23244_v9  ;;  %v16878_v39 = vmul.f32 %v16642_v37, %v23245_v21 }
 0x252   :  { %v16882_v54 = vmul.f32 %v16642_v37, %v23246_v17  ;;  %v16886_v7 = vmul.f32 %v16642_v37, %v23248_v28  ;;  %v16890_v19 = vmul.f32 %v16642_v37, %v23250_v27  ;;  %v16894_v9 = vmul.f32 %v16642_v37, %v23252_v33  ;;  %v23261_v27 = vld [vmem:[#allocation99_spill] sm:$0xff]  ;;  %v23263_v33 = vld [vmem:[#allocation101_spill] sm:$0xff] }
 0x253   :  { %v16898_v21 = vmul.f32 %v16642_v37, %v23254_v8  ;;  %v16902_v17 = vmul.f32 %v16642_v37, %v23256_v45  ;;  %v23265_v8 = vld [vmem:[#allocation103_spill] sm:$0xff]  ;;  %v23267_v45 = vld [vmem:[#allocation105_spill] sm:$0xff] }
 0x254   :  { %23247 = vst [vmem:[#allocation79_spill] sm:$0xff] %v16882_v54  ;;  %23249 = vst [vmem:[#allocation80_spill] sm:$0xff] %v16886_v7  ;;  %v23258_v54 = vld [vmem:[#allocation97_spill] sm:$0xff]  ;;  %v16908_v7 = vpop.permute.xlu0 %1879 }
 0x255   :  { %23251 = vst [vmem:[#allocation81_spill] sm:$0xff] %v16890_v19  ;;  %23253 = vst [vmem:[#allocation82_spill] sm:$0xff] %v16894_v9  ;;  %v16906_v28 = vmul.f32 %v16642_v37, %v23258_v54  ;;  %v16912_v19 = vmul.f32 %v16642_v37, %v23261_v27  ;;  %v16916_v9 = vmul.f32 %v16642_v37, %v23263_v33  ;;  %v16926_v54 = vpop.permute.xlu1 %1884  ;;  %v23271_v27 = vld [vmem:[#allocation109_spill] sm:$0xff]  ;;  %v23272_v33 = vld [vmem:[#allocation111_spill] sm:$0xff] }
 0x256   :  { %23255 = vst [vmem:[#allocation83_spill] sm:$0xff] %v16898_v21  ;;  %23257 = vst [vmem:[#allocation84_spill] sm:$0xff] %v16902_v17  ;;  %v16920_v21 = vmul.f32 %v16642_v37, %v23265_v8  ;;  %v16924_v17 = vmul.f32 %v16642_v37, %v23267_v45  ;;  %v23273_v8 = vld [vmem:[#allocation113_spill] sm:$0xff]  ;;  %v23274_v45 = vld [vmem:[#allocation114_spill] sm:$0xff] }
 0x257   :  { %23259 = vst [vmem:[#allocation85_spill] sm:$0xff] %v16906_v28  ;;  %23260 = vst [vmem:[#allocation86_spill] sm:$0xff] %v16908_v7  ;;  %v23270_v28 = vld [vmem:[#allocation107_spill] sm:$0xff] }
 0x258   :  { %23262 = vst [vmem:[#allocation87_spill] sm:$0xff] %v16912_v19  ;;  %23264 = vst [vmem:[#allocation88_spill] sm:$0xff] %v16916_v9  ;;  %v16930_v7 = vmul.f32 %v16642_v37, %v23270_v28  ;;  %v16934_v19 = vmul.f32 %v16642_v37, %v23271_v27  ;;  %v16938_v9 = vmul.f32 %v16642_v37, %v23272_v33 }
 0x259   :  { %23266 = vst [vmem:[#allocation89_spill] sm:$0xff] %v16920_v21  ;;  %23268 = vst [vmem:[#allocation90_spill] sm:$0xff] %v16924_v17  ;;  %v16942_v21 = vmul.f32 %v16642_v37, %v23273_v8  ;;  %v16946_v17 = vmul.f32 %v16642_v37, %v23274_v45  ;;  %v16954_v27 = vadd.f32 %v16676_v1, %v16653_v16 }
 0x25a   :  { %23269 = vst [vmem:[#allocation91_spill] sm:$0xff] %v16926_v54  ;;  %v23275_v54 = vld [vmem:[#allocation115_spill] sm:$0xff]  ;;  %v16958_v33 = vadd.f32 %v16676_v1, %v16657_v15  ;;  %v16962_v8 = vadd.f32 %v16676_v1, %v16661_v4  ;;  %v16966_v45 = vadd.f32 %v16676_v1, %v16665_v0  ;;  %v16974_v16 = vadd.f32 %v16676_v1, %v16673_v11 }
 0x25b   :  { %v16950_v28 = vmul.f32 %v16642_v37, %v23275_v54  ;;  %v16970_v54 = vadd.f32 %v16676_v1, %v16669_v13  ;;  %v16978_v15 = vadd.f32 %v16676_v1, %v16680_v12  ;;  %v16982_v4 = vadd.f32 %v16676_v1, %v16684_v29  ;;  %v17008_v37 = vpop.permute.xlu0 %1889 }
 0x25c   :  { %23276 = vst [vmem:[#allocation92_spill] sm:$0xff] %v16962_v8  ;;  %23277 = vst [vmem:[#allocation93_spill] sm:$0xff] %v16966_v45  ;;  %v16986_v0 = vadd.f32 %v16676_v1, %v16688_v23  ;;  %v16990_v13 = vadd.f32 %v16676_v1, %v16697_v36  ;;  %v16994_v11 = vadd.f32 %v16676_v1, %v16701_v38 }
 0x25d   :  { %23278 = vst [vmem:[#allocation94_spill] sm:$0xff] %v16970_v54  ;;  %23279 = vst [vmem:[#allocation95_spill] sm:$0xff] %v16974_v16  ;;  %v16998_v12 = vadd.f32 %v16676_v1, %v16705_v41  ;;  %v17002_v29 = vadd.f32 %v16676_v1, %v16709_v26  ;;  %v17006_v23 = vadd.f32 %v16676_v1, %v16718_v60  ;;  %v17026_v60 = vpop.permute.xlu1 %1894 }
 0x25e   :  { %23280 = vst [vmem:[#allocation97_spill] sm:$0xff] %v16978_v15  ;;  %23281 = vst [vmem:[#allocation99_spill] sm:$0xff] %v16982_v4  ;;  %v17012_v36 = vadd.f32 %v16676_v1, %v16722_v57  ;;  %v17016_v38 = vadd.f32 %v16676_v1, %v16726_v47  ;;  %v17020_v41 = vadd.f32 %v16676_v1, %v16732_v42 }
 0x25f   :  { %23282 = vst [vmem:[#allocation101_spill] sm:$0xff] %v16986_v0  ;;  %23283 = vst [vmem:[#allocation103_spill] sm:$0xff] %v16990_v13  ;;  %v17024_v26 = vadd.f32 %v16676_v1, %v16736_v50  ;;  %v17034_v57 = vadd.f32 %v16676_v1, %v16744_v20  ;;  %v17038_v47 = vadd.f32 %v16676_v1, %v16752_v62 }
 0x260   :  { %23284 = vst [vmem:[#allocation105_spill] sm:$0xff] %v16994_v11  ;;  %23285 = vst [vmem:[#allocation107_spill] sm:$0xff] %v16998_v12  ;;  %v17042_v42 = vadd.f32 %v16676_v1, %v16756_v44  ;;  %v17046_v50 = vadd.f32 %v16676_v1, %v16760_v56  ;;  %v17054_v20 = vadd.f32 %v16676_v1, %v16768_v5 }
 0x261   :  { %23286 = vst [vmem:[#allocation109_spill] sm:$0xff] %v17002_v29  ;;  %23287 = vst [vmem:[#allocation111_spill] sm:$0xff] %v17006_v23  ;;  %v17058_v62 = vadd.f32 %v16676_v1, %v16772_v46  ;;  %v17062_v44 = vadd.f32 %v16676_v1, %v16776_v61  ;;  %v17066_v56 = vadd.f32 %v16676_v1, %v16782_v3 }
 0x262   :  { %23288 = vst [vmem:[#allocation113_spill] sm:$0xff] %v17008_v37  ;;  %23289 = vst [vmem:[#allocation114_spill] sm:$0xff] %v17012_v36  ;;  %v17030_v37 = vadd.f32 %v16676_v1, %v16740_v35  ;;  %v17050_v35 = vadd.f32 %v16676_v1, %v16764_v59  ;;  %v17070_v59 = vadd.f32 %v16676_v1, %v16786_v25 }
 0x263   :  { %23290 = vst [vmem:[#allocation115_spill] sm:$0xff] %v17016_v38  ;;  %23291 = vst [vmem:[#allocation134_spill] sm:$0xff] %v17020_v41  ;;  %v17074_v5 = vadd.f32 %v16676_v1, %v16790_v52  ;;  %v17078_v46 = vadd.f32 %v16676_v1, %v16794_v55  ;;  %v17082_v61 = vadd.f32 %v16676_v1, %v16798_v40 }
 0x264   :  { %23292 = vst [vmem:[#allocation135_spill] sm:$0xff] %v17024_v26  ;;  %23293 = vst [vmem:[#allocation136_spill] sm:$0xff] %v17026_v60  ;;  %v17086_v3 = vadd.f32 %v16676_v1, %v16802_v14  ;;  %v17090_v25 = vadd.f32 %v16676_v1, %v16806_v32  ;;  %v17094_v52 = vadd.f32 %v16676_v1, %v16812_v22  ;;  %v17108_v60 = vpop.permute.xlu0 %1899 }
 0x265   :  { %23294 = vst [vmem:[#allocation137_spill] sm:$0xff] %v17030_v37  ;;  %23295 = vst [vmem:[#allocation138_spill] sm:$0xff] %v17034_v57  ;;  %v17098_v55 = vadd.f32 %v16676_v1, %v16816_v30  ;;  %v17102_v40 = vadd.f32 %v16676_v1, %v16820_v48  ;;  %v17106_v14 = vadd.f32 %v16676_v1, %v16824_v24  ;;  %v17126_v24 = vpop.permute.xlu1 %1904 }
 0x266   :  { %23296 = vst [vmem:[#allocation139_spill] sm:$0xff] %v17038_v47  ;;  %23297 = vst [vmem:[#allocation140_spill] sm:$0xff] %v17042_v42  ;;  %v17112_v32 = vadd.f32 %v16676_v1, %v16830_v34  ;;  %v17116_v22 = vadd.f32 %v16676_v1, %v16834_v51  ;;  %v17120_v30 = vadd.f32 %v16676_v1, %v16838_v10 }
 0x267   :  { %23298 = vst [vmem:[#allocation141_spill] sm:$0xff] %v17046_v50  ;;  %23299 = vst [vmem:[#allocation142_spill] sm:$0xff] %v17050_v35  ;;  %v17124_v48 = vadd.f32 %v16676_v1, %v16842_v2  ;;  %v17134_v34 = vadd.f32 %v16676_v1, %v16850_v43  ;;  %v17138_v51 = vadd.f32 %v16676_v1, %v16854_v49 }
 0x268   :  { %23300 = vst [vmem:[#allocation143_spill] sm:$0xff] %v17054_v20  ;;  %23301 = vst [vmem:[#allocation144_spill] sm:$0xff] %v17058_v62  ;;  %v17142_v10 = vadd.f32 %v16676_v1, %v16858_v6  ;;  %v17146_v2 = vadd.f32 %v16676_v1, %v16862_v58  ;;  %v17154_v43 = vadd.f32 %v16676_v1, %v16870_v18 }
 0x269   :  { %23302 = vst [vmem:[#allocation145_spill] sm:$0xff] %v17062_v44  ;;  %23303 = vst [vmem:[#allocation146_spill] sm:$0xff] %v17066_v56  ;;  %v17158_v49 = vadd.f32 %v16676_v1, %v16874_v31  ;;  %v17162_v6 = vadd.f32 %v16676_v1, %v16878_v39 }
 0x26a   :  { %23304 = vst [vmem:[#allocation147_spill] sm:$0xff] %v17070_v59  ;;  %23305 = vst [vmem:[#allocation148_spill] sm:$0xff] %v17074_v5 }
 0x26b   :  { %23306 = vst [vmem:[#allocation149_spill] sm:$0xff] %v17078_v46  ;;  %23307 = vst [vmem:[#allocation150_spill] sm:$0xff] %v17082_v61 }
 0x26c   :  { %23308 = vst [vmem:[#allocation151_spill] sm:$0xff] %v17086_v3  ;;  %23309 = vst [vmem:[#allocation152_spill] sm:$0xff] %v17090_v25 }
 0x26d   :  { %23310 = vst [vmem:[#allocation153_spill] sm:$0xff] %v17094_v52  ;;  %23311 = vst [vmem:[#allocation154_spill] sm:$0xff] %v17098_v55 }
 0x26e   :  { %23312 = vst [vmem:[#allocation155_spill] sm:$0xff] %v17102_v40  ;;  %23313 = vst [vmem:[#allocation156_spill] sm:$0xff] %v17106_v14 }
 0x26f   :  { %23314 = vst [vmem:[#allocation157_spill] sm:$0xff] %v17108_v60  ;;  %23315 = vst [vmem:[#allocation158_spill] sm:$0xff] %v17112_v32  ;;  %v17130_v60 = vadd.f32 %v16676_v1, %v16846_v53  ;;  %v17150_v53 = vadd.f32 %v16676_v1, %v16866_v63 }
 0x270   :  { %23316 = vst [vmem:[#allocation159_spill] sm:$0xff] %v17116_v22  ;;  %23317 = vst [vmem:[#allocation160_spill] sm:$0xff] %v17120_v30 }
 0x271   :  { %23318 = vst [vmem:[#allocation161_spill] sm:$0xff] %v17124_v48  ;;  %23319 = vst [vmem:[#allocation162_spill] sm:$0xff] %v17126_v24  ;;  %v23329_v24 = vld [vmem:[#allocation79_spill] sm:$0xff] }
 0x272   :  { %23320 = vst [vmem:[#allocation163_spill] sm:$0xff] %v17130_v60  ;;  %23321 = vst [vmem:[#allocation164_spill] sm:$0xff] %v17134_v34  ;;  %v17166_v58 = vadd.f32 %v16676_v1, %v23329_v24 }
 0x273   :  { %23322 = vst [vmem:[#allocation165_spill] sm:$0xff] %v17138_v51  ;;  %23323 = vst [vmem:[#allocation166_spill] sm:$0xff] %v17142_v10 }
 0x274   :  { %23324 = vst [vmem:[#allocation167_spill] sm:$0xff] %v17146_v2  ;;  %23325 = vst [vmem:[#allocation168_spill] sm:$0xff] %v17150_v53  ;;  %v23331_v2 = vld [vmem:[#allocation80_spill] sm:$0xff]  ;;  %v23333_v53 = vld [vmem:[#allocation81_spill] sm:$0xff] }
 0x275   :  { %23326 = vst [vmem:[#allocation169_spill] sm:$0xff] %v17154_v43  ;;  %23327 = vst [vmem:[#allocation170_spill] sm:$0xff] %v17158_v49  ;;  %v17170_v63 = vadd.f32 %v16676_v1, %v23331_v2  ;;  %v17174_v18 = vadd.f32 %v16676_v1, %v23333_v53  ;;  %v23335_v43 = vld [vmem:[#allocation82_spill] sm:$0xff]  ;;  %v23337_v49 = vld [vmem:[#allocation83_spill] sm:$0xff] }
 0x276   :  { %23328 = vst [vmem:[#allocation171_spill] sm:$0xff] %v17162_v6  ;;  %23330 = vst [vmem:[#allocation79_spill] sm:$0xff] %v17166_v58  ;;  %v17178_v31 = vadd.f32 %v16676_v1, %v23335_v43  ;;  %v17182_v39 = vadd.f32 %v16676_v1, %v23337_v49  ;;  %v23339_v6 = vld [vmem:[#allocation84_spill] sm:$0xff]  ;;  %v23341_v58 = vld [vmem:[#allocation85_spill] sm:$0xff] }
 0x277   :  { %23332 = vst [vmem:[#allocation80_spill] sm:$0xff] %v17170_v63  ;;  %23334 = vst [vmem:[#allocation81_spill] sm:$0xff] %v17174_v18  ;;  %v17186_v24 = vadd.f32 %v16676_v1, %v23339_v6  ;;  %v17190_v2 = vadd.f32 %v16676_v1, %v23341_v58  ;;  %v23343_v63 = vld [vmem:[#allocation87_spill] sm:$0xff]  ;;  %v23345_v18 = vld [vmem:[#allocation88_spill] sm:$0xff]  ;;  %v17212_v58 = vadd.f32 %v16676_v1, %v16930_v7 }
 0x278   :  { %23336 = vst [vmem:[#allocation82_spill] sm:$0xff] %v17178_v31  ;;  %23338 = vst [vmem:[#allocation83_spill] sm:$0xff] %v17182_v39  ;;  %v17194_v53 = vadd.f32 %v16676_v1, %v23343_v63  ;;  %v17198_v43 = vadd.f32 %v16676_v1, %v23345_v18  ;;  %v23347_v31 = vld [vmem:[#allocation89_spill] sm:$0xff]  ;;  %v23349_v39 = vld [vmem:[#allocation90_spill] sm:$0xff]  ;;  %v17216_v63 = vadd.f32 %v16676_v1, %v16934_v19 }
 0x279   :  { %23340 = vst [vmem:[#allocation84_spill] sm:$0xff] %v17186_v24  ;;  %23342 = vst [vmem:[#allocation85_spill] sm:$0xff] %v17190_v2  ;;  %v17202_v49 = vadd.f32 %v16676_v1, %v23347_v31  ;;  %v17206_v6 = vadd.f32 %v16676_v1, %v23349_v39  ;;  %v17208_v24 = vpop.permute.xlu0 %1909  ;;  %v17220_v18 = vadd.f32 %v16676_v1, %v16938_v9  ;;  %v17226_v39 = vpop.permute.xlu1 %1914  ;;  %v23359_v19 = vld [vmem:[#allocation127_spill] sm:$0xff] }
 0x27a   :  { %23344 = vst [vmem:[#allocation87_spill] sm:$0xff] %v17194_v53  ;;  %23346 = vst [vmem:[#allocation88_spill] sm:$0xff] %v17198_v43  ;;  %v17224_v31 = vadd.f32 %v16676_v1, %v16942_v21  ;;  %v17234_v7 = vadd.f32 %v16676_v1, %v16950_v28  ;;  %v17242_v9 = vmul.f32 %v23359_v19, %v16958_v33 }
 0x27b   :  { %23348 = vst [vmem:[#allocation89_spill] sm:$0xff] %v17202_v49  ;;  %23350 = vst [vmem:[#allocation90_spill] sm:$0xff] %v17206_v6  ;;  %v17246_v21 = vmul.f32 %v23359_v19, %v16962_v8  ;;  %v17254_v28 = vmul.f32 %v23359_v19, %v16970_v54  ;;  %v17266_v8 = vmul.f32 %v23359_v19, %v16982_v4 }
 0x27c   :  { %23351 = vst [vmem:[#allocation172_spill] sm:$0xff] %v17208_v24  ;;  %23352 = vst [vmem:[#allocation173_spill] sm:$0xff] %v17212_v58  ;;  %v17230_v24 = vadd.f32 %v16676_v1, %v16946_v17  ;;  %v17250_v17 = vmul.f32 %v23359_v19, %v16966_v45  ;;  %v17262_v1 = vmul.f32 %v23359_v19, %v16978_v15 }
 0x27d   :  { %23353 = vst [vmem:[#allocation174_spill] sm:$0xff] %v17216_v63  ;;  %23354 = vst [vmem:[#allocation175_spill] sm:$0xff] %v17220_v18  ;;  %v17238_v63 = vmul.f32 %v23359_v19, %v16954_v27  ;;  %v17270_v45 = vmul.f32 %v23359_v19, %v16986_v0  ;;  %v17274_v54 = vmul.f32 %v23359_v19, %v16990_v13 }
 0x27e   :  { %23355 = vst [vmem:[#allocation176_spill] sm:$0xff] %v17224_v31  ;;  %23356 = vst [vmem:[#allocation177_spill] sm:$0xff] %v17226_v39  ;;  %v17258_v39 = vmul.f32 %v23359_v19, %v16974_v16  ;;  %v17278_v16 = vmul.f32 %v23359_v19, %v16994_v11  ;;  %v17282_v15 = vmul.f32 %v23359_v19, %v16998_v12 }
 0x27f   :  { %23357 = vst [vmem:[#allocation178_spill] sm:$0xff] %v17230_v24  ;;  %23358 = vst [vmem:[#allocation179_spill] sm:$0xff] %v17234_v7  ;;  %v17286_v4 = vmul.f32 %v23359_v19, %v17002_v29  ;;  %v17290_v0 = vmul.f32 %v23359_v19, %v17006_v23  ;;  %v17294_v13 = vmul.f32 %v23359_v19, %v17012_v36 }
 0x280   :  { %23360 = vst [vmem:[#allocation180_spill] sm:$0xff] %v17238_v63  ;;  %23361 = vst [vmem:[#allocation181_spill] sm:$0xff] %v17242_v9  ;;  %v17298_v11 = vmul.f32 %v23359_v19, %v17016_v38  ;;  %v17302_v12 = vmul.f32 %v23359_v19, %v17020_v41  ;;  %v17306_v29 = vmul.f32 %v23359_v19, %v17024_v26  ;;  %v17326_v26 = vpop.permute.xlu1 %7924  ;;  %v23444_v63 = vld [vmem:[#allocation99_spill] sm:$0xff] }
 0x281   :  { %23362 = vst [vmem:[#allocation182_spill] sm:$0xff] %v17246_v21  ;;  %23363 = vst [vmem:[#allocation183_spill] sm:$0xff] %v17250_v17  ;;  %v17312_v23 = vmul.f32 %v23359_v19, %v17030_v37  ;;  %v17316_v36 = vmul.f32 %v23359_v19, %v17034_v57  ;;  %v17320_v38 = vmul.f32 %v23359_v19, %v17038_v47  ;;  %v23453_v9 = vld [vmem:[#allocation115_spill] sm:$0xff]  ;;  %v23454_v21 = vld [vmem:[#allocation134_spill] sm:$0xff] }
 0x282   :  { %23364 = vst [vmem:[#allocation184_spill] sm:$0xff] %v17254_v28  ;;  %23365 = vst [vmem:[#allocation185_spill] sm:$0xff] %v17258_v39  ;;  %v17324_v41 = vmul.f32 %v23359_v19, %v17042_v42  ;;  %v17334_v37 = vmul.f32 %v23359_v19, %v17050_v35  ;;  %v17338_v57 = vmul.f32 %v23359_v19, %v17054_v20  ;;  %v23455_v17 = vld [vmem:[#allocation135_spill] sm:$0xff]  ;;  %v23456_v28 = vld [vmem:[#allocation137_spill] sm:$0xff] }
 0x283   :  { %23366 = vst [vmem:[#allocation186_spill] sm:$0xff] %v17262_v1  ;;  %23367 = vst [vmem:[#allocation187_spill] sm:$0xff] %v17266_v8  ;;  %v17342_v47 = vmul.f32 %v23359_v19, %v17058_v62  ;;  %v17346_v42 = vmul.f32 %v23359_v19, %v17062_v44  ;;  %v17354_v35 = vmul.f32 %v23359_v19, %v17070_v59  ;;  %v23457_v39 = vld [vmem:[#allocation138_spill] sm:$0xff]  ;;  %v23458_v1 = vld [vmem:[#allocation139_spill] sm:$0xff] }
 0x284   :  { %23368 = vst [vmem:[#allocation188_spill] sm:$0xff] %v17270_v45  ;;  %23369 = vst [vmem:[#allocation189_spill] sm:$0xff] %v17274_v54  ;;  %v17358_v20 = vmul.f32 %v23359_v19, %v17074_v5  ;;  %v17362_v62 = vmul.f32 %v23359_v19, %v17078_v46  ;;  %v17366_v44 = vmul.f32 %v23359_v19, %v17082_v61  ;;  %v23459_v8 = vld [vmem:[#allocation140_spill] sm:$0xff]  ;;  %v23461_v45 = vld [vmem:[#allocation142_spill] sm:$0xff] }
 0x285   :  { %23370 = vst [vmem:[#allocation190_spill] sm:$0xff] %v17278_v16  ;;  %23371 = vst [vmem:[#allocation191_spill] sm:$0xff] %v17282_v15  ;;  %v17374_v59 = vmul.f32 %v23359_v19, %v17090_v25  ;;  %v17378_v5 = vmul.f32 %v23359_v19, %v17094_v52  ;;  %v17382_v46 = vmul.f32 %v23359_v19, %v17098_v55 }
 0x286   :  { %23372 = vst [vmem:[#allocation192_spill] sm:$0xff] %v17286_v4  ;;  %23373 = vst [vmem:[#allocation193_spill] sm:$0xff] %v17290_v0  ;;  %v17308_v4 = vpop.permute.xlu0 %1919  ;;  %v17386_v61 = vmul.f32 %v23359_v19, %v17102_v40  ;;  %v17394_v25 = vmul.f32 %v23359_v19, %v17112_v32  ;;  %v17398_v52 = vmul.f32 %v23359_v19, %v17116_v22 }
 0x287   :  { %23374 = vst [vmem:[#allocation194_spill] sm:$0xff] %v17294_v13  ;;  %23375 = vst [vmem:[#allocation195_spill] sm:$0xff] %v17306_v29  ;;  %v17402_v55 = vmul.f32 %v23359_v19, %v17120_v30  ;;  %v17406_v40 = vmul.f32 %v23359_v19, %v17124_v48  ;;  %v17416_v32 = vmul.f32 %v23359_v19, %v17134_v34  ;;  %v17426_v48 = vpop.permute.xlu1 %7934  ;;  %v23408_v34 = vld [vmem:[#allocation169_spill] sm:$0xff]  ;;  %v23466_v13 = vld [vmem:[#allocation146_spill] sm:$0xff] }
 0x288   :  { %23376 = vst [vmem:[#allocation196_spill] sm:$0xff] %v17308_v4  ;;  %23377 = vst [vmem:[#allocation197_spill] sm:$0xff] %v17312_v23  ;;  %v17330_v4 = vmul.f32 %v23359_v19, %v17046_v50  ;;  %v17420_v22 = vmul.f32 %v23359_v19, %v17138_v51  ;;  %v17424_v30 = vmul.f32 %v23359_v19, %v17142_v10  ;;  %v23410_v51 = vld [vmem:[#allocation170_spill] sm:$0xff]  ;;  %v23412_v10 = vld [vmem:[#allocation171_spill] sm:$0xff] }
 0x289   :  { %23378 = vst [vmem:[#allocation198_spill] sm:$0xff] %v17316_v36  ;;  %23379 = vst [vmem:[#allocation199_spill] sm:$0xff] %v17320_v38  ;;  %v23463_v23 = vld [vmem:[#allocation144_spill] sm:$0xff]  ;;  %v23479_v29 = vld [vmem:[#allocation159_spill] sm:$0xff] }
 0x28a   :  { %23380 = vst [vmem:[#allocation200_spill] sm:$0xff] %v17324_v41  ;;  %23381 = vst [vmem:[#allocation201_spill] sm:$0xff] %v17326_v26  ;;  %v17350_v26 = vmul.f32 %v23359_v19, %v17066_v56  ;;  %v17370_v56 = vmul.f32 %v23359_v19, %v17086_v3  ;;  %v17390_v3 = vmul.f32 %v23359_v19, %v17106_v14  ;;  %v23472_v38 = vld [vmem:[#allocation152_spill] sm:$0xff]  ;;  %v23490_v50 = vld [vmem:[#allocation166_spill] sm:$0xff] }
 0x28b   :  { %23382 = vst [vmem:[#allocation202_spill] sm:$0xff] %v17330_v4  ;;  %23383 = vst [vmem:[#allocation203_spill] sm:$0xff] %v17338_v57  ;;  %v17412_v14 = vmul.f32 %v23359_v19, %v17130_v60  ;;  %v23406_v60 = vld [vmem:[#allocation168_spill] sm:$0xff]  ;;  %v23470_v57 = vld [vmem:[#allocation150_spill] sm:$0xff] }
 0x28c   :  { %23384 = vst [vmem:[#allocation204_spill] sm:$0xff] %v17346_v42  ;;  %23385 = vst [vmem:[#allocation205_spill] sm:$0xff] %v17354_v35  ;;  %v23468_v4 = vld [vmem:[#allocation148_spill] sm:$0xff]  ;;  %v23499_v35 = vld [vmem:[#allocation170_spill] sm:$0xff] }
 0x28d   :  { %23386 = vst [vmem:[#allocation206_spill] sm:$0xff] %v17358_v20  ;;  %23387 = vst [vmem:[#allocation207_spill] sm:$0xff] %v17362_v62  ;;  %v23486_v20 = vld [vmem:[#allocation164_spill] sm:$0xff]  ;;  %v23532_v41 = vld [vmem:[#allocation49_spill] sm:$0xff] }
 0x28e   :  { %23388 = vst [vmem:[#allocation208_spill] sm:$0xff] %v17370_v56  ;;  %23389 = vst [vmem:[#allocation209_spill] sm:$0xff] %v17374_v59  ;;  %v23495_v42 = vld [vmem:[#allocation168_spill] sm:$0xff]  ;;  %v23505_v56 = vld [vmem:[#allocation81_spill] sm:$0xff] }
 0x28f   :  { %23390 = vst [vmem:[#allocation210_spill] sm:$0xff] %v17378_v5  ;;  %23391 = vst [vmem:[#allocation211_spill] sm:$0xff] %v17382_v46  ;;  %v23507_v59 = vld [vmem:[#allocation83_spill] sm:$0xff]  ;;  %v23515_v46 = vld [vmem:[#allocation90_spill] sm:$0xff] }
 0x290   :  { %23392 = vst [vmem:[#allocation212_spill] sm:$0xff] %v17386_v61  ;;  %23393 = vst [vmem:[#allocation213_spill] sm:$0xff] %v17390_v3  ;;  %v17408_v61 = vpop.permute.xlu0 %7929  ;;  %v23536_v3 = vld [vmem:[#allocation51_spill] sm:$0xff]  ;;  %v23620_v62 = vld [vmem:[#allocation9_spill] sm:$0xff] }
 0x291   :  { %23394 = vst [vmem:[#allocation214_spill] sm:$0xff] %v17394_v25  ;;  %23395 = vst [vmem:[#allocation215_spill] sm:$0xff] %v17398_v52  ;;  %v23503_v25 = vld [vmem:[#allocation79_spill] sm:$0xff] }
 0x292   :  { %23396 = vst [vmem:[#allocation216_spill] sm:$0xff] %v17402_v55  ;;  %23397 = vst [vmem:[#allocation217_spill] sm:$0xff] %v17406_v40  ;;  %v23404_v40 = vld [vmem:[#allocation167_spill] sm:$0xff] }
 0x293   :  { %23398 = vst [vmem:[#allocation218_spill] sm:$0xff] %v17408_v61  ;;  %23399 = vst [vmem:[#allocation219_spill] sm:$0xff] %v17412_v14  ;;  %v17430_v61 = vmul.f32 %v23359_v19, %v23404_v40  ;;  %v17434_v14 = vmul.f32 %v23359_v19, %v23406_v60 }
 0x294   :  { %23400 = vst [vmem:[#allocation220_spill] sm:$0xff] %v17416_v32  ;;  %23401 = vst [vmem:[#allocation221_spill] sm:$0xff] %v17420_v22  ;;  %v17438_v32 = vmul.f32 %v23359_v19, %v23408_v34  ;;  %v17442_v22 = vmul.f32 %v23359_v19, %v23410_v51 }
 0x295   :  { %23402 = vst [vmem:[#allocation222_spill] sm:$0xff] %v17424_v30  ;;  %23403 = vst [vmem:[#allocation223_spill] sm:$0xff] %v17426_v48  ;;  %v17446_v30 = vmul.f32 %v23359_v19, %v23412_v10  ;;  %v23414_v48 = vld [vmem:[#allocation79_spill] sm:$0xff] }
 0x296   :  { %23405 = vst [vmem:[#allocation224_spill] sm:$0xff] %v17430_v61  ;;  %23407 = vst [vmem:[#allocation225_spill] sm:$0xff] %v17434_v14  ;;  %v17450_v40 = vmul.f32 %v23359_v19, %v23414_v48  ;;  %v23415_v61 = vld [vmem:[#allocation80_spill] sm:$0xff]  ;;  %v23417_v14 = vld [vmem:[#allocation81_spill] sm:$0xff] }
 0x297   :  { %23409 = vst [vmem:[#allocation226_spill] sm:$0xff] %v17438_v32  ;;  %23411 = vst [vmem:[#allocation227_spill] sm:$0xff] %v17442_v22  ;;  %v17454_v60 = vmul.f32 %v23359_v19, %v23415_v61  ;;  %v17458_v34 = vmul.f32 %v23359_v19, %v23417_v14  ;;  %v23419_v32 = vld [vmem:[#allocation82_spill] sm:$0xff]  ;;  %v23421_v22 = vld [vmem:[#allocation83_spill] sm:$0xff]  ;;  %v17474_v61 = vmul.f32 %v23359_v19, %v17190_v2 }
 0x298   :  { %23413 = vst [vmem:[#allocation228_spill] sm:$0xff] %v17446_v30  ;;  %v17462_v51 = vmul.f32 %v23359_v19, %v23419_v32  ;;  %v17466_v10 = vmul.f32 %v23359_v19, %v23421_v22  ;;  %v23423_v30 = vld [vmem:[#allocation84_spill] sm:$0xff]  ;;  %v17478_v14 = vmul.f32 %v23359_v19, %v17194_v53  ;;  %v17482_v32 = vmul.f32 %v23359_v19, %v17198_v43 }
 0x299   :  { %23416 = vst [vmem:[#allocation229_spill] sm:$0xff] %v17454_v60  ;;  %23418 = vst [vmem:[#allocation230_spill] sm:$0xff] %v17458_v34  ;;  %v17470_v48 = vmul.f32 %v23359_v19, %v23423_v30  ;;  %v17486_v22 = vmul.f32 %v23359_v19, %v17202_v49  ;;  %v17490_v30 = vmul.f32 %v23359_v19, %v17206_v6  ;;  %v23539_v60 = vld [vmem:[#allocation3_spill] sm:$0xff] }
 0x29a   :  { %23420 = vst [vmem:[#allocation231_spill] sm:$0xff] %v17462_v51  ;;  %23422 = vst [vmem:[#allocation232_spill] sm:$0xff] %v17466_v10  ;;  %v17494_v2 = vmul.f32 %v23359_v19, %v17212_v58  ;;  %v17502_v43 = vmul.f32 %v23359_v19, %v17220_v18  ;;  %v17506_v49 = vmul.f32 %v23359_v19, %v17224_v31  ;;  %v23439_v31 = vld [vmem:[#allocation92_spill] sm:$0xff] }
 0x29b   :  { %23424 = vst [vmem:[#allocation233_spill] sm:$0xff] %v17470_v48  ;;  %23425 = vst [vmem:[#allocation234_spill] sm:$0xff] %v17474_v61  ;;  %v23431_v61 = vld [vmem:[#allocation174_spill] sm:$0xff]  ;;  %v17512_v6 = vmul.f32 %v23359_v19, %v17230_v24  ;;  %v17516_v58 = vmul.f32 %v23359_v19, %v17234_v7  ;;  %v23450_v7 = vld [vmem:[#allocation109_spill] sm:$0xff] }
 0x29c   :  { %23426 = vst [vmem:[#allocation235_spill] sm:$0xff] %v17478_v14  ;;  %23427 = vst [vmem:[#allocation236_spill] sm:$0xff] %v17482_v32  ;;  %v17498_v53 = vmul.f32 %v23359_v19, %v23431_v61  ;;  %v23442_v19 = vld [vmem:[#allocation95_spill] sm:$0xff]  ;;  %v23527_v51 = vld [vmem:[#allocation180_spill] sm:$0xff] }
 0x29d   :  { %23428 = vst [vmem:[#allocation237_spill] sm:$0xff] %v17486_v22  ;;  %23429 = vst [vmem:[#allocation238_spill] sm:$0xff] %v17490_v30  ;;  %v17508_v22 = vpop.permute.xlu0 %7939  ;;  %v23451_v61 = vld [vmem:[#allocation111_spill] sm:$0xff]  ;;  %v23494_v55 = vld [vmem:[#allocation225_spill] sm:$0xff]  ;;  %v23528_v5 = vmax.f32 %v16954_v27, %v23527_v51 }
 0x29e   :  { %23430 = vst [vmem:[#allocation239_spill] sm:$0xff] %v17494_v2  ;;  %23432 = vst [vmem:[#allocation240_spill] sm:$0xff] %v17498_v53  ;;  %v23447_v53 = vld [vmem:[#allocation105_spill] sm:$0xff]  ;;  %v23529_v30 = vld [vmem:[#allocation47_spill] sm:$0xff] }
 0x29f   :  { %23433 = vst [vmem:[#allocation241_spill] sm:$0xff] %v17502_v43  ;;  %23434 = vst [vmem:[#allocation242_spill] sm:$0xff] %v17506_v49  ;;  %v17522_v43 = vpop.permute.xlu1 %7944  ;;  %v23446_v49 = vld [vmem:[#allocation103_spill] sm:$0xff]  ;;  %v1922_v52 = vmul.f32 %v23529_v30, %v23528_v5  ;;  %v23530_v2 = vld [vmem:[#allocation181_spill] sm:$0xff] }
 0x2a0   :  { %23435 = vst [vmem:[#allocation243_spill] sm:$0xff] %v17508_v22  ;;  %23436 = vst [vmem:[#allocation244_spill] sm:$0xff] %v17512_v6  ;;  %v23440_v22 = vld [vmem:[#allocation93_spill] sm:$0xff]  ;;  %v23448_v6 = vld [vmem:[#allocation107_spill] sm:$0xff]  ;;  %v23531_v48 = vmax.f32 %v16958_v33, %v23530_v2 }
 0x2a1   :  { %23437 = vst [vmem:[#allocation245_spill] sm:$0xff] %v17516_v58  ;;  %23438 = vst [vmem:[#allocation246_spill] sm:$0xff] %v17522_v43  ;;  %v23443_v58 = vld [vmem:[#allocation97_spill] sm:$0xff]  ;;  %v17564_v18 = vpop.permute.xlu0 %7949  ;;  %v23534_v14 = vld [vmem:[#allocation182_spill] sm:$0xff]  ;;  %9088 = vrot.lane.b32.xlu0 %v1922_v52, %s14820_s4 }
 0x2a2   :  { %v23445_v43 = vld [vmem:[#allocation101_spill] sm:$0xff]  ;;  %23460 = vst [vmem:[#allocation92_spill] sm:$0xff] %v17564_v18  ;;  %v1923_v10 = vmul.f32 %v23532_v41, %v23531_v48  ;;  %v23540_v27 = vld [vmem:[#allocation94_spill] sm:$0xff]  ;;  %v23541_v51 = vld [vmem:[#allocation184_spill] sm:$0xff] }
 0x2a3   :  { %v17574_v36 = vpop.permute.xlu1 %7954  ;;  %v23542_v5 = vmax.f32 %v23540_v27, %v23541_v51  ;;  %v23543_v30 = vld [vmem:[#allocation5_spill] sm:$0xff]  ;;  %v23546_v48 = vld [vmem:[#allocation6_spill] sm:$0xff]  ;;  %v23554_v51 = vld [vmem:[#allocation188_spill] sm:$0xff]  ;;  %2090 = vst [vmem:[#allocation2 + $0x18] sm:$0xff] %v1922_v52 }
 0x2a4   :  { %23464 = vst [vmem:[#allocation93_spill] sm:$0xff] %v17574_v36  ;;  %v23544_v33 = vld [vmem:[#allocation185_spill] sm:$0xff]  ;;  %2091 = vst [vmem:[#allocation2 + $0x20] sm:$0xff] %v1923_v10  ;;  %9090 = vrot.lane.b32.xlu1 %v1923_v10, %s14820_s4  ;;  %v23580_v52 = vld [vmem:[#allocation195_spill] sm:$0xff] }
 0x2a5   :  { %v17616_v24 = vpop.permute.xlu0 %7959  ;;  %v17686_v34 = vmul.f32 %v23543_v30, %v23542_v5  ;;  %v23545_v41 = vmax.f32 %v23442_v19, %v23544_v33  ;;  %v23555_v19 = vmax.f32 %v23445_v43, %v23554_v51  ;;  %v23556_v5 = vld [vmem:[#allocation14_spill] sm:$0xff]  ;;  %v23557_v33 = vld [vmem:[#allocation189_spill] sm:$0xff]  ;;  %v23563_v43 = vld [vmem:[#allocation191_spill] sm:$0xff] }
 0x2a6   :  { %23491 = vst [vmem:[#allocation95_spill] sm:$0xff] %v17616_v24  ;;  %v23537_v24 = vld [vmem:[#allocation183_spill] sm:$0xff]  ;;  %v23569_v10 = vld [vmem:[#allocation193_spill] sm:$0xff] }
 0x2a7   :  { %v17626_v54 = vpop.permute.xlu1 %7964  ;;  %v23538_v15 = vmax.f32 %v23440_v22, %v23537_v24  ;;  %v17692_v2 = vmul.f32 %v23546_v48, %v23545_v41  ;;  %v23550_v22 = vld [vmem:[#allocation10_spill] sm:$0xff]  ;;  %v17712_v30 = vmul.f32 %v23556_v5, %v23555_v19  ;;  %v23558_v41 = vmax.f32 %v23446_v49, %v23557_v33  ;;  %v23559_v48 = vld [vmem:[#allocation13_spill] sm:$0xff]  ;;  %v23566_v49 = vld [vmem:[#allocation192_spill] sm:$0xff]  ;;  %2094 = vst [vmem:[#allocation2 + $0x38] sm:$0xff] %v17686_v34 }
 0x2a8   :  { %23500 = vst [vmem:[#allocation97_spill] sm:$0xff] %v17626_v54  ;;  %v23535_v54 = vmax.f32 %v23439_v31, %v23534_v14  ;;  %v23553_v31 = vld [vmem:[#allocation8_spill] sm:$0xff]  ;;  %v23567_v51 = vmax.f32 %v23450_v7, %v23566_v49  ;;  %v23570_v33 = vmax.f32 %v23451_v61, %v23569_v10  ;;  %v23576_v61 = vmax.f32 %v23453_v9, %v17298_v11  ;;  %v23583_v11 = vld [vmem:[#allocation197_spill] sm:$0xff]  ;;  %v23585_v9 = vld [vmem:[#allocation26_spill] sm:$0xff] }
 0x2a9   :  { %v17672_v18 = vpop.permute.xlu0 %7969  ;;  %v1925_v36 = vmul.f32 %v23539_v60, %v23538_v15  ;;  %v23551_v15 = vld [vmem:[#allocation187_spill] sm:$0xff]  ;;  %v23568_v19 = vld [vmem:[#allocation20_spill] sm:$0xff]  ;;  %2095 = vst [vmem:[#allocation2 + $0x40] sm:$0xff] %v17692_v2  ;;  %2098 = vst [vmem:[#allocation2 + $0x58] sm:$0xff] %v17712_v30 }
 0x2aa   :  { %23533 = vst [vmem:[#allocation99_spill] sm:$0xff] %v17672_v18  ;;  %v1924_v32 = vmul.f32 %v23536_v3, %v23535_v54  ;;  %v23548_v54 = vld [vmem:[#allocation186_spill] sm:$0xff]  ;;  %v23552_v60 = vmax.f32 %v23444_v63, %v23551_v15  ;;  %v23564_v15 = vmax.f32 %v23448_v6, %v23563_v43  ;;  %v17737_v5 = vmul.f32 %v23568_v19, %v23567_v51  ;;  %v23582_v19 = vld [vmem:[#allocation23_spill] sm:$0xff] }
 0x2ab   :  { %v17694_v14 = vpop.permute.xlu1 %7974  ;;  %v23549_v3 = vmax.f32 %v23443_v58, %v23548_v54  ;;  %v17718_v58 = vmul.f32 %v23559_v48, %v23558_v41  ;;  %v23560_v63 = vld [vmem:[#allocation190_spill] sm:$0xff]  ;;  %v23571_v41 = vld [vmem:[#allocation19_spill] sm:$0xff]  ;;  %2093 = vst [vmem:[#allocation2 + $0x30] sm:$0xff] %v1925_v36  ;;  %v23581_v51 = vmax.f32 %v23455_v17, %v23580_v52  ;;  %12011 = vmatmul.mubr.f32.vlgmr.msra.gmra.mrb[0].mxu1 %v1925_v36 }
 0x2ac   :  { %23547 = vst [vmem:[#allocation101_spill] sm:$0xff] %v17694_v14  ;;  %v17706_v27 = vmul.f32 %v23553_v31, %v23552_v60  ;;  %v23561_v54 = vmax.f32 %v23447_v53, %v23560_v63  ;;  %v23565_v60 = vld [vmem:[#allocation17_spill] sm:$0xff]  ;;  %v17743_v53 = vmul.f32 %v23571_v41, %v23570_v33  ;;  %2092 = vst [vmem:[#allocation2 + $0x28] sm:$0xff] %v1924_v32  ;;  %v23572_v6 = vld [vmem:[#allocation114_spill] sm:$0xff]  ;;  %9094 = vrot.lane.b32.xlu1 %v1925_v36, %s14820_s4  ;;  %v23608_v36 = vmov 0.0|0.0  }
 0x2ad   :  { %v17700_v24 = vmul.f32 %v23550_v22, %v23549_v3  ;;  %v23562_v3 = vld [vmem:[#allocation18_spill] sm:$0xff]  ;;  %v17731_v31 = vmul.f32 %v23565_v60, %v23564_v15  ;;  %v23578_v15 = vmax.f32 %v23454_v21, %v17302_v12  ;;  %v23579_v60 = vld [vmem:[#allocation24_spill] sm:$0xff]  ;;  %v17770_v10 = vmul.f32 %v23582_v19, %v23581_v51  ;;  %2099 = vst [vmem:[#allocation2 + $0x60] sm:$0xff] %v17718_v58  ;;  %v23589_v41 = vld [vmem:[#allocation25_spill] sm:$0xff] }
 0x2ae   :  { %v17725_v22 = vmul.f32 %v23562_v3, %v23561_v54  ;;  %v23573_v48 = vld [vmem:[#allocation194_spill] sm:$0xff]  ;;  %v23577_v3 = vld [vmem:[#allocation21_spill] sm:$0xff]  ;;  %2097 = vst [vmem:[#allocation2 + $0x50] sm:$0xff] %v17706_v27  ;;  %v23584_v12 = vmax.f32 %v23456_v28, %v23583_v11  ;;  %2102 = vst [vmem:[#allocation2 + $0x78] sm:$0xff] %v17737_v5  ;;  %9092 = vrot.lane.b32.xlu0 %v1924_v32, %s14820_s4 }
 0x2af   :  { %v23574_v7 = vmax.f32 %v23572_v6, %v23573_v48  ;;  %v23575_v63 = vld [vmem:[#allocation22_spill] sm:$0xff]  ;;  %v17758_v43 = vmul.f32 %v23577_v3, %v23576_v61  ;;  %v17764_v49 = vmul.f32 %v23579_v60, %v23578_v15  ;;  %2096 = vst [vmem:[#allocation2 + $0x48] sm:$0xff] %v17700_v24  ;;  %v23591_v48 = vld [vmem:[#allocation199_spill] sm:$0xff]  ;;  %v23595_v3 = vld [vmem:[#allocation200_spill] sm:$0xff] }
 0x2b0   :  { %v17780_v21 = vmul.f32 %v23585_v9, %v23584_v12  ;;  %v23587_v17 = vld [vmem:[#allocation198_spill] sm:$0xff]  ;;  %v23596_v15 = vmax.f32 %v23459_v8, %v23595_v3  ;;  %2100 = vst [vmem:[#allocation2 + $0x68] sm:$0xff] %v17725_v22  ;;  %2101 = vst [vmem:[#allocation2 + $0x70] sm:$0xff] %v17731_v31  ;;  %v23600_v52 = vld [vmem:[#allocation119_spill] sm:$0xff]  ;;  %9098 = vrot.lane.b32.xlu1 %v17692_v2, %s14820_s4 }
 0x2b1   :  { %v17752_v54 = vmul.f32 %v23575_v63, %v23574_v7  ;;  %v23588_v33 = vmax.f32 %v23457_v39, %v23587_v17  ;;  %v23592_v7 = vmax.f32 %v23458_v1, %v23591_v48  ;;  %v23593_v63 = vld [vmem:[#allocation28_spill] sm:$0xff]  ;;  %v23597_v60 = vld [vmem:[#allocation30_spill] sm:$0xff]  ;;  %2103 = vst [vmem:[#allocation2 + $0x80] sm:$0xff] %v17743_v53  ;;  %2105 = vst [vmem:[#allocation2 + $0x90] sm:$0xff] %v17758_v43 }
 0x2b2   :  { %23586 = vst [vmem:[#allocation103_spill] sm:$0xff] %v17780_v21  ;;  %v17798_v28 = vmul.f32 %v23597_v60, %v23596_v15  ;;  %v23599_v39 = vld [vmem:[#allocation120_spill] sm:$0xff]  ;;  %2106 = vst [vmem:[#allocation2 + $0x98] sm:$0xff] %v17764_v49  ;;  %v23603_v51 = vld [vmem:[#allocation62_spill] sm:$0xff]  ;;  %9096 = vrot.lane.b32.xlu0 %v17686_v34, %s14820_s4 }
 0x2b3   :  { %v17786_v6 = vmul.f32 %v23589_v41, %v23588_v33  ;;  %v17792_v61 = vmul.f32 %v23593_v63, %v23592_v7  ;;  %v23601_v1 = vpack.c.bf16 %v23599_v39, %v23600_v52  ;;  %2104 = vst [vmem:[#allocation2 + $0x88] sm:$0xff] %v17752_v54  ;;  %2107 = vst [vmem:[#allocation2 + $0xa0] sm:$0xff] %v17770_v10  ;;  %v23602_v8 = vld [vmem:[#allocation112_spill] sm:$0xff]  ;;  %v23605_v12 = vld [vmem:[#allocation66_spill] sm:$0xff]  ;;  %v17820_v41 = vpop.permute.xlu0 %7979  ;;  %v17834_v39 = vpop.permute.xlu1 %7984 }
 0x2b4   :  { %23598 = vst [vmem:[#allocation109_spill] sm:$0xff] %v17798_v28  ;;  %12013 = vmatprep.mubr.msk.f32.mxu1 %vm14817_vm0, %v23602_v8  ;;  %v23604_v19 = vld [vmem:[#allocation124_spill] sm:$0xff]  ;;  %v23606_v17 = vld [vmem:[#allocation70_spill] sm:$0xff]  ;;  %23607 = vst [vmem:[#allocation111_spill] sm:$0xff] %v17820_v41  ;;  %9102 = vrot.lane.b32.xlu1 %v17706_v27, %s14820_s4 }
 0x2b5   :  { %23590 = vst [vmem:[#allocation105_spill] sm:$0xff] %v17786_v6  ;;  %23594 = vst [vmem:[#allocation107_spill] sm:$0xff] %v17792_v61  ;;  %13472 = vmatpush3.bf16.msra.mxu1 %v23601_v1  ;;  %v1120_v11 = vmul.f32 %v23604_v19, %v23603_v51  ;;  %v1122_v9 = vmul.f32 %v23604_v19, %v23605_v12  ;;  %v1124_v33 = vmul.f32 %v23604_v19, %v23606_v17  ;;  %v23609_v48 = vld [vmem:[#allocation68_spill] sm:$0xff]  ;;  %v23610_v63 = vld [vmem:[#allocation15_spill] sm:$0xff] }
 0x2b6   :  { %2108 = vst [vmem:[#allocation2 + $0xa8] sm:$0xff] %v17780_v21  ;;  %2109 = vst [vmem:[#allocation2 + $0xb0] sm:$0xff] %v17786_v6  ;;  %13473 = vmatprep.subr.bf16.mxu1 %v23608_v36  ;;  %v1123_v7 = vmul.f32 %v23604_v19, %v23609_v48  ;;  %v1126_v3 = vmul.f32 %v23604_v19, %v23610_v63  ;;  %v23611_v15 = vld [vmem:[#allocation11_spill] sm:$0xff]  ;;  %12014 = vmatmul.mubr.f32.gmra.mrb[2].mxu1 %v17686_v34  ;;  %v23613_v52 = vld [vmem:[#allocation126_spill] sm:$0xff] }
 0x2b7   :  { %2110 = vst [vmem:[#allocation2 + $0xb8] sm:$0xff] %v17792_v61  ;;  %2112 = vst [vmem:[#allocation2 + $0xc8] sm:$0xff] %v17798_v28  ;;  %v1125_v60 = vmul.f32 %v23604_v19, %v23611_v15  ;;  %v1207_v1 = vadd.f32 %v23613_v52, %v1120_v11  ;;  %v1209_v51 = vadd.f32 %v23613_v52, %v1122_v9  ;;  %v23614_v12 = vld [vmem:[#allocation74_spill] sm:$0xff]  ;;  %12016 = vmatprep.mubr.msk.f32.mxu1 %vm14817_vm0, %v23602_v8  ;;  %v23616_v41 = vld [vmem:[#allocation121_spill] sm:$0xff]  ;;  %v17864_v28 = vpop.permute.xlu0 %7989  ;;  %v17870_v0 = vpop.permute.xlu1 %7994 }
 0x2b8   :  { %23612 = vst [vmem:[#allocation115_spill] sm:$0xff] %v17834_v39  ;;  %v1211_v32 = vadd.f32 %v23613_v52, %v1124_v33  ;;  %v1128_v17 = vmul.f32 %v23604_v19, %v23614_v12  ;;  %v2270_v48 = vld [vmem:[#allocation2 + $0x16] sm:$0xff]  ;;  %v1210_v39 = vadd.f32 %v23613_v52, %v1123_v7  ;;  %v1213_v14 = vadd.f32 %v23613_v52, %v1126_v3  ;;  %v2271_v61 = vld [vmem:[#allocation2 + $0x1e] sm:$0xff] }
 0x2b9   :  { %v23615_v63 = vld [vmem:[#allocation122_spill] sm:$0xff]  ;;  %v1212_v11 = vadd.f32 %v23613_v52, %v1125_v60  ;;  %10908 = vmatmul.mubr.f32.gmra.mrb[166].mxu0 %v2270_v48  ;;  %v23618_v9 = vld [vmem:[#allocation127_spill] sm:$0xff]  ;;  %23619 = vst [vmem:[#allocation134_spill] sm:$0xff] %v17864_v28  ;;  %v1127_v16 = vmul.f32 %v23604_v19, %v23620_v62  ;;  %23621 = vst [vmem:[#allocation135_spill] sm:$0xff] %v17870_v0  ;;  %9100 = vrot.lane.b32.xlu0 %v17700_v24, %s14820_s4 }
 0x2ba   :  { %v23617_v15 = vpack.c.bf16 %v23615_v63, %v23616_v41  ;;  %v1295_v33 = vmul.f32 %v23618_v9, %v1207_v1  ;;  %v1297_v12 = vmul.f32 %v23618_v9, %v1209_v51  ;;  %v1299_v18 = vmul.f32 %v23618_v9, %v1211_v32  ;;  %10910 = vmatprep.mubr.msk.f32.mxu0 %vm14817_vm0, %v23602_v8  ;;  %v23625_v62 = vld [vmem:[#allocation32_spill] sm:$0xff]  ;;  %v23715_v28 = vld [vmem:[#allocation61_spill] sm:$0xff] }
 0x2bb   :  { %v1298_v41 = vmul.f32 %v23618_v9, %v1210_v39  ;;  %v1301_v7 = vmul.f32 %v23618_v9, %v1213_v14  ;;  %v1300_v3 = vmul.f32 %v23618_v9, %v1212_v11  ;;  %12017 = vmatmul.mubr.f32.gmra.mrb[4].mxu1 %v17692_v2  ;;  %9106 = vrot.lane.b32.xlu1 %v17718_v58, %s14820_s4  ;;  %v2275_v0 = vld [vmem:[#allocation2 + $0x3e] sm:$0xff] }
 0x2bc   :  { %13475 = vmatpush3.bf16.msra.mxu1 %v23617_v15  ;;  %v1376_v60 = vmax.f32 %v1207_v1, %v1295_v33  ;;  %v1378_v48 = vmax.f32 %v1209_v51, %v1297_v12  ;;  %v1380_v63 = vmax.f32 %v1211_v32, %v1299_v18  ;;  %v1215_v15 = vadd.f32 %v23613_v52, %v1128_v17  ;;  %v23622_v18 = vld [vmem:[#allocation27_spill] sm:$0xff]  ;;  %v23623_v1 = vld [vmem:[#allocation29_spill] sm:$0xff] }
 0x2bd   :  { %12019 = vmatprep.mubr.msk.f32.mxu1 %vm14817_vm0, %v23602_v8  ;;  %v1379_v34 = vmax.f32 %v1210_v39, %v1298_v41  ;;  %v1382_v21 = vmax.f32 %v1213_v14, %v1301_v7  ;;  %v1381_v6 = vmax.f32 %v1212_v11, %v1300_v3  ;;  %10911 = vmatmul.mubr.f32.gmra.mrb[168].mxu0 %v2271_v61  ;;  %v23624_v32 = vld [vmem:[#allocation31_spill] sm:$0xff]  ;;  %v23626_v39 = vld [vmem:[#allocation33_spill] sm:$0xff]  ;;  %v23627_v11 = vld [vmem:[#allocation34_spill] sm:$0xff] }
 0x2be   :  { %v17875_v2 = vmul.f32 %v23622_v18, %v1376_v60  ;;  %v17878_v51 = vmul.f32 %v23623_v1, %v1378_v48  ;;  %v17881_v17 = vmul.f32 %v23624_v32, %v1380_v63  ;;  %10913 = vmatprep.mubr.msk.f32.mxu0 %vm14817_vm0, %v23602_v8  ;;  %v1303_v12 = vmul.f32 %v23618_v9, %v1215_v15  ;;  %v23628_v7 = vld [vmem:[#allocation76_spill] sm:$0xff]  ;;  %v23633_v18 = vld [vmem:[#allocation41_spill] sm:$0xff] }
 0x2bf   :  { %v17888_v14 = vmul.f32 %v23625_v62, %v1379_v34  ;;  %v17891_v61 = vmul.f32 %v23626_v39, %v1382_v21  ;;  %v17894_v33 = vmul.f32 %v23627_v11, %v1381_v6  ;;  %12020 = vmatmul.mubr.f32.gmra.mrb[6].mxu1 %v17700_v24  ;;  %v1214_v41 = vadd.f32 %v23613_v52, %v1127_v16  ;;  %v23629_v21 = vld [vmem:[#allocation16_spill] sm:$0xff]  ;;  %v23630_v24 = vld [vmem:[#allocation78_spill] sm:$0xff]  ;;  %v23631_v16 = vld [vmem:[#allocation77_spill] sm:$0xff] }
 0x2c0   :  { %2111 = vst [vmem:[#allocation2 + $0xc0] sm:$0xff] %v17875_v2  ;;  %2113 = vst [vmem:[#allocation2 + $0xd0] sm:$0xff] %v17878_v51  ;;  %v1130_v3 = vmul.f32 %v23604_v19, %v23628_v7  ;;  %v1129_v60 = vmul.f32 %v23604_v19, %v23629_v21  ;;  %v2272_v6 = vld [vmem:[#allocation2 + $0x26] sm:$0xff]  ;;  %12022 = vmatprep.mubr.msk.f32.mxu1 %vm14817_vm0, %v23602_v8  ;;  %v1132_v48 = vmul.f32 %v23604_v19, %v23630_v24  ;;  %v23635_v62 = vld [vmem:[#allocation202_spill] sm:$0xff] }
 0x2c1   :  { %2115 = vst [vmem:[#allocation2 + $0xe0] sm:$0xff] %v17881_v17  ;;  %2114 = vst [vmem:[#allocation2 + $0xd8] sm:$0xff] %v17888_v14  ;;  %v1131_v63 = vmul.f32 %v23604_v19, %v23631_v16  ;;  %v23632_v34 = vmax.f32 %v23461_v45, %v17334_v37  ;;  %v23634_v32 = vld [vmem:[#allocation141_spill] sm:$0xff]  ;;  %v23637_v11 = vld [vmem:[#allocation42_spill] sm:$0xff]  ;;  %10914 = vmatmul.mubr.f32.gmra.mrb[170].mxu0 %v2272_v6  ;;  %v1384_v21 = vmax.f32 %v1215_v15, %v1303_v12  ;;  %v17931_v16 = vpop.permute.xlu0 %7999  ;;  %v17942_v15 = vpop.permute.xlu1 %8004 }
 0x2c2   :  { %2117 = vst [vmem:[#allocation2 + $0xf0] sm:$0xff] %v17891_v61  ;;  %2116 = vst [vmem:[#allocation2 + $0xe8] sm:$0xff] %v17894_v33  ;;  %v23636_v39 = vmax.f32 %v23634_v32, %v23635_v62  ;;  %v1302_v24 = vmul.f32 %v23618_v9, %v1214_v41  ;;  %v1217_v19 = vadd.f32 %v23613_v52, %v1130_v3  ;;  %9104 = vrot.lane.b32.xlu0 %v17712_v30, %s14820_s4  ;;  %v23640_v12 = vld [vmem:[#allocation35_spill] sm:$0xff] }
 0x2c3   :  { %v17919_v1 = vmul.f32 %v23633_v18, %v23632_v34  ;;  %23638 = vst [vmem:[#allocation137_spill] sm:$0xff] %v17931_v16  ;;  %10916 = vmatprep.mubr.msk.f32.mxu0 %vm14817_vm0, %v23602_v8  ;;  %v1216_v37 = vadd.f32 %v23613_v52, %v1129_v60  ;;  %v1219_v45 = vadd.f32 %v23613_v52, %v1132_v48  ;;  %23639 = vst [vmem:[#allocation138_spill] sm:$0xff] %v17942_v15  ;;  %v23642_v48 = vld [vmem:[#allocation43_spill] sm:$0xff] }
 0x2c4   :  { %v17925_v7 = vmul.f32 %v23637_v11, %v23636_v39  ;;  %v1218_v34 = vadd.f32 %v23613_v52, %v1131_v63  ;;  %12023 = vmatmul.mubr.f32.gmra.mrb[8].mxu1 %v17706_v27  ;;  %v17946_v3 = vmul.f32 %v23640_v12, %v1384_v21  ;;  %v1383_v6 = vmax.f32 %v1214_v41, %v1302_v24  ;;  %v2273_v52 = vld [vmem:[#allocation2 + $0x2e] sm:$0xff]  ;;  %v23643_v39 = vld [vmem:[#allocation143_spill] sm:$0xff]  ;;  %v23646_v21 = vld [vmem:[#allocation44_spill] sm:$0xff] }
 0x2c5   :  { %2125 = vst [vmem:[#allocation2 + $0x130] sm:$0xff] %v17919_v1  ;;  %v1305_v18 = vmul.f32 %v23618_v9, %v1217_v19  ;;  %v23641_v60 = vmax.f32 %v23463_v23, %v17342_v47  ;;  %12025 = vmatprep.mubr.msk.f32.mxu1 %vm14817_vm0, %v23602_v8  ;;  %v1304_v63 = vmul.f32 %v23618_v9, %v1216_v37  ;;  %v23644_v41 = vld [vmem:[#allocation203_spill] sm:$0xff]  ;;  %v23647_v23 = vld [vmem:[#allocation36_spill] sm:$0xff]  ;;  %v23649_v12 = vld [vmem:[#allocation45_spill] sm:$0xff] }
 0x2c6   :  { %2124 = vst [vmem:[#allocation2 + $0x128] sm:$0xff] %v17925_v7  ;;  %v1307_v27 = vmul.f32 %v23618_v9, %v1219_v45  ;;  %v1306_v62 = vmul.f32 %v23618_v9, %v1218_v34  ;;  %v23645_v11 = vmax.f32 %v23643_v39, %v23644_v41  ;;  %9110 = vrot.lane.b32.xlu1 %v17731_v31, %s14820_s4  ;;  %2119 = vst [vmem:[#allocation2 + $0x100] sm:$0xff] %v17946_v3  ;;  %v2274_v15 = vld [vmem:[#allocation2 + $0x36] sm:$0xff] }
 0x2c7   :  { %v17953_v32 = vmul.f32 %v23642_v48, %v23641_v60  ;;  %10917 = vmatmul.mubr.f32.gmra.mrb[172].mxu0 %v2273_v52  ;;  %v17970_v47 = vmul.f32 %v23647_v23, %v1383_v6  ;;  %v1386_v8 = vmax.f32 %v1217_v19, %v1305_v18  ;;  %v23648_v9 = vmax.f32 %v23466_v13, %v17350_v26  ;;  %v17981_v48 = vld [vmem:[#allocation2] sm:$0xff]  ;;  %v5335_v26 = vld [vmem:[%s22737_s6 + $0x2a8] sm:$0xff] }
 0x2c8   :  { %v17964_v24 = vmul.f32 %v23646_v21, %v23645_v11  ;;  %9108 = vrot.lane.b32.xlu0 %v17725_v22, %s14820_s4  ;;  %10919 = vmatprep.mubr.msk.f32.mxu0 %vm14817_vm0, %v17981_v48  ;;  %v1385_v52 = vmax.f32 %v1216_v37, %v1304_v63  ;;  %v1388_v6 = vmax.f32 %v1219_v45, %v1307_v27  ;;  %v5334_v13 = vld [vmem:[%s22737_s6 + $0x2a0] sm:$0xff]  ;;  %v23650_v19 = vld [vmem:[#allocation37_spill] sm:$0xff]  ;;  %v23654_v63 = vld [vmem:[#allocation46_spill] sm:$0xff] }
 0x2c9   :  { %2127 = vst [vmem:[#allocation2 + $0x140] sm:$0xff] %v17953_v32  ;;  %v17977_v60 = vmul.f32 %v23649_v12, %v23648_v9  ;;  %v1387_v39 = vmax.f32 %v1218_v34, %v1306_v62  ;;  %12026 = vmatmul.mubr.f32.gmra.mrb[10].mxu1 %v17712_v30  ;;  %2118 = vst [vmem:[#allocation2 + $0xf8] sm:$0xff] %v17970_v47  ;;  %v17995_v18 = vmul.f32 %v23650_v19, %v1386_v8  ;;  %v23651_v37 = vld [vmem:[#allocation145_spill] sm:$0xff]  ;;  %v23652_v45 = vld [vmem:[#allocation204_spill] sm:$0xff]  ;;  %v18016_v19 = vpop.permute.xlu0 %8009 }
 0x2ca   :  { %2126 = vst [vmem:[#allocation2 + $0x138] sm:$0xff] %v17964_v24  ;;  %v23653_v34 = vmax.f32 %v23651_v37, %v23652_v45  ;;  %v23655_v62 = vld [vmem:[#allocation206_spill] sm:$0xff]  ;;  %v23658_v30 = vld [vmem:[#allocation147_spill] sm:$0xff]  ;;  %v23659_v23 = vld [vmem:[#allocation205_spill] sm:$0xff]  ;;  %12028 = vmatprep.mubr.msk.f32.mxu1 %vm14817_vm0, %v17981_v48  ;;  %9114 = vrot.lane.b32.xlu1 %v17743_v53, %s14820_s4 }
 0x2cb   :  { %2129 = vst [vmem:[#allocation2 + $0x150] sm:$0xff] %v17977_v60  ;;  %v23656_v41 = vmax.f32 %v23468_v4, %v23655_v62  ;;  %v23657_v11 = vld [vmem:[#allocation50_spill] sm:$0xff]  ;;  %v23660_v9 = vmax.f32 %v23658_v30, %v23659_v23  ;;  %v23661_v12 = vld [vmem:[#allocation48_spill] sm:$0xff]  ;;  %23662 = vst [vmem:[#allocation139_spill] sm:$0xff] %v18016_v19  ;;  %v18035_v23 = vpop.permute.xlu1 %8014  ;;  %10920 = vmatmul.mubr.f32.gmra.mrb[174].mxu0 %v2274_v15  ;;  %13476 = vmatprep.subr.bf16.mxu1 %v23608_v36 }
 0x2cc   :  { %v18002_v27 = vmul.f32 %v23654_v63, %v23653_v34  ;;  %v23663_v37 = vld [vmem:[#allocation38_spill] sm:$0xff]  ;;  %v23664_v34 = vld [vmem:[#allocation39_spill] sm:$0xff]  ;;  %v23665_v63 = vld [vmem:[#allocation40_spill] sm:$0xff]  ;;  %23668 = vst [vmem:[#allocation140_spill] sm:$0xff] %v18035_v23  ;;  %9112 = vrot.lane.b32.xlu0 %v17737_v5, %s14820_s4  ;;  %10922 = vmatprep.mubr.msk.f32.mxu0 %vm14817_vm0, %v17981_v48 }
 0x2cd   :  { %v18008_v21 = vmul.f32 %v23657_v11, %v23656_v41  ;;  %v18014_v8 = vmul.f32 %v23661_v12, %v23660_v9  ;;  %v18021_v45 = vmul.f32 %v23663_v37, %v1385_v52  ;;  %v18024_v4 = vmul.f32 %v23664_v34, %v1388_v6  ;;  %v23667_v11 = vld [vmem:[#allocation54_spill] sm:$0xff]  ;;  %2121 = vst [vmem:[#allocation2 + $0x110] sm:$0xff] %v17995_v18  ;;  %v23669_v52 = vld [vmem:[#allocation149_spill] sm:$0xff]  ;;  %v23670_v6 = vld [vmem:[#allocation207_spill] sm:$0xff] }
 0x2ce   :  { %v18027_v62 = vmul.f32 %v23665_v63, %v1387_v39  ;;  %v23666_v41 = vmax.f32 %v23470_v57, %v17366_v44  ;;  %2128 = vst [vmem:[#allocation2 + $0x148] sm:$0xff] %v18002_v27  ;;  %v23671_v57 = vmax.f32 %v23669_v52, %v23670_v6  ;;  %v23672_v44 = vld [vmem:[#allocation52_spill] sm:$0xff]  ;;  %v13477_v9 = vpack.c.bf16 %v5335_v26, %v5334_v13  ;;  %v23673_v12 = vld [vmem:[#allocation209_spill] sm:$0xff]  ;;  %v23676_v13 = vld [vmem:[#allocation151_spill] sm:$0xff] }
 0x2cf   :  { %2131 = vst [vmem:[#allocation2 + $0x160] sm:$0xff] %v18008_v21  ;;  %2130 = vst [vmem:[#allocation2 + $0x158] sm:$0xff] %v18014_v8  ;;  %v23674_v37 = vmax.f32 %v23472_v38, %v23673_v12  ;;  %v23675_v34 = vld [vmem:[#allocation56_spill] sm:$0xff]  ;;  %v23679_v63 = vld [vmem:[#allocation53_spill] sm:$0xff]  ;;  %12029 = vmatmul.mubr.f32.gmra.mrb[12].mxu1 %v17718_v58  ;;  %9118 = vrot.lane.b32.xlu1 %v17758_v43, %s14820_s4 }
 0x2d0   :  { %v18033_v30 = vmul.f32 %v23667_v11, %v23666_v41  ;;  %v18047_v39 = vmul.f32 %v23672_v44, %v23671_v57  ;;  %2120 = vst [vmem:[#allocation2 + $0x108] sm:$0xff] %v18021_v45  ;;  %2123 = vst [vmem:[#allocation2 + $0x120] sm:$0xff] %v18024_v4  ;;  %v23677_v26 = vld [vmem:[#allocation208_spill] sm:$0xff]  ;;  %v23681_v11 = vld [vmem:[#allocation154_spill] sm:$0xff]  ;;  %12031 = vmatprep.mubr.msk.f32.mxu1 %vm14817_vm0, %v17981_v48  ;;  %13478 = vmatpush3.bf16.msra.mxu1 %v13477_v9 }
 0x2d1   :  { %v18053_v15 = vmul.f32 %v23675_v34, %v23674_v37  ;;  %2122 = vst [vmem:[#allocation2 + $0x118] sm:$0xff] %v18027_v62  ;;  %v23678_v38 = vmax.f32 %v23676_v13, %v23677_v26  ;;  %v23682_v52 = vld [vmem:[#allocation211_spill] sm:$0xff]  ;;  %v23684_v57 = vld [vmem:[#allocation58_spill] sm:$0xff]  ;;  %v23685_v12 = vld [vmem:[#allocation153_spill] sm:$0xff]  ;;  %10923 = vmatmul.mubr.f32.gmra.mrb[176].mxu0 %v2275_v0  ;;  %9116 = vrot.lane.b32.xlu0 %v17752_v54, %s14820_s4 }
 0x2d2   :  { %2133 = vst [vmem:[#allocation2 + $0x170] sm:$0xff] %v18033_v30  ;;  %v23683_v6 = vmax.f32 %v23681_v11, %v23682_v52  ;;  %v23686_v37 = vld [vmem:[#allocation210_spill] sm:$0xff]  ;;  %v23688_v23 = vld [vmem:[#allocation55_spill] sm:$0xff]  ;;  %2132 = vst [vmem:[#allocation2 + $0x168] sm:$0xff] %v18047_v39  ;;  %10925 = vmatprep.mubr.msk.f32.mxu0 %vm14817_vm0, %v17981_v48  ;;  %13479 = vmatprep.subr.bf16.mxu1 %v23608_v36 }
 0x2d3   :  { %v18067_v41 = vmul.f32 %v23679_v63, %v23678_v38  ;;  %v23687_v34 = vmax.f32 %v23685_v12, %v23686_v37  ;;  %2135 = vst [vmem:[#allocation2 + $0x180] sm:$0xff] %v18053_v15  ;;  %v23689_v13 = vld [vmem:[#allocation156_spill] sm:$0xff]  ;;  %v23690_v26 = vld [vmem:[#allocation213_spill] sm:$0xff]  ;;  %v23693_v52 = vld [vmem:[#allocation155_spill] sm:$0xff]  ;;  %12032 = vmatmul.mubr.f32.gmra.mrb[14].mxu1 %v17725_v22  ;;  %v23749_v22 = vmax.f32 %v23503_v25, %v17450_v40 }
 0x2d4   :  { %v18073_v44 = vmul.f32 %v23684_v57, %v23683_v6  ;;  %v23691_v38 = vmax.f32 %v23689_v13, %v23690_v26  ;;  %v23692_v63 = vld [vmem:[#allocation60_spill] sm:$0xff]  ;;  %v23696_v12 = vld [vmem:[#allocation57_spill] sm:$0xff]  ;;  %v23698_v58 = vld [vmem:[#allocation215_spill] sm:$0xff]  ;;  %12034 = vmatprep.mubr.msk.f32.mxu1 %vm14817_vm0, %v17981_v48  ;;  %9122 = vrot.lane.b32.xlu1 %v17770_v10, %s14820_s4 }
 0x2d5   :  { %23680 = vst [vmem:[#allocation142_spill] sm:$0xff] %v18067_v41  ;;  %v18079_v19 = vmul.f32 %v23688_v23, %v23687_v34  ;;  %v23694_v6 = vld [vmem:[#allocation212_spill] sm:$0xff]  ;;  %v23699_v37 = vmax.f32 %v23479_v29, %v23698_v58  ;;  %v23700_v34 = vld [vmem:[#allocation63_spill] sm:$0xff]  ;;  %2134 = vst [vmem:[#allocation2 + $0x178] sm:$0xff] %v18067_v41  ;;  %9120 = vrot.lane.b32.xlu0 %v17764_v49, %s14820_s4 }
 0x2d6   :  { %v18089_v11 = vmul.f32 %v23692_v63, %v23691_v38  ;;  %v23695_v57 = vmax.f32 %v23693_v52, %v23694_v6  ;;  %2137 = vst [vmem:[#allocation2 + $0x190] sm:$0xff] %v18073_v44  ;;  %v23702_v13 = vld [vmem:[#allocation158_spill] sm:$0xff]  ;;  %v23705_v63 = vld [vmem:[#allocation59_spill] sm:$0xff]  ;;  %v23707_v29 = vld [vmem:[#allocation161_spill] sm:$0xff] }
 0x2d7   :  { %v18101_v16 = vmul.f32 %v23700_v34, %v23699_v37  ;;  %2136 = vst [vmem:[#allocation2 + $0x188] sm:$0xff] %v18079_v19  ;;  %v23703_v26 = vld [vmem:[#allocation214_spill] sm:$0xff]  ;;  %v23708_v6 = vld [vmem:[#allocation217_spill] sm:$0xff]  ;;  %v23712_v37 = vld [vmem:[#allocation160_spill] sm:$0xff]  ;;  %12035 = vmatmul.mubr.f32.gmra.mrb[16].mxu1 %v17731_v31 }
 0x2d8   :  { %v18095_v23 = vmul.f32 %v23696_v12, %v23695_v57  ;;  %v23704_v38 = vmax.f32 %v23702_v13, %v23703_v26  ;;  %v23709_v57 = vmax.f32 %v23707_v29, %v23708_v6  ;;  %v23710_v12 = vld [vmem:[#allocation65_spill] sm:$0xff]  ;;  %v23713_v9 = vld [vmem:[#allocation216_spill] sm:$0xff]  ;;  %2139 = vst [vmem:[#allocation2 + $0x1a0] sm:$0xff] %v18089_v11  ;;  %v23719_v29 = vld [vmem:[#allocation163_spill] sm:$0xff]  ;;  %12037 = vmatprep.mubr.msk.f32.mxu1 %vm14817_vm0, %v17981_v48 }
 0x2d9   :  { %23701 = vst [vmem:[#allocation146_spill] sm:$0xff] %v18101_v16  ;;  %v23714_v34 = vmax.f32 %v23712_v37, %v23713_v9  ;;  %2141 = vst [vmem:[#allocation2 + $0x1b0] sm:$0xff] %v18101_v16  ;;  %v23716_v13 = vld [vmem:[#allocation220_spill] sm:$0xff]  ;;  %v23720_v6 = vld [vmem:[#allocation219_spill] sm:$0xff] }
 0x2da   :  { %23697 = vst [vmem:[#allocation144_spill] sm:$0xff] %v18095_v23  ;;  %v18112_v52 = vmul.f32 %v23705_v63, %v23704_v38  ;;  %v18118_v58 = vmul.f32 %v23710_v12, %v23709_v57  ;;  %2138 = vst [vmem:[#allocation2 + $0x198] sm:$0xff] %v18095_v23  ;;  %v23717_v26 = vmax.f32 %v23486_v20, %v23716_v13  ;;  %v23718_v38 = vld [vmem:[#allocation69_spill] sm:$0xff]  ;;  %v23722_v57 = vld [vmem:[#allocation64_spill] sm:$0xff]  ;;  %v18155_v13 = vpop.permute.xlu0 %8019 }
 0x2db   :  { %v18124_v41 = vmul.f32 %v23715_v28, %v23714_v34  ;;  %v23721_v28 = vmax.f32 %v23719_v29, %v23720_v6  ;;  %v23723_v0 = vld [vmem:[#allocation222_spill] sm:$0xff]  ;;  %v23725_v9 = vld [vmem:[#allocation4_spill] sm:$0xff]  ;;  %v5337_v20 = vld [vmem:[%s22737_s6 + $0x2b8] sm:$0xff]  ;;  %23726 = vst [vmem:[#allocation152_spill] sm:$0xff] %v18155_v13  ;;  %12038 = vmatmul.mubr.f32.gmra.mrb[18].mxu1 %v17737_v5 }
 0x2dc   :  { %23706 = vst [vmem:[#allocation148_spill] sm:$0xff] %v18112_v52  ;;  %23711 = vst [vmem:[#allocation150_spill] sm:$0xff] %v18118_v58  ;;  %v18135_v63 = vmul.f32 %v23718_v38, %v23717_v26  ;;  %v23724_v37 = vmax.f32 %v23490_v50, %v23723_v0  ;;  %v5336_v16 = vld [vmem:[%s22737_s6 + $0x2b0] sm:$0xff]  ;;  %v23727_v50 = vld [vmem:[#allocation165_spill] sm:$0xff]  ;;  %12040 = vmatprep.mubr.msk.f32.mxu1 %vm14817_vm0, %v17981_v48 }
 0x2dd   :  { %v18141_v12 = vmul.f32 %v23722_v57, %v23721_v28  ;;  %2140 = vst [vmem:[#allocation2 + $0x1a8] sm:$0xff] %v18112_v52  ;;  %2143 = vst [vmem:[#allocation2 + $0x1c0] sm:$0xff] %v18118_v58  ;;  %v23728_v26 = vld [vmem:[#allocation221_spill] sm:$0xff]  ;;  %v23730_v29 = vld [vmem:[#allocation67_spill] sm:$0xff]  ;;  %v23732_v28 = vmax.f32 %v23495_v42, %v23494_v55  ;;  %v18182_v58 = vpop.permute.xlu1 %8024  ;;  %v13480_v25 = vpack.c.bf16 %v5337_v20, %v5336_v16 }
 0x2de   :  { %v18147_v34 = vmul.f32 %v23725_v9, %v23724_v37  ;;  %2142 = vst [vmem:[#allocation2 + $0x1b8] sm:$0xff] %v18124_v41  ;;  %v23729_v38 = vmax.f32 %v23727_v50, %v23728_v26  ;;  %v23733_v57 = vld [vmem:[#allocation72_spill] sm:$0xff]  ;;  %v23735_v37 = vld [vmem:[#allocation167_spill] sm:$0xff]  ;;  %23739 = vst [vmem:[#allocation166_spill] sm:$0xff] %v18182_v58 }
 0x2df   :  { %v18174_v0 = vmul.f32 %v23733_v57, %v23732_v28  ;;  %v23736_v9 = vld [vmem:[#allocation224_spill] sm:$0xff]  ;;  %v23738_v52 = vld [vmem:[#allocation71_spill] sm:$0xff]  ;;  %2145 = vst [vmem:[#allocation2 + $0x1d0] sm:$0xff] %v18135_v63  ;;  %2144 = vst [vmem:[#allocation2 + $0x1c8] sm:$0xff] %v18141_v12  ;;  %13481 = vmatpush3.bf16.msra.mxu1 %v13480_v25 }
 0x2e0   :  { %v18168_v6 = vmul.f32 %v23730_v29, %v23729_v38  ;;  %v23737_v13 = vmax.f32 %v23735_v37, %v23736_v9  ;;  %2147 = vst [vmem:[#allocation2 + $0x1e0] sm:$0xff] %v18147_v34  ;;  %v23740_v42 = vld [vmem:[#allocation227_spill] sm:$0xff]  ;;  %v23742_v50 = vld [vmem:[#allocation12_spill] sm:$0xff]  ;;  %v23744_v38 = vld [vmem:[#allocation169_spill] sm:$0xff]  ;;  %13482 = vmatprep.subr.bf16.mxu1 %v23608_v36  ;;  %12041 = vmatmul.mubr.f32.gmra.mrb[20].mxu1 %v17743_v53 }
 0x2e1   :  { %23734 = vst [vmem:[#allocation164_spill] sm:$0xff] %v18174_v0  ;;  %v23741_v55 = vmax.f32 %v23499_v35, %v23740_v42  ;;  %v23745_v29 = vld [vmem:[#allocation226_spill] sm:$0xff]  ;;  %v23750_v57 = vld [vmem:[#allocation75_spill] sm:$0xff]  ;;  %v2276_v9 = vld [vmem:[#allocation2 + $0x46] sm:$0xff]  ;;  %v18331_v25 = vpop.permute.xlu1 %8034  ;;  %12043 = vmatprep.mubr.msk.f32.mxu1 %vm14817_vm0, %v17981_v48 }
 0x2e2   :  { %23731 = vst [vmem:[#allocation159_spill] sm:$0xff] %v18168_v6  ;;  %v18180_v23 = vmul.f32 %v23738_v52, %v23737_v13  ;;  %v23746_v52 = vmax.f32 %v23744_v38, %v23745_v29  ;;  %v23747_v13 = vld [vmem:[#allocation7_spill] sm:$0xff]  ;;  %v18205_v37 = vmul.f32 %v23750_v57, %v23749_v22  ;;  %2146 = vst [vmem:[#allocation2 + $0x1d8] sm:$0xff] %v18168_v6  ;;  %v23753_v42 = vld [vmem:[#allocation228_spill] sm:$0xff]  ;;  %10926 = vmatmul.mubr.f32.gmra.mrb[178].mxu0 %v2276_v9 }
 0x2e3   :  { %v18192_v26 = vmul.f32 %v23742_v50, %v23741_v55  ;;  %2149 = vst [vmem:[#allocation2 + $0x1f0] sm:$0xff] %v18174_v0  ;;  %v23752_v35 = vld [vmem:[#allocation171_spill] sm:$0xff]  ;;  %v23755_v50 = vld [vmem:[#allocation73_spill] sm:$0xff]  ;;  %v23757_v40 = vld [vmem:[#allocation230_spill] sm:$0xff]  ;;  %10928 = vmatprep.mubr.msk.f32.mxu0 %vm14817_vm0, %v17981_v48 }
 0x2e4   :  { %v18198_v28 = vmul.f32 %v23747_v13, %v23746_v52  ;;  %23751 = vst [vmem:[#allocation170_spill] sm:$0xff] %v18205_v37  ;;  %2148 = vst [vmem:[#allocation2 + $0x1e8] sm:$0xff] %v18180_v23  ;;  %v23754_v55 = vmax.f32 %v23752_v35, %v23753_v42  ;;  %v23758_v29 = vmax.f32 %v23505_v56, %v23757_v40  ;;  %v23759_v52 = vld [vmem:[#allocation117_spill] sm:$0xff]  ;;  %v23761_v22 = vld [vmem:[#allocation80_spill] sm:$0xff]  ;;  %12044 = vmatmul.mubr.f32.gmra.mrb[22].mxu1 %v17752_v54 }
 0x2e5   :  { %23743 = vst [vmem:[#allocation225_spill] sm:$0xff] %v18192_v26  ;;  %v23762_v57 = vld [vmem:[#allocation229_spill] sm:$0xff]  ;;  %v23764_v6 = vld [vmem:[#allocation116_spill] sm:$0xff]  ;;  %2151 = vst [vmem:[#allocation2 + $0x200] sm:$0xff] %v18192_v26  ;;  %12046 = vmatprep.mubr.msk.f32.mxu1 %vm14817_vm0, %v17981_v48 }
 0x2e6   :  { %23748 = vst [vmem:[#allocation168_spill] sm:$0xff] %v18198_v28  ;;  %v18216_v38 = vmul.f32 %v23755_v50, %v23754_v55  ;;  %v18222_v13 = vmul.f32 %v23759_v52, %v23758_v29  ;;  %v23763_v58 = vmax.f32 %v23761_v22, %v23762_v57  ;;  %2150 = vst [vmem:[#allocation2 + $0x1f8] sm:$0xff] %v18198_v28  ;;  %v23766_v56 = vld [vmem:[#allocation232_spill] sm:$0xff]  ;;  %v23768_v20 = vld [vmem:[#allocation125_spill] sm:$0xff] }
 0x2e7   :  { %2153 = vst [vmem:[#allocation2 + $0x210] sm:$0xff] %v18205_v37  ;;  %v23767_v16 = vmax.f32 %v23507_v59, %v23766_v56  ;;  %v23770_v42 = vld [vmem:[#allocation82_spill] sm:$0xff]  ;;  %v23771_v55 = vld [vmem:[#allocation231_spill] sm:$0xff]  ;;  %v23775_v40 = vld [vmem:[#allocation85_spill] sm:$0xff] }
 0x2e8   :  { %23756 = vst [vmem:[#allocation79_spill] sm:$0xff] %v18216_v38  ;;  %23760 = vst [vmem:[#allocation81_spill] sm:$0xff] %v18222_v13  ;;  %v18228_v0 = vmul.f32 %v23764_v6, %v23763_v58  ;;  %v23772_v58 = vmax.f32 %v23770_v42, %v23771_v55  ;;  %v23773_v6 = vld [vmem:[#allocation123_spill] sm:$0xff]  ;;  %v23776_v9 = vld [vmem:[#allocation234_spill] sm:$0xff]  ;;  %12047 = vmatmul.mubr.f32.gmra.mrb[24].mxu1 %v17758_v43 }
 0x2e9   :  { %v18239_v35 = vmul.f32 %v23768_v20, %v23767_v16  ;;  %v23777_v29 = vmax.f32 %v23775_v40, %v23776_v9  ;;  %v23778_v52 = vld [vmem:[#allocation130_spill] sm:$0xff]  ;;  %v2252_v57 = vld [vmem:[%s22737_s6] sm:$0xff]  ;;  %v2253_v59 = vld [vmem:[%s22737_s6 + $0x8] sm:$0xff]  ;;  %2152 = vst [vmem:[#allocation2 + $0x208] sm:$0xff] %v18216_v38  ;;  %12049 = vmatprep.mubr.msk.f32.mxu1 %vm14817_vm0, %v17981_v48 }
 0x2ea   :  { %23765 = vst [vmem:[#allocation83_spill] sm:$0xff] %v18228_v0  ;;  %v18245_v50 = vmul.f32 %v23773_v6, %v23772_v58  ;;  %2155 = vst [vmem:[#allocation2 + $0x220] sm:$0xff] %v18222_v13  ;;  %v23780_v56 = vld [vmem:[#allocation84_spill] sm:$0xff]  ;;  %v23781_v16 = vld [vmem:[#allocation233_spill] sm:$0xff] }
 0x2eb   :  { %23769 = vst [vmem:[#allocation90_spill] sm:$0xff] %v18239_v35  ;;  %v18251_v22 = vmul.f32 %v23778_v52, %v23777_v29  ;;  %2154 = vst [vmem:[#allocation2 + $0x218] sm:$0xff] %v18228_v0  ;;  %v23782_v20 = vmax.f32 %v23780_v56, %v23781_v16  ;;  %v23783_v42 = vld [vmem:[#allocation128_spill] sm:$0xff]  ;;  %v23787_v9 = vld [vmem:[#allocation133_spill] sm:$0xff] }
 0x2ec   :  { %23774 = vst [vmem:[#allocation180_spill] sm:$0xff] %v18245_v50  ;;  %v23784_v58 = vld [vmem:[#allocation88_spill] sm:$0xff]  ;;  %v23788_v52 = vld [vmem:[#allocation87_spill] sm:$0xff]  ;;  %2157 = vst [vmem:[#allocation2 + $0x230] sm:$0xff] %v18239_v35  ;;  %12050 = vmatmul.mubr.f32.gmra.mrb[26].mxu1 %v17764_v49 }
 0x2ed   :  { %23779 = vst [vmem:[#allocation47_spill] sm:$0xff] %v18251_v22  ;;  %v18270_v55 = vmul.f32 %v23783_v42, %v23782_v20  ;;  %v23785_v6 = vld [vmem:[#allocation236_spill] sm:$0xff]  ;;  %v23789_v37 = vld [vmem:[#allocation235_spill] sm:$0xff]  ;;  %2156 = vst [vmem:[#allocation2 + $0x228] sm:$0xff] %v18245_v50  ;;  %12052 = vmatprep.mubr.msk.f32.mxu1 %vm14817_vm0, %v17981_v48 }
 0x2ee   :  { %v23786_v40 = vmax.f32 %v23784_v58, %v23785_v6  ;;  %v23790_v28 = vmax.f32 %v23788_v52, %v23789_v37  ;;  %v23791_v38 = vld [vmem:[#allocation132_spill] sm:$0xff]  ;;  %2159 = vst [vmem:[#allocation2 + $0x240] sm:$0xff] %v18251_v22  ;;  %v23792_v56 = vld [vmem:[#allocation238_spill] sm:$0xff]  ;;  %v23794_v20 = vld [vmem:[#allocation91_spill] sm:$0xff] }
 0x2ef   :  { %v23793_v16 = vmax.f32 %v23515_v46, %v23792_v56  ;;  %v23795_v58 = vld [vmem:[#allocation89_spill] sm:$0xff]  ;;  %v23801_v31 = vld [vmem:[#allocation240_spill] sm:$0xff]  ;;  %v23805_v22 = vld [vmem:[#allocation239_spill] sm:$0xff]  ;;  %v18312_v56 = vpop.permute.xlu0 %8029  ;;  %2158 = vst [vmem:[#allocation2 + $0x238] sm:$0xff] %v18270_v55 }
 0x2f0   :  { %v18276_v29 = vmul.f32 %v23787_v9, %v23786_v40  ;;  %v18282_v26 = vmul.f32 %v23791_v38, %v23790_v28  ;;  %v23796_v6 = vld [vmem:[#allocation237_spill] sm:$0xff]  ;;  %v23798_v40 = vld [vmem:[#allocation86_spill] sm:$0xff]  ;;  %v23803_v52 = vld [vmem:[#allocation136_spill] sm:$0xff]  ;;  %23809 = vst [vmem:[#allocation182_spill] sm:$0xff] %v18312_v56  ;;  %12053 = vmatmul.mubr.f32.gmra.mrb[28].mxu1 %v17770_v10 }
 0x2f1   :  { %v18292_v42 = vmul.f32 %v23794_v20, %v23793_v16  ;;  %v23797_v37 = vmax.f32 %v23795_v58, %v23796_v6  ;;  %v23800_v38 = vld [vmem:[#allocation174_spill] sm:$0xff]  ;;  %v23804_v50 = vld [vmem:[#allocation173_spill] sm:$0xff]  ;;  %v13375_v20 = vpack.c.bf16 %v2253_v59, %v2252_v57  ;;  %v23810_v58 = vld [vmem:[#allocation176_spill] sm:$0xff]  ;;  %23818 = vst [vmem:[#allocation51_spill] sm:$0xff] %v18331_v25  ;;  %12055 = vmatprep.mubr.msk.f32.mxu1 %vm14817_vm0, %v17981_v48 }
 0x2f2   :  { %v23802_v9 = vmax.f32 %v23800_v38, %v23801_v31  ;;  %v23806_v0 = vmax.f32 %v23804_v50, %v23805_v22  ;;  %v23807_v13 = vld [vmem:[#allocation113_spill] sm:$0xff]  ;;  %2161 = vst [vmem:[#allocation2 + $0x250] sm:$0xff] %v18276_v29  ;;  %2160 = vst [vmem:[#allocation2 + $0x248] sm:$0xff] %v18282_v26  ;;  %v23811_v6 = vld [vmem:[#allocation242_spill] sm:$0xff] }
 0x2f3   :  { %v18298_v28 = vmul.f32 %v23798_v40, %v23797_v37  ;;  %v2277_v16 = vld [vmem:[#allocation2 + $0x4e] sm:$0xff]  ;;  %v23812_v50 = vmax.f32 %v23810_v58, %v23811_v6  ;;  %2163 = vst [vmem:[#allocation2 + $0x260] sm:$0xff] %v18292_v42  ;;  %v23820_v57 = vld [vmem:[#allocation179_spill] sm:$0xff]  ;;  %v23831_v56 = vld [vmem:[#allocation196_spill] sm:$0xff]  ;;  %13376 = vmatpush3.bf16.msra.mxu0 %v13375_v20  ;;  %v18384_v20 = vpop.permute.xlu1 %8044 }
 0x2f4   :  { %v18304_v35 = vmul.f32 %v23803_v52, %v23802_v9  ;;  %v18310_v46 = vmul.f32 %v23807_v13, %v23806_v0  ;;  %v23813_v22 = vld [vmem:[#allocation162_spill] sm:$0xff]  ;;  %v23814_v13 = vld [vmem:[#allocation175_spill] sm:$0xff]  ;;  %v23815_v37 = vld [vmem:[#allocation241_spill] sm:$0xff]  ;;  %10929 = vmatmul.mubr.f32.gmra.mrb[180].mxu0 %v2277_v16  ;;  %23835 = vst [vmem:[#allocation3_spill] sm:$0xff] %v18384_v20  ;;  %13377 = vmatprep.subr.bf16.mxu0 %v23608_v36 }
 0x2f5   :  { %23799 = vst [vmem:[#allocation181_spill] sm:$0xff] %v18298_v28  ;;  %v18323_v0 = vmul.f32 %v23813_v22, %v23812_v50  ;;  %v23816_v40 = vmax.f32 %v23814_v13, %v23815_v37  ;;  %v23817_v38 = vld [vmem:[#allocation157_spill] sm:$0xff]  ;;  %2162 = vst [vmem:[#allocation2 + $0x258] sm:$0xff] %v18298_v28  ;;  %v23824_v50 = vld [vmem:[#allocation178_spill] sm:$0xff]  ;;  %10931 = vmatprep.mubr.msk.f32.mxu0 %vm14817_vm0, %v17981_v48 }
 0x2f6   :  { %23808 = vst [vmem:[#allocation49_spill] sm:$0xff] %v18310_v46  ;;  %v23819_v9 = vld [vmem:[#allocation105_spill] sm:$0xff]  ;;  %2165 = vst [vmem:[#allocation2 + $0x270] sm:$0xff] %v18304_v35  ;;  %v23825_v22 = vld [vmem:[#allocation244_spill] sm:$0xff] }
 0x2f7   :  { %v18329_v31 = vmul.f32 %v23817_v38, %v23816_v40  ;;  %9126 = vrot.lane.b32.xlu1 %v23819_v9, %s14820_s4  ;;  %2164 = vst [vmem:[#allocation2 + $0x268] sm:$0xff] %v18310_v46  ;;  %v23821_v59 = vld [vmem:[#allocation245_spill] sm:$0xff]  ;;  %v23826_v13 = vmax.f32 %v23824_v50, %v23825_v22  ;;  %v23827_v37 = vld [vmem:[#allocation172_spill] sm:$0xff]  ;;  %v23829_v38 = vld [vmem:[#allocation131_spill] sm:$0xff]  ;;  %v18402_v22 = vpop.permute.xlu1 %8054 }
 0x2f8   :  { %v23822_v52 = vmax.f32 %v23820_v57, %v23821_v59  ;;  %v23823_v58 = vld [vmem:[#allocation177_spill] sm:$0xff]  ;;  %v5338_v46 = vld [vmem:[%s22737_s6 + $0x2c0] sm:$0xff]  ;;  %v23832_v59 = vld [vmem:[#allocation103_spill] sm:$0xff]  ;;  %2167 = vst [vmem:[#allocation2 + $0x280] sm:$0xff] %v18323_v0 }
 0x2f9   :  { %v18349_v40 = vmul.f32 %v23827_v37, %v23826_v13  ;;  %v23828_v16 = vld [vmem:[#allocation129_spill] sm:$0xff]  ;;  %9124 = vrot.lane.b32.xlu0 %v23832_v59, %s14820_s4  ;;  %2166 = vst [vmem:[#allocation2 + $0x278] sm:$0xff] %v18329_v31  ;;  %v23834_v5 = vld [vmem:[#allocation107_spill] sm:$0xff]  ;;  %23838 = vst [vmem:[#allocation184_spill] sm:$0xff] %v18402_v22  ;;  %12056 = vmatmul.mubr.f32.gmra.mrb[30].mxu1 %v23832_v59 }
 0x2fa   :  { %v18343_v6 = vmul.f32 %v23823_v58, %v23822_v52  ;;  %v23830_v25 = vmax.f32 %v23828_v16, %v23829_v38  ;;  %v5339_v57 = vld [vmem:[%s22737_s6 + $0x2c8] sm:$0xff]  ;;  %v18378_v52 = vpop.permute.xlu0 %8039  ;;  %v2279_v58 = vld [vmem:[#allocation2 + $0x5e] sm:$0xff]  ;;  %v2282_v43 = vld [vmem:[#allocation2 + $0x76] sm:$0xff]  ;;  %12058 = vmatprep.mubr.msk.f32.mxu1 %vm14817_vm0, %v17981_v48 }
 0x2fb   :  { %2168 = vst [vmem:[#allocation2 + $0x288] sm:$0xff] %v18349_v40  ;;  %9130 = vrot.lane.b32.xlu1 %v17875_v2, %s14820_s4  ;;  %23833 = vst [vmem:[#allocation183_spill] sm:$0xff] %v18378_v52  ;;  %v2280_v50 = vld [vmem:[#allocation2 + $0x66] sm:$0xff]  ;;  %v2281_v54 = vld [vmem:[#allocation2 + $0x6e] sm:$0xff]  ;;  %v18421_v37 = vpop.permute.xlu1 %8064 }
 0x2fc   :  { %v18355_v28 = vmul.f32 %v23831_v56, %v23830_v25  ;;  %2169 = vst [vmem:[#allocation2 + $0x290] sm:$0xff] %v18343_v6  ;;  %v2278_v56 = vld [vmem:[#allocation2 + $0x56] sm:$0xff]  ;;  %v13483_v25 = vpack.c.bf16 %v5339_v57, %v5338_v46  ;;  %v23836_v46 = vld [vmem:[#allocation109_spill] sm:$0xff]  ;;  %23840 = vst [vmem:[#allocation185_spill] sm:$0xff] %v18421_v37 }
 0x2fd   :  { %10932 = vmatmul.mubr.f32.gmra.mrb[182].mxu0 %v2278_v56  ;;  %9128 = vrot.lane.b32.xlu0 %v23834_v5, %s14820_s4  ;;  %v2283_v38 = vld [vmem:[#allocation2 + $0x7e] sm:$0xff]  ;;  %v2284_v10 = vld [vmem:[#allocation2 + $0x86] sm:$0xff]  ;;  %v2254_v57 = vld [vmem:[%s22737_s6 + $0x10] sm:$0xff] }
 0x2fe   :  { %2170 = vst [vmem:[#allocation2 + $0x298] sm:$0xff] %v18355_v28  ;;  %10934 = vmatprep.mubr.msk.f32.mxu0 %vm14817_vm0, %v17981_v48  ;;  %13484 = vmatpush3.bf16.msra.mxu1 %v13483_v25  ;;  %v18398_v53 = vpop.permute.xlu0 %8049  ;;  %v2255_v56 = vld [vmem:[%s22737_s6 + $0x18] sm:$0xff] }
 0x2ff   :  { %9134 = vrot.lane.b32.xlu1 %v17878_v51, %s14820_s4  ;;  %13485 = vmatprep.subr.bf16.mxu1 %v23608_v36  ;;  %23837 = vst [vmem:[#allocation94_spill] sm:$0xff] %v18398_v53  ;;  %v18437_v49 = vpop.permute.xlu1 %8074  ;;  %v13378_v59 = vpack.c.bf16 %v2255_v56, %v2254_v57  ;;  %v7248_v53 = vld [vmem:[#allocation2 + $0x1e3] sm:$0xff]  ;;  %v7250_v52 = vld [vmem:[#allocation2 + $0x1f3] sm:$0xff] }
 0x300   :  { %23842 = vst [vmem:[#allocation186_spill] sm:$0xff] %v18437_v49  ;;  %12059 = vmatmul.mubr.f32.gmra.mrb[32].mxu1 %v23819_v9 }
 0x301   :  { %10935 = vmatmul.mubr.f32.gmra.mrb[184].mxu0 %v2279_v58  ;;  %9132 = vrot.lane.b32.xlu0 %v23836_v46, %s14820_s4 }
 0x302   :  { %10937 = vmatprep.mubr.msk.f32.mxu0 %vm14817_vm0, %v17981_v48  ;;  %v18415_v13 = vpop.permute.xlu0 %8059  ;;  %12061 = vmatprep.mubr.msk.f32.mxu1 %vm14817_vm0, %v17981_v48 }
 0x303   :  { %9138 = vrot.lane.b32.xlu1 %v17881_v17, %s14820_s4  ;;  %23839 = vst [vmem:[#allocation5_spill] sm:$0xff] %v18415_v13  ;;  %v18462_v58 = vpop.permute.xlu1 %8084  ;;  %13379 = vmatpush3.bf16.msra.mxu0 %v13378_v59  ;;  %v2288_v59 = vld [vmem:[#allocation2 + $0xa6] sm:$0xff] }
 0x304   :  { %23844 = vst [vmem:[#allocation187_spill] sm:$0xff] %v18462_v58  ;;  %12062 = vmatmul.mubr.f32.gmra.mrb[34].mxu1 %v23834_v5  ;;  %13380 = vmatprep.subr.bf16.mxu0 %v23608_v36  ;;  %v2287_v5 = vld [vmem:[#allocation2 + $0x9e] sm:$0xff] }
 0x305   :  { %10938 = vmatmul.mubr.f32.gmra.mrb[186].mxu0 %v2280_v50  ;;  %9136 = vrot.lane.b32.xlu0 %v17888_v14, %s14820_s4  ;;  %v2285_v50 = vld [vmem:[#allocation2 + $0x8e] sm:$0xff] }
 0x306   :  { %10940 = vmatprep.mubr.msk.f32.mxu0 %vm14817_vm0, %v17981_v48  ;;  %v18433_v16 = vpop.permute.xlu0 %8069  ;;  %12064 = vmatprep.mubr.msk.f32.mxu1 %vm14817_vm0, %v17981_v48 }
 0x307   :  { %9142 = vrot.lane.b32.xlu1 %v17891_v61, %s14820_s4  ;;  %23841 = vst [vmem:[#allocation6_spill] sm:$0xff] %v18433_v16 }
 0x308   :  { %12065 = vmatmul.mubr.f32.gmra.mrb[36].mxu1 %v17875_v2 }
 0x309   :  { %10941 = vmatmul.mubr.f32.gmra.mrb[188].mxu0 %v2281_v54  ;;  %9140 = vrot.lane.b32.xlu0 %v17894_v33, %s14820_s4  ;;  %v2286_v54 = vld [vmem:[#allocation2 + $0x96] sm:$0xff] }
 0x30a   :  { %10943 = vmatprep.mubr.msk.f32.mxu0 %vm14817_vm0, %v17981_v48  ;;  %v18456_v25 = vpop.permute.xlu0 %8079  ;;  %12067 = vmatprep.mubr.msk.f32.mxu1 %vm14817_vm0, %v17981_v48 }
 0x30b   :  { %9146 = vrot.lane.b32.xlu1 %v17946_v3, %s14820_s4  ;;  %23843 = vst [vmem:[#allocation10_spill] sm:$0xff] %v18456_v25 }
 0x30c   :  { %12068 = vmatmul.mubr.f32.gmra.mrb[38].mxu1 %v23836_v46 }
 0x30d   :  { %10944 = vmatmul.mubr.f32.gmra.mrb[190].mxu0 %v2282_v43  ;;  %9144 = vrot.lane.b32.xlu0 %v17970_v47, %s14820_s4  ;;  %v18479_v43 = vpop.permute.xlu1 %8094 }
 0x30e   :  { %10946 = vmatprep.mubr.msk.f32.mxu0 %vm14817_vm0, %v17981_v48  ;;  %v18475_v9 = vpop.permute.xlu0 %8089  ;;  %23846 = vst [vmem:[#allocation188_spill] sm:$0xff] %v18479_v43  ;;  %12070 = vmatprep.mubr.msk.f32.mxu1 %vm14817_vm0, %v17981_v48 }
 0x30f   :  { %9150 = vrot.lane.b32.xlu1 %v17995_v18, %s14820_s4  ;;  %23845 = vst [vmem:[#allocation8_spill] sm:$0xff] %v18475_v9 }
 0x310   :  { %12071 = vmatmul.mubr.f32.gmra.mrb[40].mxu1 %v17878_v51  ;;  %v2290_v51 = vld [vmem:[#allocation2 + $0xb6] sm:$0xff] }
 0x311   :  { %10947 = vmatmul.mubr.f32.gmra.mrb[192].mxu0 %v2283_v38  ;;  %9148 = vrot.lane.b32.xlu0 %v18021_v45, %s14820_s4  ;;  %v5340_v38 = vld [vmem:[%s22737_s6 + $0x2d0] sm:$0xff]  ;;  %v18504_v2 = vpop.permute.xlu1 %8104 }
 0x312   :  { %10949 = vmatprep.mubr.msk.f32.mxu0 %vm14817_vm0, %v17981_v48  ;;  %v18498_v56 = vpop.permute.xlu0 %8099  ;;  %23848 = vst [vmem:[#allocation189_spill] sm:$0xff] %v18504_v2  ;;  %12073 = vmatprep.mubr.msk.f32.mxu1 %vm14817_vm0, %v17981_v48 }
 0x313   :  { %9154 = vrot.lane.b32.xlu1 %v18024_v4, %s14820_s4  ;;  %23847 = vst [vmem:[#allocation14_spill] sm:$0xff] %v18498_v56 }
 0x314   :  { %12074 = vmatmul.mubr.f32.gmra.mrb[42].mxu1 %v17888_v14  ;;  %v2291_v14 = vld [vmem:[#allocation2 + $0xbe] sm:$0xff] }
 0x315   :  { %10950 = vmatmul.mubr.f32.gmra.mrb[194].mxu0 %v2284_v10  ;;  %9152 = vrot.lane.b32.xlu0 %v18027_v62, %s14820_s4  ;;  %v5341_v10 = vld [vmem:[%s22737_s6 + $0x2d8] sm:$0xff] }
 0x316   :  { %10952 = vmatprep.mubr.msk.f32.mxu0 %vm14817_vm0, %v17981_v48  ;;  %v13486_v57 = vpack.c.bf16 %v5341_v10, %v5340_v38  ;;  %v18517_v46 = vpop.permute.xlu0 %8109  ;;  %12076 = vmatprep.mubr.msk.f32.mxu1 %vm14817_vm0, %v17981_v48  ;;  %v23852_v38 = vld [vmem:[#allocation142_spill] sm:$0xff] }
 0x317   :  { %9158 = vrot.lane.b32.xlu1 %v17919_v1, %s14820_s4  ;;  %23849 = vst [vmem:[#allocation13_spill] sm:$0xff] %v18517_v46 }
 0x318   :  { %13487 = vmatpush3.bf16.msra.mxu1 %v13486_v57 }
 0x319   :  { %10953 = vmatmul.mubr.f32.gmra.mrb[196].mxu0 %v2285_v50  ;;  %9156 = vrot.lane.b32.xlu0 %v17925_v7, %s14820_s4  ;;  %v2289_v50 = vld [vmem:[#allocation2 + $0xae] sm:$0xff] }
 0x31a   :  { %10955 = vmatprep.mubr.msk.f32.mxu0 %vm14817_vm0, %v17981_v48  ;;  %13488 = vmatprep.subr.bf16.mxu1 %v23608_v36 }
 0x31b   :  { %9162 = vrot.lane.b32.xlu1 %v17953_v32, %s14820_s4  ;;  %12077 = vmatmul.mubr.f32.gmra.mrb[44].mxu1 %v17881_v17 }
 0x31c   :  { %12079 = vmatprep.mubr.msk.f32.mxu1 %vm14817_vm0, %v17981_v48 }
 0x31d   :  { %10956 = vmatmul.mubr.f32.gmra.mrb[198].mxu0 %v2286_v54  ;;  %9160 = vrot.lane.b32.xlu0 %v17964_v24, %s14820_s4  ;;  %v18521_v54 = vpop.permute.xlu1 %8114 }
 0x31e   :  { %10958 = vmatprep.mubr.msk.f32.mxu0 %vm14817_vm0, %v17981_v48  ;;  %23850 = vst [vmem:[#allocation190_spill] sm:$0xff] %v18521_v54  ;;  %v23889_v54 = vld [vmem:[#allocation49_spill] sm:$0xff] }
 0x31f   :  { %9166 = vrot.lane.b32.xlu1 %v17977_v60, %s14820_s4  ;;  %12080 = vmatmul.mubr.f32.gmra.mrb[46].mxu1 %v17894_v33  ;;  %v2293_v33 = vld [vmem:[#allocation2 + $0xce] sm:$0xff] }
 0x320   :  { %12082 = vmatprep.mubr.msk.f32.mxu1 %vm14817_vm0, %v17981_v48 }
 0x321   :  { %10959 = vmatmul.mubr.f32.gmra.mrb[200].mxu0 %v2287_v5  ;;  %9164 = vrot.lane.b32.xlu0 %v18002_v27, %s14820_s4  ;;  %v18534_v5 = vpop.permute.xlu0 %8119  ;;  %v18540_v10 = vpop.permute.xlu1 %8124 }
 0x322   :  { %10961 = vmatprep.mubr.msk.f32.mxu0 %vm14817_vm0, %v17981_v48  ;;  %23851 = vst [vmem:[#allocation18_spill] sm:$0xff] %v18534_v5  ;;  %23853 = vst [vmem:[#allocation191_spill] sm:$0xff] %v18540_v10  ;;  %v23880_v5 = vld [vmem:[#allocation90_spill] sm:$0xff] }
 0x323   :  { %9170 = vrot.lane.b32.xlu1 %v18008_v21, %s14820_s4  ;;  %12083 = vmatmul.mubr.f32.gmra.mrb[48].mxu1 %v17891_v61  ;;  %v2294_v61 = vld [vmem:[#allocation2 + $0xd6] sm:$0xff] }
 0x324   :  { %12085 = vmatprep.mubr.msk.f32.mxu1 %vm14817_vm0, %v17981_v48 }
 0x325   :  { %10962 = vmatmul.mubr.f32.gmra.mrb[202].mxu0 %v2288_v59  ;;  %9168 = vrot.lane.b32.xlu0 %v18014_v8, %s14820_s4  ;;  %v18552_v57 = vpop.permute.xlu0 %8129  ;;  %v2292_v59 = vld [vmem:[#allocation2 + $0xc6] sm:$0xff]  ;;  %v18556_v17 = vpop.permute.xlu1 %8134 }
 0x326   :  { %10964 = vmatprep.mubr.msk.f32.mxu0 %vm14817_vm0, %v17981_v48  ;;  %23854 = vst [vmem:[#allocation17_spill] sm:$0xff] %v18552_v57  ;;  %23855 = vst [vmem:[#allocation192_spill] sm:$0xff] %v18556_v17  ;;  %v23861_v57 = vld [vmem:[#allocation150_spill] sm:$0xff] }
 0x327   :  { %9174 = vrot.lane.b32.xlu1 %v18033_v30, %s14820_s4  ;;  %12086 = vmatmul.mubr.f32.gmra.mrb[50].mxu1 %v17970_v47 }
 0x328   :  { %12088 = vmatprep.mubr.msk.f32.mxu1 %vm14817_vm0, %v17981_v48 }
 0x329   :  { %10965 = vmatmul.mubr.f32.gmra.mrb[204].mxu0 %v2289_v50  ;;  %9172 = vrot.lane.b32.xlu0 %v18047_v39, %s14820_s4  ;;  %v23856_v50 = vld [vmem:[#allocation144_spill] sm:$0xff]  ;;  %v18575_v17 = vpop.permute.xlu1 %8144 }
 0x32a   :  { %10967 = vmatprep.mubr.msk.f32.mxu0 %vm14817_vm0, %v17981_v48  ;;  %23860 = vst [vmem:[#allocation193_spill] sm:$0xff] %v18575_v17 }
 0x32b   :  { %9178 = vrot.lane.b32.xlu1 %v18053_v15, %s14820_s4  ;;  %12089 = vmatmul.mubr.f32.gmra.mrb[52].mxu1 %v17946_v3  ;;  %v2296_v3 = vld [vmem:[#allocation2 + $0xe6] sm:$0xff] }
 0x32c   :  { %12091 = vmatprep.mubr.msk.f32.mxu1 %vm14817_vm0, %v17981_v48 }
 0x32d   :  { %10968 = vmatmul.mubr.f32.gmra.mrb[206].mxu0 %v2290_v51  ;;  %9176 = vrot.lane.b32.xlu0 %v23852_v38, %s14820_s4  ;;  %v23857_v51 = vld [vmem:[#allocation146_spill] sm:$0xff]  ;;  %v18597_v10 = vpop.permute.xlu1 %8154 }
 0x32e   :  { %10970 = vmatprep.mubr.msk.f32.mxu0 %vm14817_vm0, %v17981_v48  ;;  %23863 = vst [vmem:[#allocation114_spill] sm:$0xff] %v18597_v10 }
 0x32f   :  { %9182 = vrot.lane.b32.xlu1 %v18073_v44, %s14820_s4  ;;  %12092 = vmatmul.mubr.f32.gmra.mrb[54].mxu1 %v18021_v45  ;;  %v23865_v45 = vld [vmem:[#allocation159_spill] sm:$0xff] }
 0x330   :  { %12094 = vmatprep.mubr.msk.f32.mxu1 %vm14817_vm0, %v17981_v48 }
 0x331   :  { %10971 = vmatmul.mubr.f32.gmra.mrb[208].mxu0 %v2291_v14  ;;  %9180 = vrot.lane.b32.xlu0 %v18079_v19, %s14820_s4  ;;  %v18569_v14 = vpop.permute.xlu0 %8139  ;;  %v18623_v10 = vpop.permute.xlu1 %8164 }
 0x332   :  { %10973 = vmatprep.mubr.msk.f32.mxu0 %vm14817_vm0, %v17981_v48  ;;  %23858 = vst [vmem:[#allocation20_spill] sm:$0xff] %v18569_v14  ;;  %v2257_v14 = vld [vmem:[%s22737_s6 + $0x28] sm:$0xff]  ;;  %23866 = vst [vmem:[#allocation22_spill] sm:$0xff] %v18623_v10 }
 0x333   :  { %9186 = vrot.lane.b32.xlu1 %v18089_v11, %s14820_s4  ;;  %12095 = vmatmul.mubr.f32.gmra.mrb[56].mxu1 %v17995_v18 }
 0x334   :  { %12097 = vmatprep.mubr.msk.f32.mxu1 %vm14817_vm0, %v17981_v48 }
 0x335   :  { %10974 = vmatmul.mubr.f32.gmra.mrb[210].mxu0 %v2292_v59  ;;  %9184 = vrot.lane.b32.xlu0 %v23856_v50, %s14820_s4  ;;  %v23859_v59 = vld [vmem:[#allocation148_spill] sm:$0xff]  ;;  %v18593_v17 = vpop.permute.xlu0 %8149 }
 0x336   :  { %10976 = vmatprep.mubr.msk.f32.mxu0 %vm14817_vm0, %v17981_v48  ;;  %23862 = vst [vmem:[#allocation19_spill] sm:$0xff] %v18593_v17  ;;  %v23867_v17 = vld [vmem:[#allocation164_spill] sm:$0xff] }
 0x337   :  { %9190 = vrot.lane.b32.xlu1 %v23857_v51, %s14820_s4  ;;  %12098 = vmatmul.mubr.f32.gmra.mrb[58].mxu1 %v18027_v62  ;;  %v2299_v62 = vld [vmem:[#allocation2 + $0xfe] sm:$0xff] }
 0x338   :  { %12100 = vmatprep.mubr.msk.f32.mxu1 %vm14817_vm0, %v17981_v48 }
 0x339   :  { %10977 = vmatmul.mubr.f32.gmra.mrb[212].mxu0 %v2293_v33  ;;  %9188 = vrot.lane.b32.xlu0 %v23859_v59, %s14820_s4  ;;  %v2256_v33 = vld [vmem:[%s22737_s6 + $0x20] sm:$0xff] }
 0x33a   :  { %10979 = vmatprep.mubr.msk.f32.mxu0 %vm14817_vm0, %v17981_v48  ;;  %v13381_v47 = vpack.c.bf16 %v2257_v14, %v2256_v33  ;;  %v5342_v14 = vld [vmem:[%s22737_s6 + $0x2e0] sm:$0xff]  ;;  %v5343_v33 = vld [vmem:[%s22737_s6 + $0x2e8] sm:$0xff] }
 0x33b   :  { %9194 = vrot.lane.b32.xlu1 %v23861_v57, %s14820_s4  ;;  %12101 = vmatmul.mubr.f32.gmra.mrb[60].mxu1 %v18024_v4  ;;  %v2300_v4 = vld [vmem:[#allocation2 + $0x106] sm:$0xff] }
 0x33c   :  { %13382 = vmatpush3.bf16.msra.mxu0 %v13381_v47  ;;  %v18617_v47 = vpop.permute.xlu0 %8159  ;;  %12103 = vmatprep.mubr.msk.f32.mxu1 %vm14817_vm0, %v17981_v48 }
 0x33d   :  { %10980 = vmatmul.mubr.f32.gmra.mrb[214].mxu0 %v2294_v61  ;;  %9192 = vrot.lane.b32.xlu0 %v18124_v41, %s14820_s4  ;;  %v2295_v61 = vld [vmem:[#allocation2 + $0xde] sm:$0xff]  ;;  %23864 = vst [vmem:[#allocation194_spill] sm:$0xff] %v18617_v47  ;;  %v23876_v47 = vld [vmem:[#allocation81_spill] sm:$0xff] }
 0x33e   :  { %10982 = vmatprep.mubr.msk.f32.mxu0 %vm14817_vm0, %v17981_v48  ;;  %13383 = vmatprep.subr.bf16.mxu0 %v23608_v36 }
 0x33f   :  { %9198 = vrot.lane.b32.xlu1 %v18135_v63, %s14820_s4  ;;  %12104 = vmatmul.mubr.f32.gmra.mrb[62].mxu1 %v17925_v7 }
 0x340   :  { %v18636_v18 = vpop.permute.xlu0 %8169  ;;  %12106 = vmatprep.mubr.msk.f32.mxu1 %vm14817_vm0, %v17981_v48 }
 0x341   :  { %10983 = vmatmul.mubr.f32.gmra.mrb[216].mxu0 %v2295_v61  ;;  %9196 = vrot.lane.b32.xlu0 %v18141_v12, %s14820_s4  ;;  %v13489_v61 = vpack.c.bf16 %v5343_v33, %v5342_v14  ;;  %23868 = vst [vmem:[#allocation21_spill] sm:$0xff] %v18636_v18  ;;  %v2298_v14 = vld [vmem:[#allocation2 + $0xf6] sm:$0xff]  ;;  %v18640_v33 = vpop.permute.xlu1 %8174 }
 0x342   :  { %10985 = vmatprep.mubr.msk.f32.mxu0 %vm14817_vm0, %v17981_v48  ;;  %23869 = vst [vmem:[#allocation24_spill] sm:$0xff] %v18640_v33  ;;  %v23872_v18 = vld [vmem:[#allocation170_spill] sm:$0xff] }
 0x343   :  { %9202 = vrot.lane.b32.xlu1 %v18147_v34, %s14820_s4  ;;  %13490 = vmatpush3.bf16.msra.mxu1 %v13489_v61  ;;  %v23870_v61 = vld [vmem:[#allocation225_spill] sm:$0xff] }
 0x344   :  { %13491 = vmatprep.subr.bf16.mxu1 %v23608_v36  ;;  %v18653_v33 = vpop.permute.xlu0 %8179  ;;  %12107 = vmatmul.mubr.f32.gmra.mrb[64].mxu1 %v17919_v1  ;;  %v2302_v1 = vld [vmem:[#allocation2 + $0x116] sm:$0xff] }
 0x345   :  { %10986 = vmatmul.mubr.f32.gmra.mrb[218].mxu0 %v2296_v3  ;;  %9200 = vrot.lane.b32.xlu0 %v23865_v45, %s14820_s4  ;;  %v2297_v3 = vld [vmem:[#allocation2 + $0xee] sm:$0xff]  ;;  %23873 = vst [vmem:[#allocation195_spill] sm:$0xff] %v18653_v33  ;;  %v18659_v10 = vpop.permute.xlu1 %8184 }
 0x346   :  { %10988 = vmatprep.mubr.msk.f32.mxu0 %vm14817_vm0, %v17981_v48  ;;  %23875 = vst [vmem:[#allocation23_spill] sm:$0xff] %v18659_v10  ;;  %v2301_v10 = vld [vmem:[#allocation2 + $0x10e] sm:$0xff]  ;;  %12109 = vmatprep.mubr.msk.f32.mxu1 %vm14817_vm0, %v17981_v48 }
 0x347   :  { %9206 = vrot.lane.b32.xlu1 %v23867_v17, %s14820_s4 }
 0x348   :  { %v18671_v33 = vpop.permute.xlu0 %8189  ;;  %12110 = vmatmul.mubr.f32.gmra.mrb[66].mxu1 %v17964_v24  ;;  %v2303_v24 = vld [vmem:[#allocation2 + $0x11e] sm:$0xff] }
 0x349   :  { %10989 = vmatmul.mubr.f32.gmra.mrb[220].mxu0 %v2297_v3  ;;  %9204 = vrot.lane.b32.xlu0 %v18180_v23, %s14820_s4  ;;  %v23871_v3 = vld [vmem:[#allocation168_spill] sm:$0xff]  ;;  %23878 = vst [vmem:[#allocation197_spill] sm:$0xff] %v18671_v33  ;;  %v18675_v7 = vpop.permute.xlu1 %8194  ;;  %v23882_v33 = vld [vmem:[#allocation47_spill] sm:$0xff] }
 0x34a   :  { %10991 = vmatprep.mubr.msk.f32.mxu0 %vm14817_vm0, %v17981_v48  ;;  %23879 = vst [vmem:[#allocation26_spill] sm:$0xff] %v18675_v7  ;;  %12112 = vmatprep.mubr.msk.f32.mxu1 %vm14817_vm0, %v17981_v48 }
 0x34b   :  { %9210 = vrot.lane.b32.xlu1 %v23870_v61, %s14820_s4 }
 0x34c   :  { %v18688_v7 = vpop.permute.xlu0 %8199  ;;  %12113 = vmatmul.mubr.f32.gmra.mrb[68].mxu1 %v17953_v32 }
 0x34d   :  { %10992 = vmatmul.mubr.f32.gmra.mrb[222].mxu0 %v2298_v14  ;;  %9208 = vrot.lane.b32.xlu0 %v23871_v3, %s14820_s4  ;;  %v23874_v14 = vld [vmem:[#allocation79_spill] sm:$0xff]  ;;  %23883 = vst [vmem:[#allocation198_spill] sm:$0xff] %v18688_v7 }
 0x34e   :  { %10994 = vmatprep.mubr.msk.f32.mxu0 %vm14817_vm0, %v17981_v48  ;;  %12115 = vmatprep.mubr.msk.f32.mxu1 %vm14817_vm0, %v17981_v48 }
 0x34f   :  { %9214 = vrot.lane.b32.xlu1 %v23872_v18, %s14820_s4 }
 0x350   :  { %12116 = vmatmul.mubr.f32.gmra.mrb[70].mxu1 %v18002_v27  ;;  %v2259_v27 = vld [vmem:[%s22737_s6 + $0x38] sm:$0xff] }
 0x351   :  { %10995 = vmatmul.mubr.f32.gmra.mrb[224].mxu0 %v2299_v62  ;;  %9212 = vrot.lane.b32.xlu0 %v23874_v14, %s14820_s4  ;;  %v23877_v62 = vld [vmem:[#allocation83_spill] sm:$0xff] }
 0x352   :  { %10997 = vmatprep.mubr.msk.f32.mxu0 %vm14817_vm0, %v17981_v48  ;;  %12118 = vmatprep.mubr.msk.f32.mxu1 %vm14817_vm0, %v17981_v48 }
 0x353   :  { %9218 = vrot.lane.b32.xlu1 %v23876_v47, %s14820_s4 }
 0x354   :  { %12119 = vmatmul.mubr.f32.gmra.mrb[72].mxu1 %v17977_v60  ;;  %v2306_v60 = vld [vmem:[#allocation2 + $0x136] sm:$0xff] }
 0x355   :  { %10998 = vmatmul.mubr.f32.gmra.mrb[226].mxu0 %v2300_v4  ;;  %9216 = vrot.lane.b32.xlu0 %v23877_v62, %s14820_s4  ;;  %v23881_v4 = vld [vmem:[#allocation180_spill] sm:$0xff] }
 0x356   :  { %11000 = vmatprep.mubr.msk.f32.mxu0 %vm14817_vm0, %v17981_v48  ;;  %12121 = vmatprep.mubr.msk.f32.mxu1 %vm14817_vm0, %v17981_v48 }
 0x357   :  { %9222 = vrot.lane.b32.xlu1 %v23880_v5, %s14820_s4 }
 0x358   :  { %12122 = vmatmul.mubr.f32.gmra.mrb[74].mxu1 %v18014_v8 }
 0x359   :  { %11001 = vmatmul.mubr.f32.gmra.mrb[228].mxu0 %v2301_v10  ;;  %9220 = vrot.lane.b32.xlu0 %v23881_v4, %s14820_s4  ;;  %v18694_v10 = vpop.permute.xlu1 %8204 }
 0x35a   :  { %11003 = vmatprep.mubr.msk.f32.mxu0 %vm14817_vm0, %v17981_v48  ;;  %23884 = vst [vmem:[#allocation25_spill] sm:$0xff] %v18694_v10  ;;  %v2304_v10 = vld [vmem:[#allocation2 + $0x126] sm:$0xff]  ;;  %12124 = vmatprep.mubr.msk.f32.mxu1 %vm14817_vm0, %v17981_v48 }
 0x35b   :  { %9226 = vrot.lane.b32.xlu1 %v23882_v33, %s14820_s4 }
 0x35c   :  { %12125 = vmatmul.mubr.f32.gmra.mrb[76].mxu1 %v18008_v21  ;;  %v2308_v21 = vld [vmem:[#allocation2 + $0x146] sm:$0xff] }
 0x35d   :  { %11004 = vmatmul.mubr.f32.gmra.mrb[230].mxu0 %v2302_v1  ;;  %9224 = vrot.lane.b32.xlu0 %v18270_v55, %s14820_s4  ;;  %v18706_v1 = vpop.permute.xlu0 %8209  ;;  %v18710_v32 = vpop.permute.xlu1 %8214 }
 0x35e   :  { %11006 = vmatprep.mubr.msk.f32.mxu0 %vm14817_vm0, %v17981_v48  ;;  %23885 = vst [vmem:[#allocation199_spill] sm:$0xff] %v18706_v1  ;;  %23886 = vst [vmem:[#allocation28_spill] sm:$0xff] %v18710_v32  ;;  %v23887_v1 = vld [vmem:[#allocation181_spill] sm:$0xff]  ;;  %12127 = vmatprep.mubr.msk.f32.mxu1 %vm14817_vm0, %v17981_v48 }
 0x35f   :  { %9230 = vrot.lane.b32.xlu1 %v18276_v29, %s14820_s4  ;;  %v2305_v32 = vld [vmem:[#allocation2 + $0x12e] sm:$0xff] }
 0x360   :  { %12128 = vmatmul.mubr.f32.gmra.mrb[78].mxu1 %v18047_v39  ;;  %v2310_v39 = vld [vmem:[#allocation2 + $0x156] sm:$0xff] }
 0x361   :  { %11007 = vmatmul.mubr.f32.gmra.mrb[232].mxu0 %v2303_v24  ;;  %9228 = vrot.lane.b32.xlu0 %v18282_v26, %s14820_s4  ;;  %v2258_v24 = vld [vmem:[%s22737_s6 + $0x30] sm:$0xff] }
 0x362   :  { %11009 = vmatprep.mubr.msk.f32.mxu0 %vm14817_vm0, %v17981_v48  ;;  %v13384_v7 = vpack.c.bf16 %v2259_v27, %v2258_v24  ;;  %v18735_v24 = vpop.permute.xlu1 %8224  ;;  %12130 = vmatprep.mubr.msk.f32.mxu1 %vm14817_vm0, %v17981_v48 }
 0x363   :  { %9234 = vrot.lane.b32.xlu1 %v18292_v42, %s14820_s4  ;;  %23890 = vst [vmem:[#allocation30_spill] sm:$0xff] %v18735_v24 }
 0x364   :  { %13385 = vmatpush3.bf16.msra.mxu0 %v13384_v7  ;;  %v5344_v7 = vld [vmem:[%s22737_s6 + $0x2f0] sm:$0xff]  ;;  %12131 = vmatmul.mubr.f32.gmra.mrb[80].mxu1 %v18033_v30  ;;  %v2311_v30 = vld [vmem:[#allocation2 + $0x15e] sm:$0xff] }
 0x365   :  { %11010 = vmatmul.mubr.f32.gmra.mrb[234].mxu0 %v2304_v10  ;;  %9232 = vrot.lane.b32.xlu0 %v23887_v1, %s14820_s4  ;;  %v18729_v10 = vpop.permute.xlu0 %8219 }
 0x366   :  { %11012 = vmatprep.mubr.msk.f32.mxu0 %vm14817_vm0, %v17981_v48  ;;  %23888 = vst [vmem:[#allocation200_spill] sm:$0xff] %v18729_v10  ;;  %13386 = vmatprep.subr.bf16.mxu0 %v23608_v36  ;;  %v18758_v24 = vpop.permute.xlu1 %8234 }
 0x367   :  { %9238 = vrot.lane.b32.xlu1 %v18304_v35, %s14820_s4  ;;  %23892 = vst [vmem:[#allocation119_spill] sm:$0xff] %v18758_v24  ;;  %12133 = vmatprep.mubr.msk.f32.mxu1 %vm14817_vm0, %v17981_v48 }
 0x368   :  { %12134 = vmatmul.mubr.f32.gmra.mrb[82].mxu1 %v23852_v38  ;;  %v2312_v38 = vld [vmem:[#allocation2 + $0x166] sm:$0xff] }
 0x369   :  { %11013 = vmatmul.mubr.f32.gmra.mrb[236].mxu0 %v2305_v32  ;;  %9236 = vrot.lane.b32.xlu0 %v23889_v54, %s14820_s4  ;;  %v5345_v32 = vld [vmem:[%s22737_s6 + $0x2f8] sm:$0xff]  ;;  %v18754_v27 = vpop.permute.xlu0 %8229 }
 0x36a   :  { %11015 = vmatprep.mubr.msk.f32.mxu0 %vm14817_vm0, %v17981_v48  ;;  %v13492_v8 = vpack.c.bf16 %v5345_v32, %v5344_v7  ;;  %23891 = vst [vmem:[#allocation120_spill] sm:$0xff] %v18754_v27  ;;  %v2309_v32 = vld [vmem:[#allocation2 + $0x14e] sm:$0xff]  ;;  %12136 = vmatprep.mubr.msk.f32.mxu1 %vm14817_vm0, %v17981_v48 }
 0x36b   :  { %9242 = vrot.lane.b32.xlu1 %v18323_v0, %s14820_s4 }
 0x36c   :  { %13493 = vmatpush3.bf16.msra.mxu1 %v13492_v8  ;;  %v2260_v8 = vld [vmem:[%s22737_s6 + $0x40] sm:$0xff] }
 0x36d   :  { %11016 = vmatmul.mubr.f32.gmra.mrb[238].mxu0 %v2306_v60  ;;  %9240 = vrot.lane.b32.xlu0 %v18329_v31, %s14820_s4  ;;  %v2307_v60 = vld [vmem:[#allocation2 + $0x13e] sm:$0xff]  ;;  %v18770_v7 = vpop.permute.xlu0 %8239 }
 0x36e   :  { %11018 = vmatprep.mubr.msk.f32.mxu0 %vm14817_vm0, %v17981_v48  ;;  %13494 = vmatprep.subr.bf16.mxu1 %v23608_v36  ;;  %23893 = vst [vmem:[#allocation112_spill] sm:$0xff] %v18770_v7 }
 0x36f   :  { %9246 = vrot.lane.b32.xlu1 %v18343_v6, %s14820_s4  ;;  %12137 = vmatmul.mubr.f32.gmra.mrb[84].mxu1 %v18053_v15  ;;  %v2313_v15 = vld [vmem:[#allocation2 + $0x16e] sm:$0xff] }
 0x370   :  { %12139 = vmatprep.mubr.msk.f32.mxu1 %vm14817_vm0, %v17981_v48 }
 0x371   :  { %11019 = vmatmul.mubr.f32.gmra.mrb[240].mxu0 %v2307_v60  ;;  %9244 = vrot.lane.b32.xlu0 %v18349_v40, %s14820_s4 }
 0x372   :  { %11021 = vmatprep.mubr.msk.f32.mxu0 %vm14817_vm0, %v17981_v48 }
 0x373   :  { %12140 = vmatmul.mubr.f32.gmra.mrb[86].mxu1 %v18079_v19  ;;  %v2261_v19 = vld [vmem:[%s22737_s6 + $0x48] sm:$0xff] }
 0x374   :  { %12142 = vmatprep.mubr.msk.f32.mxu1 %vm14817_vm0, %v17981_v48  ;;  %v13387_v60 = vpack.c.bf16 %v2261_v19, %v2260_v8  ;;  %v2266_v8 = vld [vmem:[%s22737_s6 + $0x70] sm:$0xff]  ;;  %v2267_v19 = vld [vmem:[%s22737_s6 + $0x78] sm:$0xff] }
 0x375   :  { %11022 = vmatmul.mubr.f32.gmra.mrb[242].mxu0 %v2308_v21  ;;  %9248 = vrot.lane.b32.xlu0 %v18355_v28, %s14820_s4  ;;  %v2262_v21 = vld [vmem:[%s22737_s6 + $0x50] sm:$0xff] }
 0x376   :  { %11024 = vmatprep.mubr.msk.f32.mxu0 %vm14817_vm0, %v17981_v48  ;;  %13388 = vmatpush3.bf16.msra.mxu0 %v13387_v60  ;;  %v2317_v60 = vld [vmem:[#allocation2 + $0x18e] sm:$0xff] }
 0x377   :  { %12143 = vmatmul.mubr.f32.gmra.mrb[88].mxu1 %v18073_v44  ;;  %v2314_v44 = vld [vmem:[#allocation2 + $0x176] sm:$0xff]  ;;  %13389 = vmatprep.subr.bf16.mxu0 %v23608_v36 }
 0x378   :  { %12145 = vmatprep.mubr.msk.f32.mxu1 %vm14817_vm0, %v17981_v48 }
 0x379   :  { %11025 = vmatmul.mubr.f32.gmra.mrb[244].mxu0 %v2309_v32  ;;  %v2263_v32 = vld [vmem:[%s22737_s6 + $0x58] sm:$0xff] }
 0x37a   :  { %11027 = vmatprep.mubr.msk.f32.mxu0 %vm14817_vm0, %v17981_v48 }
 0x37b   :  { %12146 = vmatmul.mubr.f32.gmra.mrb[90].mxu1 %v23856_v50  ;;  %v13390_v50 = vpack.c.bf16 %v2263_v32, %v2262_v21  ;;  %v18855_v21 = vld [vmem:[#allocation2] sm:$0xff]  ;;  %v2346_v32 = vld [vmem:[#allocation2 + $0x276] sm:$0xff] }
 0x37c   :  { %12148 = vmatprep.mubr.msk.f32.mxu1 %vm14817_vm0, %v17981_v48 }
 0x37d   :  { %11028 = vmatmul.mubr.f32.gmra.mrb[246].mxu0 %v2310_v39  ;;  %v2315_v39 = vld [vmem:[#allocation2 + $0x17e] sm:$0xff] }
 0x37e   :  { %11030 = vmatprep.mubr.msk.f32.mxu0 %vm14817_vm0, %v17981_v48  ;;  %13391 = vmatpush3.bf16.msra.mxu0 %v13390_v50  ;;  %v5980_v50 = vld [vmem:[%s22737_s6 + $0x310] sm:$0xff] }
 0x37f   :  { %12149 = vmatmul.mubr.f32.gmra.mrb[92].mxu1 %v18089_v11  ;;  %13392 = vmatprep.subr.bf16.mxu0 %v23608_v36 }
 0x380   :  { %12151 = vmatprep.mubr.msk.f32.mxu1 %vm14817_vm0, %v17981_v48 }
 0x381   :  { %11031 = vmatmul.mubr.f32.gmra.mrb[248].mxu0 %v2311_v30  ;;  %v2264_v30 = vld [vmem:[%s22737_s6 + $0x60] sm:$0xff] }
 0x382   :  { %11033 = vmatprep.mubr.msk.f32.mxu0 %vm14817_vm0, %v17981_v48 }
 0x383   :  { %12152 = vmatmul.mubr.f32.gmra.mrb[94].mxu1 %v23859_v59  ;;  %v13396_v59 = vpack.c.bf16 %v2267_v19, %v2266_v8  ;;  %v5250_v8 = vld [vmem:[#allocation2 + $0x21] sm:$0xff] }
 0x384   :  { %12154 = vmatprep.mubr.msk.f32.mxu1 %vm14817_vm0, %v17981_v48  ;;  %v2348_v19 = vld [vmem:[#allocation2 + $0x286] sm:$0xff] }
 0x385   :  { %11034 = vmatmul.mubr.f32.gmra.mrb[250].mxu0 %v2312_v38  ;;  %v2265_v38 = vld [vmem:[%s22737_s6 + $0x68] sm:$0xff] }
 0x386   :  { %11036 = vmatprep.mubr.msk.f32.mxu0 %vm14817_vm0, %v17981_v48  ;;  %v13393_v11 = vpack.c.bf16 %v2265_v38, %v2264_v30  ;;  %v5249_v30 = vld [vmem:[#allocation2 + $0x19] sm:$0xff] }
 0x387   :  { %12155 = vmatmul.mubr.f32.gmra.mrb[96].mxu1 %v23857_v51  ;;  %v2319_v51 = vld [vmem:[#allocation2 + $0x19e] sm:$0xff] }
 0x388   :  { %13394 = vmatpush3.bf16.msra.mxu0 %v13393_v11  ;;  %12157 = vmatprep.mubr.msk.f32.mxu1 %vm14817_vm0, %v17981_v48  ;;  %v5982_v11 = vld [vmem:[%s22737_s6 + $0x320] sm:$0xff] }
 0x389   :  { %11037 = vmatmul.mubr.f32.gmra.mrb[252].mxu0 %v2313_v15  ;;  %v2316_v15 = vld [vmem:[#allocation2 + $0x186] sm:$0xff]  ;;  %13395 = vmatprep.subr.bf16.mxu0 %v23608_v36 }
 0x38a   :  { %11039 = vmatprep.mubr.msk.f32.mxu0 %vm14817_vm0, %v17981_v48 }
 0x38b   :  { %12158 = vmatmul.mubr.f32.gmra.mrb[98].mxu1 %v18124_v41  ;;  %v2320_v41 = vld [vmem:[#allocation2 + $0x1a6] sm:$0xff] }
 0x38c   :  { %13397 = vmatpush3.bf16.msra.mxu0 %v13396_v59  ;;  %12160 = vmatprep.mubr.msk.f32.mxu1 %vm14817_vm0, %v17981_v48 }
 0x38d   :  { %11040 = vmatmul.mubr.f32.gmra.mrb[254].mxu0 %v2314_v44  ;;  %13398 = vmatprep.subr.bf16.mxu0 %v23608_v36  ;;  %v2318_v44 = vld [vmem:[#allocation2 + $0x196] sm:$0xff] }
 0x38e   :  { %11042 = vmatprep.mubr.msk.f32.mxu0 %vm14817_vm0, %v17981_v48 }
 0x38f   :  { %12161 = vmatmul.mubr.f32.gmra.mrb[100].mxu1 %v23861_v57  ;;  %v2324_v57 = vld [vmem:[#allocation2 + $0x1c6] sm:$0xff] }
 0x390   :  { %12163 = vmatprep.mubr.msk.f32.mxu1 %vm14817_vm0, %v18855_v21 }
 0x391   :  { %11043 = vmatmul.mubr.f32.gmra.mrb[0].mxu0 %v2315_v39  ;;  %v5981_v39 = vld [vmem:[%s22737_s6 + $0x318] sm:$0xff] }
 0x392   :  { %11045 = vmatprep.mubr.msk.f32.mxu0 %vm14817_vm0, %v17981_v48  ;;  %v13498_v38 = vpack.c.bf16 %v5981_v39, %v5980_v50  ;;  %v5263_v50 = vld [vmem:[#allocation2 + $0x89] sm:$0xff] }
 0x393   :  { %12164 = vmatmul.mubr.f32.gmra.mrb[102].mxu1 %v18141_v12  ;;  %v2322_v12 = vld [vmem:[#allocation2 + $0x1b6] sm:$0xff]  ;;  %v2183_v39 = vld [vmem:[#allocation2 + $0x65] sm:$0xff] }
 0x394   :  { %12166 = vmatprep.mubr.msk.f32.mxu1 %vm14817_vm0, %v18855_v21 }
 0x395   :  { %11046 = vmatmul.mubr.f32.gmra.mrb[2].mxu0 %v2316_v15  ;;  %v5983_v15 = vld [vmem:[%s22737_s6 + $0x328] sm:$0xff] }
 0x396   :  { %11048 = vmatprep.mubr.msk.f32.mxu0 %vm14817_vm0, %v17981_v48  ;;  %v13501_v59 = vpack.c.bf16 %v5983_v15, %v5982_v11  ;;  %v2185_v11 = vld [vmem:[#allocation2 + $0x75] sm:$0xff]  ;;  %v5266_v15 = vld [vmem:[#allocation2 + $0xa1] sm:$0xff] }
 0x397   :  { %12167 = vmatmul.mubr.f32.gmra.mrb[104].mxu1 %v18135_v63  ;;  %v2323_v63 = vld [vmem:[#allocation2 + $0x1be] sm:$0xff] }
 0x398   :  { %12169 = vmatprep.mubr.msk.f32.mxu1 %vm14817_vm0, %v18855_v21 }
 0x399   :  { %11049 = vmatmul.mubr.f32.gmra.mrb[4].mxu0 %v2317_v60  ;;  %v5984_v60 = vld [vmem:[%s22737_s6 + $0x330] sm:$0xff] }
 0x39a   :  { %11051 = vmatprep.mubr.msk.f32.mxu0 %vm14817_vm0, %v17981_v48 }
 0x39b   :  { %12170 = vmatmul.mubr.f32.gmra.mrb[106].mxu1 %v23865_v45  ;;  %v2328_v45 = vld [vmem:[#allocation2 + $0x1e6] sm:$0xff] }
 0x39c   :  { %12172 = vmatprep.mubr.msk.f32.mxu1 %vm14817_vm0, %v18855_v21 }
 0x39d   :  { %11052 = vmatmul.mubr.f32.gmra.mrb[6].mxu0 %v2318_v44  ;;  %v5985_v44 = vld [vmem:[%s22737_s6 + $0x338] sm:$0xff] }
 0x39e   :  { %11054 = vmatprep.mubr.msk.f32.mxu0 %vm14817_vm0, %v17981_v48  ;;  %v2321_v48 = vld [vmem:[#allocation2 + $0x1ae] sm:$0xff] }
 0x39f   :  { %12173 = vmatmul.mubr.f32.gmra.mrb[108].mxu1 %v18147_v34  ;;  %v2325_v34 = vld [vmem:[#allocation2 + $0x1ce] sm:$0xff] }
 0x3a0   :  { %12175 = vmatprep.mubr.msk.f32.mxu1 %vm14817_vm0, %v18855_v21 }
 0x3a1   :  { %11055 = vmatmul.mubr.f32.gmra.mrb[8].mxu0 %v2319_v51  ;;  %v2171_v51 = vld [vmem:[#allocation2 + $0x5] sm:$0xff] }
 0x3a2   :  { %11057 = vmatprep.mubr.msk.f32.mxu0 %vm14817_vm0, %v18855_v21 }
 0x3a3   :  { %12176 = vmatmul.mubr.f32.gmra.mrb[110].mxu1 %v18180_v23  ;;  %v2326_v23 = vld [vmem:[#allocation2 + $0x1d6] sm:$0xff] }
 0x3a4   :  { %12178 = vmatprep.mubr.msk.f32.mxu1 %vm14817_vm0, %v18855_v21 }
 0x3a5   :  { %11058 = vmatmul.mubr.f32.gmra.mrb[10].mxu0 %v2320_v41  ;;  %v5251_v41 = vld [vmem:[#allocation2 + $0x29] sm:$0xff] }
 0x3a6   :  { %11060 = vmatprep.mubr.msk.f32.mxu0 %vm14817_vm0, %v18855_v21 }
 0x3a7   :  { %12179 = vmatmul.mubr.f32.gmra.mrb[112].mxu1 %v23867_v17  ;;  %v2327_v17 = vld [vmem:[#allocation2 + $0x1de] sm:$0xff] }
 0x3a8   :  { %12181 = vmatprep.mubr.msk.f32.mxu1 %vm14817_vm0, %v18855_v21 }
 0x3a9   :  { %11061 = vmatmul.mubr.f32.gmra.mrb[12].mxu0 %v2321_v48  ;;  %v13504_v48 = vpack.c.bf16 %v5985_v44, %v5984_v60  ;;  %v3388_v60 = vld [vmem:[%s22737_s6 + $0x110] sm:$0xff]  ;;  %v3389_v44 = vld [vmem:[%s22737_s6 + $0x118] sm:$0xff] }
 0x3aa   :  { %11063 = vmatprep.mubr.msk.f32.mxu0 %vm14817_vm0, %v18855_v21 }
 0x3ab   :  { %12182 = vmatmul.mubr.f32.gmra.mrb[114].mxu1 %v23871_v3  ;;  %v2330_v3 = vld [vmem:[#allocation2 + $0x1f6] sm:$0xff] }
 0x3ac   :  { %12184 = vmatprep.mubr.msk.f32.mxu1 %vm14817_vm0, %v18855_v21 }
 0x3ad   :  { %11064 = vmatmul.mubr.f32.gmra.mrb[14].mxu0 %v2322_v12  ;;  %v2172_v12 = vld [vmem:[#allocation2 + $0xd] sm:$0xff] }
 0x3ae   :  { %11066 = vmatprep.mubr.msk.f32.mxu0 %vm14817_vm0, %v18855_v21 }
 0x3af   :  { %12185 = vmatmul.mubr.f32.gmra.mrb[116].mxu1 %v23870_v61  ;;  %v2329_v61 = vld [vmem:[#allocation2 + $0x1ee] sm:$0xff] }
 0x3b0   :  { %12187 = vmatprep.mubr.msk.f32.mxu1 %vm14817_vm0, %v18855_v21 }
 0x3b1   :  { %11067 = vmatmul.mubr.f32.gmra.mrb[16].mxu0 %v2323_v63  ;;  %v5252_v63 = vld [vmem:[#allocation2 + $0x31] sm:$0xff] }
 0x3b2   :  { %11069 = vmatprep.mubr.msk.f32.mxu0 %vm14817_vm0, %v18855_v21 }
 0x3b3   :  { %12188 = vmatmul.mubr.f32.gmra.mrb[118].mxu1 %v23874_v14  ;;  %v2332_v14 = vld [vmem:[#allocation2 + $0x206] sm:$0xff] }
 0x3b4   :  { %12190 = vmatprep.mubr.msk.f32.mxu1 %vm14817_vm0, %v18855_v21 }
 0x3b5   :  { %11070 = vmatmul.mubr.f32.gmra.mrb[18].mxu0 %v2324_v57  ;;  %v5253_v57 = vld [vmem:[#allocation2 + $0x39] sm:$0xff] }
 0x3b6   :  { %11072 = vmatprep.mubr.msk.f32.mxu0 %vm14817_vm0, %v18855_v21 }
 0x3b7   :  { %12191 = vmatmul.mubr.f32.gmra.mrb[120].mxu1 %v23872_v18  ;;  %v2331_v18 = vld [vmem:[#allocation2 + $0x1fe] sm:$0xff] }
 0x3b8   :  { %12193 = vmatprep.mubr.msk.f32.mxu1 %vm14817_vm0, %v18855_v21 }
 0x3b9   :  { %11073 = vmatmul.mubr.f32.gmra.mrb[20].mxu0 %v2325_v34  ;;  %v2173_v34 = vld [vmem:[#allocation2 + $0x15] sm:$0xff] }
 0x3ba   :  { %11075 = vmatprep.mubr.msk.f32.mxu0 %vm14817_vm0, %v18855_v21 }
 0x3bb   :  { %12194 = vmatmul.mubr.f32.gmra.mrb[122].mxu1 %v23877_v62  ;;  %v2334_v62 = vld [vmem:[#allocation2 + $0x216] sm:$0xff] }
 0x3bc   :  { %12196 = vmatprep.mubr.msk.f32.mxu1 %vm14817_vm0, %v18855_v21 }
 0x3bd   :  { %11076 = vmatmul.mubr.f32.gmra.mrb[22].mxu0 %v2326_v23  ;;  %v5254_v23 = vld [vmem:[#allocation2 + $0x41] sm:$0xff] }
 0x3be   :  { %11078 = vmatprep.mubr.msk.f32.mxu0 %vm14817_vm0, %v18855_v21 }
 0x3bf   :  { %12197 = vmatmul.mubr.f32.gmra.mrb[124].mxu1 %v23876_v47  ;;  %v2333_v47 = vld [vmem:[#allocation2 + $0x20e] sm:$0xff] }
 0x3c0   :  { %12199 = vmatprep.mubr.msk.f32.mxu1 %vm14817_vm0, %v18855_v21 }
 0x3c1   :  { %11079 = vmatmul.mubr.f32.gmra.mrb[24].mxu0 %v2327_v17  ;;  %v2174_v17 = vld [vmem:[#allocation2 + $0x1d] sm:$0xff] }
 0x3c2   :  { %11081 = vmatprep.mubr.msk.f32.mxu0 %vm14817_vm0, %v18855_v21 }
 0x3c3   :  { %12200 = vmatmul.mubr.f32.gmra.mrb[126].mxu1 %v23881_v4  ;;  %v2340_v4 = vld [vmem:[#allocation2 + $0x246] sm:$0xff] }
 0x3c4   :  { %12202 = vmatprep.mubr.msk.f32.mxu1 %vm14817_vm0, %v18855_v21 }
 0x3c5   :  { %11082 = vmatmul.mubr.f32.gmra.mrb[26].mxu0 %v2328_v45  ;;  %v5255_v45 = vld [vmem:[#allocation2 + $0x49] sm:$0xff] }
 0x3c6   :  { %11084 = vmatprep.mubr.msk.f32.mxu0 %vm14817_vm0, %v18855_v21 }
 0x3c7   :  { %12203 = vmatmul.mubr.f32.gmra.mrb[128].mxu1 %v23880_v5  ;;  %v2335_v5 = vld [vmem:[#allocation2 + $0x21e] sm:$0xff] }
 0x3c8   :  { %12205 = vmatprep.mubr.msk.f32.mxu1 %vm14817_vm0, %v18855_v21 }
 0x3c9   :  { %11085 = vmatmul.mubr.f32.gmra.mrb[28].mxu0 %v2329_v61  ;;  %v2175_v61 = vld [vmem:[#allocation2 + $0x25] sm:$0xff] }
 0x3ca   :  { %11087 = vmatprep.mubr.msk.f32.mxu0 %vm14817_vm0, %v18855_v21 }
 0x3cb   :  { %12206 = vmatmul.mubr.f32.gmra.mrb[130].mxu1 %v18270_v55  ;;  %v2336_v55 = vld [vmem:[#allocation2 + $0x226] sm:$0xff] }
 0x3cc   :  { %12208 = vmatprep.mubr.msk.f32.mxu1 %vm14817_vm0, %v18855_v21 }
 0x3cd   :  { %11088 = vmatmul.mubr.f32.gmra.mrb[30].mxu0 %v2330_v3  ;;  %v5256_v3 = vld [vmem:[#allocation2 + $0x51] sm:$0xff] }
 0x3ce   :  { %11090 = vmatprep.mubr.msk.f32.mxu0 %vm14817_vm0, %v18855_v21 }
 0x3cf   :  { %12209 = vmatmul.mubr.f32.gmra.mrb[132].mxu1 %v23882_v33  ;;  %v2337_v33 = vld [vmem:[#allocation2 + $0x22e] sm:$0xff] }
 0x3d0   :  { %12211 = vmatprep.mubr.msk.f32.mxu1 %vm14817_vm0, %v18855_v21 }
 0x3d1   :  { %11091 = vmatmul.mubr.f32.gmra.mrb[32].mxu0 %v2331_v18  ;;  %v2176_v18 = vld [vmem:[#allocation2 + $0x2d] sm:$0xff] }
 0x3d2   :  { %11093 = vmatprep.mubr.msk.f32.mxu0 %vm14817_vm0, %v18855_v21 }
 0x3d3   :  { %12212 = vmatmul.mubr.f32.gmra.mrb[134].mxu1 %v18282_v26  ;;  %v2338_v26 = vld [vmem:[#allocation2 + $0x236] sm:$0xff] }
 0x3d4   :  { %12214 = vmatprep.mubr.msk.f32.mxu1 %vm14817_vm0, %v18855_v21 }
 0x3d5   :  { %11094 = vmatmul.mubr.f32.gmra.mrb[34].mxu0 %v2332_v14  ;;  %v5257_v14 = vld [vmem:[#allocation2 + $0x59] sm:$0xff] }
 0x3d6   :  { %11096 = vmatprep.mubr.msk.f32.mxu0 %vm14817_vm0, %v18855_v21 }
 0x3d7   :  { %12215 = vmatmul.mubr.f32.gmra.mrb[136].mxu1 %v18276_v29  ;;  %v2339_v29 = vld [vmem:[#allocation2 + $0x23e] sm:$0xff] }
 0x3d8   :  { %12217 = vmatprep.mubr.msk.f32.mxu1 %vm14817_vm0, %v18855_v21 }
 0x3d9   :  { %11097 = vmatmul.mubr.f32.gmra.mrb[36].mxu0 %v2333_v47  ;;  %v2177_v47 = vld [vmem:[#allocation2 + $0x35] sm:$0xff] }
 0x3da   :  { %11099 = vmatprep.mubr.msk.f32.mxu0 %vm14817_vm0, %v18855_v21 }
 0x3db   :  { %12218 = vmatmul.mubr.f32.gmra.mrb[138].mxu1 %v23887_v1  ;;  %v5978_v1 = vld [vmem:[%s22737_s6 + $0x300] sm:$0xff] }
 0x3dc   :  { %12220 = vmatprep.mubr.msk.f32.mxu1 %vm14817_vm0, %v18855_v21 }
 0x3dd   :  { %11100 = vmatmul.mubr.f32.gmra.mrb[38].mxu0 %v2334_v62  ;;  %v3386_v62 = vld [vmem:[%s22737_s6 + $0x100] sm:$0xff] }
 0x3de   :  { %11102 = vmatprep.mubr.msk.f32.mxu0 %vm14817_vm0, %v18855_v21 }
 0x3df   :  { %12221 = vmatmul.mubr.f32.gmra.mrb[140].mxu1 %v18292_v42  ;;  %v2341_v42 = vld [vmem:[#allocation2 + $0x24e] sm:$0xff] }
 0x3e0   :  { %12223 = vmatprep.mubr.msk.f32.mxu1 %vm14817_vm0, %v18855_v21 }
 0x3e1   :  { %11103 = vmatmul.mubr.f32.gmra.mrb[40].mxu0 %v2335_v5  ;;  %v3387_v5 = vld [vmem:[%s22737_s6 + $0x108] sm:$0xff] }
 0x3e2   :  { %11105 = vmatprep.mubr.msk.f32.mxu0 %vm14817_vm0, %v18855_v21 }
 0x3e3   :  { %12224 = vmatmul.mubr.f32.gmra.mrb[142].mxu1 %v23889_v54  ;;  %v2342_v54 = vld [vmem:[#allocation2 + $0x256] sm:$0xff] }
 0x3e4   :  { %12226 = vmatprep.mubr.msk.f32.mxu1 %vm14817_vm0, %v18855_v21 }
 0x3e5   :  { %11106 = vmatmul.mubr.f32.gmra.mrb[42].mxu0 %v2336_v55  ;;  %v5258_v55 = vld [vmem:[#allocation2 + $0x61] sm:$0xff] }
 0x3e6   :  { %11108 = vmatprep.mubr.msk.f32.mxu0 %vm14817_vm0, %v18855_v21 }
 0x3e7   :  { %12227 = vmatmul.mubr.f32.gmra.mrb[144].mxu1 %v18304_v35  ;;  %v2343_v35 = vld [vmem:[#allocation2 + $0x25e] sm:$0xff] }
 0x3e8   :  { %12229 = vmatprep.mubr.msk.f32.mxu1 %vm14817_vm0, %v18855_v21 }
 0x3e9   :  { %11109 = vmatmul.mubr.f32.gmra.mrb[44].mxu0 %v2337_v33  ;;  %v13399_v33 = vpack.c.bf16 %v3387_v5, %v3386_v62  ;;  %v2193_v62 = vld [vmem:[#allocation2 + $0xb5] sm:$0xff]  ;;  %v5274_v5 = vld [vmem:[#allocation2 + $0xe1] sm:$0xff] }
 0x3ea   :  { %11111 = vmatprep.mubr.msk.f32.mxu0 %vm14817_vm0, %v18855_v21 }
 0x3eb   :  { %12230 = vmatmul.mubr.f32.gmra.mrb[146].mxu1 %v18329_v31  ;;  %v2344_v31 = vld [vmem:[#allocation2 + $0x266] sm:$0xff] }
 0x3ec   :  { %12232 = vmatprep.mubr.msk.f32.mxu1 %vm14817_vm0, %v18855_v21 }
 0x3ed   :  { %11112 = vmatmul.mubr.f32.gmra.mrb[46].mxu0 %v2338_v26  ;;  %v2178_v26 = vld [vmem:[#allocation2 + $0x3d] sm:$0xff] }
 0x3ee   :  { %11114 = vmatprep.mubr.msk.f32.mxu0 %vm14817_vm0, %v18855_v21 }
 0x3ef   :  { %12233 = vmatmul.mubr.f32.gmra.mrb[148].mxu1 %v18323_v0  ;;  %v2345_v0 = vld [vmem:[#allocation2 + $0x26e] sm:$0xff] }
 0x3f0   :  { %12235 = vmatprep.mubr.msk.f32.mxu1 %vm14817_vm0, %v18855_v21 }
 0x3f1   :  { %11115 = vmatmul.mubr.f32.gmra.mrb[48].mxu0 %v2339_v29  ;;  %v5986_v29 = vld [vmem:[%s22737_s6 + $0x340] sm:$0xff] }
 0x3f2   :  { %11117 = vmatprep.mubr.msk.f32.mxu0 %vm14817_vm0, %v18855_v21 }
 0x3f3   :  { %12236 = vmatmul.mubr.f32.gmra.mrb[150].mxu1 %v18349_v40  ;;  %v5979_v40 = vld [vmem:[%s22737_s6 + $0x308] sm:$0xff] }
 0x3f4   :  { %12238 = vmatprep.mubr.msk.f32.mxu1 %vm14817_vm0, %v18855_v21 }
 0x3f5   :  { %11118 = vmatmul.mubr.f32.gmra.mrb[50].mxu0 %v2340_v4  ;;  %v5987_v4 = vld [vmem:[%s22737_s6 + $0x348] sm:$0xff] }
 0x3f6   :  { %11120 = vmatprep.mubr.msk.f32.mxu0 %vm14817_vm0, %v18855_v21 }
 0x3f7   :  { %12239 = vmatmul.mubr.f32.gmra.mrb[152].mxu1 %v18343_v6  ;;  %v13495_v6 = vpack.c.bf16 %v5979_v40, %v5978_v1  ;;  %v5261_v1 = vld [vmem:[#allocation2 + $0x79] sm:$0xff] }
 0x3f8   :  { %12241 = vmatprep.mubr.msk.f32.mxu1 %vm14817_vm0, %v18855_v21  ;;  %v2181_v40 = vld [vmem:[#allocation2 + $0x55] sm:$0xff] }
 0x3f9   :  { %11121 = vmatmul.mubr.f32.gmra.mrb[52].mxu0 %v2341_v42  ;;  %v5259_v42 = vld [vmem:[#allocation2 + $0x69] sm:$0xff] }
 0x3fa   :  { %11123 = vmatprep.mubr.msk.f32.mxu0 %vm14817_vm0, %v18855_v21 }
 0x3fb   :  { %12242 = vmatmul.mubr.f32.gmra.mrb[154].mxu1 %v18355_v28  ;;  %v2347_v28 = vld [vmem:[#allocation2 + $0x27e] sm:$0xff] }
 0x3fc   :  { %12276 = vmatprep.mubr.msk.f32.mxu1 %vm14817_vm0, %v18855_v21 }
 0x3fd   :  { %11124 = vmatmul.mubr.f32.gmra.mrb[54].mxu0 %v2342_v54  ;;  %v13507_v54 = vpack.c.bf16 %v5987_v4, %v5986_v29  ;;  %v5276_v29 = vld [vmem:[#allocation2 + $0xf1] sm:$0xff] }
 0x3fe   :  { %11126 = vmatprep.mubr.msk.f32.mxu0 %vm14817_vm0, %v18855_v21  ;;  %v2196_v4 = vld [vmem:[#allocation2 + $0xcd] sm:$0xff] }
 0x3ff   :  { %12277 = vmatmul.mubr.f32.vlgmr.msra.gmra.mrb[156].mxu1 %v5249_v30  ;;  %v5264_v30 = vld [vmem:[#allocation2 + $0x91] sm:$0xff] }
 0x400   :  { %13496 = vmatpush3.bf16.msra.mxu1 %v13495_v6  ;;  %12279 = vmatprep.mubr.msk.f32.mxu1 %vm14817_vm0, %v18855_v21  ;;  %v2182_v6 = vld [vmem:[#allocation2 + $0x5d] sm:$0xff] }
 0x401   :  { %11127 = vmatmul.mubr.f32.gmra.mrb[56].mxu0 %v2343_v35  ;;  %13497 = vmatprep.subr.bf16.mxu1 %v23608_v36  ;;  %v2179_v35 = vld [vmem:[#allocation2 + $0x45] sm:$0xff] }
 0x402   :  { %11129 = vmatprep.mubr.msk.f32.mxu0 %vm14817_vm0, %v18855_v21 }
 0x403   :  { %12280 = vmatmul.mubr.f32.gmra.mrb[158].mxu1 %v5250_v8  ;;  %v2186_v8 = vld [vmem:[#allocation2 + $0x7d] sm:$0xff] }
 0x404   :  { %12282 = vmatprep.mubr.msk.f32.mxu1 %vm14817_vm0, %v18855_v21  ;;  %13499 = vmatpush3.bf16.msra.mxu1 %v13498_v38  ;;  %v5265_v38 = vld [vmem:[#allocation2 + $0x99] sm:$0xff] }
 0x405   :  { %11130 = vmatmul.mubr.f32.gmra.mrb[58].mxu0 %v2344_v31  ;;  %13500 = vmatprep.subr.bf16.mxu1 %v23608_v36  ;;  %v5260_v31 = vld [vmem:[#allocation2 + $0x71] sm:$0xff] }
 0x406   :  { %11132 = vmatprep.mubr.msk.f32.mxu0 %vm14817_vm0, %v18855_v21 }
 0x407   :  { %12283 = vmatmul.mubr.f32.gmra.mrb[160].mxu1 %v5251_v41  ;;  %v13402_v41 = vpack.c.bf16 %v3389_v44, %v3388_v60  ;;  %v2203_v60 = vld [vmem:[#allocation2 + $0x105] sm:$0xff]  ;;  %v5284_v44 = vld [vmem:[#allocation2 + $0x131] sm:$0xff] }
 0x408   :  { %12285 = vmatprep.mubr.msk.f32.mxu1 %vm14817_vm0, %v18855_v21  ;;  %13502 = vmatpush3.bf16.msra.mxu1 %v13501_v59  ;;  %v2187_v59 = vld [vmem:[#allocation2 + $0x85] sm:$0xff] }
 0x409   :  { %11133 = vmatmul.mubr.f32.gmra.mrb[60].mxu0 %v2345_v0  ;;  %13503 = vmatprep.subr.bf16.mxu1 %v23608_v36  ;;  %v2180_v0 = vld [vmem:[#allocation2 + $0x4d] sm:$0xff] }
 0x40a   :  { %11135 = vmatprep.mubr.msk.f32.mxu0 %vm14817_vm0, %v18855_v21 }
 0x40b   :  { %12286 = vmatmul.mubr.f32.gmra.mrb[0].mxu1 %v5252_v63  ;;  %v5988_v63 = vld [vmem:[%s22737_s6 + $0x350] sm:$0xff] }
 0x40c   :  { %12288 = vmatprep.mubr.msk.f32.mxu1 %vm14817_vm0, %v18855_v21  ;;  %13505 = vmatpush3.bf16.msra.mxu1 %v13504_v48  ;;  %v2188_v48 = vld [vmem:[#allocation2 + $0x8d] sm:$0xff] }
 0x40d   :  { %11136 = vmatmul.mubr.f32.gmra.mrb[62].mxu0 %v2346_v32  ;;  %13506 = vmatprep.subr.bf16.mxu1 %v23608_v36  ;;  %v5262_v32 = vld [vmem:[#allocation2 + $0x81] sm:$0xff] }
 0x40e   :  { %11138 = vmatprep.mubr.msk.f32.mxu0 %vm14817_vm0, %v18855_v21 }
 0x40f   :  { %12289 = vmatmul.mubr.f32.gmra.mrb[2].mxu1 %v5253_v57  ;;  %v5989_v57 = vld [vmem:[%s22737_s6 + $0x358] sm:$0xff] }
 0x410   :  { %12291 = vmatprep.mubr.msk.f32.mxu1 %vm14817_vm0, %v18855_v21  ;;  %13508 = vmatpush3.bf16.msra.mxu1 %v13507_v54  ;;  %v2197_v54 = vld [vmem:[#allocation2 + $0xd5] sm:$0xff] }
 0x411   :  { %11139 = vmatmul.mubr.f32.gmra.mrb[64].mxu0 %v2347_v28  ;;  %13509 = vmatprep.subr.bf16.mxu1 %v23608_v36  ;;  %v2184_v28 = vld [vmem:[#allocation2 + $0x6d] sm:$0xff] }
 0x412   :  { %11141 = vmatprep.mubr.msk.f32.mxu0 %vm14817_vm0, %v18855_v21 }
 0x413   :  { %12292 = vmatmul.mubr.f32.gmra.mrb[4].mxu1 %v5254_v23  ;;  %v2189_v23 = vld [vmem:[#allocation2 + $0x95] sm:$0xff] }
 0x414   :  { %12294 = vmatprep.mubr.msk.f32.mxu1 %vm14817_vm0, %v18855_v21 }
 0x415   :  { %11142 = vmatmul.mubr.f32.gmra.mrb[66].mxu0 %v2348_v19  ;;  %v5267_v19 = vld [vmem:[#allocation2 + $0xa9] sm:$0xff] }
 0x416   :  { %11176 = vmatprep.mubr.msk.f32.mxu0 %vm14817_vm0, %v18855_v21 }
 0x417   :  { %12295 = vmatmul.mubr.f32.gmra.mrb[6].mxu1 %v5255_v45  ;;  %v2190_v45 = vld [vmem:[#allocation2 + $0x9d] sm:$0xff] }
 0x418   :  { %12297 = vmatprep.mubr.msk.f32.mxu1 %vm14817_vm0, %v18855_v21 }
 0x419   :  { %11177 = vmatmul.mubr.f32.vlgmr.msra.gmra.mrb[162].mxu0 %v2171_v51  ;;  %v5268_v51 = vld [vmem:[#allocation2 + $0xb1] sm:$0xff] }
 0x41a   :  { %11179 = vmatprep.mubr.msk.f32.mxu0 %vm14817_vm0, %v18855_v21  ;;  %13400 = vmatpush3.bf16.msra.mxu0 %v13399_v33  ;;  %v5275_v33 = vld [vmem:[#allocation2 + $0xe9] sm:$0xff] }
 0x41b   :  { %12298 = vmatmul.mubr.f32.gmra.mrb[8].mxu1 %v5256_v3  ;;  %13401 = vmatprep.subr.bf16.mxu0 %v23608_v36  ;;  %v2191_v3 = vld [vmem:[#allocation2 + $0xa5] sm:$0xff] }
 0x41c   :  { %12300 = vmatprep.mubr.msk.f32.mxu1 %vm14817_vm0, %v18855_v21 }
 0x41d   :  { %11180 = vmatmul.mubr.f32.gmra.mrb[164].mxu0 %v2172_v12  ;;  %v5269_v12 = vld [vmem:[#allocation2 + $0xb9] sm:$0xff] }
 0x41e   :  { %11182 = vmatprep.mubr.msk.f32.mxu0 %vm14817_vm0, %v18855_v21  ;;  %13403 = vmatpush3.bf16.msra.mxu0 %v13402_v41  ;;  %v5285_v41 = vld [vmem:[#allocation2 + $0x139] sm:$0xff] }
 0x41f   :  { %12301 = vmatmul.mubr.f32.gmra.mrb[10].mxu1 %v5257_v14  ;;  %13404 = vmatprep.subr.bf16.mxu0 %v23608_v36  ;;  %v2192_v14 = vld [vmem:[#allocation2 + $0xad] sm:$0xff] }
 0x420   :  { %12303 = vmatprep.mubr.msk.f32.mxu1 %vm14817_vm0, %v18855_v21 }
 0x421   :  { %11183 = vmatmul.mubr.f32.gmra.mrb[166].mxu0 %v2173_v34  ;;  %v13510_v34 = vpack.c.bf16 %v5989_v57, %v5988_v63  ;;  %v2206_v63 = vld [vmem:[#allocation2 + $0x11d] sm:$0xff]  ;;  %v5287_v57 = vld [vmem:[#allocation2 + $0x149] sm:$0xff] }
 0x422   :  { %11185 = vmatprep.mubr.msk.f32.mxu0 %vm14817_vm0, %v18855_v21 }
 0x423   :  { %12304 = vmatmul.mubr.f32.gmra.mrb[12].mxu1 %v5258_v55  ;;  %v2194_v55 = vld [vmem:[#allocation2 + $0xbd] sm:$0xff] }
 0x424   :  { %12306 = vmatprep.mubr.msk.f32.mxu1 %vm14817_vm0, %v18855_v21  ;;  %13511 = vmatpush3.bf16.msra.mxu1 %v13510_v34  ;;  %v2207_v34 = vld [vmem:[#allocation2 + $0x125] sm:$0xff] }
 0x425   :  { %11186 = vmatmul.mubr.f32.gmra.mrb[168].mxu0 %v2174_v17  ;;  %v5270_v17 = vld [vmem:[#allocation2 + $0xc1] sm:$0xff]  ;;  %13512 = vmatprep.subr.bf16.mxu1 %v23608_v36 }
 0x426   :  { %11188 = vmatprep.mubr.msk.f32.mxu0 %vm14817_vm0, %v18855_v21 }
 0x427   :  { %12307 = vmatmul.mubr.f32.gmra.mrb[14].mxu1 %v5259_v42  ;;  %v5277_v42 = vld [vmem:[#allocation2 + $0xf9] sm:$0xff] }
 0x428   :  { %12309 = vmatprep.mubr.msk.f32.mxu1 %vm14817_vm0, %v18855_v21 }
 0x429   :  { %11189 = vmatmul.mubr.f32.gmra.mrb[170].mxu0 %v2175_v61  ;;  %v5271_v61 = vld [vmem:[#allocation2 + $0xc9] sm:$0xff] }
 0x42a   :  { %11191 = vmatprep.mubr.msk.f32.mxu0 %vm14817_vm0, %v18855_v21 }
 0x42b   :  { %12310 = vmatmul.mubr.f32.gmra.mrb[16].mxu1 %v5260_v31  ;;  %v3391_v31 = vld [vmem:[%s22737_s6 + $0x128] sm:$0xff] }
 0x42c   :  { %12312 = vmatprep.mubr.msk.f32.mxu1 %vm14817_vm0, %v18855_v21 }
 0x42d   :  { %11192 = vmatmul.mubr.f32.gmra.mrb[172].mxu0 %v2176_v18  ;;  %v5272_v18 = vld [vmem:[#allocation2 + $0xd1] sm:$0xff] }
 0x42e   :  { %11194 = vmatprep.mubr.msk.f32.mxu0 %vm14817_vm0, %v18855_v21 }
 0x42f   :  { %12313 = vmatmul.mubr.f32.gmra.mrb[18].mxu1 %v5261_v1 }
 0x430   :  { %12315 = vmatprep.mubr.msk.f32.mxu1 %vm14817_vm0, %v18855_v21 }
 0x431   :  { %11195 = vmatmul.mubr.f32.gmra.mrb[174].mxu0 %v2177_v47  ;;  %v5273_v47 = vld [vmem:[#allocation2 + $0xd9] sm:$0xff] }
 0x432   :  { %11197 = vmatprep.mubr.msk.f32.mxu0 %vm14817_vm0, %v18855_v21 }
 0x433   :  { %12316 = vmatmul.mubr.f32.gmra.mrb[20].mxu1 %v5262_v32  ;;  %v5279_v32 = vld [vmem:[#allocation2 + $0x109] sm:$0xff] }
 0x434   :  { %12318 = vmatprep.mubr.msk.f32.mxu1 %vm14817_vm0, %v18855_v21 }
 0x435   :  { %11198 = vmatmul.mubr.f32.gmra.mrb[176].mxu0 %v2178_v26  ;;  %v2195_v26 = vld [vmem:[#allocation2 + $0xc5] sm:$0xff] }
 0x436   :  { %11200 = vmatprep.mubr.msk.f32.mxu0 %vm14817_vm0, %v18855_v21 }
 0x437   :  { %12319 = vmatmul.mubr.f32.gmra.mrb[22].mxu1 %v5263_v50  ;;  %v5991_v50 = vld [vmem:[%s22737_s6 + $0x368] sm:$0xff] }
 0x438   :  { %12321 = vmatprep.mubr.msk.f32.mxu1 %vm14817_vm0, %v18855_v21 }
 0x439   :  { %11201 = vmatmul.mubr.f32.gmra.mrb[178].mxu0 %v2179_v35  ;;  %v3390_v35 = vld [vmem:[%s22737_s6 + $0x120] sm:$0xff] }
 0x43a   :  { %11203 = vmatprep.mubr.msk.f32.mxu0 %vm14817_vm0, %v18855_v21  ;;  %v13405_v1 = vpack.c.bf16 %v3391_v31, %v3390_v35  ;;  %v2213_v35 = vld [vmem:[#allocation2 + $0x155] sm:$0xff]  ;;  %v5294_v31 = vld [vmem:[#allocation2 + $0x181] sm:$0xff] }
 0x43b   :  { %12322 = vmatmul.mubr.f32.gmra.mrb[24].mxu1 %v5264_v30  ;;  %v2199_v30 = vld [vmem:[#allocation2 + $0xe5] sm:$0xff] }
 0x43c   :  { %12324 = vmatprep.mubr.msk.f32.mxu1 %vm14817_vm0, %v18855_v21  ;;  %13406 = vmatpush3.bf16.msra.mxu0 %v13405_v1  ;;  %v5295_v1 = vld [vmem:[#allocation2 + $0x189] sm:$0xff] }
 0x43d   :  { %11204 = vmatmul.mubr.f32.gmra.mrb[180].mxu0 %v2180_v0  ;;  %v5278_v0 = vld [vmem:[#allocation2 + $0x101] sm:$0xff]  ;;  %13407 = vmatprep.subr.bf16.mxu0 %v23608_v36 }
 0x43e   :  { %11206 = vmatprep.mubr.msk.f32.mxu0 %vm14817_vm0, %v18855_v21 }
 0x43f   :  { %12325 = vmatmul.mubr.f32.gmra.mrb[26].mxu1 %v5265_v38  ;;  %v2200_v38 = vld [vmem:[#allocation2 + $0xed] sm:$0xff] }
 0x440   :  { %12327 = vmatprep.mubr.msk.f32.mxu1 %vm14817_vm0, %v18855_v21 }
 0x441   :  { %11207 = vmatmul.mubr.f32.gmra.mrb[182].mxu0 %v2181_v40  ;;  %v2198_v40 = vld [vmem:[#allocation2 + $0xdd] sm:$0xff] }
 0x442   :  { %11209 = vmatprep.mubr.msk.f32.mxu0 %vm14817_vm0, %v18855_v21 }
 0x443   :  { %12328 = vmatmul.mubr.f32.gmra.mrb[28].mxu1 %v5266_v15  ;;  %v2201_v15 = vld [vmem:[#allocation2 + $0xf5] sm:$0xff] }
 0x444   :  { %12330 = vmatprep.mubr.msk.f32.mxu1 %vm14817_vm0, %v18855_v21 }
 0x445   :  { %11210 = vmatmul.mubr.f32.gmra.mrb[184].mxu0 %v2182_v6  ;;  %v5990_v6 = vld [vmem:[%s22737_s6 + $0x360] sm:$0xff] }
 0x446   :  { %11212 = vmatprep.mubr.msk.f32.mxu0 %vm14817_vm0, %v18855_v21 }
 0x447   :  { %12331 = vmatmul.mubr.f32.gmra.mrb[30].mxu1 %v5267_v19  ;;  %v2202_v19 = vld [vmem:[#allocation2 + $0xfd] sm:$0xff] }
 0x448   :  { %12333 = vmatprep.mubr.msk.f32.mxu1 %vm14817_vm0, %v18855_v21 }
 0x449   :  { %11213 = vmatmul.mubr.f32.gmra.mrb[186].mxu0 %v2183_v39  ;;  %v13513_v39 = vpack.c.bf16 %v5991_v50, %v5990_v6  ;;  %v2216_v6 = vld [vmem:[#allocation2 + $0x16d] sm:$0xff]  ;;  %v3394_v50 = vld [vmem:[%s22737_s6 + $0x140] sm:$0xff] }
 0x44a   :  { %11215 = vmatprep.mubr.msk.f32.mxu0 %vm14817_vm0, %v18855_v21 }
 0x44b   :  { %12334 = vmatmul.mubr.f32.gmra.mrb[32].mxu1 %v5268_v51  ;;  %v2204_v51 = vld [vmem:[#allocation2 + $0x10d] sm:$0xff] }
 0x44c   :  { %12336 = vmatprep.mubr.msk.f32.mxu1 %vm14817_vm0, %v18855_v21  ;;  %13514 = vmatpush3.bf16.msra.mxu1 %v13513_v39  ;;  %v3395_v39 = vld [vmem:[%s22737_s6 + $0x148] sm:$0xff] }
 0x44d   :  { %11216 = vmatmul.mubr.f32.gmra.mrb[188].mxu0 %v2184_v28  ;;  %v5280_v28 = vld [vmem:[#allocation2 + $0x111] sm:$0xff]  ;;  %13515 = vmatprep.subr.bf16.mxu1 %v23608_v36 }
 0x44e   :  { %11218 = vmatprep.mubr.msk.f32.mxu0 %vm14817_vm0, %v18855_v21 }
 0x44f   :  { %12337 = vmatmul.mubr.f32.gmra.mrb[34].mxu1 %v5269_v12  ;;  %v5286_v12 = vld [vmem:[#allocation2 + $0x141] sm:$0xff] }
 0x450   :  { %12339 = vmatprep.mubr.msk.f32.mxu1 %vm14817_vm0, %v18855_v21 }
 0x451   :  { %11219 = vmatmul.mubr.f32.gmra.mrb[190].mxu0 %v2185_v11  ;;  %v5281_v11 = vld [vmem:[#allocation2 + $0x119] sm:$0xff] }
 0x452   :  { %11221 = vmatprep.mubr.msk.f32.mxu0 %vm14817_vm0, %v18855_v21 }
 0x453   :  { %12340 = vmatmul.mubr.f32.gmra.mrb[36].mxu1 %v5270_v17  ;;  %v3393_v17 = vld [vmem:[%s22737_s6 + $0x138] sm:$0xff] }
 0x454   :  { %12342 = vmatprep.mubr.msk.f32.mxu1 %vm14817_vm0, %v18855_v21 }
 0x455   :  { %11222 = vmatmul.mubr.f32.gmra.mrb[192].mxu0 %v2186_v8  ;;  %v5282_v8 = vld [vmem:[#allocation2 + $0x121] sm:$0xff] }
 0x456   :  { %11224 = vmatprep.mubr.msk.f32.mxu0 %vm14817_vm0, %v18855_v21 }
 0x457   :  { %12343 = vmatmul.mubr.f32.gmra.mrb[38].mxu1 %v5271_v61 }
 0x458   :  { %12345 = vmatprep.mubr.msk.f32.mxu1 %vm14817_vm0, %v18855_v21 }
 0x459   :  { %11225 = vmatmul.mubr.f32.gmra.mrb[194].mxu0 %v2187_v59  ;;  %v5283_v59 = vld [vmem:[#allocation2 + $0x129] sm:$0xff] }
 0x45a   :  { %11227 = vmatprep.mubr.msk.f32.mxu0 %vm14817_vm0, %v18855_v21 }
 0x45b   :  { %12346 = vmatmul.mubr.f32.gmra.mrb[40].mxu1 %v5272_v18  ;;  %v5289_v18 = vld [vmem:[#allocation2 + $0x159] sm:$0xff] }
 0x45c   :  { %12348 = vmatprep.mubr.msk.f32.mxu1 %vm14817_vm0, %v18855_v21 }
 0x45d   :  { %11228 = vmatmul.mubr.f32.gmra.mrb[196].mxu0 %v2188_v48  ;;  %v2205_v48 = vld [vmem:[#allocation2 + $0x115] sm:$0xff] }
 0x45e   :  { %11230 = vmatprep.mubr.msk.f32.mxu0 %vm14817_vm0, %v18855_v21 }
 0x45f   :  { %12349 = vmatmul.mubr.f32.gmra.mrb[42].mxu1 %v5273_v47  ;;  %v5992_v47 = vld [vmem:[%s22737_s6 + $0x370] sm:$0xff] }
 0x460   :  { %12351 = vmatprep.mubr.msk.f32.mxu1 %vm14817_vm0, %v18855_v21 }
 0x461   :  { %11231 = vmatmul.mubr.f32.gmra.mrb[198].mxu0 %v2189_v23  ;;  %v3392_v23 = vld [vmem:[%s22737_s6 + $0x130] sm:$0xff] }
 0x462   :  { %11233 = vmatprep.mubr.msk.f32.mxu0 %vm14817_vm0, %v18855_v21  ;;  %v13408_v61 = vpack.c.bf16 %v3393_v17, %v3392_v23  ;;  %v2220_v23 = vld [vmem:[#allocation2 + $0x18d] sm:$0xff]  ;;  %v5301_v17 = vld [vmem:[#allocation2 + $0x1b9] sm:$0xff] }
 0x463   :  { %12352 = vmatmul.mubr.f32.gmra.mrb[44].mxu1 %v5274_v5  ;;  %v5290_v5 = vld [vmem:[#allocation2 + $0x161] sm:$0xff] }
 0x464   :  { %12354 = vmatprep.mubr.msk.f32.mxu1 %vm14817_vm0, %v18855_v21  ;;  %13409 = vmatpush3.bf16.msra.mxu0 %v13408_v61  ;;  %v5302_v61 = vld [vmem:[#allocation2 + $0x1c1] sm:$0xff] }
 0x465   :  { %11234 = vmatmul.mubr.f32.gmra.mrb[200].mxu0 %v2190_v45  ;;  %v5288_v45 = vld [vmem:[#allocation2 + $0x151] sm:$0xff]  ;;  %13410 = vmatprep.subr.bf16.mxu0 %v23608_v36 }
 0x466   :  { %11236 = vmatprep.mubr.msk.f32.mxu0 %vm14817_vm0, %v18855_v21 }
 0x467   :  { %12355 = vmatmul.mubr.f32.gmra.mrb[46].mxu1 %v5275_v33  ;;  %v2210_v33 = vld [vmem:[#allocation2 + $0x13d] sm:$0xff] }
 0x468   :  { %12357 = vmatprep.mubr.msk.f32.mxu1 %vm14817_vm0, %v18855_v21 }
 0x469   :  { %11237 = vmatmul.mubr.f32.gmra.mrb[202].mxu0 %v2191_v3  ;;  %v2208_v3 = vld [vmem:[#allocation2 + $0x12d] sm:$0xff] }
 0x46a   :  { %11239 = vmatprep.mubr.msk.f32.mxu0 %vm14817_vm0, %v18855_v21 }
 0x46b   :  { %12358 = vmatmul.mubr.f32.gmra.mrb[48].mxu1 %v5276_v29  ;;  %v2211_v29 = vld [vmem:[#allocation2 + $0x145] sm:$0xff] }
 0x46c   :  { %12360 = vmatprep.mubr.msk.f32.mxu1 %vm14817_vm0, %v18855_v21 }
 0x46d   :  { %11240 = vmatmul.mubr.f32.gmra.mrb[204].mxu0 %v2192_v14  ;;  %v2209_v14 = vld [vmem:[#allocation2 + $0x135] sm:$0xff] }
 0x46e   :  { %11242 = vmatprep.mubr.msk.f32.mxu0 %vm14817_vm0, %v18855_v21 }
 0x46f   :  { %12361 = vmatmul.mubr.f32.gmra.mrb[50].mxu1 %v5277_v42  ;;  %v2212_v42 = vld [vmem:[#allocation2 + $0x14d] sm:$0xff] }
 0x470   :  { %12363 = vmatprep.mubr.msk.f32.mxu1 %vm14817_vm0, %v18855_v21 }
 0x471   :  { %11243 = vmatmul.mubr.f32.gmra.mrb[206].mxu0 %v2193_v62  ;;  %v5993_v62 = vld [vmem:[%s22737_s6 + $0x378] sm:$0xff] }
 0x472   :  { %11245 = vmatprep.mubr.msk.f32.mxu0 %vm14817_vm0, %v18855_v21 }
 0x473   :  { %12364 = vmatmul.mubr.f32.gmra.mrb[52].mxu1 %v5278_v0  ;;  %v2214_v0 = vld [vmem:[#allocation2 + $0x15d] sm:$0xff] }
 0x474   :  { %12366 = vmatprep.mubr.msk.f32.mxu1 %vm14817_vm0, %v18855_v21 }
 0x475   :  { %11246 = vmatmul.mubr.f32.gmra.mrb[208].mxu0 %v2194_v55  ;;  %v13516_v55 = vpack.c.bf16 %v5993_v62, %v5992_v47  ;;  %v5304_v47 = vld [vmem:[#allocation2 + $0x1d1] sm:$0xff] }
 0x476   :  { %11248 = vmatprep.mubr.msk.f32.mxu0 %vm14817_vm0, %v18855_v21  ;;  %v2224_v62 = vld [vmem:[#allocation2 + $0x1ad] sm:$0xff] }
 0x477   :  { %12367 = vmatmul.mubr.f32.gmra.mrb[54].mxu1 %v5279_v32  ;;  %v5296_v32 = vld [vmem:[#allocation2 + $0x191] sm:$0xff] }
 0x478   :  { %12369 = vmatprep.mubr.msk.f32.mxu1 %vm14817_vm0, %v18855_v21  ;;  %13517 = vmatpush3.bf16.msra.mxu1 %v13516_v55  ;;  %v2225_v55 = vld [vmem:[#allocation2 + $0x1b5] sm:$0xff] }
 0x479   :  { %11249 = vmatmul.mubr.f32.gmra.mrb[210].mxu0 %v2195_v26  ;;  %13518 = vmatprep.subr.bf16.mxu1 %v23608_v36  ;;  %v5291_v26 = vld [vmem:[#allocation2 + $0x169] sm:$0xff] }
 0x47a   :  { %11251 = vmatprep.mubr.msk.f32.mxu0 %vm14817_vm0, %v18855_v21 }
 0x47b   :  { %12370 = vmatmul.mubr.f32.gmra.mrb[56].mxu1 %v5280_v28  ;;  %v13411_v28 = vpack.c.bf16 %v3395_v39, %v3394_v50  ;;  %v2232_v50 = vld [vmem:[#allocation2 + $0x1ed] sm:$0xff]  ;;  %v5313_v39 = vld [vmem:[#allocation2 + $0x219] sm:$0xff] }
 0x47c   :  { %12372 = vmatprep.mubr.msk.f32.mxu1 %vm14817_vm0, %v18855_v21 }
 0x47d   :  { %11252 = vmatmul.mubr.f32.gmra.mrb[212].mxu0 %v2196_v4  ;;  %v5292_v4 = vld [vmem:[#allocation2 + $0x171] sm:$0xff] }
 0x47e   :  { %11254 = vmatprep.mubr.msk.f32.mxu0 %vm14817_vm0, %v18855_v21  ;;  %13412 = vmatpush3.bf16.msra.mxu0 %v13411_v28  ;;  %v5314_v28 = vld [vmem:[#allocation2 + $0x221] sm:$0xff] }
 0x47f   :  { %12373 = vmatmul.mubr.f32.gmra.mrb[58].mxu1 %v5281_v11  ;;  %13413 = vmatprep.subr.bf16.mxu0 %v23608_v36  ;;  %v3396_v11 = vld [vmem:[%s22737_s6 + $0x150] sm:$0xff] }
 0x480   :  { %12375 = vmatprep.mubr.msk.f32.mxu1 %vm14817_vm0, %v18855_v21 }
 0x481   :  { %11255 = vmatmul.mubr.f32.gmra.mrb[214].mxu0 %v2197_v54  ;;  %v5293_v54 = vld [vmem:[#allocation2 + $0x179] sm:$0xff] }
 0x482   :  { %11257 = vmatprep.mubr.msk.f32.mxu0 %vm14817_vm0, %v18855_v21 }
 0x483   :  { %12376 = vmatmul.mubr.f32.gmra.mrb[60].mxu1 %v5282_v8  ;;  %v5298_v8 = vld [vmem:[#allocation2 + $0x1a1] sm:$0xff] }
 0x484   :  { %12378 = vmatprep.mubr.msk.f32.mxu1 %vm14817_vm0, %v18855_v21 }
 0x485   :  { %11258 = vmatmul.mubr.f32.gmra.mrb[216].mxu0 %v2198_v40  ;;  %v2215_v40 = vld [vmem:[#allocation2 + $0x165] sm:$0xff] }
 0x486   :  { %11260 = vmatprep.mubr.msk.f32.mxu0 %vm14817_vm0, %v18855_v21 }
 0x487   :  { %12379 = vmatmul.mubr.f32.gmra.mrb[62].mxu1 %v5283_v59  ;;  %v2218_v59 = vld [vmem:[#allocation2 + $0x17d] sm:$0xff] }
 0x488   :  { %12381 = vmatprep.mubr.msk.f32.mxu1 %vm14817_vm0, %v18855_v21 }
 0x489   :  { %11261 = vmatmul.mubr.f32.gmra.mrb[218].mxu0 %v2199_v30  ;;  %v5297_v30 = vld [vmem:[#allocation2 + $0x199] sm:$0xff] }
 0x48a   :  { %11263 = vmatprep.mubr.msk.f32.mxu0 %vm14817_vm0, %v18855_v21 }
 0x48b   :  { %12382 = vmatmul.mubr.f32.gmra.mrb[64].mxu1 %v5284_v44  ;;  %v3399_v44 = vld [vmem:[%s22737_s6 + $0x168] sm:$0xff] }
 0x48c   :  { %12384 = vmatprep.mubr.msk.f32.mxu1 %vm14817_vm0, %v18855_v21 }
 0x48d   :  { %11264 = vmatmul.mubr.f32.gmra.mrb[220].mxu0 %v2200_v38  ;;  %v2217_v38 = vld [vmem:[#allocation2 + $0x175] sm:$0xff] }
 0x48e   :  { %11266 = vmatprep.mubr.msk.f32.mxu0 %vm14817_vm0, %v18855_v21 }
 0x48f   :  { %12385 = vmatmul.mubr.f32.gmra.mrb[66].mxu1 %v5285_v41 }
 0x490   :  { %12387 = vmatprep.mubr.msk.f32.mxu1 %vm14817_vm0, %v18855_v21 }
 0x491   :  { %11267 = vmatmul.mubr.f32.gmra.mrb[222].mxu0 %v2201_v15  ;;  %v3397_v15 = vld [vmem:[%s22737_s6 + $0x158] sm:$0xff] }
 0x492   :  { %11269 = vmatprep.mubr.msk.f32.mxu0 %vm14817_vm0, %v18855_v21 }
 0x493   :  { %12388 = vmatmul.mubr.f32.gmra.mrb[68].mxu1 %v5286_v12  ;;  %v19300_v12 = vld [vmem:[#allocation2] sm:$0xff] }
 0x494   :  { %12390 = vmatprep.mubr.msk.f32.mxu1 %vm14817_vm0, %v18855_v21 }
 0x495   :  { %11270 = vmatmul.mubr.f32.gmra.mrb[224].mxu0 %v2202_v19  ;;  %v13414_v19 = vpack.c.bf16 %v3397_v15, %v3396_v11  ;;  %v5315_v11 = vld [vmem:[#allocation2 + $0x229] sm:$0xff] }
 0x496   :  { %11272 = vmatprep.mubr.msk.f32.mxu0 %vm14817_vm0, %v18855_v21  ;;  %v2235_v15 = vld [vmem:[#allocation2 + $0x205] sm:$0xff] }
 0x497   :  { %12391 = vmatmul.mubr.f32.gmra.mrb[70].mxu1 %v5287_v57  ;;  %13415 = vmatpush3.bf16.msra.mxu0 %v13414_v19  ;;  %v3401_v57 = vld [vmem:[%s22737_s6 + $0x178] sm:$0xff]  ;;  %v2236_v19 = vld [vmem:[#allocation2 + $0x20d] sm:$0xff] }
 0x498   :  { %12393 = vmatprep.mubr.msk.f32.mxu1 %vm14817_vm0, %v18855_v21  ;;  %13416 = vmatprep.subr.bf16.mxu0 %v23608_v36 }
 0x499   :  { %11273 = vmatmul.mubr.f32.gmra.mrb[226].mxu0 %v2203_v60  ;;  %v3398_v60 = vld [vmem:[%s22737_s6 + $0x160] sm:$0xff] }
 0x49a   :  { %11275 = vmatprep.mubr.msk.f32.mxu0 %vm14817_vm0, %v18855_v21  ;;  %v13417_v41 = vpack.c.bf16 %v3399_v44, %v3398_v60  ;;  %v2237_v60 = vld [vmem:[#allocation2 + $0x215] sm:$0xff]  ;;  %v5318_v44 = vld [vmem:[#allocation2 + $0x241] sm:$0xff] }
 0x49b   :  { %12394 = vmatmul.mubr.f32.gmra.mrb[72].mxu1 %v5288_v45  ;;  %v2221_v45 = vld [vmem:[#allocation2 + $0x195] sm:$0xff] }
 0x49c   :  { %12396 = vmatprep.mubr.msk.f32.mxu1 %vm14817_vm0, %v18855_v21  ;;  %13418 = vmatpush3.bf16.msra.mxu0 %v13417_v41  ;;  %v5319_v41 = vld [vmem:[#allocation2 + $0x249] sm:$0xff] }
 0x49d   :  { %11276 = vmatmul.mubr.f32.gmra.mrb[228].mxu0 %v2204_v51  ;;  %v5299_v51 = vld [vmem:[#allocation2 + $0x1a9] sm:$0xff]  ;;  %13419 = vmatprep.subr.bf16.mxu0 %v23608_v36 }
 0x49e   :  { %11278 = vmatprep.mubr.msk.f32.mxu0 %vm14817_vm0, %v18855_v21 }
 0x49f   :  { %12397 = vmatmul.mubr.f32.gmra.mrb[74].mxu1 %v5289_v18  ;;  %v5303_v18 = vld [vmem:[#allocation2 + $0x1c9] sm:$0xff] }
 0x4a0   :  { %12399 = vmatprep.mubr.msk.f32.mxu1 %vm14817_vm0, %v18855_v21 }
 0x4a1   :  { %11279 = vmatmul.mubr.f32.gmra.mrb[230].mxu0 %v2205_v48  ;;  %v2219_v48 = vld [vmem:[#allocation2 + $0x185] sm:$0xff] }
 0x4a2   :  { %11281 = vmatprep.mubr.msk.f32.mxu0 %vm14817_vm0, %v18855_v21 }
 0x4a3   :  { %12400 = vmatmul.mubr.f32.gmra.mrb[76].mxu1 %v5290_v5  ;;  %v5305_v5 = vld [vmem:[#allocation2 + $0x1d9] sm:$0xff] }
 0x4a4   :  { %12402 = vmatprep.mubr.msk.f32.mxu1 %vm14817_vm0, %v18855_v21 }
 0x4a5   :  { %11282 = vmatmul.mubr.f32.gmra.mrb[232].mxu0 %v2206_v63  ;;  %v3400_v63 = vld [vmem:[%s22737_s6 + $0x170] sm:$0xff] }
 0x4a6   :  { %11284 = vmatprep.mubr.msk.f32.mxu0 %vm14817_vm0, %v18855_v21 }
 0x4a7   :  { %12403 = vmatmul.mubr.f32.gmra.mrb[78].mxu1 %v5291_v26  ;;  %v2226_v26 = vld [vmem:[#allocation2 + $0x1bd] sm:$0xff] }
 0x4a8   :  { %12405 = vmatprep.mubr.msk.f32.mxu1 %vm14817_vm0, %v18855_v21 }
 0x4a9   :  { %11285 = vmatmul.mubr.f32.gmra.mrb[234].mxu0 %v2207_v34  ;;  %v13420_v34 = vpack.c.bf16 %v3401_v57, %v3400_v63  ;;  %v5320_v63 = vld [vmem:[#allocation2 + $0x251] sm:$0xff]  ;;  %v5321_v57 = vld [vmem:[#allocation2 + $0x259] sm:$0xff] }
 0x4aa   :  { %11287 = vmatprep.mubr.msk.f32.mxu0 %vm14817_vm0, %v18855_v21 }
 0x4ab   :  { %12406 = vmatmul.mubr.f32.gmra.mrb[80].mxu1 %v5292_v4  ;;  %13421 = vmatpush3.bf16.msra.mxu0 %v13420_v34  ;;  %v2227_v4 = vld [vmem:[#allocation2 + $0x1c5] sm:$0xff]  ;;  %v2241_v34 = vld [vmem:[#allocation2 + $0x235] sm:$0xff] }
 0x4ac   :  { %12408 = vmatprep.mubr.msk.f32.mxu1 %vm14817_vm0, %v18855_v21  ;;  %13422 = vmatprep.subr.bf16.mxu0 %v23608_v36 }
 0x4ad   :  { %11288 = vmatmul.mubr.f32.gmra.mrb[236].mxu0 %v2208_v3  ;;  %v2222_v3 = vld [vmem:[#allocation2 + $0x19d] sm:$0xff] }
 0x4ae   :  { %11290 = vmatprep.mubr.msk.f32.mxu0 %vm14817_vm0, %v18855_v21 }
 0x4af   :  { %12409 = vmatmul.mubr.f32.gmra.mrb[82].mxu1 %v5293_v54  ;;  %v2228_v54 = vld [vmem:[#allocation2 + $0x1cd] sm:$0xff] }
 0x4b0   :  { %12411 = vmatprep.mubr.msk.f32.mxu1 %vm14817_vm0, %v18855_v21 }
 0x4b1   :  { %11291 = vmatmul.mubr.f32.gmra.mrb[238].mxu0 %v2209_v14  ;;  %v2223_v14 = vld [vmem:[#allocation2 + $0x1a5] sm:$0xff] }
 0x4b2   :  { %11293 = vmatprep.mubr.msk.f32.mxu0 %vm14817_vm0, %v18855_v21 }
 0x4b3   :  { %12412 = vmatmul.mubr.f32.gmra.mrb[84].mxu1 %v5294_v31  ;;  %v2229_v31 = vld [vmem:[#allocation2 + $0x1d5] sm:$0xff] }
 0x4b4   :  { %12414 = vmatprep.mubr.msk.f32.mxu1 %vm14817_vm0, %v18855_v21 }
 0x4b5   :  { %11294 = vmatmul.mubr.f32.gmra.mrb[240].mxu0 %v2210_v33  ;;  %v5306_v33 = vld [vmem:[#allocation2 + $0x1e1] sm:$0xff] }
 0x4b6   :  { %11296 = vmatprep.mubr.msk.f32.mxu0 %vm14817_vm0, %v18855_v21 }
 0x4b7   :  { %12415 = vmatmul.mubr.f32.gmra.mrb[86].mxu1 %v5295_v1  ;;  %v2230_v1 = vld [vmem:[#allocation2 + $0x1dd] sm:$0xff] }
 0x4b8   :  { %12417 = vmatprep.mubr.msk.f32.mxu1 %vm14817_vm0, %v18855_v21 }
 0x4b9   :  { %11297 = vmatmul.mubr.f32.gmra.mrb[242].mxu0 %v2211_v29  ;;  %v5307_v29 = vld [vmem:[#allocation2 + $0x1e9] sm:$0xff] }
 0x4ba   :  { %11299 = vmatprep.mubr.msk.f32.mxu0 %vm14817_vm0, %v18855_v21 }
 0x4bb   :  { %12418 = vmatmul.mubr.f32.gmra.mrb[88].mxu1 %v5296_v32  ;;  %v2231_v32 = vld [vmem:[#allocation2 + $0x1e5] sm:$0xff] }
 0x4bc   :  { %12420 = vmatprep.mubr.msk.f32.mxu1 %vm14817_vm0, %v18855_v21 }
 0x4bd   :  { %11300 = vmatmul.mubr.f32.gmra.mrb[244].mxu0 %v2212_v42  ;;  %v5308_v42 = vld [vmem:[#allocation2 + $0x1f1] sm:$0xff] }
 0x4be   :  { %11302 = vmatprep.mubr.msk.f32.mxu0 %vm14817_vm0, %v18855_v21 }
 0x4bf   :  { %12421 = vmatmul.mubr.f32.gmra.mrb[90].mxu1 %v5297_v30  ;;  %v2233_v30 = vld [vmem:[#allocation2 + $0x1f5] sm:$0xff] }
 0x4c0   :  { %12423 = vmatprep.mubr.msk.f32.mxu1 %vm14817_vm0, %v18855_v21 }
 0x4c1   :  { %11303 = vmatmul.mubr.f32.gmra.mrb[246].mxu0 %v2213_v35  ;;  %v5309_v35 = vld [vmem:[#allocation2 + $0x1f9] sm:$0xff] }
 0x4c2   :  { %11305 = vmatprep.mubr.msk.f32.mxu0 %vm14817_vm0, %v18855_v21 }
 0x4c3   :  { %12424 = vmatmul.mubr.f32.gmra.mrb[92].mxu1 %v5298_v8  ;;  %v5316_v8 = vld [vmem:[#allocation2 + $0x231] sm:$0xff] }
 0x4c4   :  { %12426 = vmatprep.mubr.msk.f32.mxu1 %vm14817_vm0, %v18855_v21 }
 0x4c5   :  { %11306 = vmatmul.mubr.f32.gmra.mrb[248].mxu0 %v2214_v0  ;;  %v5310_v0 = vld [vmem:[#allocation2 + $0x201] sm:$0xff] }
 0x4c6   :  { %11308 = vmatprep.mubr.msk.f32.mxu0 %vm14817_vm0, %v18855_v21 }
 0x4c7   :  { %12427 = vmatmul.mubr.f32.gmra.mrb[94].mxu1 %v5299_v51  ;;  %v2238_v51 = vld [vmem:[#allocation2 + $0x21d] sm:$0xff] }
 0x4c8   :  { %12429 = vmatprep.mubr.msk.f32.mxu1 %vm14817_vm0, %v19300_v12 }
 0x4c9   :  { %11309 = vmatmul.mubr.f32.gmra.mrb[250].mxu0 %v2215_v40  ;;  %v5311_v40 = vld [vmem:[#allocation2 + $0x209] sm:$0xff] }
 0x4ca   :  { %11311 = vmatprep.mubr.msk.f32.mxu0 %vm14817_vm0, %v18855_v21 }
 0x4cd   :  { %11312 = vmatmul.mubr.f32.gmra.mrb[252].mxu0 %v2216_v6  ;;  %v5312_v6 = vld [vmem:[#allocation2 + $0x211] sm:$0xff] }
 0x4ce   :  { %11314 = vmatprep.mubr.msk.f32.mxu0 %vm14817_vm0, %v18855_v21 }
 0x4d1   :  { %11315 = vmatmul.mubr.f32.gmra.mrb[254].mxu0 %v2217_v38  ;;  %v2234_v38 = vld [vmem:[#allocation2 + $0x1fd] sm:$0xff] }
 0x4d2   :  { %11317 = vmatprep.mubr.msk.f32.mxu0 %vm14817_vm0, %v18855_v21 }
 0x4d5   :  { %11318 = vmatmul.mubr.f32.gmra.mrb[0].mxu0 %v2218_v59  ;;  %v5317_v59 = vld [vmem:[#allocation2 + $0x239] sm:$0xff] }
 0x4d6   :  { %11320 = vmatprep.mubr.msk.f32.mxu0 %vm14817_vm0, %v18855_v21  ;;  %v5300_v21 = vld [vmem:[#allocation2 + $0x1b1] sm:$0xff] }
 0x4d7   :  { %12430 = vmatmul.mubr.f32.gmra.mrb[96].mxu1 %v5300_v21  ;;  %v2240_v21 = vld [vmem:[#allocation2 + $0x22d] sm:$0xff] }
 0x4d8   :  { %12432 = vmatprep.mubr.msk.f32.mxu1 %vm14817_vm0, %v19300_v12 }
 0x4d9   :  { %11321 = vmatmul.mubr.f32.gmra.mrb[2].mxu0 %v2219_v48  ;;  %v2239_v48 = vld [vmem:[#allocation2 + $0x225] sm:$0xff] }
 0x4da   :  { %11323 = vmatprep.mubr.msk.f32.mxu0 %vm14817_vm0, %v19300_v12 }
 0x4db   :  { %12433 = vmatmul.mubr.f32.gmra.mrb[98].mxu1 %v5301_v17  ;;  %v2242_v17 = vld [vmem:[#allocation2 + $0x23d] sm:$0xff] }
 0x4dc   :  { %12435 = vmatprep.mubr.msk.f32.mxu1 %vm14817_vm0, %v19300_v12 }
 0x4dd   :  { %11324 = vmatmul.mubr.f32.gmra.mrb[4].mxu0 %v2220_v23  ;;  %v5322_v23 = vld [vmem:[#allocation2 + $0x261] sm:$0xff] }
 0x4de   :  { %11326 = vmatprep.mubr.msk.f32.mxu0 %vm14817_vm0, %v19300_v12 }
 0x4df   :  { %12436 = vmatmul.mubr.f32.gmra.mrb[100].mxu1 %v5302_v61  ;;  %v2243_v61 = vld [vmem:[#allocation2 + $0x245] sm:$0xff] }
 0x4e0   :  { %12438 = vmatprep.mubr.msk.f32.mxu1 %vm14817_vm0, %v19300_v12 }
 0x4e1   :  { %11327 = vmatmul.mubr.f32.gmra.mrb[6].mxu0 %v2221_v45  ;;  %v5323_v45 = vld [vmem:[#allocation2 + $0x269] sm:$0xff] }
 0x4e2   :  { %11329 = vmatprep.mubr.msk.f32.mxu0 %vm14817_vm0, %v19300_v12 }
 0x4e3   :  { %12439 = vmatmul.mubr.f32.gmra.mrb[102].mxu1 %v5303_v18  ;;  %v2244_v18 = vld [vmem:[#allocation2 + $0x24d] sm:$0xff] }
 0x4e4   :  { %12441 = vmatprep.mubr.msk.f32.mxu1 %vm14817_vm0, %v19300_v12 }
 0x4e5   :  { %11330 = vmatmul.mubr.f32.gmra.mrb[8].mxu0 %v2222_v3  ;;  %v5324_v3 = vld [vmem:[#allocation2 + $0x271] sm:$0xff] }
 0x4e6   :  { %11332 = vmatprep.mubr.msk.f32.mxu0 %vm14817_vm0, %v19300_v12 }
 0x4e7   :  { %12442 = vmatmul.mubr.f32.gmra.mrb[104].mxu1 %v5304_v47  ;;  %v2245_v47 = vld [vmem:[#allocation2 + $0x255] sm:$0xff] }
 0x4e8   :  { %12444 = vmatprep.mubr.msk.f32.mxu1 %vm14817_vm0, %v19300_v12 }
 0x4e9   :  { %11333 = vmatmul.mubr.f32.gmra.mrb[10].mxu0 %v2223_v14  ;;  %v5325_v14 = vld [vmem:[#allocation2 + $0x279] sm:$0xff] }
 0x4ea   :  { %11335 = vmatprep.mubr.msk.f32.mxu0 %vm14817_vm0, %v19300_v12 }
 0x4eb   :  { %12445 = vmatmul.mubr.f32.gmra.mrb[106].mxu1 %v5305_v5  ;;  %v2246_v5 = vld [vmem:[#allocation2 + $0x25d] sm:$0xff] }
 0x4ec   :  { %12447 = vmatprep.mubr.msk.f32.mxu1 %vm14817_vm0, %v19300_v12 }
 0x4ed   :  { %11336 = vmatmul.mubr.f32.gmra.mrb[12].mxu0 %v2224_v62  ;;  %v5326_v62 = vld [vmem:[#allocation2 + $0x281] sm:$0xff] }
 0x4ee   :  { %11338 = vmatprep.mubr.msk.f32.mxu0 %vm14817_vm0, %v19300_v12 }
 0x4ef   :  { %12448 = vmatmul.mubr.f32.gmra.mrb[108].mxu1 %v5306_v33  ;;  %v2247_v33 = vld [vmem:[#allocation2 + $0x265] sm:$0xff] }
 0x4f0   :  { %12450 = vmatprep.mubr.msk.f32.mxu1 %vm14817_vm0, %v19300_v12 }
 0x4f1   :  { %11339 = vmatmul.mubr.f32.gmra.mrb[14].mxu0 %v2225_v55  ;;  %v5327_v55 = vld [vmem:[#allocation2 + $0x289] sm:$0xff] }
 0x4f2   :  { %11341 = vmatprep.mubr.msk.f32.mxu0 %vm14817_vm0, %v19300_v12 }
 0x4f3   :  { %12451 = vmatmul.mubr.f32.gmra.mrb[110].mxu1 %v5307_v29  ;;  %v2248_v29 = vld [vmem:[#allocation2 + $0x26d] sm:$0xff] }
 0x4f4   :  { %12453 = vmatprep.mubr.msk.f32.mxu1 %vm14817_vm0, %v19300_v12 }
 0x4f5   :  { %11342 = vmatmul.mubr.f32.gmra.mrb[16].mxu0 %v2226_v26  ;;  %v5328_v26 = vld [vmem:[#allocation2 + $0x291] sm:$0xff] }
 0x4f6   :  { %11344 = vmatprep.mubr.msk.f32.mxu0 %vm14817_vm0, %v19300_v12 }
 0x4f7   :  { %12454 = vmatmul.mubr.f32.gmra.mrb[112].mxu1 %v5308_v42  ;;  %v6627_v42 = vld [vmem:[%s22737_s6 + $0x388] sm:$0xff] }
 0x4f8   :  { %12456 = vmatprep.mubr.msk.f32.mxu1 %vm14817_vm0, %v19300_v12 }
 0x4f9   :  { %11345 = vmatmul.mubr.f32.gmra.mrb[18].mxu0 %v2227_v4  ;;  %v6626_v4 = vld [vmem:[%s22737_s6 + $0x380] sm:$0xff] }
 0x4fa   :  { %11347 = vmatprep.mubr.msk.f32.mxu0 %vm14817_vm0, %v19300_v12 }
 0x4fb   :  { %12457 = vmatmul.mubr.f32.gmra.mrb[114].mxu1 %v5309_v35  ;;  %v2249_v35 = vld [vmem:[#allocation2 + $0x275] sm:$0xff] }
 0x4fc   :  { %12459 = vmatprep.mubr.msk.f32.mxu1 %vm14817_vm0, %v19300_v12 }
 0x4fd   :  { %11348 = vmatmul.mubr.f32.gmra.mrb[20].mxu0 %v2228_v54  ;;  %v5329_v54 = vld [vmem:[#allocation2 + $0x299] sm:$0xff] }
 0x4fe   :  { %11350 = vmatprep.mubr.msk.f32.mxu0 %vm14817_vm0, %v19300_v12 }
 0x4ff   :  { %12460 = vmatmul.mubr.f32.gmra.mrb[116].mxu1 %v5310_v0  ;;  %v6628_v0 = vld [vmem:[%s22737_s6 + $0x390] sm:$0xff] }
 0x500   :  { %12462 = vmatprep.mubr.msk.f32.mxu1 %vm14817_vm0, %v19300_v12 }
 0x501   :  { %11351 = vmatmul.mubr.f32.gmra.mrb[22].mxu0 %v2229_v31  ;;  %v13519_v31 = vpack.c.bf16 %v6627_v42, %v6626_v4  ;;  %v3314_v4 = vld [vmem:[#allocation2 + $0x4f] sm:$0xff] }
 0x502   :  { %11353 = vmatprep.mubr.msk.f32.mxu0 %vm14817_vm0, %v19300_v12  ;;  %v5909_v42 = vld [vmem:[#allocation2 + $0x89] sm:$0xff] }
 0x503   :  { %12463 = vmatmul.mubr.f32.gmra.mrb[118].mxu1 %v5311_v40  ;;  %v5897_v40 = vld [vmem:[#allocation2 + $0x29] sm:$0xff] }
 0x504   :  { %12465 = vmatprep.mubr.msk.f32.mxu1 %vm14817_vm0, %v19300_v12 }
 0x505   :  { %11354 = vmatmul.mubr.f32.gmra.mrb[24].mxu0 %v2230_v1  ;;  %v6629_v1 = vld [vmem:[%s22737_s6 + $0x398] sm:$0xff] }
 0x506   :  { %11356 = vmatprep.mubr.msk.f32.mxu0 %vm14817_vm0, %v19300_v12 }
 0x507   :  { %12466 = vmatmul.mubr.f32.gmra.mrb[120].mxu1 %v5312_v6  ;;  %v13522_v6 = vpack.c.bf16 %v6629_v1, %v6628_v0  ;;  %v5911_v0 = vld [vmem:[#allocation2 + $0x99] sm:$0xff]  ;;  %v3317_v1 = vld [vmem:[#allocation2 + $0x67] sm:$0xff] }
 0x508   :  { %12468 = vmatprep.mubr.msk.f32.mxu1 %vm14817_vm0, %v19300_v12 }
 0x509   :  { %11357 = vmatmul.mubr.f32.gmra.mrb[26].mxu0 %v2231_v32  ;;  %v2250_v32 = vld [vmem:[#allocation2 + $0x27d] sm:$0xff] }
 0x50a   :  { %11359 = vmatprep.mubr.msk.f32.mxu0 %vm14817_vm0, %v19300_v12 }
 0x50b   :  { %12469 = vmatmul.mubr.f32.gmra.mrb[122].mxu1 %v5313_v39  ;;  %v6631_v39 = vld [vmem:[%s22737_s6 + $0x3a8] sm:$0xff] }
 0x50c   :  { %12471 = vmatprep.mubr.msk.f32.mxu1 %vm14817_vm0, %v19300_v12 }
 0x50d   :  { %11360 = vmatmul.mubr.f32.gmra.mrb[28].mxu0 %v2232_v50  ;;  %v6630_v50 = vld [vmem:[%s22737_s6 + $0x3a0] sm:$0xff] }
 0x50e   :  { %11362 = vmatprep.mubr.msk.f32.mxu0 %vm14817_vm0, %v19300_v12 }
 0x50f   :  { %12472 = vmatmul.mubr.f32.gmra.mrb[124].mxu1 %v5314_v28  ;;  %v2251_v28 = vld [vmem:[#allocation2 + $0x285] sm:$0xff] }
 0x510   :  { %12474 = vmatprep.mubr.msk.f32.mxu1 %vm14817_vm0, %v19300_v12 }
 0x511   :  { %11363 = vmatmul.mubr.f32.gmra.mrb[30].mxu0 %v2233_v30  ;;  %v5898_v30 = vld [vmem:[#allocation2 + $0x31] sm:$0xff] }
 0x512   :  { %11365 = vmatprep.mubr.msk.f32.mxu0 %vm14817_vm0, %v19300_v12 }
 0x513   :  { %12475 = vmatmul.mubr.f32.gmra.mrb[126].mxu1 %v5315_v11  ;;  %v6632_v11 = vld [vmem:[%s22737_s6 + $0x3b0] sm:$0xff] }
 0x514   :  { %12477 = vmatprep.mubr.msk.f32.mxu1 %vm14817_vm0, %v19300_v12 }
 0x515   :  { %11366 = vmatmul.mubr.f32.gmra.mrb[32].mxu0 %v2234_v38  ;;  %v13525_v38 = vpack.c.bf16 %v6631_v39, %v6630_v50  ;;  %v3319_v50 = vld [vmem:[#allocation2 + $0x77] sm:$0xff] }
 0x516   :  { %11368 = vmatprep.mubr.msk.f32.mxu0 %vm14817_vm0, %v19300_v12  ;;  %v5914_v39 = vld [vmem:[#allocation2 + $0xb1] sm:$0xff] }
 0x517   :  { %12478 = vmatmul.mubr.f32.gmra.mrb[128].mxu1 %v5316_v8  ;;  %v3305_v8 = vld [vmem:[#allocation2 + $0x7] sm:$0xff] }
 0x518   :  { %12480 = vmatprep.mubr.msk.f32.mxu1 %vm14817_vm0, %v19300_v12 }
 0x519   :  { %11369 = vmatmul.mubr.f32.gmra.mrb[34].mxu0 %v2235_v15  ;;  %v6633_v15 = vld [vmem:[%s22737_s6 + $0x3b8] sm:$0xff] }
 0x51a   :  { %11371 = vmatprep.mubr.msk.f32.mxu0 %vm14817_vm0, %v19300_v12 }
 0x51b   :  { %12481 = vmatmul.mubr.f32.gmra.mrb[130].mxu1 %v5317_v59  ;;  %v13528_v59 = vpack.c.bf16 %v6633_v15, %v6632_v11  ;;  %v4036_v11 = vld [vmem:[%s22737_s6 + $0x190] sm:$0xff]  ;;  %v4037_v15 = vld [vmem:[%s22737_s6 + $0x198] sm:$0xff] }
 0x51c   :  { %12483 = vmatprep.mubr.msk.f32.mxu1 %vm14817_vm0, %v19300_v12 }
 0x51d   :  { %11372 = vmatmul.mubr.f32.gmra.mrb[36].mxu0 %v2236_v19  ;;  %v5899_v19 = vld [vmem:[#allocation2 + $0x39] sm:$0xff] }
 0x51e   :  { %11374 = vmatprep.mubr.msk.f32.mxu0 %vm14817_vm0, %v19300_v12 }
 0x51f   :  { %12484 = vmatmul.mubr.f32.gmra.mrb[132].mxu1 %v5318_v44  ;;  %v5900_v44 = vld [vmem:[#allocation2 + $0x41] sm:$0xff] }
 0x520   :  { %12486 = vmatprep.mubr.msk.f32.mxu1 %vm14817_vm0, %v19300_v12 }
 0x521   :  { %11375 = vmatmul.mubr.f32.gmra.mrb[38].mxu0 %v2237_v60  ;;  %v3306_v60 = vld [vmem:[#allocation2 + $0xf] sm:$0xff] }
 0x522   :  { %11377 = vmatprep.mubr.msk.f32.mxu0 %vm14817_vm0, %v19300_v12 }
 0x523   :  { %12487 = vmatmul.mubr.f32.gmra.mrb[134].mxu1 %v5319_v41  ;;  %v3307_v41 = vld [vmem:[#allocation2 + $0x17] sm:$0xff] }
 0x524   :  { %12489 = vmatprep.mubr.msk.f32.mxu1 %vm14817_vm0, %v19300_v12 }
 0x525   :  { %11378 = vmatmul.mubr.f32.gmra.mrb[40].mxu0 %v2238_v51  ;;  %v5901_v51 = vld [vmem:[#allocation2 + $0x49] sm:$0xff] }
 0x526   :  { %11380 = vmatprep.mubr.msk.f32.mxu0 %vm14817_vm0, %v19300_v12 }
 0x527   :  { %12490 = vmatmul.mubr.f32.gmra.mrb[136].mxu1 %v5320_v63  ;;  %v3308_v63 = vld [vmem:[#allocation2 + $0x1f] sm:$0xff] }
 0x528   :  { %12492 = vmatprep.mubr.msk.f32.mxu1 %vm14817_vm0, %v19300_v12 }
 0x529   :  { %11381 = vmatmul.mubr.f32.gmra.mrb[42].mxu0 %v2239_v48  ;;  %v5902_v48 = vld [vmem:[#allocation2 + $0x51] sm:$0xff] }
 0x52a   :  { %11383 = vmatprep.mubr.msk.f32.mxu0 %vm14817_vm0, %v19300_v12 }
 0x52b   :  { %12493 = vmatmul.mubr.f32.gmra.mrb[138].mxu1 %v5321_v57  ;;  %v3309_v57 = vld [vmem:[#allocation2 + $0x27] sm:$0xff] }
 0x52c   :  { %12495 = vmatprep.mubr.msk.f32.mxu1 %vm14817_vm0, %v19300_v12 }
 0x52d   :  { %11384 = vmatmul.mubr.f32.gmra.mrb[44].mxu0 %v2240_v21  ;;  %v5903_v21 = vld [vmem:[#allocation2 + $0x59] sm:$0xff] }
 0x52e   :  { %11386 = vmatprep.mubr.msk.f32.mxu0 %vm14817_vm0, %v19300_v12 }
 0x52f   :  { %12496 = vmatmul.mubr.f32.gmra.mrb[140].mxu1 %v5322_v23  ;;  %v3310_v23 = vld [vmem:[#allocation2 + $0x2f] sm:$0xff] }
 0x530   :  { %12498 = vmatprep.mubr.msk.f32.mxu1 %vm14817_vm0, %v19300_v12 }
 0x531   :  { %11387 = vmatmul.mubr.f32.gmra.mrb[46].mxu0 %v2241_v34  ;;  %v5904_v34 = vld [vmem:[#allocation2 + $0x61] sm:$0xff] }
 0x532   :  { %11389 = vmatprep.mubr.msk.f32.mxu0 %vm14817_vm0, %v19300_v12 }
 0x533   :  { %12499 = vmatmul.mubr.f32.gmra.mrb[142].mxu1 %v5323_v45  ;;  %v3311_v45 = vld [vmem:[#allocation2 + $0x37] sm:$0xff] }
 0x534   :  { %12501 = vmatprep.mubr.msk.f32.mxu1 %vm14817_vm0, %v19300_v12 }
 0x535   :  { %11390 = vmatmul.mubr.f32.gmra.mrb[48].mxu0 %v2242_v17  ;;  %v5905_v17 = vld [vmem:[#allocation2 + $0x69] sm:$0xff] }
 0x536   :  { %11392 = vmatprep.mubr.msk.f32.mxu0 %vm14817_vm0, %v19300_v12 }
 0x537   :  { %12502 = vmatmul.mubr.f32.gmra.mrb[144].mxu1 %v5324_v3  ;;  %v4035_v3 = vld [vmem:[%s22737_s6 + $0x188] sm:$0xff] }
 0x538   :  { %12504 = vmatprep.mubr.msk.f32.mxu1 %vm14817_vm0, %v19300_v12 }
 0x539   :  { %11393 = vmatmul.mubr.f32.gmra.mrb[50].mxu0 %v2243_v61  ;;  %v4034_v61 = vld [vmem:[%s22737_s6 + $0x180] sm:$0xff] }
 0x53a   :  { %11395 = vmatprep.mubr.msk.f32.mxu0 %vm14817_vm0, %v19300_v12 }
 0x53b   :  { %12505 = vmatmul.mubr.f32.gmra.mrb[146].mxu1 %v5325_v14  ;;  %v13423_v14 = vpack.c.bf16 %v4035_v3, %v4034_v61  ;;  %v3327_v61 = vld [vmem:[#allocation2 + $0xb7] sm:$0xff] }
 0x53c   :  { %12507 = vmatprep.mubr.msk.f32.mxu1 %vm14817_vm0, %v19300_v12  ;;  %v5922_v3 = vld [vmem:[#allocation2 + $0xf1] sm:$0xff] }
 0x53d   :  { %11396 = vmatmul.mubr.f32.gmra.mrb[52].mxu0 %v2244_v18  ;;  %v5906_v18 = vld [vmem:[#allocation2 + $0x71] sm:$0xff] }
 0x53e   :  { %11398 = vmatprep.mubr.msk.f32.mxu0 %vm14817_vm0, %v19300_v12 }
 0x53f   :  { %12508 = vmatmul.mubr.f32.gmra.mrb[148].mxu1 %v5326_v62  ;;  %v6634_v62 = vld [vmem:[%s22737_s6 + $0x3c0] sm:$0xff] }
 0x540   :  { %12510 = vmatprep.mubr.msk.f32.mxu1 %vm14817_vm0, %v19300_v12 }
 0x541   :  { %11399 = vmatmul.mubr.f32.gmra.mrb[54].mxu0 %v2245_v47  ;;  %v3312_v47 = vld [vmem:[#allocation2 + $0x3f] sm:$0xff] }
 0x542   :  { %11401 = vmatprep.mubr.msk.f32.mxu0 %vm14817_vm0, %v19300_v12 }
 0x543   :  { %12511 = vmatmul.mubr.f32.gmra.mrb[150].mxu1 %v5327_v55  ;;  %v5907_v55 = vld [vmem:[#allocation2 + $0x79] sm:$0xff] }
 0x544   :  { %12513 = vmatprep.mubr.msk.f32.mxu1 %vm14817_vm0, %v19300_v12 }
 0x545   :  { %11402 = vmatmul.mubr.f32.gmra.mrb[56].mxu0 %v2246_v5  ;;  %v6635_v5 = vld [vmem:[%s22737_s6 + $0x3c8] sm:$0xff] }
 0x546   :  { %11404 = vmatprep.mubr.msk.f32.mxu0 %vm14817_vm0, %v19300_v12 }
 0x547   :  { %12514 = vmatmul.mubr.f32.gmra.mrb[152].mxu1 %v5328_v26  ;;  %v3313_v26 = vld [vmem:[#allocation2 + $0x47] sm:$0xff] }
 0x548   :  { %12516 = vmatprep.mubr.msk.f32.mxu1 %vm14817_vm0, %v19300_v12 }
 0x549   :  { %11405 = vmatmul.mubr.f32.gmra.mrb[58].mxu0 %v2247_v33  ;;  %v13531_v33 = vpack.c.bf16 %v6635_v5, %v6634_v62  ;;  %v5924_v62 = vld [vmem:[#allocation2 + $0x101] sm:$0xff]  ;;  %v3330_v5 = vld [vmem:[#allocation2 + $0xcf] sm:$0xff] }
 0x54a   :  { %11407 = vmatprep.mubr.msk.f32.mxu0 %vm14817_vm0, %v19300_v12 }
 0x54b   :  { %12517 = vmatmul.mubr.f32.gmra.mrb[154].mxu1 %v5329_v54  ;;  %v3315_v54 = vld [vmem:[#allocation2 + $0x57] sm:$0xff] }
 0x54c   :  { %12551 = vmatprep.mubr.msk.f32.mxu1 %vm14817_vm0, %v19300_v12 }
 0x54d   :  { %11408 = vmatmul.mubr.f32.gmra.mrb[60].mxu0 %v2248_v29  ;;  %v5908_v29 = vld [vmem:[#allocation2 + $0x81] sm:$0xff] }
 0x54e   :  { %11410 = vmatprep.mubr.msk.f32.mxu0 %vm14817_vm0, %v19300_v12 }
 0x54f   :  { %12552 = vmatmul.mubr.f32.vlgmr.msra.gmra.mrb[156].mxu1 %v5897_v40  ;;  %v5912_v40 = vld [vmem:[#allocation2 + $0xa1] sm:$0xff] }
 0x550   :  { %13520 = vmatpush3.bf16.msra.mxu1 %v13519_v31  ;;  %12554 = vmatprep.mubr.msk.f32.mxu1 %vm14817_vm0, %v19300_v12  ;;  %v3316_v31 = vld [vmem:[#allocation2 + $0x5f] sm:$0xff] }
 0x551   :  { %11411 = vmatmul.mubr.f32.gmra.mrb[62].mxu0 %v2249_v35  ;;  %13521 = vmatprep.subr.bf16.mxu1 %v23608_v36  ;;  %v5910_v35 = vld [vmem:[#allocation2 + $0x91] sm:$0xff] }
 0x552   :  { %11413 = vmatprep.mubr.msk.f32.mxu0 %vm14817_vm0, %v19300_v12 }
 0x553   :  { %12555 = vmatmul.mubr.f32.gmra.mrb[158].mxu1 %v5898_v30  ;;  %v3320_v30 = vld [vmem:[#allocation2 + $0x7f] sm:$0xff] }
 0x554   :  { %12557 = vmatprep.mubr.msk.f32.mxu1 %vm14817_vm0, %v19300_v12  ;;  %13523 = vmatpush3.bf16.msra.mxu1 %v13522_v6  ;;  %v5913_v6 = vld [vmem:[#allocation2 + $0xa9] sm:$0xff] }
 0x555   :  { %11414 = vmatmul.mubr.f32.gmra.mrb[64].mxu0 %v2250_v32  ;;  %13524 = vmatprep.subr.bf16.mxu1 %v23608_v36  ;;  %v3318_v32 = vld [vmem:[#allocation2 + $0x6f] sm:$0xff] }
 0x556   :  { %11416 = vmatprep.mubr.msk.f32.mxu0 %vm14817_vm0, %v19300_v12 }
 0x557   :  { %12558 = vmatmul.mubr.f32.gmra.mrb[160].mxu1 %v5899_v19  ;;  %v13426_v19 = vpack.c.bf16 %v4037_v15, %v4036_v11  ;;  %v3337_v11 = vld [vmem:[#allocation2 + $0x107] sm:$0xff] }
 0x558   :  { %12560 = vmatprep.mubr.msk.f32.mxu1 %vm14817_vm0, %v19300_v12  ;;  %13526 = vmatpush3.bf16.msra.mxu1 %v13525_v38  ;;  %v3321_v38 = vld [vmem:[#allocation2 + $0x87] sm:$0xff] }
 0x559   :  { %11417 = vmatmul.mubr.f32.gmra.mrb[66].mxu0 %v2251_v28  ;;  %13527 = vmatprep.subr.bf16.mxu1 %v23608_v36  ;;  %v5915_v28 = vld [vmem:[#allocation2 + $0xb9] sm:$0xff]  ;;  %v5932_v15 = vld [vmem:[#allocation2 + $0x141] sm:$0xff] }
 0x55a   :  { %11451 = vmatprep.mubr.msk.f32.mxu0 %vm14817_vm0, %v19300_v12 }
 0x55b   :  { %12561 = vmatmul.mubr.f32.gmra.mrb[0].mxu1 %v5900_v44  ;;  %v6636_v44 = vld [vmem:[%s22737_s6 + $0x3d0] sm:$0xff] }
 0x55c   :  { %12563 = vmatprep.mubr.msk.f32.mxu1 %vm14817_vm0, %v19300_v12  ;;  %13529 = vmatpush3.bf16.msra.mxu1 %v13528_v59  ;;  %v3322_v59 = vld [vmem:[#allocation2 + $0x8f] sm:$0xff] }
 0x55d   :  { %11452 = vmatmul.mubr.f32.vlgmr.msra.gmra.mrb[162].mxu0 %v3305_v8  ;;  %13530 = vmatprep.subr.bf16.mxu1 %v23608_v36  ;;  %v5916_v8 = vld [vmem:[#allocation2 + $0xc1] sm:$0xff] }
 0x55e   :  { %11454 = vmatprep.mubr.msk.f32.mxu0 %vm14817_vm0, %v19300_v12  ;;  %13424 = vmatpush3.bf16.msra.mxu0 %v13423_v14  ;;  %v5923_v14 = vld [vmem:[#allocation2 + $0xf9] sm:$0xff] }
 0x55f   :  { %12564 = vmatmul.mubr.f32.gmra.mrb[2].mxu1 %v5901_v51  ;;  %13425 = vmatprep.subr.bf16.mxu0 %v23608_v36  ;;  %v6637_v51 = vld [vmem:[%s22737_s6 + $0x3d8] sm:$0xff] }
 0x560   :  { %12566 = vmatprep.mubr.msk.f32.mxu1 %vm14817_vm0, %v19300_v12  ;;  %13532 = vmatpush3.bf16.msra.mxu1 %v13531_v33  ;;  %v3331_v33 = vld [vmem:[#allocation2 + $0xd7] sm:$0xff] }
 0x561   :  { %11455 = vmatmul.mubr.f32.gmra.mrb[164].mxu0 %v3306_v60  ;;  %13533 = vmatprep.subr.bf16.mxu1 %v23608_v36  ;;  %v5917_v60 = vld [vmem:[#allocation2 + $0xc9] sm:$0xff] }
 0x562   :  { %11457 = vmatprep.mubr.msk.f32.mxu0 %vm14817_vm0, %v19300_v12  ;;  %13427 = vmatpush3.bf16.msra.mxu0 %v13426_v19  ;;  %v5933_v19 = vld [vmem:[#allocation2 + $0x149] sm:$0xff] }
 0x563   :  { %12567 = vmatmul.mubr.f32.gmra.mrb[4].mxu1 %v5902_v48  ;;  %13428 = vmatprep.subr.bf16.mxu0 %v23608_v36  ;;  %v3323_v48 = vld [vmem:[#allocation2 + $0x97] sm:$0xff] }
 0x564   :  { %12569 = vmatprep.mubr.msk.f32.mxu1 %vm14817_vm0, %v19300_v12 }
 0x565   :  { %11458 = vmatmul.mubr.f32.gmra.mrb[166].mxu0 %v3307_v41  ;;  %v13534_v41 = vpack.c.bf16 %v6637_v51, %v6636_v44  ;;  %v3340_v44 = vld [vmem:[#allocation2 + $0x11f] sm:$0xff] }
 0x566   :  { %11460 = vmatprep.mubr.msk.f32.mxu0 %vm14817_vm0, %v19300_v12  ;;  %v5935_v51 = vld [vmem:[#allocation2 + $0x159] sm:$0xff] }
 0x567   :  { %12570 = vmatmul.mubr.f32.gmra.mrb[6].mxu1 %v5903_v21  ;;  %v3324_v21 = vld [vmem:[#allocation2 + $0x9f] sm:$0xff] }
 0x568   :  { %12572 = vmatprep.mubr.msk.f32.mxu1 %vm14817_vm0, %v19300_v12  ;;  %13535 = vmatpush3.bf16.msra.mxu1 %v13534_v41  ;;  %v3341_v41 = vld [vmem:[#allocation2 + $0x127] sm:$0xff] }
 0x569   :  { %11461 = vmatmul.mubr.f32.gmra.mrb[168].mxu0 %v3308_v63  ;;  %v5918_v63 = vld [vmem:[#allocation2 + $0xd1] sm:$0xff]  ;;  %13536 = vmatprep.subr.bf16.mxu1 %v23608_v36 }
 0x56a   :  { %11463 = vmatprep.mubr.msk.f32.mxu0 %vm14817_vm0, %v19300_v12 }
 0x56b   :  { %12573 = vmatmul.mubr.f32.gmra.mrb[8].mxu1 %v5904_v34  ;;  %v3325_v34 = vld [vmem:[#allocation2 + $0xa7] sm:$0xff] }
 0x56c   :  { %12575 = vmatprep.mubr.msk.f32.mxu1 %vm14817_vm0, %v19300_v12 }
 0x56d   :  { %11464 = vmatmul.mubr.f32.gmra.mrb[170].mxu0 %v3309_v57  ;;  %v5919_v57 = vld [vmem:[#allocation2 + $0xd9] sm:$0xff] }
 0x56e   :  { %11466 = vmatprep.mubr.msk.f32.mxu0 %vm14817_vm0, %v19300_v12 }
 0x56f   :  { %12576 = vmatmul.mubr.f32.gmra.mrb[10].mxu1 %v5905_v17  ;;  %v3326_v17 = vld [vmem:[#allocation2 + $0xaf] sm:$0xff] }
 0x570   :  { %12578 = vmatprep.mubr.msk.f32.mxu1 %vm14817_vm0, %v19300_v12 }
 0x571   :  { %11467 = vmatmul.mubr.f32.gmra.mrb[172].mxu0 %v3310_v23  ;;  %v5920_v23 = vld [vmem:[#allocation2 + $0xe1] sm:$0xff] }
 0x572   :  { %11469 = vmatprep.mubr.msk.f32.mxu0 %vm14817_vm0, %v19300_v12 }
 0x573   :  { %12579 = vmatmul.mubr.f32.gmra.mrb[12].mxu1 %v5906_v18  ;;  %v3328_v18 = vld [vmem:[#allocation2 + $0xbf] sm:$0xff] }
 0x574   :  { %12581 = vmatprep.mubr.msk.f32.mxu1 %vm14817_vm0, %v19300_v12 }
 0x575   :  { %11470 = vmatmul.mubr.f32.gmra.mrb[174].mxu0 %v3311_v45  ;;  %v5921_v45 = vld [vmem:[#allocation2 + $0xe9] sm:$0xff] }
 0x576   :  { %11472 = vmatprep.mubr.msk.f32.mxu0 %vm14817_vm0, %v19300_v12 }
 0x577   :  { %12582 = vmatmul.mubr.f32.gmra.mrb[14].mxu1 %v5907_v55  ;;  %v5925_v55 = vld [vmem:[#allocation2 + $0x109] sm:$0xff] }
 0x578   :  { %12584 = vmatprep.mubr.msk.f32.mxu1 %vm14817_vm0, %v19300_v12 }
 0x579   :  { %11473 = vmatmul.mubr.f32.gmra.mrb[176].mxu0 %v3312_v47  ;;  %v3329_v47 = vld [vmem:[#allocation2 + $0xc7] sm:$0xff] }
 0x57a   :  { %11475 = vmatprep.mubr.msk.f32.mxu0 %vm14817_vm0, %v19300_v12 }
 0x57b   :  { %12585 = vmatmul.mubr.f32.gmra.mrb[16].mxu1 %v5908_v29  ;;  %v4039_v29 = vld [vmem:[%s22737_s6 + $0x1a8] sm:$0xff] }
 0x57c   :  { %12587 = vmatprep.mubr.msk.f32.mxu1 %vm14817_vm0, %v19300_v12 }
 0x57d   :  { %11476 = vmatmul.mubr.f32.gmra.mrb[178].mxu0 %v3313_v26  ;;  %v4038_v26 = vld [vmem:[%s22737_s6 + $0x1a0] sm:$0xff] }
 0x57e   :  { %11478 = vmatprep.mubr.msk.f32.mxu0 %vm14817_vm0, %v19300_v12 }
 0x57f   :  { %12588 = vmatmul.mubr.f32.gmra.mrb[18].mxu1 %v5909_v42  ;;  %v13429_v42 = vpack.c.bf16 %v4039_v29, %v4038_v26  ;;  %v5941_v26 = vld [vmem:[#allocation2 + $0x189] sm:$0xff]  ;;  %v3347_v29 = vld [vmem:[#allocation2 + $0x157] sm:$0xff] }
 0x580   :  { %12590 = vmatprep.mubr.msk.f32.mxu1 %vm14817_vm0, %v19300_v12 }
 0x581   :  { %11479 = vmatmul.mubr.f32.gmra.mrb[180].mxu0 %v3314_v4  ;;  %v5926_v4 = vld [vmem:[#allocation2 + $0x111] sm:$0xff] }
 0x582   :  { %11481 = vmatprep.mubr.msk.f32.mxu0 %vm14817_vm0, %v19300_v12  ;;  %13430 = vmatpush3.bf16.msra.mxu0 %v13429_v42  ;;  %v3348_v42 = vld [vmem:[#allocation2 + $0x15f] sm:$0xff] }
 0x583   :  { %12591 = vmatmul.mubr.f32.gmra.mrb[20].mxu1 %v5910_v35  ;;  %13431 = vmatprep.subr.bf16.mxu0 %v23608_v36  ;;  %v5927_v35 = vld [vmem:[#allocation2 + $0x119] sm:$0xff] }
 0x584   :  { %12593 = vmatprep.mubr.msk.f32.mxu1 %vm14817_vm0, %v19300_v12 }
 0x585   :  { %11482 = vmatmul.mubr.f32.gmra.mrb[182].mxu0 %v3315_v54  ;;  %v3332_v54 = vld [vmem:[#allocation2 + $0xdf] sm:$0xff] }
 0x586   :  { %11484 = vmatprep.mubr.msk.f32.mxu0 %vm14817_vm0, %v19300_v12 }
 0x587   :  { %12594 = vmatmul.mubr.f32.gmra.mrb[22].mxu1 %v5911_v0  ;;  %v6639_v0 = vld [vmem:[%s22737_s6 + $0x3e8] sm:$0xff] }
 0x588   :  { %12596 = vmatprep.mubr.msk.f32.mxu1 %vm14817_vm0, %v19300_v12 }
 0x589   :  { %11485 = vmatmul.mubr.f32.gmra.mrb[184].mxu0 %v3316_v31  ;;  %v6638_v31 = vld [vmem:[%s22737_s6 + $0x3e0] sm:$0xff] }
 0x58a   :  { %11487 = vmatprep.mubr.msk.f32.mxu0 %vm14817_vm0, %v19300_v12 }
 0x58b   :  { %12597 = vmatmul.mubr.f32.gmra.mrb[24].mxu1 %v5912_v40  ;;  %v3333_v40 = vld [vmem:[#allocation2 + $0xe7] sm:$0xff] }
 0x58c   :  { %12599 = vmatprep.mubr.msk.f32.mxu1 %vm14817_vm0, %v19300_v12 }
 0x58d   :  { %11488 = vmatmul.mubr.f32.gmra.mrb[186].mxu0 %v3317_v1  ;;  %v13537_v1 = vpack.c.bf16 %v6639_v0, %v6638_v31  ;;  %v3350_v31 = vld [vmem:[#allocation2 + $0x16f] sm:$0xff]  ;;  %v4042_v0 = vld [vmem:[%s22737_s6 + $0x1c0] sm:$0xff] }
 0x58e   :  { %11490 = vmatprep.mubr.msk.f32.mxu0 %vm14817_vm0, %v19300_v12 }
 0x58f   :  { %12600 = vmatmul.mubr.f32.gmra.mrb[26].mxu1 %v5913_v6  ;;  %v3334_v6 = vld [vmem:[#allocation2 + $0xef] sm:$0xff] }
 0x590   :  { %12602 = vmatprep.mubr.msk.f32.mxu1 %vm14817_vm0, %v19300_v12  ;;  %13538 = vmatpush3.bf16.msra.mxu1 %v13537_v1  ;;  %v4043_v1 = vld [vmem:[%s22737_s6 + $0x1c8] sm:$0xff] }
 0x591   :  { %11491 = vmatmul.mubr.f32.gmra.mrb[188].mxu0 %v3318_v32  ;;  %v5928_v32 = vld [vmem:[#allocation2 + $0x121] sm:$0xff]  ;;  %13539 = vmatprep.subr.bf16.mxu1 %v23608_v36 }
 0x592   :  { %11493 = vmatprep.mubr.msk.f32.mxu0 %vm14817_vm0, %v19300_v12 }
 0x593   :  { %12603 = vmatmul.mubr.f32.gmra.mrb[28].mxu1 %v5914_v39  ;;  %v3335_v39 = vld [vmem:[#allocation2 + $0xf7] sm:$0xff] }
 0x594   :  { %12605 = vmatprep.mubr.msk.f32.mxu1 %vm14817_vm0, %v19300_v12 }
 0x595   :  { %11494 = vmatmul.mubr.f32.gmra.mrb[190].mxu0 %v3319_v50  ;;  %v5929_v50 = vld [vmem:[#allocation2 + $0x129] sm:$0xff] }
 0x596   :  { %11496 = vmatprep.mubr.msk.f32.mxu0 %vm14817_vm0, %v19300_v12 }
 0x597   :  { %12606 = vmatmul.mubr.f32.gmra.mrb[30].mxu1 %v5915_v28  ;;  %v3336_v28 = vld [vmem:[#allocation2 + $0xff] sm:$0xff] }
 0x598   :  { %12608 = vmatprep.mubr.msk.f32.mxu1 %vm14817_vm0, %v19300_v12 }
 0x599   :  { %11497 = vmatmul.mubr.f32.gmra.mrb[192].mxu0 %v3320_v30  ;;  %v5930_v30 = vld [vmem:[#allocation2 + $0x131] sm:$0xff] }
 0x59a   :  { %11499 = vmatprep.mubr.msk.f32.mxu0 %vm14817_vm0, %v19300_v12 }
 0x59b   :  { %12609 = vmatmul.mubr.f32.gmra.mrb[32].mxu1 %v5916_v8  ;;  %v3338_v8 = vld [vmem:[#allocation2 + $0x10f] sm:$0xff] }
 0x59c   :  { %12611 = vmatprep.mubr.msk.f32.mxu1 %vm14817_vm0, %v19300_v12 }
 0x59d   :  { %11500 = vmatmul.mubr.f32.gmra.mrb[194].mxu0 %v3321_v38  ;;  %v5931_v38 = vld [vmem:[#allocation2 + $0x139] sm:$0xff] }
 0x59e   :  { %11502 = vmatprep.mubr.msk.f32.mxu0 %vm14817_vm0, %v19300_v12 }
 0x59f   :  { %12612 = vmatmul.mubr.f32.gmra.mrb[34].mxu1 %v5917_v60  ;;  %v5934_v60 = vld [vmem:[#allocation2 + $0x151] sm:$0xff] }
 0x5a0   :  { %12614 = vmatprep.mubr.msk.f32.mxu1 %vm14817_vm0, %v19300_v12 }
 0x5a1   :  { %11503 = vmatmul.mubr.f32.gmra.mrb[196].mxu0 %v3322_v59  ;;  %v3339_v59 = vld [vmem:[#allocation2 + $0x117] sm:$0xff] }
 0x5a2   :  { %11505 = vmatprep.mubr.msk.f32.mxu0 %vm14817_vm0, %v19300_v12 }
 0x5a3   :  { %12615 = vmatmul.mubr.f32.gmra.mrb[36].mxu1 %v5918_v63  ;;  %v4041_v63 = vld [vmem:[%s22737_s6 + $0x1b8] sm:$0xff] }
 0x5a4   :  { %12617 = vmatprep.mubr.msk.f32.mxu1 %vm14817_vm0, %v19300_v12 }
 0x5a5   :  { %11506 = vmatmul.mubr.f32.gmra.mrb[198].mxu0 %v3323_v48  ;;  %v4040_v48 = vld [vmem:[%s22737_s6 + $0x1b0] sm:$0xff] }
 0x5a6   :  { %11508 = vmatprep.mubr.msk.f32.mxu0 %vm14817_vm0, %v19300_v12 }
 0x5a7   :  { %12618 = vmatmul.mubr.f32.gmra.mrb[38].mxu1 %v5919_v57  ;;  %v13432_v57 = vpack.c.bf16 %v4041_v63, %v4040_v48  ;;  %v3354_v48 = vld [vmem:[#allocation2 + $0x18f] sm:$0xff] }
 0x5a8   :  { %12620 = vmatprep.mubr.msk.f32.mxu1 %vm14817_vm0, %v19300_v12  ;;  %v5949_v63 = vld [vmem:[#allocation2 + $0x1c9] sm:$0xff] }
 0x5a9   :  { %11509 = vmatmul.mubr.f32.gmra.mrb[200].mxu0 %v3324_v21  ;;  %v5936_v21 = vld [vmem:[#allocation2 + $0x161] sm:$0xff] }
 0x5aa   :  { %11511 = vmatprep.mubr.msk.f32.mxu0 %vm14817_vm0, %v19300_v12  ;;  %13433 = vmatpush3.bf16.msra.mxu0 %v13432_v57  ;;  %v5950_v57 = vld [vmem:[#allocation2 + $0x1d1] sm:$0xff] }
 0x5ab   :  { %12621 = vmatmul.mubr.f32.gmra.mrb[40].mxu1 %v5920_v23  ;;  %13434 = vmatprep.subr.bf16.mxu0 %v23608_v36  ;;  %v5937_v23 = vld [vmem:[#allocation2 + $0x169] sm:$0xff] }
 0x5ac   :  { %12623 = vmatprep.mubr.msk.f32.mxu1 %vm14817_vm0, %v19300_v12 }
 0x5ad   :  { %11512 = vmatmul.mubr.f32.gmra.mrb[202].mxu0 %v3325_v34  ;;  %v3342_v34 = vld [vmem:[#allocation2 + $0x12f] sm:$0xff] }
 0x5ae   :  { %11514 = vmatprep.mubr.msk.f32.mxu0 %vm14817_vm0, %v19300_v12 }
 0x5af   :  { %12624 = vmatmul.mubr.f32.gmra.mrb[42].mxu1 %v5921_v45  ;;  %v6640_v45 = vld [vmem:[%s22737_s6 + $0x3f0] sm:$0xff] }
 0x5b0   :  { %12626 = vmatprep.mubr.msk.f32.mxu1 %vm14817_vm0, %v19300_v12 }
 0x5b1   :  { %11515 = vmatmul.mubr.f32.gmra.mrb[204].mxu0 %v3326_v17  ;;  %v3343_v17 = vld [vmem:[#allocation2 + $0x137] sm:$0xff] }
 0x5b2   :  { %11517 = vmatprep.mubr.msk.f32.mxu0 %vm14817_vm0, %v19300_v12 }
 0x5b3   :  { %12627 = vmatmul.mubr.f32.gmra.mrb[44].mxu1 %v5922_v3  ;;  %v5938_v3 = vld [vmem:[#allocation2 + $0x171] sm:$0xff] }
 0x5b4   :  { %12629 = vmatprep.mubr.msk.f32.mxu1 %vm14817_vm0, %v19300_v12 }
 0x5b5   :  { %11518 = vmatmul.mubr.f32.gmra.mrb[206].mxu0 %v3327_v61  ;;  %v6641_v61 = vld [vmem:[%s22737_s6 + $0x3f8] sm:$0xff] }
 0x5b6   :  { %11520 = vmatprep.mubr.msk.f32.mxu0 %vm14817_vm0, %v19300_v12 }
 0x5b7   :  { %12630 = vmatmul.mubr.f32.gmra.mrb[46].mxu1 %v5923_v14  ;;  %v3344_v14 = vld [vmem:[#allocation2 + $0x13f] sm:$0xff] }
 0x5b8   :  { %12632 = vmatprep.mubr.msk.f32.mxu1 %vm14817_vm0, %v19300_v12 }
 0x5b9   :  { %11521 = vmatmul.mubr.f32.gmra.mrb[208].mxu0 %v3328_v18  ;;  %v13540_v18 = vpack.c.bf16 %v6641_v61, %v6640_v45  ;;  %v5952_v45 = vld [vmem:[#allocation2 + $0x1e1] sm:$0xff]  ;;  %v3358_v61 = vld [vmem:[#allocation2 + $0x1af] sm:$0xff] }
 0x5ba   :  { %11523 = vmatprep.mubr.msk.f32.mxu0 %vm14817_vm0, %v19300_v12 }
 0x5bb   :  { %12633 = vmatmul.mubr.f32.gmra.mrb[48].mxu1 %v5924_v62  ;;  %v3345_v62 = vld [vmem:[#allocation2 + $0x147] sm:$0xff] }
 0x5bc   :  { %12635 = vmatprep.mubr.msk.f32.mxu1 %vm14817_vm0, %v19300_v12  ;;  %13541 = vmatpush3.bf16.msra.mxu1 %v13540_v18  ;;  %v3359_v18 = vld [vmem:[#allocation2 + $0x1b7] sm:$0xff] }
 0x5bd   :  { %11524 = vmatmul.mubr.f32.gmra.mrb[210].mxu0 %v3329_v47  ;;  %13542 = vmatprep.subr.bf16.mxu1 %v23608_v36  ;;  %v5939_v47 = vld [vmem:[#allocation2 + $0x179] sm:$0xff] }
 0x5be   :  { %11526 = vmatprep.mubr.msk.f32.mxu0 %vm14817_vm0, %v19300_v12 }
 0x5bf   :  { %12636 = vmatmul.mubr.f32.gmra.mrb[50].mxu1 %v5925_v55  ;;  %v3346_v55 = vld [vmem:[#allocation2 + $0x14f] sm:$0xff] }
 0x5c0   :  { %12638 = vmatprep.mubr.msk.f32.mxu1 %vm14817_vm0, %v19300_v12 }
 0x5c1   :  { %11527 = vmatmul.mubr.f32.gmra.mrb[212].mxu0 %v3330_v5  ;;  %v5940_v5 = vld [vmem:[#allocation2 + $0x181] sm:$0xff] }
 0x5c2   :  { %11529 = vmatprep.mubr.msk.f32.mxu0 %vm14817_vm0, %v19300_v12 }
 0x5c3   :  { %12639 = vmatmul.mubr.f32.gmra.mrb[52].mxu1 %v5926_v4  ;;  %v5942_v4 = vld [vmem:[#allocation2 + $0x191] sm:$0xff] }
 0x5c4   :  { %12641 = vmatprep.mubr.msk.f32.mxu1 %vm14817_vm0, %v19300_v12 }
 0x5c5   :  { %11530 = vmatmul.mubr.f32.gmra.mrb[214].mxu0 %v3331_v33  ;;  %v19692_v33 = vld [vmem:[#allocation2] sm:$0xff] }
 0x5c6   :  { %11532 = vmatprep.mubr.msk.f32.mxu0 %vm14817_vm0, %v19300_v12 }
 0x5c7   :  { %12642 = vmatmul.mubr.f32.gmra.mrb[54].mxu1 %v5927_v35  ;;  %v5944_v35 = vld [vmem:[#allocation2 + $0x1a1] sm:$0xff] }
 0x5c8   :  { %12644 = vmatprep.mubr.msk.f32.mxu1 %vm14817_vm0, %v19300_v12 }
 0x5c9   :  { %11533 = vmatmul.mubr.f32.gmra.mrb[216].mxu0 %v3332_v54  ;;  %v3349_v54 = vld [vmem:[#allocation2 + $0x167] sm:$0xff] }
 0x5ca   :  { %11535 = vmatprep.mubr.msk.f32.mxu0 %vm14817_vm0, %v19300_v12 }
 0x5cb   :  { %12645 = vmatmul.mubr.f32.gmra.mrb[56].mxu1 %v5928_v32  ;;  %v13435_v32 = vpack.c.bf16 %v4043_v1, %v4042_v0  ;;  %v3366_v0 = vld [vmem:[#allocation2 + $0x1ef] sm:$0xff] }
 0x5cc   :  { %12647 = vmatprep.mubr.msk.f32.mxu1 %vm14817_vm0, %v19300_v12  ;;  %v5961_v1 = vld [vmem:[#allocation2 + $0x229] sm:$0xff] }
 0x5cd   :  { %11536 = vmatmul.mubr.f32.gmra.mrb[218].mxu0 %v3333_v40  ;;  %v5945_v40 = vld [vmem:[#allocation2 + $0x1a9] sm:$0xff] }
 0x5ce   :  { %11538 = vmatprep.mubr.msk.f32.mxu0 %vm14817_vm0, %v19300_v12  ;;  %13436 = vmatpush3.bf16.msra.mxu0 %v13435_v32  ;;  %v5962_v32 = vld [vmem:[#allocation2 + $0x231] sm:$0xff] }
 0x5cf   :  { %12648 = vmatmul.mubr.f32.gmra.mrb[58].mxu1 %v5929_v50  ;;  %13437 = vmatprep.subr.bf16.mxu0 %v23608_v36  ;;  %v4044_v50 = vld [vmem:[%s22737_s6 + $0x1d0] sm:$0xff] }
 0x5d0   :  { %12650 = vmatprep.mubr.msk.f32.mxu1 %vm14817_vm0, %v19300_v12 }
 0x5d1   :  { %11539 = vmatmul.mubr.f32.gmra.mrb[220].mxu0 %v3334_v6  ;;  %v3351_v6 = vld [vmem:[#allocation2 + $0x177] sm:$0xff] }
 0x5d2   :  { %11541 = vmatprep.mubr.msk.f32.mxu0 %vm14817_vm0, %v19300_v12 }
 0x5d3   :  { %12651 = vmatmul.mubr.f32.gmra.mrb[60].mxu1 %v5930_v30  ;;  %v5946_v30 = vld [vmem:[#allocation2 + $0x1b1] sm:$0xff] }
 0x5d4   :  { %12653 = vmatprep.mubr.msk.f32.mxu1 %vm14817_vm0, %v19300_v12 }
 0x5d5   :  { %11542 = vmatmul.mubr.f32.gmra.mrb[222].mxu0 %v3335_v39  ;;  %v4045_v39 = vld [vmem:[%s22737_s6 + $0x1d8] sm:$0xff] }
 0x5d6   :  { %11544 = vmatprep.mubr.msk.f32.mxu0 %vm14817_vm0, %v19300_v12 }
 0x5d7   :  { %12654 = vmatmul.mubr.f32.gmra.mrb[62].mxu1 %v5931_v38  ;;  %v3352_v38 = vld [vmem:[#allocation2 + $0x17f] sm:$0xff] }
 0x5d8   :  { %12656 = vmatprep.mubr.msk.f32.mxu1 %vm14817_vm0, %v19300_v12 }
 0x5d9   :  { %11545 = vmatmul.mubr.f32.gmra.mrb[224].mxu0 %v3336_v28  ;;  %v13438_v28 = vpack.c.bf16 %v4045_v39, %v4044_v50  ;;  %v5963_v50 = vld [vmem:[#allocation2 + $0x239] sm:$0xff]  ;;  %v3369_v39 = vld [vmem:[#allocation2 + $0x207] sm:$0xff] }
 0x5da   :  { %11547 = vmatprep.mubr.msk.f32.mxu0 %vm14817_vm0, %v19300_v12 }
 0x5db   :  { %12657 = vmatmul.mubr.f32.gmra.mrb[64].mxu1 %v5932_v15  ;;  %13439 = vmatpush3.bf16.msra.mxu0 %v13438_v28  ;;  %v4047_v15 = vld [vmem:[%s22737_s6 + $0x1e8] sm:$0xff] }
 0x5dc   :  { %12659 = vmatprep.mubr.msk.f32.mxu1 %vm14817_vm0, %v19300_v12  ;;  %13440 = vmatprep.subr.bf16.mxu0 %v23608_v36  ;;  %v3370_v28 = vld [vmem:[#allocation2 + $0x20f] sm:$0xff] }
 0x5dd   :  { %11548 = vmatmul.mubr.f32.gmra.mrb[226].mxu0 %v3337_v11  ;;  %v4046_v11 = vld [vmem:[%s22737_s6 + $0x1e0] sm:$0xff] }
 0x5de   :  { %11550 = vmatprep.mubr.msk.f32.mxu0 %vm14817_vm0, %v19300_v12 }
 0x5df   :  { %12660 = vmatmul.mubr.f32.gmra.mrb[66].mxu1 %v5933_v19  ;;  %v13441_v19 = vpack.c.bf16 %v4047_v15, %v4046_v11  ;;  %v3371_v11 = vld [vmem:[#allocation2 + $0x217] sm:$0xff] }
 0x5e0   :  { %12662 = vmatprep.mubr.msk.f32.mxu1 %vm14817_vm0, %v19300_v12  ;;  %v5966_v15 = vld [vmem:[#allocation2 + $0x251] sm:$0xff] }
 0x5e1   :  { %11551 = vmatmul.mubr.f32.gmra.mrb[228].mxu0 %v3338_v8  ;;  %v5947_v8 = vld [vmem:[#allocation2 + $0x1b9] sm:$0xff] }
 0x5e2   :  { %11553 = vmatprep.mubr.msk.f32.mxu0 %vm14817_vm0, %v19300_v12  ;;  %13442 = vmatpush3.bf16.msra.mxu0 %v13441_v19  ;;  %v5967_v19 = vld [vmem:[#allocation2 + $0x259] sm:$0xff] }
 0x5e3   :  { %12663 = vmatmul.mubr.f32.gmra.mrb[68].mxu1 %v5934_v60  ;;  %13443 = vmatprep.subr.bf16.mxu0 %v23608_v36  ;;  %v4048_v60 = vld [vmem:[%s22737_s6 + $0x1f0] sm:$0xff] }
 0x5e4   :  { %12665 = vmatprep.mubr.msk.f32.mxu1 %vm14817_vm0, %v19300_v12 }
 0x5e5   :  { %11554 = vmatmul.mubr.f32.gmra.mrb[230].mxu0 %v3339_v59  ;;  %v3353_v59 = vld [vmem:[#allocation2 + $0x187] sm:$0xff] }
 0x5e6   :  { %11556 = vmatprep.mubr.msk.f32.mxu0 %vm14817_vm0, %v19300_v12 }
 0x5e7   :  { %12666 = vmatmul.mubr.f32.gmra.mrb[70].mxu1 %v5935_v51  ;;  %v4049_v51 = vld [vmem:[%s22737_s6 + $0x1f8] sm:$0xff] }
 0x5e8   :  { %12668 = vmatprep.mubr.msk.f32.mxu1 %vm14817_vm0, %v19300_v12 }
 0x5e9   :  { %11557 = vmatmul.mubr.f32.gmra.mrb[232].mxu0 %v3340_v44  ;;  %v5948_v44 = vld [vmem:[#allocation2 + $0x1c1] sm:$0xff] }
 0x5ea   :  { %11559 = vmatprep.mubr.msk.f32.mxu0 %vm14817_vm0, %v19300_v12 }
 0x5eb   :  { %12669 = vmatmul.mubr.f32.gmra.mrb[72].mxu1 %v5936_v21  ;;  %v3355_v21 = vld [vmem:[#allocation2 + $0x197] sm:$0xff] }
 0x5ec   :  { %12671 = vmatprep.mubr.msk.f32.mxu1 %vm14817_vm0, %v19300_v12 }
 0x5ed   :  { %11560 = vmatmul.mubr.f32.gmra.mrb[234].mxu0 %v3341_v41  ;;  %v13444_v41 = vpack.c.bf16 %v4049_v51, %v4048_v60  ;;  %v5968_v60 = vld [vmem:[#allocation2 + $0x261] sm:$0xff]  ;;  %v5969_v51 = vld [vmem:[#allocation2 + $0x269] sm:$0xff] }
 0x5ee   :  { %11562 = vmatprep.mubr.msk.f32.mxu0 %vm14817_vm0, %v19300_v12 }
 0x5ef   :  { %12672 = vmatmul.mubr.f32.gmra.mrb[74].mxu1 %v5937_v23  ;;  %13445 = vmatpush3.bf16.msra.mxu0 %v13444_v41  ;;  %v5951_v23 = vld [vmem:[#allocation2 + $0x1d9] sm:$0xff] }
 0x5f0   :  { %12674 = vmatprep.mubr.msk.f32.mxu1 %vm14817_vm0, %v19300_v12  ;;  %13446 = vmatprep.subr.bf16.mxu0 %v23608_v36  ;;  %v3375_v41 = vld [vmem:[#allocation2 + $0x237] sm:$0xff] }
 0x5f1   :  { %11563 = vmatmul.mubr.f32.gmra.mrb[236].mxu0 %v3342_v34  ;;  %v3356_v34 = vld [vmem:[#allocation2 + $0x19f] sm:$0xff] }
 0x5f2   :  { %11565 = vmatprep.mubr.msk.f32.mxu0 %vm14817_vm0, %v19300_v12 }
 0x5f3   :  { %12675 = vmatmul.mubr.f32.gmra.mrb[76].mxu1 %v5938_v3  ;;  %v5953_v3 = vld [vmem:[#allocation2 + $0x1e9] sm:$0xff] }
 0x5f4   :  { %12677 = vmatprep.mubr.msk.f32.mxu1 %vm14817_vm0, %v19300_v12 }
 0x5f5   :  { %11566 = vmatmul.mubr.f32.gmra.mrb[238].mxu0 %v3343_v17  ;;  %v3357_v17 = vld [vmem:[#allocation2 + $0x1a7] sm:$0xff] }
 0x5f6   :  { %11568 = vmatprep.mubr.msk.f32.mxu0 %vm14817_vm0, %v19300_v12 }
 0x5f7   :  { %12678 = vmatmul.mubr.f32.gmra.mrb[78].mxu1 %v5939_v47  ;;  %v3360_v47 = vld [vmem:[#allocation2 + $0x1bf] sm:$0xff] }
 0x5f8   :  { %12680 = vmatprep.mubr.msk.f32.mxu1 %vm14817_vm0, %v19300_v12 }
 0x5f9   :  { %11569 = vmatmul.mubr.f32.gmra.mrb[240].mxu0 %v3344_v14  ;;  %v5954_v14 = vld [vmem:[#allocation2 + $0x1f1] sm:$0xff] }
 0x5fa   :  { %11571 = vmatprep.mubr.msk.f32.mxu0 %vm14817_vm0, %v19300_v12 }
 0x5fb   :  { %12681 = vmatmul.mubr.f32.gmra.mrb[80].mxu1 %v5940_v5  ;;  %v3361_v5 = vld [vmem:[#allocation2 + $0x1c7] sm:$0xff] }
 0x5fc   :  { %12683 = vmatprep.mubr.msk.f32.mxu1 %vm14817_vm0, %v19300_v12 }
 0x5fd   :  { %11572 = vmatmul.mubr.f32.gmra.mrb[242].mxu0 %v3345_v62  ;;  %v5955_v62 = vld [vmem:[#allocation2 + $0x1f9] sm:$0xff] }
 0x5fe   :  { %11574 = vmatprep.mubr.msk.f32.mxu0 %vm14817_vm0, %v19300_v12  ;;  %v5943_v12 = vld [vmem:[#allocation2 + $0x199] sm:$0xff] }
 0x5ff   :  { %12684 = vmatmul.mubr.f32.gmra.mrb[82].mxu1 %v5941_v26  ;;  %v3362_v26 = vld [vmem:[#allocation2 + $0x1cf] sm:$0xff] }
 0x600   :  { %12686 = vmatprep.mubr.msk.f32.mxu1 %vm14817_vm0, %v19692_v33 }
 0x601   :  { %11575 = vmatmul.mubr.f32.gmra.mrb[244].mxu0 %v3346_v55  ;;  %v5956_v55 = vld [vmem:[#allocation2 + $0x201] sm:$0xff] }
 0x602   :  { %11577 = vmatprep.mubr.msk.f32.mxu0 %vm14817_vm0, %v19692_v33 }
 0x603   :  { %12687 = vmatmul.mubr.f32.gmra.mrb[84].mxu1 %v5942_v4  ;;  %v3363_v4 = vld [vmem:[#allocation2 + $0x1d7] sm:$0xff] }
 0x604   :  { %12689 = vmatprep.mubr.msk.f32.mxu1 %vm14817_vm0, %v19692_v33 }
 0x605   :  { %11578 = vmatmul.mubr.f32.gmra.mrb[246].mxu0 %v3347_v29  ;;  %v5957_v29 = vld [vmem:[#allocation2 + $0x209] sm:$0xff] }
 0x606   :  { %11580 = vmatprep.mubr.msk.f32.mxu0 %vm14817_vm0, %v19692_v33 }
 0x607   :  { %12690 = vmatmul.mubr.f32.gmra.mrb[86].mxu1 %v5943_v12  ;;  %v3364_v12 = vld [vmem:[#allocation2 + $0x1df] sm:$0xff] }
 0x608   :  { %12692 = vmatprep.mubr.msk.f32.mxu1 %vm14817_vm0, %v19692_v33 }
 0x609   :  { %11581 = vmatmul.mubr.f32.gmra.mrb[248].mxu0 %v3348_v42  ;;  %v5958_v42 = vld [vmem:[#allocation2 + $0x211] sm:$0xff] }
 0x60a   :  { %11583 = vmatprep.mubr.msk.f32.mxu0 %vm14817_vm0, %v19692_v33 }
 0x60b   :  { %12693 = vmatmul.mubr.f32.gmra.mrb[88].mxu1 %v5944_v35  ;;  %v3365_v35 = vld [vmem:[#allocation2 + $0x1e7] sm:$0xff] }
 0x60c   :  { %12695 = vmatprep.mubr.msk.f32.mxu1 %vm14817_vm0, %v19692_v33 }
 0x60d   :  { %11584 = vmatmul.mubr.f32.gmra.mrb[250].mxu0 %v3349_v54  ;;  %v5959_v54 = vld [vmem:[#allocation2 + $0x219] sm:$0xff] }
 0x60e   :  { %11586 = vmatprep.mubr.msk.f32.mxu0 %vm14817_vm0, %v19692_v33 }
 0x60f   :  { %12696 = vmatmul.mubr.f32.gmra.mrb[90].mxu1 %v5945_v40  ;;  %v3367_v40 = vld [vmem:[#allocation2 + $0x1f7] sm:$0xff] }
 0x610   :  { %12698 = vmatprep.mubr.msk.f32.mxu1 %vm14817_vm0, %v19692_v33 }
 0x611   :  { %11587 = vmatmul.mubr.f32.gmra.mrb[252].mxu0 %v3350_v31  ;;  %v5960_v31 = vld [vmem:[#allocation2 + $0x221] sm:$0xff] }
 0x612   :  { %11589 = vmatprep.mubr.msk.f32.mxu0 %vm14817_vm0, %v19692_v33 }
 0x613   :  { %12699 = vmatmul.mubr.f32.gmra.mrb[92].mxu1 %v5946_v30  ;;  %v5964_v30 = vld [vmem:[#allocation2 + $0x241] sm:$0xff] }
 0x614   :  { %12701 = vmatprep.mubr.msk.f32.mxu1 %vm14817_vm0, %v19692_v33 }
 0x615   :  { %11590 = vmatmul.mubr.f32.gmra.mrb[254].mxu0 %v3351_v6  ;;  %v3368_v6 = vld [vmem:[#allocation2 + $0x1ff] sm:$0xff] }
 0x616   :  { %11592 = vmatprep.mubr.msk.f32.mxu0 %vm14817_vm0, %v19692_v33 }
 0x617   :  { %12702 = vmatmul.mubr.f32.gmra.mrb[94].mxu1 %v5947_v8  ;;  %v3372_v8 = vld [vmem:[#allocation2 + $0x21f] sm:$0xff] }
 0x618   :  { %12704 = vmatprep.mubr.msk.f32.mxu1 %vm14817_vm0, %v19692_v33 }
 0x619   :  { %11593 = vmatmul.mubr.f32.gmra.mrb[0].mxu0 %v3352_v38  ;;  %v5965_v38 = vld [vmem:[#allocation2 + $0x249] sm:$0xff] }
 0x61a   :  { %11595 = vmatprep.mubr.msk.f32.mxu0 %vm14817_vm0, %v19692_v33 }
 0x61b   :  { %12705 = vmatmul.mubr.f32.gmra.mrb[96].mxu1 %v5948_v44  ;;  %v3374_v44 = vld [vmem:[#allocation2 + $0x22f] sm:$0xff] }
 0x61c   :  { %12707 = vmatprep.mubr.msk.f32.mxu1 %vm14817_vm0, %v19692_v33 }
 0x61d   :  { %11596 = vmatmul.mubr.f32.gmra.mrb[2].mxu0 %v3353_v59  ;;  %v3373_v59 = vld [vmem:[#allocation2 + $0x227] sm:$0xff] }
 0x61e   :  { %11598 = vmatprep.mubr.msk.f32.mxu0 %vm14817_vm0, %v19692_v33 }
 0x61f   :  { %12708 = vmatmul.mubr.f32.gmra.mrb[98].mxu1 %v5949_v63  ;;  %v3376_v63 = vld [vmem:[#allocation2 + $0x23f] sm:$0xff] }
 0x620   :  { %12710 = vmatprep.mubr.msk.f32.mxu1 %vm14817_vm0, %v19692_v33 }
 0x621   :  { %11599 = vmatmul.mubr.f32.gmra.mrb[4].mxu0 %v3354_v48  ;;  %v5970_v48 = vld [vmem:[#allocation2 + $0x271] sm:$0xff] }
 0x622   :  { %11601 = vmatprep.mubr.msk.f32.mxu0 %vm14817_vm0, %v19692_v33 }
 0x623   :  { %12711 = vmatmul.mubr.f32.gmra.mrb[100].mxu1 %v5950_v57  ;;  %v3377_v57 = vld [vmem:[#allocation2 + $0x247] sm:$0xff] }
 0x624   :  { %12713 = vmatprep.mubr.msk.f32.mxu1 %vm14817_vm0, %v19692_v33 }
 0x625   :  { %11602 = vmatmul.mubr.f32.gmra.mrb[6].mxu0 %v3355_v21  ;;  %v5971_v21 = vld [vmem:[#allocation2 + $0x279] sm:$0xff] }
 0x626   :  { %11604 = vmatprep.mubr.msk.f32.mxu0 %vm14817_vm0, %v19692_v33 }
 0x627   :  { %12714 = vmatmul.mubr.f32.gmra.mrb[102].mxu1 %v5951_v23  ;;  %v3378_v23 = vld [vmem:[#allocation2 + $0x24f] sm:$0xff] }
 0x628   :  { %12716 = vmatprep.mubr.msk.f32.mxu1 %vm14817_vm0, %v19692_v33 }
 0x629   :  { %11605 = vmatmul.mubr.f32.gmra.mrb[8].mxu0 %v3356_v34  ;;  %v5972_v34 = vld [vmem:[#allocation2 + $0x281] sm:$0xff] }
 0x62a   :  { %11607 = vmatprep.mubr.msk.f32.mxu0 %vm14817_vm0, %v19692_v33 }
 0x62b   :  { %12717 = vmatmul.mubr.f32.gmra.mrb[104].mxu1 %v5952_v45  ;;  %v3379_v45 = vld [vmem:[#allocation2 + $0x257] sm:$0xff] }
 0x62c   :  { %12719 = vmatprep.mubr.msk.f32.mxu1 %vm14817_vm0, %v19692_v33 }
 0x62d   :  { %11608 = vmatmul.mubr.f32.gmra.mrb[10].mxu0 %v3357_v17  ;;  %v5973_v17 = vld [vmem:[#allocation2 + $0x289] sm:$0xff] }
 0x62e   :  { %11610 = vmatprep.mubr.msk.f32.mxu0 %vm14817_vm0, %v19692_v33 }
 0x62f   :  { %12720 = vmatmul.mubr.f32.gmra.mrb[106].mxu1 %v5953_v3  ;;  %v3380_v3 = vld [vmem:[#allocation2 + $0x25f] sm:$0xff] }
 0x630   :  { %12722 = vmatprep.mubr.msk.f32.mxu1 %vm14817_vm0, %v19692_v33 }
 0x631   :  { %11611 = vmatmul.mubr.f32.gmra.mrb[12].mxu0 %v3358_v61  ;;  %v5974_v61 = vld [vmem:[#allocation2 + $0x291] sm:$0xff] }
 0x632   :  { %11613 = vmatprep.mubr.msk.f32.mxu0 %vm14817_vm0, %v19692_v33 }
 0x633   :  { %12723 = vmatmul.mubr.f32.gmra.mrb[108].mxu1 %v5954_v14  ;;  %v3381_v14 = vld [vmem:[#allocation2 + $0x267] sm:$0xff] }
 0x634   :  { %12725 = vmatprep.mubr.msk.f32.mxu1 %vm14817_vm0, %v19692_v33 }
 0x635   :  { %11614 = vmatmul.mubr.f32.gmra.mrb[14].mxu0 %v3359_v18  ;;  %v5975_v18 = vld [vmem:[#allocation2 + $0x299] sm:$0xff] }
 0x636   :  { %11616 = vmatprep.mubr.msk.f32.mxu0 %vm14817_vm0, %v19692_v33 }
 0x637   :  { %12726 = vmatmul.mubr.f32.gmra.mrb[110].mxu1 %v5955_v62  ;;  %v3382_v62 = vld [vmem:[#allocation2 + $0x26f] sm:$0xff] }
 0x638   :  { %12728 = vmatprep.mubr.msk.f32.mxu1 %vm14817_vm0, %v19692_v33 }
 0x639   :  { %11617 = vmatmul.mubr.f32.gmra.mrb[16].mxu0 %v3360_v47  ;;  %v5976_v47 = vld [vmem:[#allocation2 + $0x2a1] sm:$0xff] }
 0x63a   :  { %11619 = vmatprep.mubr.msk.f32.mxu0 %vm14817_vm0, %v19692_v33 }
 0x63b   :  { %12729 = vmatmul.mubr.f32.gmra.mrb[112].mxu1 %v5956_v55  ;;  %v7274_v55 = vld [vmem:[%s22737_s6 + $0x400] sm:$0xff] }
 0x63c   :  { %12731 = vmatprep.mubr.msk.f32.mxu1 %vm14817_vm0, %v19692_v33 }
 0x63d   :  { %11620 = vmatmul.mubr.f32.gmra.mrb[18].mxu0 %v3361_v5  ;;  %v5977_v5 = vld [vmem:[#allocation2 + $0x2a9] sm:$0xff] }
 0x63e   :  { %11622 = vmatprep.mubr.msk.f32.mxu0 %vm14817_vm0, %v19692_v33 }
 0x63f   :  { %12732 = vmatmul.mubr.f32.gmra.mrb[114].mxu1 %v5957_v29  ;;  %v3383_v29 = vld [vmem:[#allocation2 + $0x277] sm:$0xff] }
 0x640   :  { %12734 = vmatprep.mubr.msk.f32.mxu1 %vm14817_vm0, %v19692_v33 }
 0x641   :  { %11623 = vmatmul.mubr.f32.gmra.mrb[20].mxu0 %v3362_v26  ;;  %v7275_v26 = vld [vmem:[%s22737_s6 + $0x408] sm:$0xff] }
 0x642   :  { %11625 = vmatprep.mubr.msk.f32.mxu0 %vm14817_vm0, %v19692_v33 }
 0x643   :  { %12735 = vmatmul.mubr.f32.gmra.mrb[116].mxu1 %v5958_v42  ;;  %v7276_v42 = vld [vmem:[%s22737_s6 + $0x410] sm:$0xff] }
 0x644   :  { %12737 = vmatprep.mubr.msk.f32.mxu1 %vm14817_vm0, %v19692_v33 }
 0x645   :  { %11626 = vmatmul.mubr.f32.gmra.mrb[22].mxu0 %v3363_v4  ;;  %v13543_v4 = vpack.c.bf16 %v7275_v26, %v7274_v55  ;;  %v23901_v26 = vld [vmem:[#allocation110_spill] sm:$0xff] }
 0x646   :  { %11628 = vmatprep.mubr.msk.f32.mxu0 %vm14817_vm0, %v19692_v33 }
 0x647   :  { %12738 = vmatmul.mubr.f32.gmra.mrb[118].mxu1 %v5959_v54  ;;  %v6545_v54 = vld [vmem:[#allocation2 + $0x2a] sm:$0xff] }
 0x648   :  { %12740 = vmatprep.mubr.msk.f32.mxu1 %vm14817_vm0, %v19692_v33 }
 0x649   :  { %11629 = vmatmul.mubr.f32.gmra.mrb[24].mxu0 %v3364_v12  ;;  %v7277_v12 = vld [vmem:[%s22737_s6 + $0x418] sm:$0xff] }
 0x64a   :  { %11631 = vmatprep.mubr.msk.f32.mxu0 %vm14817_vm0, %v19692_v33 }
 0x64b   :  { %12741 = vmatmul.mubr.f32.gmra.mrb[120].mxu1 %v5960_v31  ;;  %v13546_v31 = vpack.c.bf16 %v7277_v12, %v7276_v42  ;;  %v3962_v42 = vld [vmem:[#allocation2 + $0x5f] sm:$0xff]  ;;  %v6557_v12 = vld [vmem:[#allocation2 + $0x8a] sm:$0xff] }
 0x64c   :  { %12743 = vmatprep.mubr.msk.f32.mxu1 %vm14817_vm0, %v19692_v33 }
 0x64d   :  { %11632 = vmatmul.mubr.f32.gmra.mrb[26].mxu0 %v3365_v35  ;;  %v3384_v35 = vld [vmem:[#allocation2 + $0x27f] sm:$0xff] }
 0x64e   :  { %11634 = vmatprep.mubr.msk.f32.mxu0 %vm14817_vm0, %v19692_v33 }
 0x64f   :  { %12744 = vmatmul.mubr.f32.gmra.mrb[122].mxu1 %v5961_v1  ;;  %v7279_v1 = vld [vmem:[%s22737_s6 + $0x428] sm:$0xff] }
 0x650   :  { %12746 = vmatprep.mubr.msk.f32.mxu1 %vm14817_vm0, %v19692_v33 }
 0x651   :  { %11635 = vmatmul.mubr.f32.gmra.mrb[28].mxu0 %v3366_v0  ;;  %v7278_v0 = vld [vmem:[%s22737_s6 + $0x420] sm:$0xff] }
 0x652   :  { %11637 = vmatprep.mubr.msk.f32.mxu0 %vm14817_vm0, %v19692_v33 }
 0x653   :  { %12747 = vmatmul.mubr.f32.gmra.mrb[124].mxu1 %v5962_v32  ;;  %v3385_v32 = vld [vmem:[#allocation2 + $0x287] sm:$0xff] }
 0x654   :  { %12749 = vmatprep.mubr.msk.f32.mxu1 %vm14817_vm0, %v19692_v33 }
 0x655   :  { %11638 = vmatmul.mubr.f32.gmra.mrb[30].mxu0 %v3367_v40  ;;  %v6546_v40 = vld [vmem:[#allocation2 + $0x32] sm:$0xff] }
 0x656   :  { %11640 = vmatprep.mubr.msk.f32.mxu0 %vm14817_vm0, %v19692_v33 }
 0x657   :  { %12750 = vmatmul.mubr.f32.gmra.mrb[126].mxu1 %v5963_v50  ;;  %v7280_v50 = vld [vmem:[%s22737_s6 + $0x430] sm:$0xff] }
 0x658   :  { %12752 = vmatprep.mubr.msk.f32.mxu1 %vm14817_vm0, %v19692_v33 }
 0x659   :  { %11641 = vmatmul.mubr.f32.gmra.mrb[32].mxu0 %v3368_v6  ;;  %v13549_v6 = vpack.c.bf16 %v7279_v1, %v7278_v0  ;;  %v6559_v0 = vld [vmem:[#allocation2 + $0x9a] sm:$0xff] }
 0x65a   :  { %11643 = vmatprep.mubr.msk.f32.mxu0 %vm14817_vm0, %v19692_v33  ;;  %v3965_v1 = vld [vmem:[#allocation2 + $0x77] sm:$0xff] }
 0x65b   :  { %12753 = vmatmul.mubr.f32.gmra.mrb[128].mxu1 %v5964_v30  ;;  %v6547_v30 = vld [vmem:[#allocation2 + $0x3a] sm:$0xff] }
 0x65c   :  { %12755 = vmatprep.mubr.msk.f32.mxu1 %vm14817_vm0, %v19692_v33 }
 0x65d   :  { %11644 = vmatmul.mubr.f32.gmra.mrb[34].mxu0 %v3369_v39  ;;  %v7281_v39 = vld [vmem:[%s22737_s6 + $0x438] sm:$0xff] }
 0x65e   :  { %11646 = vmatprep.mubr.msk.f32.mxu0 %vm14817_vm0, %v19692_v33 }
 0x65f   :  { %12756 = vmatmul.mubr.f32.gmra.mrb[130].mxu1 %v5965_v38  ;;  %v13552_v38 = vpack.c.bf16 %v7281_v39, %v7280_v50  ;;  %v3967_v50 = vld [vmem:[#allocation2 + $0x87] sm:$0xff]  ;;  %v6562_v39 = vld [vmem:[#allocation2 + $0xb2] sm:$0xff] }
 0x660   :  { %12758 = vmatprep.mubr.msk.f32.mxu1 %vm14817_vm0, %v19692_v33 }
 0x661   :  { %11647 = vmatmul.mubr.f32.gmra.mrb[36].mxu0 %v3370_v28  ;;  %v3953_v28 = vld [vmem:[#allocation2 + $0x17] sm:$0xff] }
 0x662   :  { %11649 = vmatprep.mubr.msk.f32.mxu0 %vm14817_vm0, %v19692_v33 }
 0x663   :  { %12759 = vmatmul.mubr.f32.gmra.mrb[132].mxu1 %v5966_v15  ;;  %v23894_v15 = vld [vmem:[#allocation96_spill] sm:$0xff] }
 0x664   :  { %12761 = vmatprep.mubr.msk.f32.mxu1 %vm14817_vm0, %v19692_v33 }
 0x665   :  { %11650 = vmatmul.mubr.f32.gmra.mrb[38].mxu0 %v3371_v11  ;;  %v6548_v11 = vld [vmem:[#allocation2 + $0x42] sm:$0xff] }
 0x666   :  { %11652 = vmatprep.mubr.msk.f32.mxu0 %vm14817_vm0, %v19692_v33 }
 0x667   :  { %12762 = vmatmul.mubr.f32.gmra.mrb[134].mxu1 %v5967_v19  ;;  %v6549_v19 = vld [vmem:[#allocation2 + $0x4a] sm:$0xff] }
 0x668   :  { %12764 = vmatprep.mubr.msk.f32.mxu1 %vm14817_vm0, %v19692_v33 }
 0x669   :  { %11653 = vmatmul.mubr.f32.gmra.mrb[40].mxu0 %v3372_v8  ;;  %v3954_v8 = vld [vmem:[#allocation2 + $0x1f] sm:$0xff] }
 0x66a   :  { %11655 = vmatprep.mubr.msk.f32.mxu0 %vm14817_vm0, %v19692_v33 }
 0x66b   :  { %12765 = vmatmul.mubr.f32.gmra.mrb[136].mxu1 %v5968_v60  ;;  %v3955_v60 = vld [vmem:[#allocation2 + $0x27] sm:$0xff] }
 0x66c   :  { %12767 = vmatprep.mubr.msk.f32.mxu1 %vm14817_vm0, %v19692_v33 }
 0x66d   :  { %11656 = vmatmul.mubr.f32.gmra.mrb[42].mxu0 %v3373_v59  ;;  %v23895_v59 = vld [vmem:[#allocation98_spill] sm:$0xff] }
 0x66e   :  { %11658 = vmatprep.mubr.msk.f32.mxu0 %vm14817_vm0, %v19692_v33 }
 0x66f   :  { %12768 = vmatmul.mubr.f32.gmra.mrb[138].mxu1 %v5969_v51  ;;  %v23896_v51 = vld [vmem:[#allocation100_spill] sm:$0xff] }
 0x670   :  { %12770 = vmatprep.mubr.msk.f32.mxu1 %vm14817_vm0, %v19692_v33 }
 0x671   :  { %11659 = vmatmul.mubr.f32.gmra.mrb[44].mxu0 %v3374_v44  ;;  %v6550_v44 = vld [vmem:[#allocation2 + $0x52] sm:$0xff] }
 0x672   :  { %11661 = vmatprep.mubr.msk.f32.mxu0 %vm14817_vm0, %v19692_v33 }
 0x673   :  { %12771 = vmatmul.mubr.f32.gmra.mrb[140].mxu1 %v5970_v48  ;;  %v6551_v48 = vld [vmem:[#allocation2 + $0x5a] sm:$0xff] }
 0x674   :  { %12773 = vmatprep.mubr.msk.f32.mxu1 %vm14817_vm0, %v19692_v33 }
 0x675   :  { %11662 = vmatmul.mubr.f32.gmra.mrb[46].mxu0 %v3375_v41  ;;  %v3956_v41 = vld [vmem:[#allocation2 + $0x2f] sm:$0xff] }
 0x676   :  { %11664 = vmatprep.mubr.msk.f32.mxu0 %vm14817_vm0, %v19692_v33 }
 0x677   :  { %12774 = vmatmul.mubr.f32.gmra.mrb[142].mxu1 %v5971_v21  ;;  %v3957_v21 = vld [vmem:[#allocation2 + $0x37] sm:$0xff] }
 0x678   :  { %12776 = vmatprep.mubr.msk.f32.mxu1 %vm14817_vm0, %v19692_v33 }
 0x679   :  { %11665 = vmatmul.mubr.f32.gmra.mrb[48].mxu0 %v3376_v63  ;;  %v23897_v63 = vld [vmem:[#allocation102_spill] sm:$0xff] }
 0x67a   :  { %11667 = vmatprep.mubr.msk.f32.mxu0 %vm14817_vm0, %v19692_v33 }
 0x67b   :  { %12777 = vmatmul.mubr.f32.gmra.mrb[144].mxu1 %v5972_v34  ;;  %v23898_v34 = vld [vmem:[#allocation104_spill] sm:$0xff] }
 0x67c   :  { %12779 = vmatprep.mubr.msk.f32.mxu1 %vm14817_vm0, %v19692_v33 }
 0x67d   :  { %11668 = vmatmul.mubr.f32.gmra.mrb[50].mxu0 %v3377_v57  ;;  %v6552_v57 = vld [vmem:[#allocation2 + $0x62] sm:$0xff] }
 0x67e   :  { %11670 = vmatprep.mubr.msk.f32.mxu0 %vm14817_vm0, %v19692_v33 }
 0x67f   :  { %12780 = vmatmul.mubr.f32.gmra.mrb[146].mxu1 %v5973_v17  ;;  %v6553_v17 = vld [vmem:[#allocation2 + $0x6a] sm:$0xff] }
 0x680   :  { %12782 = vmatprep.mubr.msk.f32.mxu1 %vm14817_vm0, %v19692_v33 }
 0x681   :  { %11671 = vmatmul.mubr.f32.gmra.mrb[52].mxu0 %v3378_v23  ;;  %v3958_v23 = vld [vmem:[#allocation2 + $0x3f] sm:$0xff] }
 0x682   :  { %11673 = vmatprep.mubr.msk.f32.mxu0 %vm14817_vm0, %v19692_v33 }
 0x683   :  { %12783 = vmatmul.mubr.f32.gmra.mrb[148].mxu1 %v5974_v61  ;;  %v3959_v61 = vld [vmem:[#allocation2 + $0x47] sm:$0xff] }
 0x684   :  { %12785 = vmatprep.mubr.msk.f32.mxu1 %vm14817_vm0, %v19692_v33 }
 0x685   :  { %11674 = vmatmul.mubr.f32.gmra.mrb[54].mxu0 %v3379_v45  ;;  %v23899_v45 = vld [vmem:[#allocation106_spill] sm:$0xff] }
 0x686   :  { %11676 = vmatprep.mubr.msk.f32.mxu0 %vm14817_vm0, %v19692_v33 }
 0x687   :  { %12786 = vmatmul.mubr.f32.gmra.mrb[150].mxu1 %v5975_v18  ;;  %v23900_v18 = vld [vmem:[#allocation108_spill] sm:$0xff] }
 0x688   :  { %12788 = vmatprep.mubr.msk.f32.mxu1 %vm14817_vm0, %v19692_v33 }
 0x689   :  { %11677 = vmatmul.mubr.f32.gmra.mrb[56].mxu0 %v3380_v3  ;;  %v6554_v3 = vld [vmem:[#allocation2 + $0x72] sm:$0xff] }
 0x68a   :  { %11679 = vmatprep.mubr.msk.f32.mxu0 %vm14817_vm0, %v19692_v33 }
 0x68b   :  { %12789 = vmatmul.mubr.f32.gmra.mrb[152].mxu1 %v5976_v47  ;;  %v7282_v47 = vld [vmem:[%s22737_s6 + $0x440] sm:$0xff] }
 0x68c   :  { %12791 = vmatprep.mubr.msk.f32.mxu1 %vm14817_vm0, %v19692_v33 }
 0x68d   :  { %11680 = vmatmul.mubr.f32.gmra.mrb[58].mxu0 %v3381_v14  ;;  %v3960_v14 = vld [vmem:[#allocation2 + $0x4f] sm:$0xff] }
 0x68e   :  { %11682 = vmatprep.mubr.msk.f32.mxu0 %vm14817_vm0, %v19692_v33 }
 0x68f   :  { %12792 = vmatmul.mubr.f32.gmra.mrb[154].mxu1 %v5977_v5  ;;  %v6555_v5 = vld [vmem:[#allocation2 + $0x7a] sm:$0xff] }
 0x690   :  { %12826 = vmatprep.mubr.msk.f32.mxu1 %vm14817_vm0, %v19692_v33 }
 0x691   :  { %11683 = vmatmul.mubr.f32.gmra.mrb[60].mxu0 %v3382_v62  ;;  %v7283_v62 = vld [vmem:[%s22737_s6 + $0x448] sm:$0xff] }
 0x692   :  { %11685 = vmatprep.mubr.msk.f32.mxu0 %vm14817_vm0, %v19692_v33  ;;  %v13555_v55 = vpack.c.bf16 %v7283_v62, %v7282_v47  ;;  %v6573_v47 = vld [vmem:[#allocation2 + $0x10a] sm:$0xff] }
 0x693   :  { %12827 = vmatmul.mubr.f32.vlgmr.msra.gmra.mrb[156].mxu1 %v6545_v54  ;;  %v3963_v54 = vld [vmem:[#allocation2 + $0x67] sm:$0xff] }
 0x694   :  { %13544 = vmatpush3.bf16.msra.mxu1 %v13543_v4  ;;  %12829 = vmatprep.mubr.msk.f32.mxu1 %vm14817_vm0, %v19692_v33  ;;  %v6556_v4 = vld [vmem:[#allocation2 + $0x82] sm:$0xff] }
 0x695   :  { %11686 = vmatmul.mubr.f32.gmra.mrb[62].mxu0 %v3383_v29  ;;  %13545 = vmatprep.subr.bf16.mxu1 %v23608_v36  ;;  %v3961_v29 = vld [vmem:[#allocation2 + $0x57] sm:$0xff]  ;;  %v3979_v62 = vld [vmem:[#allocation2 + $0xe7] sm:$0xff] }
 0x696   :  { %11688 = vmatprep.mubr.msk.f32.mxu0 %vm14817_vm0, %v19692_v33 }
 0x697   :  { %12830 = vmatmul.mubr.f32.gmra.mrb[158].mxu1 %v6546_v40  ;;  %v6560_v40 = vld [vmem:[#allocation2 + $0xa2] sm:$0xff] }
 0x698   :  { %12832 = vmatprep.mubr.msk.f32.mxu1 %vm14817_vm0, %v19692_v33  ;;  %13547 = vmatpush3.bf16.msra.mxu1 %v13546_v31  ;;  %v3964_v31 = vld [vmem:[#allocation2 + $0x6f] sm:$0xff] }
 0x699   :  { %11689 = vmatmul.mubr.f32.gmra.mrb[64].mxu0 %v3384_v35  ;;  %13548 = vmatprep.subr.bf16.mxu1 %v23608_v36  ;;  %v6558_v35 = vld [vmem:[#allocation2 + $0x92] sm:$0xff] }
 0x69a   :  { %11691 = vmatprep.mubr.msk.f32.mxu0 %vm14817_vm0, %v19692_v33 }
 0x69b   :  { %12833 = vmatmul.mubr.f32.gmra.mrb[160].mxu1 %v6547_v30  ;;  %v3968_v30 = vld [vmem:[#allocation2 + $0x8f] sm:$0xff] }
 0x69c   :  { %12835 = vmatprep.mubr.msk.f32.mxu1 %vm14817_vm0, %v19692_v33  ;;  %13550 = vmatpush3.bf16.msra.mxu1 %v13549_v6  ;;  %v6561_v6 = vld [vmem:[#allocation2 + $0xaa] sm:$0xff] }
 0x69d   :  { %11692 = vmatmul.mubr.f32.gmra.mrb[66].mxu0 %v3385_v32  ;;  %13551 = vmatprep.subr.bf16.mxu1 %v23608_v36  ;;  %v3966_v32 = vld [vmem:[#allocation2 + $0x7f] sm:$0xff] }
 0x69e   :  { %11726 = vmatprep.mubr.msk.f32.mxu0 %vm14817_vm0, %v19692_v33 }
 0x69f   :  { %12836 = vmatmul.mubr.f32.gmra.mrb[0].mxu1 %v6548_v11  ;;  %v6564_v11 = vld [vmem:[#allocation2 + $0xc2] sm:$0xff] }
 0x6a0   :  { %12838 = vmatprep.mubr.msk.f32.mxu1 %vm14817_vm0, %v19692_v33  ;;  %13553 = vmatpush3.bf16.msra.mxu1 %v13552_v38  ;;  %v3969_v38 = vld [vmem:[#allocation2 + $0x97] sm:$0xff] }
 0x6a1   :  { %11727 = vmatmul.mubr.f32.vlgmr.msra.gmra.mrb[162].mxu0 %v3953_v28  ;;  %13554 = vmatprep.subr.bf16.mxu1 %v23608_v36  ;;  %v6563_v28 = vld [vmem:[#allocation2 + $0xba] sm:$0xff] }
 0x6a2   :  { %11729 = vmatprep.mubr.msk.f32.mxu0 %vm14817_vm0, %v19692_v33  ;;  %13448 = vmatpush3.bf16.msra.mxu0 %v23894_v15  ;;  %v3970_v15 = vld [vmem:[#allocation2 + $0x9f] sm:$0xff] }
 0x6a3   :  { %13449 = vmatprep.subr.bf16.mxu0 %v23608_v36  ;;  %12839 = vmatmul.mubr.f32.gmra.mrb[2].mxu1 %v6549_v19  ;;  %v7284_v19 = vld [vmem:[%s22737_s6 + $0x450] sm:$0xff] }
 0x6a4   :  { %12841 = vmatprep.mubr.msk.f32.mxu1 %vm14817_vm0, %v19692_v33  ;;  %13556 = vmatpush3.bf16.msra.mxu1 %v13555_v55  ;;  %v3980_v55 = vld [vmem:[#allocation2 + $0xef] sm:$0xff] }
 0x6a5   :  { %11730 = vmatmul.mubr.f32.gmra.mrb[164].mxu0 %v3954_v8  ;;  %13557 = vmatprep.subr.bf16.mxu1 %v23608_v36  ;;  %v6565_v8 = vld [vmem:[#allocation2 + $0xca] sm:$0xff] }
 0x6a6   :  { %11732 = vmatprep.mubr.msk.f32.mxu0 %vm14817_vm0, %v19692_v33  ;;  %13451 = vmatpush3.bf16.msra.mxu0 %v23895_v59  ;;  %v7285_v59 = vld [vmem:[%s22737_s6 + $0x458] sm:$0xff] }
 0x6a7   :  { %13452 = vmatprep.subr.bf16.mxu0 %v23608_v36  ;;  %12842 = vmatmul.mubr.f32.gmra.mrb[4].mxu1 %v6550_v44  ;;  %v3971_v44 = vld [vmem:[#allocation2 + $0xa7] sm:$0xff] }
 0x6a8   :  { %12844 = vmatprep.mubr.msk.f32.mxu1 %vm14817_vm0, %v19692_v33 }
 0x6a9   :  { %11733 = vmatmul.mubr.f32.gmra.mrb[166].mxu0 %v3955_v60  ;;  %v13558_v60 = vpack.c.bf16 %v7285_v59, %v7284_v19  ;;  %v3990_v19 = vld [vmem:[#allocation2 + $0x13f] sm:$0xff]  ;;  %v6585_v59 = vld [vmem:[#allocation2 + $0x16a] sm:$0xff] }
 0x6aa   :  { %11735 = vmatprep.mubr.msk.f32.mxu0 %vm14817_vm0, %v19692_v33  ;;  %13454 = vmatpush3.bf16.msra.mxu0 %v23896_v51  ;;  %v6566_v51 = vld [vmem:[#allocation2 + $0xd2] sm:$0xff] }
 0x6ab   :  { %13455 = vmatprep.subr.bf16.mxu0 %v23608_v36  ;;  %12845 = vmatmul.mubr.f32.gmra.mrb[6].mxu1 %v6551_v48  ;;  %v6567_v48 = vld [vmem:[#allocation2 + $0xda] sm:$0xff] }
 0x6ac   :  { %12847 = vmatprep.mubr.msk.f32.mxu1 %vm14817_vm0, %v19692_v33  ;;  %13559 = vmatpush3.bf16.msra.mxu1 %v13558_v60  ;;  %v3991_v60 = vld [vmem:[#allocation2 + $0x147] sm:$0xff] }
 0x6ad   :  { %11736 = vmatmul.mubr.f32.gmra.mrb[168].mxu0 %v3956_v41  ;;  %13560 = vmatprep.subr.bf16.mxu1 %v23608_v36  ;;  %v3972_v41 = vld [vmem:[#allocation2 + $0xaf] sm:$0xff] }
 0x6ae   :  { %11738 = vmatprep.mubr.msk.f32.mxu0 %vm14817_vm0, %v19692_v33  ;;  %13457 = vmatpush3.bf16.msra.mxu0 %v23897_v63  ;;  %v3973_v63 = vld [vmem:[#allocation2 + $0xb7] sm:$0xff] }
 0x6af   :  { %13458 = vmatprep.subr.bf16.mxu0 %v23608_v36  ;;  %12848 = vmatmul.mubr.f32.gmra.mrb[8].mxu1 %v6552_v57  ;;  %v3974_v57 = vld [vmem:[#allocation2 + $0xbf] sm:$0xff] }
 0x6b0   :  { %12850 = vmatprep.mubr.msk.f32.mxu1 %vm14817_vm0, %v19692_v33 }
 0x6b1   :  { %11739 = vmatmul.mubr.f32.gmra.mrb[170].mxu0 %v3957_v21  ;;  %v6568_v21 = vld [vmem:[#allocation2 + $0xe2] sm:$0xff] }
 0x6b2   :  { %11741 = vmatprep.mubr.msk.f32.mxu0 %vm14817_vm0, %v19692_v33  ;;  %13460 = vmatpush3.bf16.msra.mxu0 %v23898_v34  ;;  %v6569_v34 = vld [vmem:[#allocation2 + $0xea] sm:$0xff] }
 0x6b3   :  { %13461 = vmatprep.subr.bf16.mxu0 %v23608_v36  ;;  %12851 = vmatmul.mubr.f32.gmra.mrb[10].mxu1 %v6553_v17  ;;  %v6570_v17 = vld [vmem:[#allocation2 + $0xf2] sm:$0xff] }
 0x6b4   :  { %12853 = vmatprep.mubr.msk.f32.mxu1 %vm14817_vm0, %v19692_v33 }
 0x6b5   :  { %11742 = vmatmul.mubr.f32.gmra.mrb[172].mxu0 %v3958_v23  ;;  %v3975_v23 = vld [vmem:[#allocation2 + $0xc7] sm:$0xff] }
 0x6b6   :  { %11744 = vmatprep.mubr.msk.f32.mxu0 %vm14817_vm0, %v19692_v33  ;;  %13463 = vmatpush3.bf16.msra.mxu0 %v23899_v45  ;;  %v3976_v45 = vld [vmem:[#allocation2 + $0xcf] sm:$0xff] }
 0x6b7   :  { %13464 = vmatprep.subr.bf16.mxu0 %v23608_v36  ;;  %12854 = vmatmul.mubr.f32.gmra.mrb[12].mxu1 %v6554_v3  ;;  %v3977_v3 = vld [vmem:[#allocation2 + $0xd7] sm:$0xff] }
 0x6b8   :  { %12856 = vmatprep.mubr.msk.f32.mxu1 %vm14817_vm0, %v19692_v33 }
 0x6b9   :  { %11745 = vmatmul.mubr.f32.gmra.mrb[174].mxu0 %v3959_v61  ;;  %v6571_v61 = vld [vmem:[#allocation2 + $0xfa] sm:$0xff] }
 0x6ba   :  { %11747 = vmatprep.mubr.msk.f32.mxu0 %vm14817_vm0, %v19692_v33  ;;  %13466 = vmatpush3.bf16.msra.mxu0 %v23900_v18  ;;  %v6572_v18 = vld [vmem:[#allocation2 + $0x102] sm:$0xff] }
 0x6bb   :  { %13467 = vmatprep.subr.bf16.mxu0 %v23608_v36  ;;  %12857 = vmatmul.mubr.f32.gmra.mrb[14].mxu1 %v6555_v5  ;;  %v6574_v5 = vld [vmem:[#allocation2 + $0x112] sm:$0xff] }
 0x6bc   :  { %12859 = vmatprep.mubr.msk.f32.mxu1 %vm14817_vm0, %v19692_v33 }
 0x6bd   :  { %11748 = vmatmul.mubr.f32.gmra.mrb[176].mxu0 %v3960_v14  ;;  %v3978_v14 = vld [vmem:[#allocation2 + $0xdf] sm:$0xff] }
 0x6be   :  { %11750 = vmatprep.mubr.msk.f32.mxu0 %vm14817_vm0, %v19692_v33  ;;  %13469 = vmatpush3.bf16.msra.mxu0 %v23901_v26  ;;  %v6575_v26 = vld [vmem:[#allocation2 + $0x11a] sm:$0xff] }
 0x6bf   :  { %12860 = vmatmul.mubr.f32.gmra.mrb[16].mxu1 %v6556_v4  ;;  %v7286_v4 = vld [vmem:[%s22737_s6 + $0x460] sm:$0xff] }
 0x6c0   :  { %12862 = vmatprep.mubr.msk.f32.mxu1 %vm14817_vm0, %v19692_v33 }
 0x6c1   :  { %11751 = vmatmul.mubr.f32.gmra.mrb[178].mxu0 %v3961_v29  ;;  %v3981_v29 = vld [vmem:[#allocation2 + $0xf7] sm:$0xff] }
 0x6c2   :  { %11753 = vmatprep.mubr.msk.f32.mxu0 %vm14817_vm0, %v19692_v33 }
 0x6c3   :  { %12863 = vmatmul.mubr.f32.gmra.mrb[18].mxu1 %v6557_v12 }
 0x6c4   :  { %12865 = vmatprep.mubr.msk.f32.mxu1 %vm14817_vm0, %v19692_v33 }
 0x6c5   :  { %11754 = vmatmul.mubr.f32.gmra.mrb[180].mxu0 %v3962_v42  ;;  %v7287_v42 = vld [vmem:[%s22737_s6 + $0x468] sm:$0xff] }
 0x6c6   :  { %11756 = vmatprep.mubr.msk.f32.mxu0 %vm14817_vm0, %v19692_v33  ;;  %v13561_v12 = vpack.c.bf16 %v7287_v42, %v7286_v4  ;;  %v6595_v4 = vld [vmem:[#allocation2 + $0x1ba] sm:$0xff] }
 0x6c7   :  { %12866 = vmatmul.mubr.f32.gmra.mrb[20].mxu1 %v6558_v35  ;;  %v3982_v35 = vld [vmem:[#allocation2 + $0xff] sm:$0xff]  ;;  %v4001_v42 = vld [vmem:[#allocation2 + $0x197] sm:$0xff] }
 0x6c8   :  { %12868 = vmatprep.mubr.msk.f32.mxu1 %vm14817_vm0, %v19692_v33  ;;  %13562 = vmatpush3.bf16.msra.mxu1 %v13561_v12  ;;  %v6596_v12 = vld [vmem:[#allocation2 + $0x1c2] sm:$0xff] }
 0x6c9   :  { %11757 = vmatmul.mubr.f32.gmra.mrb[182].mxu0 %v3963_v54  ;;  %v6576_v54 = vld [vmem:[#allocation2 + $0x122] sm:$0xff]  ;;  %13563 = vmatprep.subr.bf16.mxu1 %v23608_v36  ;;  %v6579_v36 = vld [vmem:[#allocation2 + $0x13a] sm:$0xff] }
 0x6ca   :  { %11759 = vmatprep.mubr.msk.f32.mxu0 %vm14817_vm0, %v19692_v33 }
 0x6cb   :  { %12869 = vmatmul.mubr.f32.gmra.mrb[22].mxu1 %v6559_v0  ;;  %v3983_v0 = vld [vmem:[#allocation2 + $0x107] sm:$0xff] }
 0x6cc   :  { %12871 = vmatprep.mubr.msk.f32.mxu1 %vm14817_vm0, %v19692_v33 }
 0x6cd   :  { %11760 = vmatmul.mubr.f32.gmra.mrb[184].mxu0 %v3964_v31  ;;  %v6577_v31 = vld [vmem:[#allocation2 + $0x12a] sm:$0xff] }
 0x6ce   :  { %11762 = vmatprep.mubr.msk.f32.mxu0 %vm14817_vm0, %v19692_v33 }
 0x6cf   :  { %12872 = vmatmul.mubr.f32.gmra.mrb[24].mxu1 %v6560_v40  ;;  %v3984_v40 = vld [vmem:[#allocation2 + $0x10f] sm:$0xff] }
 0x6d0   :  { %12874 = vmatprep.mubr.msk.f32.mxu1 %vm14817_vm0, %v19692_v33 }
 0x6d1   :  { %11763 = vmatmul.mubr.f32.gmra.mrb[186].mxu0 %v3965_v1  ;;  %v6578_v1 = vld [vmem:[#allocation2 + $0x132] sm:$0xff] }
 0x6d2   :  { %11765 = vmatprep.mubr.msk.f32.mxu0 %vm14817_vm0, %v19692_v33 }
 0x6d3   :  { %12875 = vmatmul.mubr.f32.gmra.mrb[26].mxu1 %v6561_v6  ;;  %v6580_v6 = vld [vmem:[#allocation2 + $0x142] sm:$0xff] }
 0x6d4   :  { %12877 = vmatprep.mubr.msk.f32.mxu1 %vm14817_vm0, %v19692_v33 }
 0x6d5   :  { %11766 = vmatmul.mubr.f32.gmra.mrb[188].mxu0 %v3966_v32  ;;  %v3985_v32 = vld [vmem:[#allocation2 + $0x117] sm:$0xff] }
 0x6d6   :  { %11768 = vmatprep.mubr.msk.f32.mxu0 %vm14817_vm0, %v19692_v33 }
 0x6d7   :  { %12878 = vmatmul.mubr.f32.gmra.mrb[28].mxu1 %v6562_v39  ;;  %v6581_v39 = vld [vmem:[#allocation2 + $0x14a] sm:$0xff] }
 0x6d8   :  { %12880 = vmatprep.mubr.msk.f32.mxu1 %vm14817_vm0, %v19692_v33 }
 0x6d9   :  { %11769 = vmatmul.mubr.f32.gmra.mrb[190].mxu0 %v3967_v50  ;;  %v3986_v50 = vld [vmem:[#allocation2 + $0x11f] sm:$0xff] }
 0x6da   :  { %11771 = vmatprep.mubr.msk.f32.mxu0 %vm14817_vm0, %v19692_v33 }
 0x6db   :  { %12881 = vmatmul.mubr.f32.gmra.mrb[30].mxu1 %v6563_v28  ;;  %v20080_v28 = vld [vmem:[#allocation2] sm:$0xff] }
 0x6dc   :  { %12883 = vmatprep.mubr.msk.f32.mxu1 %vm14817_vm0, %v19692_v33 }
 0x6dd   :  { %11772 = vmatmul.mubr.f32.gmra.mrb[192].mxu0 %v3968_v30  ;;  %v3987_v30 = vld [vmem:[#allocation2 + $0x127] sm:$0xff] }
 0x6de   :  { %11774 = vmatprep.mubr.msk.f32.mxu0 %vm14817_vm0, %v19692_v33 }
 0x6df   :  { %12884 = vmatmul.mubr.f32.gmra.mrb[32].mxu1 %v6564_v11  ;;  %v3988_v11 = vld [vmem:[#allocation2 + $0x12f] sm:$0xff] }
 0x6e0   :  { %12886 = vmatprep.mubr.msk.f32.mxu1 %vm14817_vm0, %v19692_v33 }
 0x6e1   :  { %11775 = vmatmul.mubr.f32.gmra.mrb[194].mxu0 %v3969_v38  ;;  %v6582_v38 = vld [vmem:[#allocation2 + $0x152] sm:$0xff] }
 0x6e2   :  { %11777 = vmatprep.mubr.msk.f32.mxu0 %vm14817_vm0, %v19692_v33 }
 0x6e3   :  { %12887 = vmatmul.mubr.f32.gmra.mrb[34].mxu1 %v6565_v8  ;;  %v6584_v8 = vld [vmem:[#allocation2 + $0x162] sm:$0xff] }
 0x6e4   :  { %12889 = vmatprep.mubr.msk.f32.mxu1 %vm14817_vm0, %v19692_v33 }
 0x6e5   :  { %11778 = vmatmul.mubr.f32.gmra.mrb[196].mxu0 %v3970_v15  ;;  %v3989_v15 = vld [vmem:[#allocation2 + $0x137] sm:$0xff] }
 0x6e6   :  { %11780 = vmatprep.mubr.msk.f32.mxu0 %vm14817_vm0, %v19692_v33 }
 0x6e7   :  { %12890 = vmatmul.mubr.f32.gmra.mrb[36].mxu1 %v6566_v51  ;;  %v7289_v51 = vld [vmem:[%s22737_s6 + $0x478] sm:$0xff] }
 0x6e8   :  { %12892 = vmatprep.mubr.msk.f32.mxu1 %vm14817_vm0, %v19692_v33 }
 0x6e9   :  { %11781 = vmatmul.mubr.f32.gmra.mrb[198].mxu0 %v3971_v44  ;;  %v7288_v44 = vld [vmem:[%s22737_s6 + $0x470] sm:$0xff] }
 0x6ea   :  { %11783 = vmatprep.mubr.msk.f32.mxu0 %vm14817_vm0, %v19692_v33 }
 0x6eb   :  { %12893 = vmatmul.mubr.f32.gmra.mrb[38].mxu1 %v6567_v48  ;;  %v13564_v48 = vpack.c.bf16 %v7289_v51, %v7288_v44  ;;  %v6605_v51 = vld [vmem:[#allocation2 + $0x20a] sm:$0xff] }
 0x6ec   :  { %12895 = vmatprep.mubr.msk.f32.mxu1 %vm14817_vm0, %v19692_v33 }
 0x6ed   :  { %11784 = vmatmul.mubr.f32.gmra.mrb[200].mxu0 %v3972_v41  ;;  %v6586_v41 = vld [vmem:[#allocation2 + $0x172] sm:$0xff]  ;;  %13565 = vmatpush3.bf16.msra.mxu1 %v13564_v48  ;;  %v4011_v48 = vld [vmem:[#allocation2 + $0x1e7] sm:$0xff] }
 0x6ee   :  { %11786 = vmatprep.mubr.msk.f32.mxu0 %vm14817_vm0, %v19692_v33 }
 0x6ef   :  { %12896 = vmatmul.mubr.f32.gmra.mrb[40].mxu1 %v6568_v21  ;;  %v6587_v21 = vld [vmem:[#allocation2 + $0x17a] sm:$0xff] }
 0x6f0   :  { %12898 = vmatprep.mubr.msk.f32.mxu1 %vm14817_vm0, %v19692_v33 }
 0x6f1   :  { %11787 = vmatmul.mubr.f32.gmra.mrb[202].mxu0 %v3973_v63  ;;  %v3992_v63 = vld [vmem:[#allocation2 + $0x14f] sm:$0xff] }
 0x6f2   :  { %11789 = vmatprep.mubr.msk.f32.mxu0 %vm14817_vm0, %v19692_v33 }
 0x6f3   :  { %12899 = vmatmul.mubr.f32.gmra.mrb[42].mxu1 %v6569_v34  ;;  %v6588_v34 = vld [vmem:[#allocation2 + $0x182] sm:$0xff] }
 0x6f4   :  { %12901 = vmatprep.mubr.msk.f32.mxu1 %vm14817_vm0, %v19692_v33 }
 0x6f5   :  { %11790 = vmatmul.mubr.f32.gmra.mrb[204].mxu0 %v3974_v57  ;;  %v3993_v57 = vld [vmem:[#allocation2 + $0x157] sm:$0xff] }
 0x6f6   :  { %11792 = vmatprep.mubr.msk.f32.mxu0 %vm14817_vm0, %v19692_v33 }
 0x6f7   :  { %12902 = vmatmul.mubr.f32.gmra.mrb[44].mxu1 %v6570_v17  ;;  %v6589_v17 = vld [vmem:[#allocation2 + $0x18a] sm:$0xff] }
 0x6f8   :  { %12904 = vmatprep.mubr.msk.f32.mxu1 %vm14817_vm0, %v19692_v33 }
 0x6f9   :  { %11793 = vmatmul.mubr.f32.gmra.mrb[206].mxu0 %v3975_v23  ;;  %v3994_v23 = vld [vmem:[#allocation2 + $0x15f] sm:$0xff] }
 0x6fa   :  { %11795 = vmatprep.mubr.msk.f32.mxu0 %vm14817_vm0, %v19692_v33 }
 0x6fb   :  { %12905 = vmatmul.mubr.f32.gmra.mrb[46].mxu1 %v6571_v61  ;;  %v6590_v61 = vld [vmem:[#allocation2 + $0x192] sm:$0xff] }
 0x6fc   :  { %12907 = vmatprep.mubr.msk.f32.mxu1 %vm14817_vm0, %v19692_v33 }
 0x6fd   :  { %11796 = vmatmul.mubr.f32.gmra.mrb[208].mxu0 %v3976_v45  ;;  %v3995_v45 = vld [vmem:[#allocation2 + $0x167] sm:$0xff] }
 0x6fe   :  { %11798 = vmatprep.mubr.msk.f32.mxu0 %vm14817_vm0, %v19692_v33 }
 0x6ff   :  { %12908 = vmatmul.mubr.f32.gmra.mrb[48].mxu1 %v6572_v18  ;;  %v6591_v18 = vld [vmem:[#allocation2 + $0x19a] sm:$0xff] }
 0x700   :  { %12910 = vmatprep.mubr.msk.f32.mxu1 %vm14817_vm0, %v19692_v33 }
 0x701   :  { %11799 = vmatmul.mubr.f32.gmra.mrb[210].mxu0 %v3977_v3  ;;  %v3996_v3 = vld [vmem:[#allocation2 + $0x16f] sm:$0xff] }
 0x702   :  { %11801 = vmatprep.mubr.msk.f32.mxu0 %vm14817_vm0, %v19692_v33 }
 0x703   :  { %12911 = vmatmul.mubr.f32.gmra.mrb[50].mxu1 %v6573_v47  ;;  %v6592_v47 = vld [vmem:[#allocation2 + $0x1a2] sm:$0xff] }
 0x704   :  { %12913 = vmatprep.mubr.msk.f32.mxu1 %vm14817_vm0, %v19692_v33 }
 0x705   :  { %11802 = vmatmul.mubr.f32.gmra.mrb[212].mxu0 %v3978_v14  ;;  %v3997_v14 = vld [vmem:[#allocation2 + $0x177] sm:$0xff] }
 0x706   :  { %11804 = vmatprep.mubr.msk.f32.mxu0 %vm14817_vm0, %v19692_v33 }
 0x707   :  { %12914 = vmatmul.mubr.f32.gmra.mrb[52].mxu1 %v6574_v5  ;;  %v6593_v5 = vld [vmem:[#allocation2 + $0x1aa] sm:$0xff] }
 0x708   :  { %12916 = vmatprep.mubr.msk.f32.mxu1 %vm14817_vm0, %v19692_v33 }
 0x709   :  { %11805 = vmatmul.mubr.f32.gmra.mrb[214].mxu0 %v3979_v62  ;;  %v3998_v62 = vld [vmem:[#allocation2 + $0x17f] sm:$0xff] }
 0x70a   :  { %11807 = vmatprep.mubr.msk.f32.mxu0 %vm14817_vm0, %v19692_v33 }
 0x70b   :  { %12917 = vmatmul.mubr.f32.gmra.mrb[54].mxu1 %v6575_v26  ;;  %v6594_v26 = vld [vmem:[#allocation2 + $0x1b2] sm:$0xff] }
 0x70c   :  { %12919 = vmatprep.mubr.msk.f32.mxu1 %vm14817_vm0, %v19692_v33 }
 0x70d   :  { %11808 = vmatmul.mubr.f32.gmra.mrb[216].mxu0 %v3980_v55  ;;  %v3999_v55 = vld [vmem:[#allocation2 + $0x187] sm:$0xff] }
 0x70e   :  { %11810 = vmatprep.mubr.msk.f32.mxu0 %vm14817_vm0, %v19692_v33 }
 0x70f   :  { %12920 = vmatmul.mubr.f32.gmra.mrb[56].mxu1 %v6576_v54  ;;  %v4002_v54 = vld [vmem:[#allocation2 + $0x19f] sm:$0xff] }
 0x710   :  { %12922 = vmatprep.mubr.msk.f32.mxu1 %vm14817_vm0, %v19692_v33 }
 0x711   :  { %11811 = vmatmul.mubr.f32.gmra.mrb[218].mxu0 %v3981_v29  ;;  %v4000_v29 = vld [vmem:[#allocation2 + $0x18f] sm:$0xff] }
 0x712   :  { %11813 = vmatprep.mubr.msk.f32.mxu0 %vm14817_vm0, %v19692_v33 }
 0x713   :  { %12923 = vmatmul.mubr.f32.gmra.mrb[58].mxu1 %v6577_v31  ;;  %v4003_v31 = vld [vmem:[#allocation2 + $0x1a7] sm:$0xff] }
 0x714   :  { %12925 = vmatprep.mubr.msk.f32.mxu1 %vm14817_vm0, %v19692_v33 }
 0x715   :  { %11814 = vmatmul.mubr.f32.gmra.mrb[220].mxu0 %v3982_v35  ;;  %v6597_v35 = vld [vmem:[#allocation2 + $0x1ca] sm:$0xff] }
 0x716   :  { %11816 = vmatprep.mubr.msk.f32.mxu0 %vm14817_vm0, %v19692_v33 }
 0x717   :  { %12926 = vmatmul.mubr.f32.gmra.mrb[60].mxu1 %v6578_v1  ;;  %v4004_v1 = vld [vmem:[#allocation2 + $0x1af] sm:$0xff] }
 0x718   :  { %12928 = vmatprep.mubr.msk.f32.mxu1 %vm14817_vm0, %v19692_v33 }
 0x719   :  { %11817 = vmatmul.mubr.f32.gmra.mrb[222].mxu0 %v3983_v0  ;;  %v6598_v0 = vld [vmem:[#allocation2 + $0x1d2] sm:$0xff] }
 0x71a   :  { %11819 = vmatprep.mubr.msk.f32.mxu0 %vm14817_vm0, %v19692_v33 }
 0x71b   :  { %12929 = vmatmul.mubr.f32.gmra.mrb[62].mxu1 %v6579_v36  ;;  %v4005_v36 = vld [vmem:[#allocation2 + $0x1b7] sm:$0xff] }
 0x71c   :  { %12931 = vmatprep.mubr.msk.f32.mxu1 %vm14817_vm0, %v19692_v33 }
 0x71d   :  { %11820 = vmatmul.mubr.f32.gmra.mrb[224].mxu0 %v3984_v40  ;;  %v6599_v40 = vld [vmem:[#allocation2 + $0x1da] sm:$0xff] }
 0x71e   :  { %11822 = vmatprep.mubr.msk.f32.mxu0 %vm14817_vm0, %v19692_v33 }
 0x71f   :  { %12932 = vmatmul.mubr.f32.gmra.mrb[64].mxu1 %v6580_v6  ;;  %v4006_v6 = vld [vmem:[#allocation2 + $0x1bf] sm:$0xff] }
 0x720   :  { %12934 = vmatprep.mubr.msk.f32.mxu1 %vm14817_vm0, %v19692_v33 }
 0x721   :  { %11823 = vmatmul.mubr.f32.gmra.mrb[226].mxu0 %v3985_v32  ;;  %v6600_v32 = vld [vmem:[#allocation2 + $0x1e2] sm:$0xff] }
 0x722   :  { %11825 = vmatprep.mubr.msk.f32.mxu0 %vm14817_vm0, %v19692_v33 }
 0x723   :  { %12935 = vmatmul.mubr.f32.gmra.mrb[66].mxu1 %v6581_v39  ;;  %v4007_v39 = vld [vmem:[#allocation2 + $0x1c7] sm:$0xff] }
 0x724   :  { %12937 = vmatprep.mubr.msk.f32.mxu1 %vm14817_vm0, %v20080_v28 }
 0x725   :  { %11826 = vmatmul.mubr.f32.gmra.mrb[228].mxu0 %v3986_v50  ;;  %v6601_v50 = vld [vmem:[#allocation2 + $0x1ea] sm:$0xff] }
 0x726   :  { %11828 = vmatprep.mubr.msk.f32.mxu0 %vm14817_vm0, %v19692_v33  ;;  %v6583_v33 = vld [vmem:[#allocation2 + $0x15a] sm:$0xff] }
 0x727   :  { %12938 = vmatmul.mubr.f32.gmra.mrb[68].mxu1 %v6582_v38  ;;  %v4008_v38 = vld [vmem:[#allocation2 + $0x1cf] sm:$0xff] }
 0x728   :  { %12940 = vmatprep.mubr.msk.f32.mxu1 %vm14817_vm0, %v20080_v28 }
 0x729   :  { %11829 = vmatmul.mubr.f32.gmra.mrb[230].mxu0 %v3987_v30  ;;  %v6602_v30 = vld [vmem:[#allocation2 + $0x1f2] sm:$0xff] }
 0x72a   :  { %11831 = vmatprep.mubr.msk.f32.mxu0 %vm14817_vm0, %v20080_v28 }
 0x72b   :  { %12941 = vmatmul.mubr.f32.gmra.mrb[70].mxu1 %v6583_v33 }
 0x72c   :  { %12943 = vmatprep.mubr.msk.f32.mxu1 %vm14817_vm0, %v20080_v28 }
 0x72d   :  { %11832 = vmatmul.mubr.f32.gmra.mrb[232].mxu0 %v3988_v11  ;;  %v6603_v11 = vld [vmem:[#allocation2 + $0x1fa] sm:$0xff] }
 0x72e   :  { %11834 = vmatprep.mubr.msk.f32.mxu0 %vm14817_vm0, %v20080_v28 }
 0x72f   :  { %12944 = vmatmul.mubr.f32.gmra.mrb[72].mxu1 %v6584_v8 }
 0x730   :  { %12946 = vmatprep.mubr.msk.f32.mxu1 %vm14817_vm0, %v20080_v28 }
 0x731   :  { %11835 = vmatmul.mubr.f32.gmra.mrb[234].mxu0 %v3989_v15  ;;  %v4009_v15 = vld [vmem:[#allocation2 + $0x1d7] sm:$0xff] }
 0x732   :  { %11837 = vmatprep.mubr.msk.f32.mxu0 %vm14817_vm0, %v20080_v28 }
 0x733   :  { %12947 = vmatmul.mubr.f32.gmra.mrb[74].mxu1 %v6585_v59 }
 0x734   :  { %12949 = vmatprep.mubr.msk.f32.mxu1 %vm14817_vm0, %v20080_v28 }
 0x735   :  { %11838 = vmatmul.mubr.f32.gmra.mrb[236].mxu0 %v3990_v19  ;;  %v6604_v19 = vld [vmem:[#allocation2 + $0x202] sm:$0xff] }
 0x736   :  { %11840 = vmatprep.mubr.msk.f32.mxu0 %vm14817_vm0, %v20080_v28 }
 0x737   :  { %12950 = vmatmul.mubr.f32.gmra.mrb[76].mxu1 %v6586_v41 }
 0x738   :  { %12952 = vmatprep.mubr.msk.f32.mxu1 %vm14817_vm0, %v20080_v28 }
 0x739   :  { %11841 = vmatmul.mubr.f32.gmra.mrb[238].mxu0 %v3991_v60  ;;  %v4010_v60 = vld [vmem:[#allocation2 + $0x1df] sm:$0xff] }
 0x73a   :  { %11843 = vmatprep.mubr.msk.f32.mxu0 %vm14817_vm0, %v20080_v28 }
 0x73b   :  { %12953 = vmatmul.mubr.f32.gmra.mrb[78].mxu1 %v6587_v21  ;;  %v6606_v21 = vld [vmem:[#allocation2 + $0x212] sm:$0xff] }
 0x73c   :  { %12955 = vmatprep.mubr.msk.f32.mxu1 %vm14817_vm0, %v20080_v28 }
 0x73d   :  { %11844 = vmatmul.mubr.f32.gmra.mrb[240].mxu0 %v3992_v63 }
 0x73e   :  { %11846 = vmatprep.mubr.msk.f32.mxu0 %vm14817_vm0, %v20080_v28 }
 0x73f   :  { %12956 = vmatmul.mubr.f32.gmra.mrb[80].mxu1 %v6588_v34  ;;  %v4012_v34 = vld [vmem:[#allocation2 + $0x1ef] sm:$0xff] }
 0x740   :  { %12958 = vmatprep.mubr.msk.f32.mxu1 %vm14817_vm0, %v20080_v28 }
 0x741   :  { %11847 = vmatmul.mubr.f32.gmra.mrb[242].mxu0 %v3993_v57 }
 0x742   :  { %11849 = vmatprep.mubr.msk.f32.mxu0 %vm14817_vm0, %v20080_v28 }
 0x743   :  { %12959 = vmatmul.mubr.f32.gmra.mrb[82].mxu1 %v6589_v17  ;;  %v6607_v17 = vld [vmem:[#allocation2 + $0x21a] sm:$0xff] }
 0x744   :  { %12961 = vmatprep.mubr.msk.f32.mxu1 %vm14817_vm0, %v20080_v28 }
 0x745   :  { %11850 = vmatmul.mubr.f32.gmra.mrb[244].mxu0 %v3994_v23 }
 0x746   :  { %11852 = vmatprep.mubr.msk.f32.mxu0 %vm14817_vm0, %v20080_v28 }
 0x747   :  { %12962 = vmatmul.mubr.f32.gmra.mrb[84].mxu1 %v6590_v61  ;;  %v4013_v61 = vld [vmem:[#allocation2 + $0x1f7] sm:$0xff] }
 0x748   :  { %12964 = vmatprep.mubr.msk.f32.mxu1 %vm14817_vm0, %v20080_v28 }
 0x749   :  { %11853 = vmatmul.mubr.f32.gmra.mrb[246].mxu0 %v3995_v45 }
 0x74a   :  { %11855 = vmatprep.mubr.msk.f32.mxu0 %vm14817_vm0, %v20080_v28 }
 0x74b   :  { %12965 = vmatmul.mubr.f32.gmra.mrb[86].mxu1 %v6591_v18  ;;  %v6608_v18 = vld [vmem:[#allocation2 + $0x222] sm:$0xff] }
 0x74c   :  { %12967 = vmatprep.mubr.msk.f32.mxu1 %vm14817_vm0, %v20080_v28 }
 0x74d   :  { %11856 = vmatmul.mubr.f32.gmra.mrb[248].mxu0 %v3996_v3 }
 0x74e   :  { %11858 = vmatprep.mubr.msk.f32.mxu0 %vm14817_vm0, %v20080_v28 }
 0x74f   :  { %12968 = vmatmul.mubr.f32.gmra.mrb[88].mxu1 %v6592_v47  ;;  %v4014_v47 = vld [vmem:[#allocation2 + $0x1ff] sm:$0xff] }
 0x750   :  { %12970 = vmatprep.mubr.msk.f32.mxu1 %vm14817_vm0, %v20080_v28 }
 0x751   :  { %11859 = vmatmul.mubr.f32.gmra.mrb[250].mxu0 %v3997_v14 }
 0x752   :  { %11861 = vmatprep.mubr.msk.f32.mxu0 %vm14817_vm0, %v20080_v28 }
 0x753   :  { %12971 = vmatmul.mubr.f32.gmra.mrb[90].mxu1 %v6593_v5  ;;  %v6609_v5 = vld [vmem:[#allocation2 + $0x22a] sm:$0xff] }
 0x754   :  { %12973 = vmatprep.mubr.msk.f32.mxu1 %vm14817_vm0, %v20080_v28 }
 0x755   :  { %11862 = vmatmul.mubr.f32.gmra.mrb[252].mxu0 %v3998_v62 }
 0x756   :  { %11864 = vmatprep.mubr.msk.f32.mxu0 %vm14817_vm0, %v20080_v28 }
 0x757   :  { %12974 = vmatmul.mubr.f32.gmra.mrb[92].mxu1 %v6594_v26  ;;  %v4015_v26 = vld [vmem:[#allocation2 + $0x207] sm:$0xff] }
 0x758   :  { %12976 = vmatprep.mubr.msk.f32.mxu1 %vm14817_vm0, %v20080_v28 }
 0x759   :  { %11865 = vmatmul.mubr.f32.gmra.mrb[254].mxu0 %v3999_v55 }
 0x75a   :  { %11867 = vmatprep.mubr.msk.f32.mxu0 %vm14817_vm0, %v20080_v28 }
 0x75b   :  { %12977 = vmatmul.mubr.f32.gmra.mrb[94].mxu1 %v6595_v4  ;;  %v6610_v4 = vld [vmem:[#allocation2 + $0x232] sm:$0xff] }
 0x75c   :  { %12979 = vmatprep.mubr.msk.f32.mxu1 %vm14817_vm0, %v20080_v28 }
 0x75d   :  { %11868 = vmatmul.mubr.f32.gmra.mrb[0].mxu0 %v4000_v29 }
 0x75e   :  { %11870 = vmatprep.mubr.msk.f32.mxu0 %vm14817_vm0, %v20080_v28 }
 0x75f   :  { %12980 = vmatmul.mubr.f32.gmra.mrb[96].mxu1 %v6596_v12  ;;  %v4016_v12 = vld [vmem:[#allocation2 + $0x20f] sm:$0xff] }
 0x760   :  { %12982 = vmatprep.mubr.msk.f32.mxu1 %vm14817_vm0, %v20080_v28 }
 0x761   :  { %11871 = vmatmul.mubr.f32.gmra.mrb[2].mxu0 %v4001_v42 }
 0x762   :  { %11873 = vmatprep.mubr.msk.f32.mxu0 %vm14817_vm0, %v20080_v28 }
 0x763   :  { %12983 = vmatmul.mubr.f32.gmra.mrb[98].mxu1 %v6597_v35  ;;  %v6611_v35 = vld [vmem:[#allocation2 + $0x23a] sm:$0xff] }
 0x764   :  { %12985 = vmatprep.mubr.msk.f32.mxu1 %vm14817_vm0, %v20080_v28 }
 0x765   :  { %11874 = vmatmul.mubr.f32.gmra.mrb[4].mxu0 %v4002_v54 }
 0x766   :  { %11876 = vmatprep.mubr.msk.f32.mxu0 %vm14817_vm0, %v20080_v28 }
 0x767   :  { %12986 = vmatmul.mubr.f32.gmra.mrb[100].mxu1 %v6598_v0  ;;  %v4017_v0 = vld [vmem:[#allocation2 + $0x217] sm:$0xff] }
 0x768   :  { %12988 = vmatprep.mubr.msk.f32.mxu1 %vm14817_vm0, %v20080_v28 }
 0x769   :  { %11877 = vmatmul.mubr.f32.gmra.mrb[6].mxu0 %v4003_v31 }
 0x76a   :  { %11879 = vmatprep.mubr.msk.f32.mxu0 %vm14817_vm0, %v20080_v28 }
 0x76b   :  { %12989 = vmatmul.mubr.f32.gmra.mrb[102].mxu1 %v6599_v40  ;;  %v6612_v40 = vld [vmem:[#allocation2 + $0x242] sm:$0xff] }
 0x76c   :  { %12991 = vmatprep.mubr.msk.f32.mxu1 %vm14817_vm0, %v20080_v28 }
 0x76d   :  { %11880 = vmatmul.mubr.f32.gmra.mrb[8].mxu0 %v4004_v1 }
 0x76e   :  { %11882 = vmatprep.mubr.msk.f32.mxu0 %vm14817_vm0, %v20080_v28 }
 0x76f   :  { %12992 = vmatmul.mubr.f32.gmra.mrb[104].mxu1 %v6600_v32  ;;  %v4018_v32 = vld [vmem:[#allocation2 + $0x21f] sm:$0xff] }
 0x770   :  { %12994 = vmatprep.mubr.msk.f32.mxu1 %vm14817_vm0, %v20080_v28 }
 0x771   :  { %11883 = vmatmul.mubr.f32.gmra.mrb[10].mxu0 %v4005_v36 }
 0x772   :  { %11885 = vmatprep.mubr.msk.f32.mxu0 %vm14817_vm0, %v20080_v28 }
 0x773   :  { %12995 = vmatmul.mubr.f32.gmra.mrb[106].mxu1 %v6601_v50  ;;  %v6613_v50 = vld [vmem:[#allocation2 + $0x24a] sm:$0xff] }
 0x774   :  { %12997 = vmatprep.mubr.msk.f32.mxu1 %vm14817_vm0, %v20080_v28 }
 0x775   :  { %11886 = vmatmul.mubr.f32.gmra.mrb[12].mxu0 %v4006_v6 }
 0x776   :  { %11888 = vmatprep.mubr.msk.f32.mxu0 %vm14817_vm0, %v20080_v28 }
 0x777   :  { %12998 = vmatmul.mubr.f32.gmra.mrb[108].mxu1 %v6602_v30  ;;  %v4019_v30 = vld [vmem:[#allocation2 + $0x227] sm:$0xff] }
 0x778   :  { %13000 = vmatprep.mubr.msk.f32.mxu1 %vm14817_vm0, %v20080_v28 }
 0x779   :  { %11889 = vmatmul.mubr.f32.gmra.mrb[14].mxu0 %v4007_v39 }
 0x77a   :  { %11891 = vmatprep.mubr.msk.f32.mxu0 %vm14817_vm0, %v20080_v28 }
 0x77b   :  { %13001 = vmatmul.mubr.f32.gmra.mrb[110].mxu1 %v6603_v11  ;;  %v6614_v11 = vld [vmem:[#allocation2 + $0x252] sm:$0xff] }
 0x77c   :  { %13003 = vmatprep.mubr.msk.f32.mxu1 %vm14817_vm0, %v20080_v28 }
 0x77d   :  { %11892 = vmatmul.mubr.f32.gmra.mrb[16].mxu0 %v4008_v38 }
 0x77e   :  { %11894 = vmatprep.mubr.msk.f32.mxu0 %vm14817_vm0, %v20080_v28 }
 0x77f   :  { %13004 = vmatmul.mubr.f32.gmra.mrb[112].mxu1 %v6604_v19 }
 0x780   :  { %v20176_v33 = vpop.f32.mrb[168].mxu0  ;;  %13006 = vmatprep.mubr.msk.f32.mxu1 %vm14817_vm0, %v20080_v28 }
 0x781   :  { %v11737_v8 = vpop.f32.mrb[169].mxu0  ;;  %11895 = vmatmul.mubr.f32.gmra.mrb[18].mxu0 %v4009_v15 }
 0x782   :  { %11897 = vmatprep.mubr.msk.f32.mxu0 %vm14817_vm0, %v20080_v28  ;;  %v4020_v8 = vld [vmem:[#allocation2 + $0x22f] sm:$0xff] }
 0x783   :  { %13007 = vmatmul.mubr.f32.gmra.mrb[114].mxu1 %v6605_v51  ;;  %v4021_v51 = vld [vmem:[#allocation2 + $0x237] sm:$0xff] }
 0x784   :  { %v20182_v59 = vpop.f32.mrb[170].mxu0  ;;  %13009 = vmatprep.mubr.msk.f32.mxu1 %vm14817_vm0, %v20080_v28 }
 0x785   :  { %v11740_v44 = vpop.f32.mrb[171].mxu0  ;;  %11898 = vmatmul.mubr.f32.gmra.mrb[20].mxu0 %v4010_v60  ;;  %v6615_v60 = vld [vmem:[#allocation2 + $0x25a] sm:$0xff] }
 0x786   :  { %11900 = vmatprep.mubr.msk.f32.mxu0 %vm14817_vm0, %v20080_v28 }
 0x787   :  { %13010 = vmatmul.mubr.f32.gmra.mrb[116].mxu1 %v6606_v21 }
 0x788   :  { %v20188_v41 = vpop.f32.mrb[172].mxu0  ;;  %13012 = vmatprep.mubr.msk.f32.mxu1 %vm14817_vm0, %v20080_v28 }
 0x789   :  { %v11743_v63 = vpop.f32.mrb[173].mxu0  ;;  %11901 = vmatmul.mubr.f32.gmra.mrb[22].mxu0 %v4011_v48 }
 0x78a   :  { %11903 = vmatprep.mubr.msk.f32.mxu0 %vm14817_vm0, %v20080_v28  ;;  %v6616_v63 = vld [vmem:[#allocation2 + $0x262] sm:$0xff] }
 0x78b   :  { %13013 = vmatmul.mubr.f32.gmra.mrb[118].mxu1 %v6607_v17  ;;  %v6617_v17 = vld [vmem:[#allocation2 + $0x26a] sm:$0xff] }
 0x78c   :  { %v20194_v57 = vpop.f32.mrb[174].mxu0  ;;  %13015 = vmatprep.mubr.msk.f32.mxu1 %vm14817_vm0, %v20080_v28 }
 0x78d   :  { %v11746_v23 = vpop.f32.mrb[175].mxu0  ;;  %11904 = vmatmul.mubr.f32.gmra.mrb[24].mxu0 %v4012_v34  ;;  %v4022_v34 = vld [vmem:[#allocation2 + $0x23f] sm:$0xff] }
 0x78e   :  { %11906 = vmatprep.mubr.msk.f32.mxu0 %vm14817_vm0, %v20080_v28 }
 0x78f   :  { %13016 = vmatmul.mubr.f32.gmra.mrb[120].mxu1 %v6608_v18 }
 0x790   :  { %v20200_v45 = vpop.f32.mrb[176].mxu0  ;;  %13018 = vmatprep.mubr.msk.f32.mxu1 %vm14817_vm0, %v20080_v28 }
 0x791   :  { %v11749_v3 = vpop.f32.mrb[177].mxu0  ;;  %11907 = vmatmul.mubr.f32.gmra.mrb[26].mxu0 %v4013_v61 }
 0x792   :  { %11909 = vmatprep.mubr.msk.f32.mxu0 %vm14817_vm0, %v20080_v28  ;;  %v4023_v3 = vld [vmem:[#allocation2 + $0x247] sm:$0xff] }
 0x793   :  { %13019 = vmatmul.mubr.f32.gmra.mrb[122].mxu1 %v6609_v5  ;;  %v4024_v5 = vld [vmem:[#allocation2 + $0x24f] sm:$0xff] }
 0x794   :  { %v20206_v14 = vpop.f32.mrb[178].mxu0  ;;  %13021 = vmatprep.mubr.msk.f32.mxu1 %vm14817_vm0, %v20080_v28 }
 0x795   :  { %v11752_v62 = vpop.f32.mrb[179].mxu0  ;;  %11910 = vmatmul.mubr.f32.gmra.mrb[28].mxu0 %v4014_v47  ;;  %v6618_v47 = vld [vmem:[#allocation2 + $0x272] sm:$0xff] }
 0x796   :  { %11912 = vmatprep.mubr.msk.f32.mxu0 %vm14817_vm0, %v20080_v28 }
 0x797   :  { %13022 = vmatmul.mubr.f32.gmra.mrb[124].mxu1 %v6610_v4 }
 0x798   :  { %v20212_v55 = vpop.f32.mrb[180].mxu0  ;;  %13024 = vmatprep.mubr.msk.f32.mxu1 %vm14817_vm0, %v20080_v28 }
 0x799   :  { %v11755_v29 = vpop.f32.mrb[181].mxu0  ;;  %11913 = vmatmul.mubr.f32.gmra.mrb[30].mxu0 %v4015_v26 }
 0x79a   :  { %11915 = vmatprep.mubr.msk.f32.mxu0 %vm14817_vm0, %v20080_v28  ;;  %v6619_v29 = vld [vmem:[#allocation2 + $0x27a] sm:$0xff] }
 0x79b   :  { %13025 = vmatmul.mubr.f32.gmra.mrb[126].mxu1 %v6611_v35  ;;  %v6620_v35 = vld [vmem:[#allocation2 + $0x282] sm:$0xff] }
 0x79c   :  { %v20218_v42 = vpop.f32.mrb[182].mxu0  ;;  %13027 = vmatprep.mubr.msk.f32.mxu1 %vm14817_vm0, %v20080_v28 }
 0x79d   :  { %v11758_v54 = vpop.f32.mrb[183].mxu0  ;;  %11916 = vmatmul.mubr.f32.gmra.mrb[32].mxu0 %v4016_v12  ;;  %v4025_v12 = vld [vmem:[#allocation2 + $0x257] sm:$0xff] }
 0x79e   :  { %11918 = vmatprep.mubr.msk.f32.mxu0 %vm14817_vm0, %v20080_v28 }
 0x79f   :  { %13028 = vmatmul.mubr.f32.gmra.mrb[128].mxu1 %v6612_v40 }
 0x7a0   :  { %v20224_v31 = vpop.f32.mrb[184].mxu0  ;;  %13030 = vmatprep.mubr.msk.f32.mxu1 %vm14817_vm0, %v20080_v28 }
 0x7a1   :  { %v11761_v1 = vpop.f32.mrb[185].mxu0  ;;  %11919 = vmatmul.mubr.f32.gmra.mrb[34].mxu0 %v4017_v0 }
 0x7a2   :  { %11921 = vmatprep.mubr.msk.f32.mxu0 %vm14817_vm0, %v20080_v28  ;;  %v4026_v1 = vld [vmem:[#allocation2 + $0x25f] sm:$0xff] }
 0x7a3   :  { %13031 = vmatmul.mubr.f32.gmra.mrb[130].mxu1 %v6613_v50  ;;  %v4027_v50 = vld [vmem:[#allocation2 + $0x267] sm:$0xff] }
 0x7a4   :  { %v20230_v36 = vpop.f32.mrb[186].mxu0  ;;  %13033 = vmatprep.mubr.msk.f32.mxu1 %vm14817_vm0, %v20080_v28 }
 0x7a5   :  { %v11764_v6 = vpop.f32.mrb[187].mxu0  ;;  %11922 = vmatmul.mubr.f32.gmra.mrb[36].mxu0 %v4018_v32  ;;  %v6621_v32 = vld [vmem:[#allocation2 + $0x28a] sm:$0xff] }
 0x7a6   :  { %11924 = vmatprep.mubr.msk.f32.mxu0 %vm14817_vm0, %v20080_v28 }
 0x7a7   :  { %13034 = vmatmul.mubr.f32.gmra.mrb[132].mxu1 %v6614_v11 }
 0x7a8   :  { %v20236_v39 = vpop.f32.mrb[188].mxu0  ;;  %13036 = vmatprep.mubr.msk.f32.mxu1 %vm14817_vm0, %v20080_v28 }
 0x7a9   :  { %v11767_v38 = vpop.f32.mrb[189].mxu0  ;;  %11925 = vmatmul.mubr.f32.gmra.mrb[38].mxu0 %v4019_v30 }
 0x7aa   :  { %11927 = vmatprep.mubr.msk.f32.mxu0 %vm14817_vm0, %v20080_v28  ;;  %v6622_v38 = vld [vmem:[#allocation2 + $0x292] sm:$0xff] }
 0x7ab   :  { %13037 = vmatmul.mubr.f32.gmra.mrb[134].mxu1 %v6615_v60  ;;  %v6623_v60 = vld [vmem:[#allocation2 + $0x29a] sm:$0xff] }
 0x7ac   :  { %v20242_v15 = vpop.f32.mrb[190].mxu0  ;;  %13039 = vmatprep.mubr.msk.f32.mxu1 %vm14817_vm0, %v20080_v28 }
 0x7ad   :  { %v11770_v19 = vpop.f32.mrb[191].mxu0  ;;  %11928 = vmatmul.mubr.f32.gmra.mrb[40].mxu0 %v4020_v8  ;;  %v4028_v8 = vld [vmem:[#allocation2 + $0x26f] sm:$0xff] }
 0x7ae   :  { %11930 = vmatprep.mubr.msk.f32.mxu0 %vm14817_vm0, %v20080_v28 }
 0x7af   :  { %13040 = vmatmul.mubr.f32.gmra.mrb[136].mxu1 %v6616_v63  ;;  %v6624_v63 = vld [vmem:[#allocation2 + $0x2a2] sm:$0xff] }
 0x7b0   :  { %v20248_v44 = vpop.f32.mrb[192].mxu0  ;;  %13042 = vmatprep.mubr.msk.f32.mxu1 %vm14817_vm0, %v20080_v28 }
 0x7b1   :  { %v11773_v48 = vpop.f32.mrb[193].mxu0  ;;  %11931 = vmatmul.mubr.f32.gmra.mrb[42].mxu0 %v4021_v51 }
 0x7b2   :  { %11933 = vmatprep.mubr.msk.f32.mxu0 %vm14817_vm0, %v20080_v28  ;;  %v4029_v48 = vld [vmem:[#allocation2 + $0x277] sm:$0xff] }
 0x7b3   :  { %13043 = vmatmul.mubr.f32.gmra.mrb[138].mxu1 %v6617_v17  ;;  %v4030_v17 = vld [vmem:[#allocation2 + $0x27f] sm:$0xff] }
 0x7b4   :  { %v20254_v21 = vpop.f32.mrb[194].mxu0  ;;  %13045 = vmatprep.mubr.msk.f32.mxu1 %vm14817_vm0, %v20080_v28 }
 0x7b5   :  { %v11776_v23 = vpop.f32.mrb[195].mxu0  ;;  %11934 = vmatmul.mubr.f32.gmra.mrb[44].mxu0 %v4022_v34 }
 0x7b6   :  { %11936 = vmatprep.mubr.msk.f32.mxu0 %vm14817_vm0, %v20080_v28 }
 0x7b7   :  { %13046 = vmatmul.mubr.f32.gmra.mrb[140].mxu1 %v6618_v47 }
 0x7b8   :  { %v20260_v61 = vpop.f32.mrb[196].mxu0  ;;  %13048 = vmatprep.mubr.msk.f32.mxu1 %vm14817_vm0, %v20080_v28 }
 0x7b9   :  { %v11779_v18 = vpop.f32.mrb[197].mxu0  ;;  %11937 = vmatmul.mubr.f32.gmra.mrb[46].mxu0 %v4023_v3  ;;  %v6625_v3 = vld [vmem:[#allocation2 + $0x2aa] sm:$0xff] }
 0x7ba   :  { %11939 = vmatprep.mubr.msk.f32.mxu0 %vm14817_vm0, %v20080_v28 }
 0x7bb   :  { %13049 = vmatmul.mubr.f32.gmra.mrb[142].mxu1 %v6619_v29  ;;  %v7193_v29 = vld [vmem:[#allocation2 + $0x2b] sm:$0xff] }
 0x7bc   :  { %v20266_v62 = vpop.f32.mrb[198].mxu0  ;;  %13051 = vmatprep.mubr.msk.f32.mxu1 %vm14817_vm0, %v20080_v28 }
 0x7bd   :  { %v11782_v26 = vpop.f32.mrb[199].mxu0  ;;  %11940 = vmatmul.mubr.f32.gmra.mrb[48].mxu0 %v4024_v5  ;;  %v4031_v5 = vld [vmem:[#allocation2 + $0x287] sm:$0xff] }
 0x7be   :  { %11942 = vmatprep.mubr.msk.f32.mxu0 %vm14817_vm0, %v20080_v28 }
 0x7bf   :  { %13052 = vmatmul.mubr.f32.gmra.mrb[144].mxu1 %v6620_v35 }
 0x7c0   :  { %v20272_v4 = vpop.f32.mrb[200].mxu0  ;;  %13054 = vmatprep.mubr.msk.f32.mxu1 %vm14817_vm0, %v20080_v28 }
 0x7c1   :  { %v11785_v54 = vpop.f32.mrb[201].mxu0  ;;  %11943 = vmatmul.mubr.f32.gmra.mrb[50].mxu0 %v4025_v12 }
 0x7c2   :  { %11945 = vmatprep.mubr.msk.f32.mxu0 %vm14817_vm0, %v20080_v28  ;;  %v4032_v54 = vld [vmem:[#allocation2 + $0x28f] sm:$0xff] }
 0x7c3   :  { %13055 = vmatmul.mubr.f32.gmra.mrb[146].mxu1 %v6621_v32  ;;  %v4033_v32 = vld [vmem:[#allocation2 + $0x297] sm:$0xff] }
 0x7c4   :  { %v20278_v0 = vpop.f32.mrb[202].mxu0  ;;  %13057 = vmatprep.mubr.msk.f32.mxu1 %vm14817_vm0, %v20080_v28 }
 0x7c5   :  { %v11788_v40 = vpop.f32.mrb[203].mxu0  ;;  %11946 = vmatmul.mubr.f32.gmra.mrb[52].mxu0 %v4026_v1  ;;  %v7194_v1 = vld [vmem:[#allocation2 + $0x33] sm:$0xff] }
 0x7c6   :  { %11948 = vmatprep.mubr.msk.f32.mxu0 %vm14817_vm0, %v20080_v28 }
 0x7c7   :  { %13058 = vmatmul.mubr.f32.gmra.mrb[148].mxu1 %v6622_v38 }
 0x7c8   :  { %v20284_v6 = vpop.f32.mrb[204].mxu0  ;;  %13060 = vmatprep.mubr.msk.f32.mxu1 %vm14817_vm0, %v20080_v28 }
 0x7c9   :  { %v11791_v30 = vpop.f32.mrb[205].mxu0  ;;  %11949 = vmatmul.mubr.f32.gmra.mrb[54].mxu0 %v4027_v50 }
 0x7ca   :  { %11951 = vmatprep.mubr.msk.f32.mxu0 %vm14817_vm0, %v20080_v28  ;;  %v7195_v30 = vld [vmem:[#allocation2 + $0x3b] sm:$0xff] }
 0x7cb   :  { %13061 = vmatmul.mubr.f32.gmra.mrb[150].mxu1 %v6623_v60  ;;  %v7196_v60 = vld [vmem:[#allocation2 + $0x43] sm:$0xff] }
 0x7cc   :  { %v20290_v11 = vpop.f32.mrb[206].mxu0  ;;  %13063 = vmatprep.mubr.msk.f32.mxu1 %vm14817_vm0, %v20080_v28 }
 0x7cd   :  { %v11794_v19 = vpop.f32.mrb[207].mxu0  ;;  %11952 = vmatmul.mubr.f32.gmra.mrb[56].mxu0 %v4028_v8  ;;  %v4601_v8 = vld [vmem:[#allocation2 + $0x18] sm:$0xff] }
 0x7ce   :  { %11954 = vmatprep.mubr.msk.f32.mxu0 %vm14817_vm0, %v20080_v28 }
 0x7cf   :  { %13064 = vmatmul.mubr.f32.gmra.mrb[152].mxu1 %v6624_v63  ;;  %v4602_v63 = vld [vmem:[#allocation2 + $0x20] sm:$0xff] }
 0x7d0   :  { %v20296_v51 = vpop.f32.mrb[208].mxu0  ;;  %13066 = vmatprep.mubr.msk.f32.mxu1 %vm14817_vm0, %v20080_v28 }
 0x7d1   :  { %v11797_v34 = vpop.f32.mrb[209].mxu0  ;;  %11955 = vmatmul.mubr.f32.gmra.mrb[58].mxu0 %v4029_v48 }
 0x7d2   :  { %11957 = vmatprep.mubr.msk.f32.mxu0 %vm14817_vm0, %v20080_v28 }
 0x7d3   :  { %13067 = vmatmul.mubr.f32.gmra.mrb[154].mxu1 %v6625_v3 }
 0x7d4   :  { %v20302_v23 = vpop.f32.mrb[210].mxu0  ;;  %13101 = vmatprep.mubr.msk.f32.mxu1 %vm14817_vm0, %v20080_v28 }
 0x7d5   :  { %v11800_v18 = vpop.f32.mrb[211].mxu0  ;;  %11958 = vmatmul.mubr.f32.gmra.mrb[60].mxu0 %v4030_v17  ;;  %v7197_v17 = vld [vmem:[#allocation2 + $0x4b] sm:$0xff] }
 0x7d6   :  { %11960 = vmatprep.mubr.msk.f32.mxu0 %vm14817_vm0, %v20080_v28  ;;  %v4603_v18 = vld [vmem:[#allocation2 + $0x28] sm:$0xff] }
 0x7d7   :  { %13102 = vmatmul.mubr.f32.vlgmr.msra.gmra.mrb[156].mxu1 %v7193_v29 }
 0x7d8   :  { %v20308_v47 = vpop.f32.mrb[212].mxu0  ;;  %13104 = vmatprep.mubr.msk.f32.mxu1 %vm14817_vm0, %v20080_v28 }
 0x7d9   :  { %v11803_v26 = vpop.f32.mrb[213].mxu0  ;;  %11961 = vmatmul.mubr.f32.gmra.mrb[62].mxu0 %v4031_v5 }
 0x7da   :  { %11963 = vmatprep.mubr.msk.f32.mxu0 %vm14817_vm0, %v20080_v28  ;;  %v7198_v26 = vld [vmem:[#allocation2 + $0x53] sm:$0xff] }
 0x7db   :  { %13105 = vmatmul.mubr.f32.gmra.mrb[158].mxu1 %v7194_v1 }
 0x7dc   :  { %v20314_v12 = vpop.f32.mrb[214].mxu0  ;;  %13107 = vmatprep.mubr.msk.f32.mxu1 %vm14817_vm0, %v20080_v28 }
 0x7dd   :  { %v11806_v35 = vpop.f32.mrb[215].mxu0  ;;  %11964 = vmatmul.mubr.f32.gmra.mrb[64].mxu0 %v4032_v54 }
 0x7de   :  { %11966 = vmatprep.mubr.msk.f32.mxu0 %vm14817_vm0, %v20080_v28  ;;  %v7199_v35 = vld [vmem:[#allocation2 + $0x5b] sm:$0xff] }
 0x7df   :  { %13108 = vmatmul.mubr.f32.gmra.mrb[160].mxu1 %v7195_v30 }
 0x7e0   :  { %v20320_v40 = vpop.f32.mrb[216].mxu0  ;;  %13110 = vmatprep.mubr.msk.f32.mxu1 %vm14817_vm0, %v20080_v28 }
 0x7e1   :  { %v11809_v50 = vpop.f32.mrb[217].mxu0  ;;  %11967 = vmatmul.mubr.f32.gmra.mrb[66].mxu0 %v4033_v32 }
 0x7e2   :  { %12001 = vmatprep.mubr.msk.f32.mxu0 %vm14817_vm0, %v20080_v28  ;;  %v7200_v50 = vld [vmem:[#allocation2 + $0x63] sm:$0xff] }
 0x7e3   :  { %13111 = vmatmul.mubr.f32.gmra.mrb[0].mxu1 %v7196_v60 }
 0x7e4   :  { %v20326_v38 = vpop.f32.mrb[218].mxu0  ;;  %13113 = vmatprep.mubr.msk.f32.mxu1 %vm14817_vm0, %v20080_v28 }
 0x7e5   :  { %v11812_v19 = vpop.f32.mrb[219].mxu0  ;;  %12002 = vmatmul.mubr.f32.vlgmr.msra.gmra.mrb[162].mxu0 %v4601_v8 }
 0x7e6   :  { %12004 = vmatprep.mubr.msk.f32.mxu0 %vm14817_vm0, %v20080_v28  ;;  %v7201_v19 = vld [vmem:[#allocation2 + $0x6b] sm:$0xff] }
 0x7e7   :  { %13114 = vmatmul.mubr.f32.gmra.mrb[2].mxu1 %v7197_v17 }
 0x7e8   :  { %v20332_v48 = vpop.f32.mrb[220].mxu0  ;;  %13116 = vmatprep.mubr.msk.f32.mxu1 %vm14817_vm0, %v20080_v28 }
 0x7e9   :  { %v11815_v34 = vpop.f32.mrb[221].mxu0  ;;  %12005 = vmatmul.mubr.f32.gmra.mrb[164].mxu0 %v4602_v63 }
 0x7ea   :  { %12007 = vmatprep.mubr.msk.f32.mxu0 %vm14817_vm0, %v20080_v28  ;;  %v7202_v34 = vld [vmem:[#allocation2 + $0x73] sm:$0xff] }
 0x7eb   :  { %13117 = vmatmul.mubr.f32.gmra.mrb[4].mxu1 %v7198_v26 }
 0x7ec   :  { %v20338_v3 = vpop.f32.mrb[222].mxu0  ;;  %13119 = vmatprep.mubr.msk.f32.mxu1 %vm14817_vm0, %v20080_v28 }
 0x7ed   :  { %v11818_v5 = vpop.f32.mrb[223].mxu0  ;;  %12008 = vmatmul.mubr.f32.gmra.mrb[166].mxu0 %v4603_v18 }
 0x7ee   :  { %v7203_v5 = vld [vmem:[#allocation2 + $0x7b] sm:$0xff] }
 0x7ef   :  { %13120 = vmatmul.mubr.f32.gmra.mrb[6].mxu1 %v7199_v35  ;;  %v7204_v35 = vld [vmem:[#allocation2 + $0x83] sm:$0xff] }
 0x7f0   :  { %v20342_v29 = vpop.f32.mrb[224].mxu0  ;;  %13122 = vmatprep.mubr.msk.f32.mxu1 %vm14817_vm0, %v20080_v28 }
 0x7f1   :  { %v11821_v54 = vpop.f32.mrb[225].mxu0 }
 0x7f3   :  { %13123 = vmatmul.mubr.f32.gmra.mrb[8].mxu1 %v7200_v50 }
 0x7f4   :  { %v20346_v1 = vpop.f32.mrb[226].mxu0  ;;  %13125 = vmatprep.mubr.msk.f32.mxu1 %vm14817_vm0, %v20080_v28 }
 0x7f5   :  { %v11824_v32 = vpop.f32.mrb[227].mxu0 }
 0x7f7   :  { %13126 = vmatmul.mubr.f32.gmra.mrb[10].mxu1 %v7201_v19 }
 0x7f8   :  { %v20350_v30 = vpop.f32.mrb[228].mxu0  ;;  %13128 = vmatprep.mubr.msk.f32.mxu1 %vm14817_vm0, %v20080_v28 }
 0x7f9   :  { %v11827_v8 = vpop.f32.mrb[229].mxu0 }
 0x7fa   :  { %v7205_v8 = vld [vmem:[#allocation2 + $0x8b] sm:$0xff] }
 0x7fb   :  { %13129 = vmatmul.mubr.f32.gmra.mrb[12].mxu1 %v7202_v34  ;;  %v7206_v34 = vld [vmem:[#allocation2 + $0x93] sm:$0xff] }
 0x7fc   :  { %v20354_v60 = vpop.f32.mrb[230].mxu0  ;;  %13131 = vmatprep.mubr.msk.f32.mxu1 %vm14817_vm0, %v20080_v28 }
 0x7fd   :  { %v11830_v63 = vpop.f32.mrb[231].mxu0 }
 0x7ff   :  { %13132 = vmatmul.mubr.f32.gmra.mrb[14].mxu1 %v7203_v5 }
 0x800   :  { %v20358_v17 = vpop.f32.mrb[232].mxu0  ;;  %13134 = vmatprep.mubr.msk.f32.mxu1 %vm14817_vm0, %v20080_v28 }
 0x801   :  { %v11833_v18 = vpop.f32.mrb[233].mxu0 }
 0x803   :  { %13135 = vmatmul.mubr.f32.gmra.mrb[16].mxu1 %v7204_v35 }
 0x804   :  { %v20362_v26 = vpop.f32.mrb[234].mxu0  ;;  %13137 = vmatprep.mubr.msk.f32.mxu1 %vm14817_vm0, %v20080_v28 }
 0x805   :  { %v11836_v54 = vpop.f32.mrb[235].mxu0 }
 0x806   :  { %v7207_v54 = vld [vmem:[#allocation2 + $0x9b] sm:$0xff] }
 0x807   :  { %13138 = vmatmul.mubr.f32.gmra.mrb[18].mxu1 %v7205_v8  ;;  %v7208_v8 = vld [vmem:[#allocation2 + $0xa3] sm:$0xff] }
 0x808   :  { %v20366_v32 = vpop.f32.mrb[236].mxu0  ;;  %13140 = vmatprep.mubr.msk.f32.mxu1 %vm14817_vm0, %v20080_v28 }
 0x809   :  { %v11839_v50 = vpop.f32.mrb[237].mxu0 }
 0x80b   :  { %13141 = vmatmul.mubr.f32.gmra.mrb[20].mxu1 %v7206_v34  ;;  %v7209_v34 = vld [vmem:[#allocation2 + $0xab] sm:$0xff] }
 0x80c   :  { %v20370_v19 = vpop.f32.mrb[238].mxu0  ;;  %13143 = vmatprep.mubr.msk.f32.mxu1 %vm14817_vm0, %v20080_v28 }
 0x80d   :  { %v11842_v63 = vpop.f32.mrb[239].mxu0 }
 0x80f   :  { %13144 = vmatmul.mubr.f32.gmra.mrb[22].mxu1 %v7207_v54  ;;  %v7210_v54 = vld [vmem:[#allocation2 + $0xb3] sm:$0xff] }
 0x810   :  { %v20374_v18 = vpop.f32.mrb[240].mxu0  ;;  %13146 = vmatprep.mubr.msk.f32.mxu1 %vm14817_vm0, %v20080_v28 }
 0x811   :  { %v11845_v5 = vpop.f32.mrb[241].mxu0 }
 0x813   :  { %13147 = vmatmul.mubr.f32.gmra.mrb[24].mxu1 %v7208_v8  ;;  %v7211_v8 = vld [vmem:[#allocation2 + $0xbb] sm:$0xff] }
 0x814   :  { %v20378_v35 = vpop.f32.mrb[242].mxu0  ;;  %13149 = vmatprep.mubr.msk.f32.mxu1 %vm14817_vm0, %v20080_v28 }
 0x815   :  { %v11848_v50 = vpop.f32.mrb[243].mxu0 }
 0x817   :  { %13150 = vmatmul.mubr.f32.gmra.mrb[26].mxu1 %v7209_v34  ;;  %v7212_v34 = vld [vmem:[#allocation2 + $0xc3] sm:$0xff] }
 0x818   :  { %v20382_v7 = vpop.f32.mrb[244].mxu0  ;;  %13152 = vmatprep.mubr.msk.f32.mxu1 %vm14817_vm0, %v20080_v28 }
 0x819   :  { %v11851_v63 = vpop.f32.mrb[245].mxu0 }
 0x81b   :  { %13153 = vmatmul.mubr.f32.gmra.mrb[28].mxu1 %v7210_v54  ;;  %v7213_v54 = vld [vmem:[#allocation2 + $0xcb] sm:$0xff] }
 0x81c   :  { %v20386_v24 = vpop.f32.mrb[246].mxu0  ;;  %13155 = vmatprep.mubr.msk.f32.mxu1 %vm14817_vm0, %v20080_v28 }
 0x81d   :  { %v11854_v5 = vpop.f32.mrb[247].mxu0 }
 0x81f   :  { %13156 = vmatmul.mubr.f32.gmra.mrb[30].mxu1 %v7211_v8  ;;  %v7214_v8 = vld [vmem:[#allocation2 + $0xd3] sm:$0xff] }
 0x820   :  { %v20390_v27 = vpop.f32.mrb[248].mxu0  ;;  %13158 = vmatprep.mubr.msk.f32.mxu1 %vm14817_vm0, %v20080_v28 }
 0x821   :  { %v11857_v50 = vpop.f32.mrb[249].mxu0 }
 0x823   :  { %13159 = vmatmul.mubr.f32.gmra.mrb[32].mxu1 %v7212_v34  ;;  %v7215_v34 = vld [vmem:[#allocation2 + $0xdb] sm:$0xff] }
 0x824   :  { %v20394_v10 = vpop.f32.mrb[250].mxu0  ;;  %13161 = vmatprep.mubr.msk.f32.mxu1 %vm14817_vm0, %v20080_v28 }
 0x825   :  { %v11860_v63 = vpop.f32.mrb[251].mxu0 }
 0x827   :  { %13162 = vmatmul.mubr.f32.gmra.mrb[34].mxu1 %v7213_v54  ;;  %v7216_v54 = vld [vmem:[#allocation2 + $0xe3] sm:$0xff] }
 0x828   :  { %v20398_v46 = vpop.f32.mrb[252].mxu0  ;;  %13164 = vmatprep.mubr.msk.f32.mxu1 %vm14817_vm0, %v20080_v28 }
 0x829   :  { %v11863_v5 = vpop.f32.mrb[253].mxu0 }
 0x82b   :  { %13165 = vmatmul.mubr.f32.gmra.mrb[36].mxu1 %v7214_v8  ;;  %v7217_v8 = vld [vmem:[#allocation2 + $0xeb] sm:$0xff] }
 0x82c   :  { %v20402_v2 = vpop.f32.mrb[254].mxu0  ;;  %13167 = vmatprep.mubr.msk.f32.mxu1 %vm14817_vm0, %v20080_v28 }
 0x82d   :  { %v11866_v50 = vpop.f32.mrb[255].mxu0 }
 0x82f   :  { %13168 = vmatmul.mubr.f32.gmra.mrb[38].mxu1 %v7215_v34  ;;  %v7218_v34 = vld [vmem:[#allocation2 + $0xf3] sm:$0xff] }
 0x830   :  { %v20406_v56 = vpop.f32.mrb[0].mxu0  ;;  %13170 = vmatprep.mubr.msk.f32.mxu1 %vm14817_vm0, %v20080_v28 }
 0x831   :  { %v11869_v63 = vpop.f32.mrb[1].mxu0 }
 0x833   :  { %13171 = vmatmul.mubr.f32.gmra.mrb[40].mxu1 %v7216_v54  ;;  %v7219_v54 = vld [vmem:[#allocation2 + $0xfb] sm:$0xff] }
 0x834   :  { %v20410_v43 = vpop.f32.mrb[2].mxu0  ;;  %13173 = vmatprep.mubr.msk.f32.mxu1 %vm14817_vm0, %v20080_v28 }
 0x835   :  { %v11872_v5 = vpop.f32.mrb[3].mxu0 }
 0x837   :  { %13174 = vmatmul.mubr.f32.gmra.mrb[42].mxu1 %v7217_v8  ;;  %v7220_v8 = vld [vmem:[#allocation2 + $0x103] sm:$0xff] }
 0x838   :  { %v20414_v9 = vpop.f32.mrb[4].mxu0  ;;  %13176 = vmatprep.mubr.msk.f32.mxu1 %vm14817_vm0, %v20080_v28 }
 0x839   :  { %v11875_v50 = vpop.f32.mrb[5].mxu0 }
 0x83b   :  { %13177 = vmatmul.mubr.f32.gmra.mrb[44].mxu1 %v7218_v34  ;;  %v7221_v34 = vld [vmem:[#allocation2 + $0x10b] sm:$0xff] }
 0x83c   :  { %v20418_v58 = vpop.f32.mrb[6].mxu0  ;;  %13179 = vmatprep.mubr.msk.f32.mxu1 %vm14817_vm0, %v20080_v28 }
 0x83d   :  { %23902 = vst [vmem:[#allocation62_spill] sm:$0xff] %v20418_v58  ;;  %v11878_v63 = vpop.f32.mrb[7].mxu0 }
 0x83f   :  { %13180 = vmatmul.mubr.f32.gmra.mrb[46].mxu1 %v7219_v54  ;;  %v7222_v54 = vld [vmem:[#allocation2 + $0x113] sm:$0xff] }
 0x840   :  { %v20422_v25 = vpop.f32.mrb[8].mxu0  ;;  %13182 = vmatprep.mubr.msk.f32.mxu1 %vm14817_vm0, %v20080_v28 }
 0x841   :  { %23903 = vst [vmem:[#allocation124_spill] sm:$0xff] %v20422_v25  ;;  %v11881_v5 = vpop.f32.mrb[9].mxu0 }
 0x843   :  { %13183 = vmatmul.mubr.f32.gmra.mrb[48].mxu1 %v7220_v8  ;;  %v7223_v8 = vld [vmem:[#allocation2 + $0x11b] sm:$0xff] }
 0x844   :  { %v20426_v49 = vpop.f32.mrb[10].mxu0  ;;  %13185 = vmatprep.mubr.msk.f32.mxu1 %vm14817_vm0, %v20080_v28 }
 0x845   :  { %23904 = vst [vmem:[#allocation66_spill] sm:$0xff] %v20426_v49  ;;  %v11884_v50 = vpop.f32.mrb[11].mxu0 }
 0x847   :  { %13186 = vmatmul.mubr.f32.gmra.mrb[50].mxu1 %v7221_v34  ;;  %v7224_v34 = vld [vmem:[#allocation2 + $0x123] sm:$0xff] }
 0x848   :  { %v20430_v16 = vpop.f32.mrb[12].mxu0  ;;  %13188 = vmatprep.mubr.msk.f32.mxu1 %vm14817_vm0, %v20080_v28 }
 0x849   :  { %23905 = vst [vmem:[#allocation70_spill] sm:$0xff] %v20430_v16  ;;  %v11887_v63 = vpop.f32.mrb[13].mxu0 }
 0x84b   :  { %13189 = vmatmul.mubr.f32.gmra.mrb[52].mxu1 %v7222_v54  ;;  %v7225_v54 = vld [vmem:[#allocation2 + $0x12b] sm:$0xff] }
 0x84c   :  { %v20434_v37 = vpop.f32.mrb[14].mxu0  ;;  %13191 = vmatprep.mubr.msk.f32.mxu1 %vm14817_vm0, %v20080_v28 }
 0x84d   :  { %23906 = vst [vmem:[#allocation68_spill] sm:$0xff] %v20434_v37  ;;  %v11890_v5 = vpop.f32.mrb[15].mxu0 }
 0x84f   :  { %13192 = vmatmul.mubr.f32.gmra.mrb[54].mxu1 %v7223_v8  ;;  %v7226_v8 = vld [vmem:[#allocation2 + $0x133] sm:$0xff] }
 0x850   :  { %v20438_v13 = vpop.f32.mrb[16].mxu0  ;;  %13194 = vmatprep.mubr.msk.f32.mxu1 %vm14817_vm0, %v20080_v28 }
 0x851   :  { %23907 = vst [vmem:[#allocation15_spill] sm:$0xff] %v20438_v13  ;;  %v11893_v50 = vpop.f32.mrb[17].mxu0 }
 0x853   :  { %13195 = vmatmul.mubr.f32.gmra.mrb[56].mxu1 %v7224_v34  ;;  %v7227_v34 = vld [vmem:[#allocation2 + $0x13b] sm:$0xff] }
 0x854   :  { %v20442_v16 = vpop.f32.mrb[18].mxu0  ;;  %13197 = vmatprep.mubr.msk.f32.mxu1 %vm14817_vm0, %v20080_v28 }
 0x855   :  { %23908 = vst [vmem:[#allocation11_spill] sm:$0xff] %v20442_v16  ;;  %v11896_v63 = vpop.f32.mrb[19].mxu0 }
 0x857   :  { %13198 = vmatmul.mubr.f32.gmra.mrb[58].mxu1 %v7225_v54  ;;  %v7228_v54 = vld [vmem:[#allocation2 + $0x143] sm:$0xff] }
 0x858   :  { %v20446_v37 = vpop.f32.mrb[20].mxu0  ;;  %13200 = vmatprep.mubr.msk.f32.mxu1 %vm14817_vm0, %v20080_v28 }
 0x859   :  { %23909 = vst [vmem:[#allocation126_spill] sm:$0xff] %v20446_v37  ;;  %v11899_v5 = vpop.f32.mrb[21].mxu0 }
 0x85b   :  { %13201 = vmatmul.mubr.f32.gmra.mrb[60].mxu1 %v7226_v8  ;;  %v7229_v8 = vld [vmem:[#allocation2 + $0x14b] sm:$0xff] }
 0x85c   :  { %v20450_v13 = vpop.f32.mrb[22].mxu0  ;;  %13203 = vmatprep.mubr.msk.f32.mxu1 %vm14817_vm0, %v20080_v28 }
 0x85d   :  { %23910 = vst [vmem:[#allocation74_spill] sm:$0xff] %v20450_v13  ;;  %v11902_v50 = vpop.f32.mrb[23].mxu0 }
 0x85f   :  { %13204 = vmatmul.mubr.f32.gmra.mrb[62].mxu1 %v7227_v34 }
 0x860   :  { %v20454_v16 = vpop.f32.mrb[24].mxu0  ;;  %13206 = vmatprep.mubr.msk.f32.mxu1 %vm14817_vm0, %v20080_v28 }
 0x861   :  { %23911 = vst [vmem:[#allocation122_spill] sm:$0xff] %v20454_v16  ;;  %v11905_v63 = vpop.f32.mrb[25].mxu0 }
 0x862   :  { %v20468_v63 = vld [vmem:[#allocation2] sm:$0xff] }
 0x863   :  { %13207 = vmatmul.mubr.f32.gmra.mrb[64].mxu1 %v7228_v54 }
 0x864   :  { %v20458_v37 = vpop.f32.mrb[26].mxu0  ;;  %13209 = vmatprep.mubr.msk.f32.mxu1 %vm14817_vm0, %v20080_v28  ;;  %v7231_v28 = vld [vmem:[#allocation2 + $0x15b] sm:$0xff] }
 0x865   :  { %23912 = vst [vmem:[#allocation121_spill] sm:$0xff] %v20458_v37  ;;  %v11908_v5 = vpop.f32.mrb[27].mxu0  ;;  %v7230_v37 = vld [vmem:[#allocation2 + $0x153] sm:$0xff] }
 0x867   :  { %13210 = vmatmul.mubr.f32.gmra.mrb[66].mxu1 %v7229_v8 }
 0x868   :  { %v20462_v13 = vpop.f32.mrb[28].mxu0  ;;  %13212 = vmatprep.mubr.msk.f32.mxu1 %vm14817_vm0, %v20468_v63 }
 0x869   :  { %23913 = vst [vmem:[#allocation127_spill] sm:$0xff] %v20462_v13  ;;  %v11911_v50 = vpop.f32.mrb[29].mxu0 }
 0x86b   :  { %13213 = vmatmul.mubr.f32.gmra.mrb[68].mxu1 %v7230_v37 }
 0x86c   :  { %v20466_v16 = vpop.f32.mrb[30].mxu0  ;;  %13215 = vmatprep.mubr.msk.f32.mxu1 %vm14817_vm0, %v20468_v63 }
 0x86d   :  { %23914 = vst [vmem:[#allocation9_spill] sm:$0xff] %v20466_v16  ;;  %v11914_v34 = vpop.f32.mrb[31].mxu0  ;;  %v7232_v16 = vld [vmem:[#allocation2 + $0x163] sm:$0xff] }
 0x86e   :  { %v7233_v34 = vld [vmem:[#allocation2 + $0x16b] sm:$0xff] }
 0x86f   :  { %13216 = vmatmul.mubr.f32.gmra.mrb[70].mxu1 %v7231_v28  ;;  %v7234_v28 = vld [vmem:[#allocation2 + $0x173] sm:$0xff] }
 0x870   :  { %v20472_v5 = vpop.f32.mrb[32].mxu0  ;;  %13218 = vmatprep.mubr.msk.f32.mxu1 %vm14817_vm0, %v20468_v63 }
 0x871   :  { %23915 = vst [vmem:[#allocation27_spill] sm:$0xff] %v20472_v5  ;;  %v11917_v54 = vpop.f32.mrb[33].mxu0 }
 0x873   :  { %13219 = vmatmul.mubr.f32.gmra.mrb[72].mxu1 %v7232_v16 }
 0x874   :  { %v20476_v50 = vpop.f32.mrb[34].mxu0  ;;  %13221 = vmatprep.mubr.msk.f32.mxu1 %vm14817_vm0, %v20468_v63 }
 0x875   :  { %23916 = vst [vmem:[#allocation29_spill] sm:$0xff] %v20476_v50  ;;  %v11920_v8 = vpop.f32.mrb[35].mxu0 }
 0x876   :  { %v7235_v8 = vld [vmem:[#allocation2 + $0x17b] sm:$0xff] }
 0x877   :  { %13222 = vmatmul.mubr.f32.gmra.mrb[74].mxu1 %v7233_v34  ;;  %v7236_v34 = vld [vmem:[#allocation2 + $0x183] sm:$0xff] }
 0x878   :  { %v20480_v13 = vpop.f32.mrb[36].mxu0  ;;  %13224 = vmatprep.mubr.msk.f32.mxu1 %vm14817_vm0, %v20468_v63 }
 0x879   :  { %23917 = vst [vmem:[#allocation31_spill] sm:$0xff] %v20480_v13  ;;  %v11923_v37 = vpop.f32.mrb[37].mxu0 }
 0x87b   :  { %13225 = vmatmul.mubr.f32.gmra.mrb[76].mxu1 %v7234_v28  ;;  %v7237_v28 = vld [vmem:[#allocation2 + $0x18b] sm:$0xff] }
 0x87c   :  { %v20484_v5 = vpop.f32.mrb[38].mxu0  ;;  %13227 = vmatprep.mubr.msk.f32.mxu1 %vm14817_vm0, %v20468_v63 }
 0x87d   :  { %23918 = vst [vmem:[#allocation32_spill] sm:$0xff] %v20484_v5  ;;  %v11926_v54 = vpop.f32.mrb[39].mxu0 }
 0x87f   :  { %13228 = vmatmul.mubr.f32.gmra.mrb[78].mxu1 %v7235_v8  ;;  %v7238_v8 = vld [vmem:[#allocation2 + $0x193] sm:$0xff] }
 0x880   :  { %v20488_v50 = vpop.f32.mrb[40].mxu0  ;;  %13230 = vmatprep.mubr.msk.f32.mxu1 %vm14817_vm0, %v20468_v63 }
 0x881   :  { %23919 = vst [vmem:[#allocation33_spill] sm:$0xff] %v20488_v50  ;;  %v11929_v16 = vpop.f32.mrb[41].mxu0 }
 0x883   :  { %13231 = vmatmul.mubr.f32.gmra.mrb[80].mxu1 %v7236_v34  ;;  %v7239_v34 = vld [vmem:[#allocation2 + $0x19b] sm:$0xff] }
 0x884   :  { %v20492_v13 = vpop.f32.mrb[42].mxu0  ;;  %13233 = vmatprep.mubr.msk.f32.mxu1 %vm14817_vm0, %v20468_v63 }
 0x885   :  { %23920 = vst [vmem:[#allocation34_spill] sm:$0xff] %v20492_v13  ;;  %v11932_v37 = vpop.f32.mrb[43].mxu0 }
 0x887   :  { %13234 = vmatmul.mubr.f32.gmra.mrb[82].mxu1 %v7237_v28  ;;  %v7240_v28 = vld [vmem:[#allocation2 + $0x1a3] sm:$0xff] }
 0x888   :  { %v20496_v5 = vpop.f32.mrb[44].mxu0  ;;  %13236 = vmatprep.mubr.msk.f32.mxu1 %vm14817_vm0, %v20468_v63 }
 0x889   :  { %23921 = vst [vmem:[#allocation76_spill] sm:$0xff] %v20496_v5  ;;  %v11935_v54 = vpop.f32.mrb[45].mxu0 }
 0x88b   :  { %13237 = vmatmul.mubr.f32.gmra.mrb[84].mxu1 %v7238_v8  ;;  %v7241_v8 = vld [vmem:[#allocation2 + $0x1ab] sm:$0xff] }
 0x88c   :  { %v20500_v50 = vpop.f32.mrb[46].mxu0  ;;  %13239 = vmatprep.mubr.msk.f32.mxu1 %vm14817_vm0, %v20468_v63 }
 0x88d   :  { %23922 = vst [vmem:[#allocation16_spill] sm:$0xff] %v20500_v50  ;;  %v11938_v16 = vpop.f32.mrb[47].mxu0 }
 0x88f   :  { %13240 = vmatmul.mubr.f32.gmra.mrb[86].mxu1 %v7239_v34  ;;  %v7242_v34 = vld [vmem:[#allocation2 + $0x1b3] sm:$0xff] }
 0x890   :  { %v20504_v13 = vpop.f32.mrb[48].mxu0  ;;  %13242 = vmatprep.mubr.msk.f32.mxu1 %vm14817_vm0, %v20468_v63 }
 0x891   :  { %23923 = vst [vmem:[#allocation78_spill] sm:$0xff] %v20504_v13  ;;  %v11941_v37 = vpop.f32.mrb[49].mxu0 }
 0x893   :  { %13243 = vmatmul.mubr.f32.gmra.mrb[88].mxu1 %v7240_v28  ;;  %v7243_v28 = vld [vmem:[#allocation2 + $0x1bb] sm:$0xff] }
 0x894   :  { %v20508_v5 = vpop.f32.mrb[50].mxu0  ;;  %13245 = vmatprep.mubr.msk.f32.mxu1 %vm14817_vm0, %v20468_v63 }
 0x895   :  { %23924 = vst [vmem:[#allocation77_spill] sm:$0xff] %v20508_v5  ;;  %v11944_v54 = vpop.f32.mrb[51].mxu0 }
 0x897   :  { %13246 = vmatmul.mubr.f32.gmra.mrb[90].mxu1 %v7241_v8  ;;  %v7244_v8 = vld [vmem:[#allocation2 + $0x1c3] sm:$0xff] }
 0x898   :  { %v20512_v50 = vpop.f32.mrb[52].mxu0  ;;  %13248 = vmatprep.mubr.msk.f32.mxu1 %vm14817_vm0, %v20468_v63 }
 0x899   :  { %23925 = vst [vmem:[#allocation41_spill] sm:$0xff] %v20512_v50  ;;  %v11947_v16 = vpop.f32.mrb[53].mxu0 }
 0x89b   :  { %13249 = vmatmul.mubr.f32.gmra.mrb[92].mxu1 %v7242_v34  ;;  %v7245_v34 = vld [vmem:[#allocation2 + $0x1cb] sm:$0xff] }
 0x89c   :  { %v20516_v13 = vpop.f32.mrb[54].mxu0  ;;  %13251 = vmatprep.mubr.msk.f32.mxu1 %vm14817_vm0, %v20468_v63 }
 0x89d   :  { %23926 = vst [vmem:[#allocation141_spill] sm:$0xff] %v20516_v13  ;;  %v11950_v37 = vpop.f32.mrb[55].mxu0 }
 0x89f   :  { %13252 = vmatmul.mubr.f32.gmra.mrb[94].mxu1 %v7243_v28 }
 0x8a0   :  { %v20520_v5 = vpop.f32.mrb[56].mxu0  ;;  %13254 = vmatprep.mubr.msk.f32.mxu1 %vm14817_vm0, %v20468_v63 }
 0x8a1   :  { %23927 = vst [vmem:[#allocation202_spill] sm:$0xff] %v20520_v5  ;;  %v11953_v54 = vpop.f32.mrb[57].mxu0 }
 0x8a3   :  { %13255 = vmatmul.mubr.f32.gmra.mrb[96].mxu1 %v7244_v8 }
 0x8a4   :  { %v20524_v50 = vpop.f32.mrb[58].mxu0  ;;  %13257 = vmatprep.mubr.msk.f32.mxu1 %vm14817_vm0, %v20468_v63 }
 0x8a5   :  { %23928 = vst [vmem:[#allocation42_spill] sm:$0xff] %v20524_v50  ;;  %v11956_v16 = vpop.f32.mrb[59].mxu0  ;;  %v7246_v50 = vld [vmem:[#allocation2 + $0x1d3] sm:$0xff] }
 0x8a7   :  { %13258 = vmatmul.mubr.f32.gmra.mrb[98].mxu1 %v7245_v34 }
 0x8a8   :  { %v20528_v13 = vpop.f32.mrb[60].mxu0  ;;  %13260 = vmatprep.mubr.msk.f32.mxu1 %vm14817_vm0, %v20468_v63 }
 0x8a9   :  { %23929 = vst [vmem:[#allocation35_spill] sm:$0xff] %v20528_v13  ;;  %v11959_v37 = vpop.f32.mrb[61].mxu0 }
 0x8aa   :  { %v7356_v28 = vpop.f32.mrb[156].mxu1  ;;  %v7247_v37 = vld [vmem:[#allocation2 + $0x1db] sm:$0xff] }
 0x8ab   :  { %v13103_v49 = vpop.f32.mrb[157].mxu1  ;;  %13261 = vmatmul.mubr.f32.gmra.mrb[100].mxu1 %v7246_v50 }
 0x8ac   :  { %v20532_v5 = vpop.f32.mrb[62].mxu0  ;;  %13263 = vmatprep.mubr.msk.f32.mxu1 %vm14817_vm0, %v20468_v63 }
 0x8ad   :  { %23930 = vst [vmem:[#allocation43_spill] sm:$0xff] %v20532_v5  ;;  %v11962_v54 = vpop.f32.mrb[63].mxu0 }
 0x8ae   :  { %v7361_v13 = vpop.f32.mrb[158].mxu1 }
 0x8af   :  { %v13106_v22 = vpop.f32.mrb[159].mxu1  ;;  %13264 = vmatmul.mubr.f32.gmra.mrb[102].mxu1 %v7247_v37 }
 0x8b0   :  { %v20536_v16 = vpop.f32.mrb[64].mxu0  ;;  %13266 = vmatprep.mubr.msk.f32.mxu1 %vm14817_vm0, %v20468_v63  ;;  %v7249_v22 = vld [vmem:[#allocation2 + $0x1eb] sm:$0xff] }
 0x8b1   :  { %23931 = vst [vmem:[#allocation143_spill] sm:$0xff] %v20536_v16  ;;  %v11965_v8 = vpop.f32.mrb[65].mxu0 }
 0x8b2   :  { %v7366_v5 = vpop.f32.mrb[160].mxu1 }
 0x8b3   :  { %v13109_v49 = vpop.f32.mrb[161].mxu1  ;;  %13267 = vmatmul.mubr.f32.gmra.mrb[104].mxu1 %v7248_v53 }
 0x8b4   :  { %v20540_v34 = vpop.f32.mrb[66].mxu0  ;;  %13269 = vmatprep.mubr.msk.f32.mxu1 %vm14817_vm0, %v20468_v63 }
 0x8b5   :  { %23932 = vst [vmem:[#allocation203_spill] sm:$0xff] %v20540_v34  ;;  %v11968_v54 = vpop.f32.mrb[67].mxu0 }
 0x8b6   :  { %v7371_v25 = vpop.f32.mrb[0].mxu1 }
 0x8b7   :  { %v20549_v37 = vadd.f32 %v7371_v25, %v20176_v33  ;;  %v13112_v34 = vpop.f32.mrb[1].mxu1  ;;  %13270 = vmatmul.mubr.f32.gmra.mrb[106].mxu1 %v7249_v22 }
 0x8b8   :  { %v4764_v50 = vpop.f32.mrb[162].mxu0  ;;  %13272 = vmatprep.mubr.msk.f32.mxu1 %vm14817_vm0, %v20468_v63 }
 0x8b9   :  { %v20546_v16 = vadd.f32 %v7356_v28, %v4764_v50  ;;  %v12003_v8 = vpop.f32.mrb[163].mxu0  ;;  %23934 = vst [vmem:[#allocation36_spill] sm:$0xff] %v20549_v37 }
 0x8ba   :  { %v7376_v49 = vpop.f32.mrb[2].mxu1  ;;  %v7251_v8 = vld [vmem:[#allocation2 + $0x1fb] sm:$0xff] }
 0x8bb   :  { %23933 = vst [vmem:[#allocation44_spill] sm:$0xff] %v20546_v16  ;;  %v13115_v58 = vpop.f32.mrb[3].mxu1  ;;  %13273 = vmatmul.mubr.f32.gmra.mrb[108].mxu1 %v7250_v52  ;;  %v20556_v50 = vadd.f32 %v7376_v49, %v20182_v59 }
 0x8bc   :  { %v4769_v20 = vpop.f32.mrb[164].mxu0  ;;  %13275 = vmatprep.mubr.msk.f32.mxu1 %vm14817_vm0, %v20468_v63  ;;  %v7252_v58 = vld [vmem:[#allocation2 + $0x203] sm:$0xff] }
 0x8bd   :  { %v20553_v54 = vadd.f32 %v7361_v13, %v4769_v20  ;;  %v12006_v53 = vpop.f32.mrb[165].mxu0  ;;  %23936 = vst [vmem:[#allocation37_spill] sm:$0xff] %v20556_v50 }
 0x8be   :  { %v7381_v34 = vpop.f32.mrb[4].mxu1  ;;  %v7253_v53 = vld [vmem:[#allocation2 + $0x20b] sm:$0xff] }
 0x8bf   :  { %23935 = vst [vmem:[#allocation45_spill] sm:$0xff] %v20553_v54  ;;  %v20563_v20 = vadd.f32 %v7381_v34, %v20188_v41  ;;  %v13118_v13 = vpop.f32.mrb[5].mxu1  ;;  %13276 = vmatmul.mubr.f32.gmra.mrb[110].mxu1 %v7251_v8 }
 0x8c0   :  { %v4774_v28 = vpop.f32.mrb[166].mxu0  ;;  %13278 = vmatprep.mubr.msk.f32.mxu1 %vm14817_vm0, %v20468_v63  ;;  %v7255_v13 = vld [vmem:[#allocation2 + $0x21b] sm:$0xff] }
 0x8c1   :  { %v20560_v25 = vadd.f32 %v7366_v5, %v4774_v28  ;;  %v12009_v33 = vpop.f32.mrb[167].mxu0  ;;  %23938 = vst [vmem:[#allocation204_spill] sm:$0xff] %v20563_v20 }
 0x8c2   :  { %v7386_v52 = vpop.f32.mrb[6].mxu1  ;;  %v7254_v33 = vld [vmem:[#allocation2 + $0x213] sm:$0xff] }
 0x8c3   :  { %23937 = vst [vmem:[#allocation145_spill] sm:$0xff] %v20560_v25  ;;  %v20568_v59 = vadd.f32 %v7386_v52, %v20194_v57  ;;  %v13121_v22 = vpop.f32.mrb[7].mxu1  ;;  %13279 = vmatmul.mubr.f32.gmra.mrb[112].mxu1 %v7252_v58 }
 0x8c4   :  { %13281 = vmatprep.mubr.msk.f32.mxu1 %vm14817_vm0, %v20468_v63  ;;  %v7256_v22 = vld [vmem:[#allocation2 + $0x223] sm:$0xff] }
 0x8c5   :  { %23939 = vst [vmem:[#allocation46_spill] sm:$0xff] %v20568_v59 }
 0x8c6   :  { %v7391_v5 = vpop.f32.mrb[8].mxu1 }
 0x8c7   :  { %v20573_v41 = vadd.f32 %v7391_v5, %v20200_v45  ;;  %v13124_v49 = vpop.f32.mrb[9].mxu1  ;;  %13282 = vmatmul.mubr.f32.gmra.mrb[114].mxu1 %v7253_v53 }
 0x8c8   :  { %13284 = vmatprep.mubr.msk.f32.mxu1 %vm14817_vm0, %v20468_v63  ;;  %v7257_v49 = vld [vmem:[#allocation2 + $0x22b] sm:$0xff] }
 0x8c9   :  { %23940 = vst [vmem:[#allocation206_spill] sm:$0xff] %v20573_v41 }
 0x8ca   :  { %v7396_v28 = vpop.f32.mrb[10].mxu1 }
 0x8cb   :  { %v20578_v57 = vadd.f32 %v7396_v28, %v20206_v14  ;;  %v13127_v34 = vpop.f32.mrb[11].mxu1  ;;  %13285 = vmatmul.mubr.f32.gmra.mrb[116].mxu1 %v7254_v33 }
 0x8cc   :  { %13287 = vmatprep.mubr.msk.f32.mxu1 %vm14817_vm0, %v20468_v63  ;;  %v7258_v34 = vld [vmem:[#allocation2 + $0x233] sm:$0xff] }
 0x8cd   :  { %23941 = vst [vmem:[#allocation50_spill] sm:$0xff] %v20578_v57 }
 0x8ce   :  { %v7401_v8 = vpop.f32.mrb[12].mxu1 }
 0x8cf   :  { %v20583_v45 = vadd.f32 %v7401_v8, %v20212_v55  ;;  %v13130_v52 = vpop.f32.mrb[13].mxu1  ;;  %13288 = vmatmul.mubr.f32.gmra.mrb[118].mxu1 %v7255_v13 }
 0x8d0   :  { %13290 = vmatprep.mubr.msk.f32.mxu1 %vm14817_vm0, %v20468_v63  ;;  %v7259_v52 = vld [vmem:[#allocation2 + $0x23b] sm:$0xff] }
 0x8d1   :  { %23942 = vst [vmem:[#allocation147_spill] sm:$0xff] %v20583_v45 }
 0x8d2   :  { %v7406_v58 = vpop.f32.mrb[14].mxu1 }
 0x8d3   :  { %v20588_v14 = vadd.f32 %v7406_v58, %v20218_v42  ;;  %v13133_v5 = vpop.f32.mrb[15].mxu1  ;;  %13291 = vmatmul.mubr.f32.gmra.mrb[120].mxu1 %v7256_v22 }
 0x8d4   :  { %13293 = vmatprep.mubr.msk.f32.mxu1 %vm14817_vm0, %v20468_v63  ;;  %v7260_v5 = vld [vmem:[#allocation2 + $0x243] sm:$0xff] }
 0x8d5   :  { %23943 = vst [vmem:[#allocation205_spill] sm:$0xff] %v20588_v14 }
 0x8d6   :  { %v7411_v53 = vpop.f32.mrb[16].mxu1 }
 0x8d7   :  { %v20593_v55 = vadd.f32 %v7411_v53, %v20224_v31  ;;  %v13136_v28 = vpop.f32.mrb[17].mxu1  ;;  %13294 = vmatmul.mubr.f32.gmra.mrb[122].mxu1 %v7257_v49 }
 0x8d8   :  { %13296 = vmatprep.mubr.msk.f32.mxu1 %vm14817_vm0, %v20468_v63  ;;  %v7261_v28 = vld [vmem:[#allocation2 + $0x24b] sm:$0xff] }
 0x8d9   :  { %23944 = vst [vmem:[#allocation48_spill] sm:$0xff] %v20593_v55 }
 0x8da   :  { %v7416_v33 = vpop.f32.mrb[18].mxu1 }
 0x8db   :  { %v20598_v42 = vadd.f32 %v7416_v33, %v20230_v36  ;;  %v13139_v8 = vpop.f32.mrb[19].mxu1  ;;  %13297 = vmatmul.mubr.f32.gmra.mrb[124].mxu1 %v7258_v34 }
 0x8dc   :  { %13299 = vmatprep.mubr.msk.f32.mxu1 %vm14817_vm0, %v20468_v63  ;;  %v7262_v8 = vld [vmem:[#allocation2 + $0x253] sm:$0xff] }
 0x8dd   :  { %23945 = vst [vmem:[#allocation38_spill] sm:$0xff] %v20598_v42 }
 0x8de   :  { %v7421_v13 = vpop.f32.mrb[20].mxu1 }
 0x8df   :  { %v20603_v31 = vadd.f32 %v7421_v13, %v20236_v39  ;;  %v13142_v58 = vpop.f32.mrb[21].mxu1  ;;  %13300 = vmatmul.mubr.f32.gmra.mrb[126].mxu1 %v7259_v52 }
 0x8e0   :  { %13302 = vmatprep.mubr.msk.f32.mxu1 %vm14817_vm0, %v20468_v63  ;;  %v7263_v58 = vld [vmem:[#allocation2 + $0x25b] sm:$0xff] }
 0x8e1   :  { %23946 = vst [vmem:[#allocation39_spill] sm:$0xff] %v20603_v31 }
 0x8e2   :  { %v7426_v22 = vpop.f32.mrb[22].mxu1 }
 0x8e3   :  { %v20608_v36 = vadd.f32 %v7426_v22, %v20242_v15  ;;  %v13145_v53 = vpop.f32.mrb[23].mxu1  ;;  %13303 = vmatmul.mubr.f32.gmra.mrb[128].mxu1 %v7260_v5 }
 0x8e4   :  { %13305 = vmatprep.mubr.msk.f32.mxu1 %vm14817_vm0, %v20468_v63  ;;  %v7264_v53 = vld [vmem:[#allocation2 + $0x263] sm:$0xff] }
 0x8e6   :  { %v7431_v49 = vpop.f32.mrb[24].mxu1 }
 0x8e7   :  { %v20613_v39 = vadd.f32 %v7431_v49, %v20248_v44  ;;  %v13148_v33 = vpop.f32.mrb[25].mxu1  ;;  %13306 = vmatmul.mubr.f32.gmra.mrb[130].mxu1 %v7261_v28 }
 0x8e8   :  { %13308 = vmatprep.mubr.msk.f32.mxu1 %vm14817_vm0, %v20468_v63  ;;  %v7265_v33 = vld [vmem:[#allocation2 + $0x26b] sm:$0xff] }
 0x8ea   :  { %v7436_v34 = vpop.f32.mrb[26].mxu1 }
 0x8eb   :  { %v20618_v15 = vadd.f32 %v7436_v34, %v20254_v21  ;;  %v13151_v13 = vpop.f32.mrb[27].mxu1  ;;  %13309 = vmatmul.mubr.f32.gmra.mrb[132].mxu1 %v7262_v8 }
 0x8ec   :  { %13311 = vmatprep.mubr.msk.f32.mxu1 %vm14817_vm0, %v20468_v63  ;;  %v7266_v13 = vld [vmem:[#allocation2 + $0x273] sm:$0xff] }
 0x8ee   :  { %v7441_v52 = vpop.f32.mrb[28].mxu1 }
 0x8ef   :  { %v20623_v44 = vadd.f32 %v7441_v52, %v20260_v61  ;;  %v13154_v22 = vpop.f32.mrb[29].mxu1  ;;  %13312 = vmatmul.mubr.f32.gmra.mrb[134].mxu1 %v7263_v58 }
 0x8f0   :  { %13314 = vmatprep.mubr.msk.f32.mxu1 %vm14817_vm0, %v20468_v63  ;;  %v7267_v22 = vld [vmem:[#allocation2 + $0x27b] sm:$0xff] }
 0x8f2   :  { %v7446_v5 = vpop.f32.mrb[30].mxu1 }
 0x8f3   :  { %v20628_v21 = vadd.f32 %v7446_v5, %v20266_v62  ;;  %v13157_v49 = vpop.f32.mrb[31].mxu1  ;;  %13315 = vmatmul.mubr.f32.gmra.mrb[136].mxu1 %v7264_v53 }
 0x8f4   :  { %13317 = vmatprep.mubr.msk.f32.mxu1 %vm14817_vm0, %v20468_v63  ;;  %v7268_v49 = vld [vmem:[#allocation2 + $0x283] sm:$0xff] }
 0x8f6   :  { %v7451_v28 = vpop.f32.mrb[32].mxu1 }
 0x8f7   :  { %v20633_v61 = vadd.f32 %v7451_v28, %v20272_v4  ;;  %v13160_v34 = vpop.f32.mrb[33].mxu1  ;;  %13318 = vmatmul.mubr.f32.gmra.mrb[138].mxu1 %v7265_v33 }
 0x8f8   :  { %13320 = vmatprep.mubr.msk.f32.mxu1 %vm14817_vm0, %v20468_v63  ;;  %v7269_v34 = vld [vmem:[#allocation2 + $0x28b] sm:$0xff] }
 0x8fa   :  { %v7456_v8 = vpop.f32.mrb[34].mxu1 }
 0x8fb   :  { %v20638_v62 = vadd.f32 %v7456_v8, %v20278_v0  ;;  %v13163_v52 = vpop.f32.mrb[35].mxu1  ;;  %13321 = vmatmul.mubr.f32.gmra.mrb[140].mxu1 %v7266_v13 }
 0x8fc   :  { %13323 = vmatprep.mubr.msk.f32.mxu1 %vm14817_vm0, %v20468_v63  ;;  %v7270_v52 = vld [vmem:[#allocation2 + $0x293] sm:$0xff] }
 0x8fe   :  { %v7461_v58 = vpop.f32.mrb[36].mxu1 }
 0x8ff   :  { %v20643_v4 = vadd.f32 %v7461_v58, %v20284_v6  ;;  %v13166_v5 = vpop.f32.mrb[37].mxu1  ;;  %13324 = vmatmul.mubr.f32.gmra.mrb[142].mxu1 %v7267_v22 }
 0x900   :  { %13326 = vmatprep.mubr.msk.f32.mxu1 %vm14817_vm0, %v20468_v63  ;;  %v7271_v5 = vld [vmem:[#allocation2 + $0x29b] sm:$0xff] }
 0x901   :  { %23947 = vst [vmem:[#allocation40_spill] sm:$0xff] %v20643_v4 }
 0x902   :  { %v7466_v53 = vpop.f32.mrb[38].mxu1 }
 0x903   :  { %v20648_v0 = vadd.f32 %v7466_v53, %v20290_v11  ;;  %v13169_v28 = vpop.f32.mrb[39].mxu1  ;;  %13327 = vmatmul.mubr.f32.gmra.mrb[144].mxu1 %v7268_v49  ;;  %v7272_v49 = vld [vmem:[#allocation2 + $0x2a3] sm:$0xff] }
 0x904   :  { %13329 = vmatprep.mubr.msk.f32.mxu1 %vm14817_vm0, %v20468_v63 }
 0x906   :  { %v7471_v33 = vpop.f32.mrb[40].mxu1 }
 0x907   :  { %v20653_v6 = vadd.f32 %v7471_v33, %v20296_v51  ;;  %v13172_v8 = vpop.f32.mrb[41].mxu1  ;;  %13330 = vmatmul.mubr.f32.gmra.mrb[146].mxu1 %v7269_v34  ;;  %v7273_v34 = vld [vmem:[#allocation2 + $0x2ab] sm:$0xff] }
 0x908   :  { %13332 = vmatprep.mubr.msk.f32.mxu1 %vm14817_vm0, %v20468_v63 }
 0x90a   :  { %v7476_v13 = vpop.f32.mrb[42].mxu1 }
 0x90b   :  { %v20658_v11 = vadd.f32 %v7476_v13, %v20302_v23  ;;  %v13175_v58 = vpop.f32.mrb[43].mxu1  ;;  %13333 = vmatmul.mubr.f32.gmra.mrb[148].mxu1 %v7270_v52 }
 0x90c   :  { %13335 = vmatprep.mubr.msk.f32.mxu1 %vm14817_vm0, %v20468_v63 }
 0x90d   :  { %23948 = vst [vmem:[#allocation54_spill] sm:$0xff] %v20658_v11 }
 0x90e   :  { %v7481_v22 = vpop.f32.mrb[44].mxu1 }
 0x90f   :  { %v20663_v51 = vadd.f32 %v7481_v22, %v20308_v47  ;;  %v13178_v53 = vpop.f32.mrb[45].mxu1  ;;  %13336 = vmatmul.mubr.f32.gmra.mrb[150].mxu1 %v7271_v5 }
 0x910   :  { %13338 = vmatprep.mubr.msk.f32.mxu1 %vm14817_vm0, %v20468_v63 }
 0x911   :  { %23949 = vst [vmem:[#allocation149_spill] sm:$0xff] %v20663_v51 }
 0x912   :  { %v7486_v28 = vpop.f32.mrb[46].mxu1 }
 0x913   :  { %v20668_v23 = vadd.f32 %v7486_v28, %v20314_v12  ;;  %v13181_v33 = vpop.f32.mrb[47].mxu1  ;;  %13339 = vmatmul.mubr.f32.gmra.mrb[152].mxu1 %v7272_v49 }
 0x914   :  { %13341 = vmatprep.mubr.msk.f32.mxu1 %vm14817_vm0, %v20468_v63 }
 0x916   :  { %v7491_v8 = vpop.f32.mrb[48].mxu1 }
 0x917   :  { %v20673_v47 = vadd.f32 %v7491_v8, %v20320_v40  ;;  %v13184_v13 = vpop.f32.mrb[49].mxu1  ;;  %13342 = vmatmul.mubr.f32.gmra.mrb[154].mxu1 %v7273_v34 }
 0x919   :  { %23950 = vst [vmem:[#allocation207_spill] sm:$0xff] %v20673_v47 }
 0x91a   :  { %v7496_v52 = vpop.f32.mrb[50].mxu1 }
 0x91b   :  { %v20676_v58 = vadd.f32 %v7496_v52, %v20326_v38  ;;  %v13187_v22 = vpop.f32.mrb[51].mxu1 }
 0x91e   :  { %v7501_v5 = vpop.f32.mrb[52].mxu1 }
 0x91f   :  { %v20679_v12 = vadd.f32 %v7501_v5, %v20332_v48  ;;  %v13190_v53 = vpop.f32.mrb[53].mxu1 }
 0x920   :  { %v20693_v53 = vpop.permute.xlu1 %8244 }
 0x921   :  { %23951 = vst [vmem:[#allocation52_spill] sm:$0xff] %v20679_v12  ;;  %23956 = vst [vmem:[#allocation53_spill] sm:$0xff] %v20693_v53 }
 0x922   :  { %v7506_v49 = vpop.f32.mrb[54].mxu1 }
 0x923   :  { %v20682_v63 = vadd.f32 %v7506_v49, %v20338_v3  ;;  %v13193_v28 = vpop.f32.mrb[55].mxu1 }
 0x925   :  { %23952 = vst [vmem:[#allocation209_spill] sm:$0xff] %v20682_v63 }
 0x926   :  { %v7511_v33 = vpop.f32.mrb[56].mxu1 }
 0x927   :  { %v20685_v40 = vadd.f32 %v7511_v33, %v20342_v29  ;;  %v13196_v34 = vpop.f32.mrb[57].mxu1  ;;  %v20698_v29 = vpop.permute.xlu0 %8249 }
 0x928   :  { %23958 = vst [vmem:[#allocation211_spill] sm:$0xff] %v20698_v29  ;;  %v20703_v34 = vpop.permute.xlu1 %8254  ;;  %v23965_v29 = vld [vmem:[#allocation201_spill] sm:$0xff] }
 0x929   :  { %23953 = vst [vmem:[#allocation56_spill] sm:$0xff] %v20685_v40  ;;  %23960 = vst [vmem:[#allocation153_spill] sm:$0xff] %v20703_v34 }
 0x92a   :  { %v7516_v8 = vpop.f32.mrb[58].mxu1 }
 0x92b   :  { %v20688_v38 = vadd.f32 %v7516_v8, %v20346_v1  ;;  %v13199_v13 = vpop.f32.mrb[59].mxu1  ;;  %v20705_v8 = vpop.permute.xlu0 %8259 }
 0x92c   :  { %23961 = vst [vmem:[#allocation210_spill] sm:$0xff] %v20705_v8 }
 0x92d   :  { %23954 = vst [vmem:[#allocation151_spill] sm:$0xff] %v20688_v38 }
 0x92e   :  { %v7521_v52 = vpop.f32.mrb[60].mxu1 }
 0x92f   :  { %v20691_v48 = vadd.f32 %v7521_v52, %v20350_v30  ;;  %v13202_v22 = vpop.f32.mrb[61].mxu1  ;;  %v20721_v53 = vpop.permute.xlu0 %8269 }
 0x930   :  { %v23963_v22 = vld [vmem:[#allocation218_spill] sm:$0xff]  ;;  %23968 = vst [vmem:[#allocation60_spill] sm:$0xff] %v20721_v53 }
 0x931   :  { %23955 = vst [vmem:[#allocation208_spill] sm:$0xff] %v20691_v48 }
 0x932   :  { %v7526_v5 = vpop.f32.mrb[62].mxu1 }
 0x933   :  { %v20696_v3 = vadd.f32 %v7526_v5, %v20354_v60  ;;  %v13205_v49 = vpop.f32.mrb[63].mxu1  ;;  %v8328_v60 = vmul.f32 %v20553_v54, %v23963_v22  ;;  %v20734_v53 = vpop.permute.xlu0 %8279 }
 0x934   :  { %v20712_v49 = vpop.permute.xlu1 %8264 }
 0x935   :  { %23957 = vst [vmem:[#allocation154_spill] sm:$0xff] %v20696_v3  ;;  %23964 = vst [vmem:[#allocation156_spill] sm:$0xff] %v20712_v49  ;;  %v8410_v22 = vsel %vm8408_vm2, %v8328_v60, 0.0 }
 0x936   :  { %v7531_v28 = vpop.f32.mrb[64].mxu1 }
 0x937   :  { %v20701_v33 = vadd.f32 %v7531_v28, %v20358_v17  ;;  %v13208_v1 = vpop.f32.mrb[65].mxu1  ;;  %v8327_v17 = vmul.f32 %v20546_v16, %v23965_v29  ;;  %v23966_v28 = vld [vmem:[#allocation223_spill] sm:$0xff] }
 0x938   :  { %v8329_v1 = vmul.f32 %v20560_v25, %v23966_v28  ;;  %v20727_v16 = vpop.permute.xlu1 %8274 }
 0x939   :  { %23959 = vst [vmem:[#allocation58_spill] sm:$0xff] %v20701_v33  ;;  %23970 = vst [vmem:[#allocation212_spill] sm:$0xff] %v20727_v16  ;;  %v8409_v28 = vsel %vm8408_vm2, %v8327_v17, 0.0 }
 0x93a   :  { %v7536_v30 = vpop.f32.mrb[66].mxu1  ;;  %v8578_v54 = vmul.f32 %v8329_v1, %v8329_v1 }
 0x93b   :  { %v20708_v13 = vadd.f32 %v7536_v30, %v20362_v26  ;;  %v13211_v52 = vpop.f32.mrb[67].mxu1  ;;  %v8577_v26 = vmul.f32 %v8328_v60, %v8328_v60 }
 0x93c   :  { %v8576_v52 = vmul.f32 %v8327_v17, %v8327_v17 }
 0x93d   :  { %23962 = vst [vmem:[#allocation55_spill] sm:$0xff] %v20708_v13 }
 0x93e   :  { %v7541_v5 = vpop.f32.mrb[68].mxu1  ;;  %v8657_v13 = vsel %vm8408_vm2, %v8576_v52, 0.0 }
 0x93f   :  { %v20719_v34 = vadd.f32 %v7541_v5, %v20366_v32  ;;  %v13214_v8 = vpop.f32.mrb[69].mxu1  ;;  %v8658_v32 = vsel %vm8408_vm2, %v8577_v26, 0.0  ;;  %v23971_v5 = vld [vmem:[#allocation243_spill] sm:$0xff] }
 0x940   :  { %v8412_v8 = vsel %vm8408_vm2, %v8329_v1, 0.0  ;;  %v8330_v25 = vmul.f32 %v20549_v37, %v23971_v5  ;;  %v8659_v17 = vadd.f32 %v8658_v32, %v8657_v13  ;;  %v20743_v37 = vpop.permute.xlu1 %8284  ;;  %v23974_v32 = vld [vmem:[#allocation92_spill] sm:$0xff] }
 0x941   :  { %23967 = vst [vmem:[#allocation213_spill] sm:$0xff] %v20719_v34  ;;  %v8411_v34 = vadd.f32 %v8410_v22, %v8409_v28  ;;  %v20749_v28 = vpop.permute.xlu0 %8289 }
 0x942   :  { %v7546_v30 = vpop.f32.mrb[70].mxu1  ;;  %v8579_v26 = vmul.f32 %v8330_v25, %v8330_v25  ;;  %v8414_v22 = vsel %vm8408_vm2, %v8330_v25, 0.0 }
 0x943   :  { %v20725_v49 = vadd.f32 %v7546_v30, %v20370_v19  ;;  %v13217_v29 = vpop.f32.mrb[71].mxu1  ;;  %v8660_v19 = vsel %vm8408_vm2, %v8578_v54, 0.0  ;;  %v8413_v16 = vadd.f32 %v8412_v8, %v8411_v34  ;;  %v8332_v8 = vmul.f32 %v20563_v20, %v23974_v32 }
 0x944   :  { %v8661_v33 = vadd.f32 %v8660_v19, %v8659_v17  ;;  %v8662_v13 = vsel %vm8408_vm2, %v8579_v26, 0.0  ;;  %v20758_v17 = vpop.permute.xlu1 %8294 }
 0x945   :  { %23969 = vst [vmem:[#allocation155_spill] sm:$0xff] %v20725_v49  ;;  %v23973_v49 = vld [vmem:[#allocation246_spill] sm:$0xff] }
 0x946   :  { %v7551_v60 = vpop.f32.mrb[72].mxu1  ;;  %v8331_v1 = vmul.f32 %v20556_v50, %v23973_v49  ;;  %v8663_v49 = vadd.f32 %v8662_v13, %v8661_v33  ;;  %v8418_v13 = vsel %vm8408_vm2, %v8332_v8, 0.0 }
 0x947   :  { %v20739_v30 = vadd.f32 %v7551_v60, %v20374_v18  ;;  %v13220_v29 = vpop.f32.mrb[73].mxu1  ;;  %v8415_v18 = vadd.f32 %v8414_v22, %v8413_v16  ;;  %v8581_v16 = vmul.f32 %v8332_v8, %v8332_v8  ;;  %v23975_v22 = vld [vmem:[#allocation93_spill] sm:$0xff] }
 0x948   :  { %v8580_v34 = vmul.f32 %v8331_v1, %v8331_v1  ;;  %v8416_v19 = vsel %vm8408_vm2, %v8331_v1, 0.0  ;;  %v8333_v26 = vmul.f32 %v20568_v59, %v23975_v22  ;;  %v20772_v22 = vpop.permute.xlu1 %8304 }
 0x949   :  { %23972 = vst [vmem:[#allocation57_spill] sm:$0xff] %v20739_v30  ;;  %23978 = vst [vmem:[#allocation63_spill] sm:$0xff] %v20772_v22  ;;  %v23982_v22 = vld [vmem:[#allocation101_spill] sm:$0xff] }
 0x94a   :  { %v7556_v5 = vpop.f32.mrb[74].mxu1 }
 0x94b   :  { %v20747_v52 = vadd.f32 %v7556_v5, %v20378_v35  ;;  %v13223_v54 = vpop.f32.mrb[75].mxu1  ;;  %v8417_v35 = vadd.f32 %v8416_v19, %v8415_v18  ;;  %v8664_v5 = vsel %vm8408_vm2, %v8580_v34, 0.0  ;;  %v8666_v18 = vsel %vm8408_vm2, %v8581_v16, 0.0 }
 0x94c   :  { %v20763_v54 = vpop.permute.xlu0 %8299  ;;  %v8665_v32 = vadd.f32 %v8664_v5, %v8663_v49  ;;  %v8582_v19 = vmul.f32 %v8333_v26, %v8333_v26  ;;  %v8420_v49 = vsel %vm8408_vm2, %v8333_v26, 0.0  ;;  %v23979_v5 = vld [vmem:[#allocation97_spill] sm:$0xff] }
 0x94d   :  { %v8335_v8 = vmul.f32 %v20578_v57, %v23979_v5  ;;  %v8337_v5 = vmul.f32 %v20588_v14, %v23982_v22  ;;  %v23986_v57 = vld [vmem:[#allocation115_spill] sm:$0xff] }
 0x94e   :  { %v7561_v60 = vpop.f32.mrb[76].mxu1  ;;  %v8667_v20 = vadd.f32 %v8666_v18, %v8665_v32  ;;  %v8339_v22 = vmul.f32 %v20598_v42, %v23986_v57 }
 0x94f   :  { %v20756_v29 = vadd.f32 %v7561_v60, %v20382_v7  ;;  %v13226_v25 = vpop.f32.mrb[77].mxu1  ;;  %v8419_v60 = vadd.f32 %v8418_v13, %v8417_v35  ;;  %v8668_v13 = vsel %vm8408_vm2, %v8582_v19, 0.0  ;;  %v8584_v59 = vmul.f32 %v8335_v8, %v8335_v8 }
 0x950   :  { %v23977_v25 = vld [vmem:[#allocation95_spill] sm:$0xff]  ;;  %v20780_v35 = vpop.permute.xlu0 %8309  ;;  %v8669_v18 = vadd.f32 %v8668_v13, %v8667_v20 }
 0x951   :  { %v8334_v34 = vmul.f32 %v20573_v41, %v23977_v25  ;;  %v8421_v16 = vadd.f32 %v8420_v49, %v8419_v60  ;;  %v23981_v25 = vld [vmem:[#allocation99_spill] sm:$0xff]  ;;  %v20791_v60 = vpop.permute.xlu1 %8314  ;;  %v8424_v49 = vsel %vm8408_vm2, %v8335_v8, 0.0 }
 0x952   :  { %v7566_v33 = vpop.f32.mrb[78].mxu1  ;;  %v8336_v32 = vmul.f32 %v20583_v45, %v23981_v25  ;;  %23983 = vst [vmem:[#allocation214_spill] sm:$0xff] %v20791_v60  ;;  %v23984_v20 = vld [vmem:[#allocation111_spill] sm:$0xff] }
 0x953   :  { %v20767_v1 = vadd.f32 %v7566_v33, %v20386_v24  ;;  %v13229_v7 = vpop.f32.mrb[79].mxu1  ;;  %v8422_v26 = vsel %vm8408_vm2, %v8334_v34, 0.0  ;;  %v8338_v13 = vmul.f32 %v20593_v55, %v23984_v20  ;;  %v8428_v20 = vsel %vm8408_vm2, %v8337_v5, 0.0 }
 0x954   :  { %v8583_v7 = vmul.f32 %v8334_v34, %v8334_v34  ;;  %v8585_v25 = vmul.f32 %v8336_v32, %v8336_v32  ;;  %v20797_v34 = vpop.permute.xlu0 %8319 }
 0x955   :  { %23976 = vst [vmem:[#allocation215_spill] sm:$0xff] %v20767_v1  ;;  %23985 = vst [vmem:[#allocation59_spill] sm:$0xff] %v20797_v34  ;;  %v8587_v55 = vmul.f32 %v8338_v13, %v8338_v13  ;;  %v8588_v34 = vmul.f32 %v8339_v22, %v8339_v22  ;;  %v20812_v60 = vpop.permute.xlu1 %8324 }
 0x956   :  { %v7571_v50 = vpop.f32.mrb[80].mxu1  ;;  %v8670_v19 = vsel %vm8408_vm2, %v8583_v7, 0.0  ;;  %v8674_v14 = vsel %vm8408_vm2, %v8585_v25, 0.0  ;;  %23990 = vst [vmem:[#allocation65_spill] sm:$0xff] %v20812_v60 }
 0x957   :  { %v20778_v24 = vadd.f32 %v7571_v50, %v20390_v27  ;;  %v13232_v33 = vpop.f32.mrb[81].mxu1  ;;  %v8671_v45 = vadd.f32 %v8670_v19, %v8669_v18  ;;  %v23988_v18 = vld [vmem:[#allocation134_spill] sm:$0xff] }
 0x958   :  { %v8423_v33 = vadd.f32 %v8422_v26, %v8421_v16  ;;  %v8426_v16 = vsel %vm8408_vm2, %v8336_v32, 0.0  ;;  %v8586_v26 = vmul.f32 %v8337_v5, %v8337_v5  ;;  %v8340_v19 = vmul.f32 %v20603_v31, %v23988_v18  ;;  %v20810_v57 = vpop.permute.xlu0 %9088 }
 0x959   :  { %23980 = vst [vmem:[#allocation158_spill] sm:$0xff] %v20778_v24  ;;  %23989 = vst [vmem:[#allocation217_spill] sm:$0xff] %v20810_v57 }
 0x95a   :  { %v7576_v41 = vpop.f32.mrb[82].mxu1 }
 0x95b   :  { %v20789_v27 = vadd.f32 %v7576_v41, %v20394_v10  ;;  %v13235_v50 = vpop.f32.mrb[83].mxu1  ;;  %v8672_v41 = vsel %vm8408_vm2, %v8584_v59, 0.0 }
 0x95c   :  { %v8425_v50 = vadd.f32 %v8424_v49, %v8423_v33  ;;  %v8673_v42 = vadd.f32 %v8672_v41, %v8671_v45  ;;  %v8430_v33 = vsel %vm8408_vm2, %v8338_v13, 0.0  ;;  %v23991_v49 = vld [vmem:[#allocation135_spill] sm:$0xff]  ;;  %v8678_v45 = vsel %vm8408_vm2, %v8587_v55, 0.0 }
 0x95d   :  { %v8341_v25 = vmul.f32 %v20608_v36, %v23991_v49  ;;  %v8432_v41 = vsel %vm8408_vm2, %v8339_v22, 0.0  ;;  %v8680_v13 = vsel %vm8408_vm2, %v8588_v34, 0.0  ;;  %v20826_v49 = vpop.permute.xlu1 %9090 }
 0x95e   :  { %v7581_v10 = vpop.f32.mrb[84].mxu1  ;;  %v8427_v59 = vadd.f32 %v8426_v16, %v8425_v50  ;;  %v8589_v16 = vmul.f32 %v8340_v19, %v8340_v19  ;;  %v23992_v50 = vld [vmem:[#allocation137_spill] sm:$0xff]  ;;  %23993 = vst [vmem:[#allocation160_spill] sm:$0xff] %v20826_v49  ;;  %v23997_v49 = vld [vmem:[#allocation140_spill] sm:$0xff] }
 0x95f   :  { %v20804_v7 = vadd.f32 %v7581_v10, %v20398_v46  ;;  %v13238_v8 = vpop.f32.mrb[85].mxu1  ;;  %v8676_v46 = vsel %vm8408_vm2, %v8586_v26, 0.0  ;;  %v8342_v57 = vmul.f32 %v20613_v39, %v23992_v50  ;;  %v8436_v34 = vsel %vm8408_vm2, %v8341_v25, 0.0 }
 0x960   :  { %v8675_v8 = vadd.f32 %v8674_v14, %v8673_v42  ;;  %v8429_v18 = vadd.f32 %v8428_v20, %v8427_v59  ;;  %v23994_v14 = vld [vmem:[#allocation138_spill] sm:$0xff]  ;;  %v20834_v20 = vpop.permute.xlu0 %9092 }
 0x961   :  { %23987 = vst [vmem:[#allocation161_spill] sm:$0xff] %v20804_v7  ;;  %v8343_v42 = vmul.f32 %v20618_v15, %v23994_v14  ;;  %23995 = vst [vmem:[#allocation216_spill] sm:$0xff] %v20834_v20  ;;  %v8345_v14 = vmul.f32 %v20628_v21, %v23997_v49  ;;  %v24000_v49 = vld [vmem:[#allocation152_spill] sm:$0xff] }
 0x962   :  { %v7586_v32 = vpop.f32.mrb[86].mxu1  ;;  %v8677_v26 = vadd.f32 %v8676_v46, %v8675_v8  ;;  %v8431_v31 = vadd.f32 %v8430_v33, %v8429_v18  ;;  %v8682_v33 = vsel %vm8408_vm2, %v8589_v16, 0.0  ;;  %v23996_v8 = vld [vmem:[#allocation139_spill] sm:$0xff] }
 0x963   :  { %v20819_v5 = vadd.f32 %v7586_v32, %v20402_v2  ;;  %v13241_v10 = vpop.f32.mrb[87].mxu1  ;;  %v8434_v2 = vsel %vm8408_vm2, %v8340_v19, 0.0  ;;  %v8590_v32 = vmul.f32 %v8341_v25, %v8341_v25  ;;  %v8344_v19 = vmul.f32 %v20623_v44, %v23996_v8 }
 0x964   :  { %v8679_v59 = vadd.f32 %v8678_v45, %v8677_v26  ;;  %v8433_v46 = vadd.f32 %v8432_v41, %v8431_v31  ;;  %v8591_v10 = vmul.f32 %v8342_v57, %v8342_v57  ;;  %v8592_v45 = vmul.f32 %v8343_v42, %v8343_v42  ;;  %v20847_v26 = vpop.permute.xlu1 %9094 }
 0x965   :  { %23999 = vst [vmem:[#allocation220_spill] sm:$0xff] %v20847_v26  ;;  %v8594_v20 = vmul.f32 %v8345_v14, %v8345_v14 }
 0x966   :  { %v7591_v60 = vpop.f32.mrb[88].mxu1  ;;  %v8681_v18 = vadd.f32 %v8680_v13, %v8679_v59  ;;  %v8435_v50 = vadd.f32 %v8434_v2, %v8433_v46  ;;  %v8686_v13 = vsel %vm8408_vm2, %v8591_v10, 0.0  ;;  %v8440_v2 = vsel %vm8408_vm2, %v8343_v42, 0.0 }
 0x967   :  { %v20832_v55 = vadd.f32 %v7591_v60, %v20406_v56  ;;  %v13244_v22 = vpop.f32.mrb[89].mxu1  ;;  %v8684_v60 = vsel %vm8408_vm2, %v8590_v32, 0.0  ;;  %v8593_v59 = vmul.f32 %v8344_v19, %v8344_v19  ;;  %v8346_v46 = vmul.f32 %v20633_v61, %v24000_v49  ;;  %v20853_v32 = vpop.permute.xlu0 %9096 }
 0x968   :  { %v8438_v22 = vsel %vm8408_vm2, %v8342_v57, 0.0  ;;  %v8683_v25 = vadd.f32 %v8682_v33, %v8681_v18  ;;  %v8437_v16 = vadd.f32 %v8436_v34, %v8435_v50  ;;  %24001 = vst [vmem:[#allocation69_spill] sm:$0xff] %v20853_v32  ;;  %v8442_v33 = vsel %vm8408_vm2, %v8344_v19, 0.0  ;;  %v24002_v34 = vld [vmem:[#allocation166_spill] sm:$0xff] }
 0x969   :  { %v8347_v18 = vmul.f32 %v20638_v62, %v24002_v34  ;;  %v8690_v49 = vsel %vm8408_vm2, %v8593_v59, 0.0  ;;  %v8692_v19 = vsel %vm8408_vm2, %v8594_v20, 0.0  ;;  %v20867_v34 = vpop.permute.xlu1 %9098  ;;  %v24007_v59 = vld [vmem:[#allocation62_spill] sm:$0xff] }
 0x96a   :  { %v7596_v56 = vpop.f32.mrb[90].mxu1  ;;  %v8685_v57 = vadd.f32 %v8684_v60, %v8683_v25  ;;  %v8439_v8 = vadd.f32 %v8438_v22, %v8437_v16  ;;  %v8444_v60 = vsel %vm8408_vm2, %v8345_v14, 0.0  ;;  %v8595_v22 = vmul.f32 %v8346_v46, %v8346_v46  ;;  %v24004_v25 = vld [vmem:[#allocation182_spill] sm:$0xff]  ;;  %24005 = vst [vmem:[#allocation219_spill] sm:$0xff] %v20867_v34 }
 0x96b   :  { %v20845_v31 = vadd.f32 %v7596_v56, %v20410_v43  ;;  %v13247_v41 = vpop.f32.mrb[91].mxu1  ;;  %v8688_v56 = vsel %vm8408_vm2, %v8592_v45, 0.0  ;;  %v8348_v16 = vmul.f32 %v20643_v4, %v24004_v25  ;;  %v8448_v20 = vsel %vm8408_vm2, %v8347_v18, 0.0  ;;  %v24010_v4 = vld [vmem:[#allocation3_spill] sm:$0xff] }
 0x96c   :  { %v8687_v50 = vadd.f32 %v8686_v13, %v8685_v57  ;;  %v8441_v41 = vadd.f32 %v8440_v2, %v8439_v8  ;;  %v24006_v13 = vld [vmem:[#allocation51_spill] sm:$0xff]  ;;  %v20875_v8 = vpop.permute.xlu0 %9100 }
 0x96d   :  { %23998 = vst [vmem:[#allocation61_spill] sm:$0xff] %v20845_v31  ;;  %v8349_v2 = vmul.f32 %v20648_v0, %v24006_v13  ;;  %24008 = vst [vmem:[#allocation64_spill] sm:$0xff] %v20875_v8  ;;  %v8351_v13 = vmul.f32 %v20658_v11, %v24010_v4  ;;  %v20888_v8 = vpop.permute.xlu1 %9102  ;;  %v24014_v4 = vld [vmem:[#allocation94_spill] sm:$0xff] }
 0x96e   :  { %v7601_v43 = vpop.f32.mrb[92].mxu1  ;;  %v8689_v45 = vadd.f32 %v8688_v56, %v8687_v50  ;;  %v8443_v32 = vadd.f32 %v8442_v33, %v8441_v41  ;;  %v8694_v33 = vsel %vm8408_vm2, %v8595_v22, 0.0  ;;  %v8597_v50 = vmul.f32 %v8348_v16, %v8348_v16  ;;  %v24009_v41 = vld [vmem:[#allocation183_spill] sm:$0xff]  ;;  %24013 = vst [vmem:[#allocation4_spill] sm:$0xff] %v20888_v8 }
 0x96f   :  { %v20860_v10 = vadd.f32 %v7601_v43, %v20414_v9  ;;  %v13250_v42 = vpop.f32.mrb[93].mxu1  ;;  %v8446_v9 = vsel %vm8408_vm2, %v8346_v46, 0.0  ;;  %v8596_v43 = vmul.f32 %v8347_v18, %v8347_v18  ;;  %v8350_v46 = vmul.f32 %v20653_v6, %v24009_v41 }
 0x970   :  { %v8691_v42 = vadd.f32 %v8690_v49, %v8689_v45  ;;  %v8445_v56 = vadd.f32 %v8444_v60, %v8443_v32  ;;  %v8598_v49 = vmul.f32 %v8349_v2, %v8349_v2  ;;  %v24011_v32 = vld [vmem:[#allocation124_spill] sm:$0xff]  ;;  %v8600_v11 = vmul.f32 %v8351_v13, %v8351_v13 }
 0x971   :  { %24003 = vst [vmem:[#allocation163_spill] sm:$0xff] %v20860_v10 }
 0x972   :  { %v7606_v26 = vpop.f32.mrb[94].mxu1  ;;  %v8693_v25 = vadd.f32 %v8692_v19, %v8691_v42  ;;  %v8447_v34 = vadd.f32 %v8446_v9, %v8445_v56  ;;  %v8698_v19 = vsel %vm8408_vm2, %v8597_v50, 0.0  ;;  %v8452_v9 = vsel %vm8408_vm2, %v8349_v2, 0.0  ;;  %v24017_v50 = vld [vmem:[#allocation66_spill] sm:$0xff] }
 0x973   :  { %v20873_v57 = vadd.f32 %v7606_v26, %v24007_v59  ;;  %v13253_v14 = vpop.f32.mrb[95].mxu1  ;;  %v8696_v59 = vsel %vm8408_vm2, %v8596_v43, 0.0  ;;  %v8599_v42 = vmul.f32 %v8350_v46, %v8350_v46  ;;  %v8352_v56 = vmul.f32 %v20663_v51, %v24014_v4  ;;  %v20894_v43 = vpop.permute.xlu0 %9104 }
 0x974   :  { %v8450_v14 = vsel %vm8408_vm2, %v8348_v16, 0.0  ;;  %v8695_v18 = vadd.f32 %v8694_v33, %v8693_v25  ;;  %v8449_v45 = vadd.f32 %v8448_v20, %v8447_v34  ;;  %24015 = vst [vmem:[#allocation165_spill] sm:$0xff] %v20894_v43  ;;  %v8454_v34 = vsel %vm8408_vm2, %v8350_v46, 0.0  ;;  %v24016_v33 = vld [vmem:[#allocation184_spill] sm:$0xff] }
 0x975   :  { %v8353_v20 = vmul.f32 %v20668_v23, %v24016_v33  ;;  %v8702_v4 = vsel %vm8408_vm2, %v8599_v42, 0.0  ;;  %v8704_v46 = vsel %vm8408_vm2, %v8600_v11, 0.0  ;;  %v20908_v33 = vpop.permute.xlu1 %9106  ;;  %v24021_v42 = vld [vmem:[#allocation70_spill] sm:$0xff] }
 0x976   :  { %v7611_v26 = vpop.f32.mrb[96].mxu1  ;;  %v8697_v16 = vadd.f32 %v8696_v59, %v8695_v18  ;;  %v8451_v41 = vadd.f32 %v8450_v14, %v8449_v45  ;;  %v8456_v59 = vsel %vm8408_vm2, %v8351_v13, 0.0  ;;  %v8601_v14 = vmul.f32 %v8352_v56, %v8352_v56  ;;  %v24018_v18 = vld [vmem:[#allocation5_spill] sm:$0xff]  ;;  %24019 = vst [vmem:[#allocation221_spill] sm:$0xff] %v20908_v33 }
 0x977   :  { %v20886_v60 = vadd.f32 %v7611_v26, %v24011_v32  ;;  %v13256_v22 = vpop.f32.mrb[97].mxu1  ;;  %v8700_v32 = vsel %vm8408_vm2, %v8598_v49, 0.0  ;;  %v8354_v45 = vmul.f32 %v20673_v47, %v24018_v18  ;;  %v8460_v11 = vsel %vm8408_vm2, %v8353_v20, 0.0  ;;  %v24024_v47 = vld [vmem:[#allocation186_spill] sm:$0xff] }
 0x978   :  { %v8699_v22 = vadd.f32 %v8698_v19, %v8697_v16  ;;  %v8453_v8 = vadd.f32 %v8452_v9, %v8451_v41  ;;  %v24020_v19 = vld [vmem:[#allocation185_spill] sm:$0xff]  ;;  %v20916_v41 = vpop.permute.xlu0 %9108 }
 0x979   :  { %24012 = vst [vmem:[#allocation222_spill] sm:$0xff] %v20886_v60  ;;  %v8355_v9 = vmul.f32 %v20676_v58, %v24020_v19  ;;  %24022 = vst [vmem:[#allocation67_spill] sm:$0xff] %v20916_v41  ;;  %v8357_v19 = vmul.f32 %v20682_v63, %v24024_v47  ;;  %v20929_v41 = vpop.permute.xlu1 %9110  ;;  %v24028_v47 = vld [vmem:[#allocation10_spill] sm:$0xff] }
 0x97a   :  { %v7616_v26 = vpop.f32.mrb[98].mxu1  ;;  %v8701_v49 = vadd.f32 %v8700_v32, %v8699_v22  ;;  %v8455_v43 = vadd.f32 %v8454_v34, %v8453_v8  ;;  %v8706_v8 = vsel %vm8408_vm2, %v8601_v14, 0.0  ;;  %v8603_v34 = vmul.f32 %v8354_v45, %v8354_v45  ;;  %v24023_v22 = vld [vmem:[#allocation6_spill] sm:$0xff]  ;;  %24027 = vst [vmem:[#allocation167_spill] sm:$0xff] %v20929_v41 }
 0x97b   :  { %v20901_v25 = vadd.f32 %v7616_v26, %v24017_v50  ;;  %v13259_v2 = vpop.f32.mrb[99].mxu1  ;;  %v8458_v26 = vsel %vm8408_vm2, %v8352_v56, 0.0  ;;  %v8602_v50 = vmul.f32 %v8353_v20, %v8353_v20  ;;  %v8356_v56 = vmul.f32 %v20679_v12, %v24023_v22 }
 0x97c   :  { %v8703_v2 = vadd.f32 %v8702_v4, %v8701_v49  ;;  %v8457_v32 = vadd.f32 %v8456_v59, %v8455_v43  ;;  %v8604_v4 = vmul.f32 %v8355_v9, %v8355_v9  ;;  %v24025_v43 = vld [vmem:[#allocation68_spill] sm:$0xff]  ;;  %v8606_v63 = vmul.f32 %v8357_v19, %v8357_v19 }
 0x97e   :  { %v7621_v51 = vpop.f32.mrb[100].mxu1  ;;  %v8705_v18 = vadd.f32 %v8704_v46, %v8703_v2  ;;  %v8459_v33 = vadd.f32 %v8458_v26, %v8457_v32  ;;  %v8710_v46 = vsel %vm8408_vm2, %v8603_v34, 0.0  ;;  %v8464_v26 = vsel %vm8408_vm2, %v8355_v9, 0.0  ;;  %v24031_v34 = vld [vmem:[#allocation15_spill] sm:$0xff] }
 0x97f   :  { %v20914_v16 = vadd.f32 %v7621_v51, %v24021_v42  ;;  %v13262_v13 = vpop.f32.mrb[101].mxu1  ;;  %v8708_v42 = vsel %vm8408_vm2, %v8602_v50, 0.0  ;;  %v8605_v2 = vmul.f32 %v8356_v56, %v8356_v56  ;;  %v8358_v32 = vmul.f32 %v20685_v40, %v24028_v47  ;;  %v20935_v50 = vpop.permute.xlu0 %9112 }
 0x980   :  { %v8462_v13 = vsel %vm8408_vm2, %v8354_v45, 0.0  ;;  %v8707_v20 = vadd.f32 %v8706_v8, %v8705_v18  ;;  %v8461_v49 = vadd.f32 %v8460_v11, %v8459_v33  ;;  %24029 = vst [vmem:[#allocation224_spill] sm:$0xff] %v20935_v50  ;;  %v8466_v33 = vsel %vm8408_vm2, %v8356_v56, 0.0  ;;  %v24030_v8 = vld [vmem:[#allocation187_spill] sm:$0xff] }
 0x981   :  { %v8359_v11 = vmul.f32 %v20688_v38, %v24030_v8  ;;  %v8714_v47 = vsel %vm8408_vm2, %v8605_v2, 0.0  ;;  %v8716_v56 = vsel %vm8408_vm2, %v8606_v63, 0.0  ;;  %v20949_v8 = vpop.permute.xlu1 %9114  ;;  %v24036_v2 = vld [vmem:[#allocation11_spill] sm:$0xff]  ;;  %v24040_v38 = vld [vmem:[#allocation189_spill] sm:$0xff] }
 0x982   :  { %v7626_v51 = vpop.f32.mrb[102].mxu1  ;;  %v8709_v45 = vadd.f32 %v8708_v42, %v8707_v20  ;;  %v8463_v22 = vadd.f32 %v8462_v13, %v8461_v49  ;;  %v8468_v42 = vsel %vm8408_vm2, %v8357_v19, 0.0  ;;  %v8607_v13 = vmul.f32 %v8358_v32, %v8358_v32  ;;  %v24033_v20 = vld [vmem:[#allocation8_spill] sm:$0xff]  ;;  %24034 = vst [vmem:[#allocation227_spill] sm:$0xff] %v20949_v8 }
 0x983   :  { %v20927_v59 = vadd.f32 %v7626_v51, %v24025_v43  ;;  %v13265_v14 = vpop.f32.mrb[103].mxu1  ;;  %v8712_v43 = vsel %vm8408_vm2, %v8604_v4, 0.0  ;;  %v8360_v49 = vmul.f32 %v20691_v48, %v24033_v20  ;;  %v8472_v63 = vsel %vm8408_vm2, %v8359_v11, 0.0  ;;  %v24039_v20 = vld [vmem:[#allocation58_spill] sm:$0xff] }
 0x984   :  { %v8711_v14 = vadd.f32 %v8710_v46, %v8709_v45  ;;  %v8465_v41 = vadd.f32 %v8464_v26, %v8463_v22  ;;  %v24035_v46 = vld [vmem:[#allocation188_spill] sm:$0xff]  ;;  %v20957_v22 = vpop.permute.xlu0 %9116 }
 0x985   :  { %24026 = vst [vmem:[#allocation72_spill] sm:$0xff] %v20927_v59  ;;  %v8361_v26 = vmul.f32 %v20696_v3, %v24035_v46  ;;  %24037 = vst [vmem:[#allocation12_spill] sm:$0xff] %v20957_v22  ;;  %v24041_v46 = vld [vmem:[#allocation55_spill] sm:$0xff]  ;;  %v20970_v22 = vpop.permute.xlu1 %9118 }
 0x986   :  { %v7631_v51 = vpop.f32.mrb[104].mxu1  ;;  %v8713_v4 = vadd.f32 %v8712_v43, %v8711_v14  ;;  %v8467_v50 = vadd.f32 %v8466_v33, %v8465_v41  ;;  %v8718_v41 = vsel %vm8408_vm2, %v8607_v13, 0.0  ;;  %v8609_v33 = vmul.f32 %v8360_v49, %v8360_v49  ;;  %v24038_v14 = vld [vmem:[#allocation14_spill] sm:$0xff]  ;;  %24044 = vst [vmem:[#allocation226_spill] sm:$0xff] %v20970_v22 }
 0x987   :  { %v20942_v18 = vadd.f32 %v7631_v51, %v24031_v34  ;;  %v13268_v9 = vpop.f32.mrb[105].mxu1  ;;  %v8470_v51 = vsel %vm8408_vm2, %v8358_v32, 0.0  ;;  %v8608_v34 = vmul.f32 %v8359_v11, %v8359_v11  ;;  %v8362_v32 = vmul.f32 %v24039_v20, %v24038_v14 }
 0x988   :  { %v8715_v9 = vadd.f32 %v8714_v47, %v8713_v4  ;;  %v8469_v43 = vadd.f32 %v8468_v42, %v8467_v50  ;;  %v8363_v3 = vmul.f32 %v24041_v46, %v24040_v38  ;;  %v8610_v47 = vmul.f32 %v8361_v26, %v8361_v26  ;;  %v24042_v50 = vld [vmem:[#allocation126_spill] sm:$0xff]  ;;  %v24045_v38 = vld [vmem:[#allocation13_spill] sm:$0xff] }
 0x989   :  { %24032 = vst [vmem:[#allocation71_spill] sm:$0xff] %v20942_v18 }
 0x98a   :  { %v7636_v40 = vpop.f32.mrb[106].mxu1  ;;  %v8717_v8 = vadd.f32 %v8716_v56, %v8715_v9  ;;  %v8471_v48 = vadd.f32 %v8470_v51, %v8469_v43  ;;  %v8722_v56 = vsel %vm8408_vm2, %v8609_v33, 0.0  ;;  %v8476_v51 = vsel %vm8408_vm2, %v8361_v26, 0.0  ;;  %v24046_v43 = vld [vmem:[#allocation213_spill] sm:$0xff]  ;;  %v24050_v33 = vld [vmem:[#allocation74_spill] sm:$0xff] }
 0x98b   :  { %v20955_v45 = vadd.f32 %v7636_v40, %v24036_v2  ;;  %v13271_v19 = vpop.f32.mrb[107].mxu1  ;;  %v8720_v2 = vsel %vm8408_vm2, %v8608_v34, 0.0  ;;  %v8611_v9 = vmul.f32 %v8362_v32, %v8362_v32  ;;  %v8364_v14 = vmul.f32 %v24046_v43, %v24045_v38  ;;  %v20976_v34 = vpop.permute.xlu0 %9120 }
 0x98c   :  { %v8474_v19 = vsel %vm8408_vm2, %v8360_v49, 0.0  ;;  %v8719_v11 = vadd.f32 %v8718_v41, %v8717_v8  ;;  %v8473_v4 = vadd.f32 %v8472_v63, %v8471_v48  ;;  %24047 = vst [vmem:[#allocation7_spill] sm:$0xff] %v20976_v34  ;;  %v8612_v20 = vmul.f32 %v8363_v3, %v8363_v3  ;;  %v24048_v8 = vld [vmem:[#allocation190_spill] sm:$0xff]  ;;  %v24049_v41 = vld [vmem:[#allocation155_spill] sm:$0xff] }
 0x98d   :  { %v8478_v48 = vsel %vm8408_vm2, %v8362_v32, 0.0  ;;  %v8365_v63 = vmul.f32 %v24049_v41, %v24048_v8  ;;  %v8726_v38 = vsel %vm8408_vm2, %v8611_v9, 0.0  ;;  %v20990_v8 = vpop.permute.xlu1 %9122 }
 0x98e   :  { %v7641_v40 = vpop.f32.mrb[108].mxu1  ;;  %v8721_v49 = vadd.f32 %v8720_v2, %v8719_v11  ;;  %v8475_v46 = vadd.f32 %v8474_v19, %v8473_v4  ;;  %v8480_v2 = vsel %vm8408_vm2, %v8363_v3, 0.0  ;;  %v8613_v19 = vmul.f32 %v8364_v14, %v8364_v14  ;;  %v24051_v11 = vld [vmem:[#allocation18_spill] sm:$0xff]  ;;  %24052 = vst [vmem:[#allocation75_spill] sm:$0xff] %v20990_v8 }
 0x98f   :  { %v20968_v42 = vadd.f32 %v7641_v40, %v24042_v50  ;;  %v13274_v13 = vpop.f32.mrb[109].mxu1  ;;  %v8724_v50 = vsel %vm8408_vm2, %v8610_v47, 0.0  ;;  %v8366_v4 = vmul.f32 %v20739_v30, %v24051_v11  ;;  %v8728_v32 = vsel %vm8408_vm2, %v8612_v20, 0.0  ;;  %v24057_v30 = vld [vmem:[#allocation192_spill] sm:$0xff] }
 0x990   :  { %v8723_v22 = vadd.f32 %v8722_v56, %v8721_v49  ;;  %v8477_v12 = vadd.f32 %v8476_v51, %v8475_v46  ;;  %v24053_v56 = vld [vmem:[#allocation191_spill] sm:$0xff]  ;;  %v24054_v51 = vld [vmem:[#allocation122_spill] sm:$0xff]  ;;  %v20998_v49 = vpop.permute.xlu0 %9124  ;;  %v8484_v20 = vsel %vm8408_vm2, %v8365_v63, 0.0 }
 0x991   :  { %24043 = vst [vmem:[#allocation169_spill] sm:$0xff] %v20968_v42  ;;  %v8367_v46 = vmul.f32 %v20747_v52, %v24053_v56  ;;  %24055 = vst [vmem:[#allocation171_spill] sm:$0xff] %v20998_v49  ;;  %v8369_v56 = vmul.f32 %v20767_v1, %v24057_v30  ;;  %v21011_v49 = vpop.permute.xlu1 %9126  ;;  %v24061_v30 = vld [vmem:[#allocation20_spill] sm:$0xff] }
 0x992   :  { %v7646_v40 = vpop.f32.mrb[110].mxu1  ;;  %v8725_v47 = vadd.f32 %v8724_v50, %v8723_v22  ;;  %v8479_v34 = vadd.f32 %v8478_v48, %v8477_v12  ;;  %v8730_v12 = vsel %vm8408_vm2, %v8613_v19, 0.0  ;;  %v8615_v50 = vmul.f32 %v8366_v4, %v8366_v4  ;;  %v24056_v48 = vld [vmem:[#allocation17_spill] sm:$0xff]  ;;  %24060 = vst [vmem:[#allocation73_spill] sm:$0xff] %v21011_v49 }
 0x993   :  { %v20983_v13 = vadd.f32 %v7646_v40, %v24050_v33  ;;  %v13277_v26 = vpop.f32.mrb[111].mxu1  ;;  %v8482_v40 = vsel %vm8408_vm2, %v8364_v14, 0.0  ;;  %v8614_v33 = vmul.f32 %v8365_v63, %v8365_v63  ;;  %v8368_v14 = vmul.f32 %v20756_v29, %v24056_v48 }
 0x994   :  { %v8727_v26 = vadd.f32 %v8726_v38, %v8725_v47  ;;  %v8481_v22 = vadd.f32 %v8480_v2, %v8479_v34  ;;  %v8616_v38 = vmul.f32 %v8367_v46, %v8367_v46  ;;  %v24058_v34 = vld [vmem:[#allocation121_spill] sm:$0xff]  ;;  %v8618_v1 = vmul.f32 %v8369_v56, %v8369_v56 }
 0x996   :  { %v7651_v43 = vpop.f32.mrb[112].mxu1  ;;  %v8729_v11 = vadd.f32 %v8728_v32, %v8727_v26  ;;  %v8483_v8 = vadd.f32 %v8482_v40, %v8481_v22  ;;  %v8734_v32 = vsel %vm8408_vm2, %v8615_v50, 0.0  ;;  %v8488_v40 = vsel %vm8408_vm2, %v8367_v46, 0.0  ;;  %v24064_v50 = vld [vmem:[#allocation127_spill] sm:$0xff] }
 0x997   :  { %v20996_v9 = vadd.f32 %v7651_v43, %v24054_v51  ;;  %v13280_v3 = vpop.f32.mrb[113].mxu1  ;;  %v8732_v51 = vsel %vm8408_vm2, %v8614_v33, 0.0  ;;  %v8617_v26 = vmul.f32 %v8368_v14, %v8368_v14  ;;  %v8370_v22 = vmul.f32 %v20778_v24, %v24061_v30  ;;  %v21017_v33 = vpop.permute.xlu0 %9128 }
 0x998   :  { %v8486_v3 = vsel %vm8408_vm2, %v8366_v4, 0.0  ;;  %v8731_v63 = vadd.f32 %v8730_v12, %v8729_v11  ;;  %v8485_v47 = vadd.f32 %v8484_v20, %v8483_v8  ;;  %24062 = vst [vmem:[#allocation230_spill] sm:$0xff] %v21017_v33  ;;  %v8490_v8 = vsel %vm8408_vm2, %v8368_v14, 0.0  ;;  %v24063_v12 = vld [vmem:[#allocation193_spill] sm:$0xff] }
 0x999   :  { %v8371_v20 = vmul.f32 %v20789_v27, %v24063_v12  ;;  %v8738_v30 = vsel %vm8408_vm2, %v8617_v26, 0.0  ;;  %v8740_v14 = vsel %vm8408_vm2, %v8618_v1, 0.0  ;;  %v21031_v12 = vpop.permute.xlu1 %9130  ;;  %v24069_v26 = vld [vmem:[#allocation9_spill] sm:$0xff] }
 0x99a   :  { %v7656_v43 = vpop.f32.mrb[114].mxu1  ;;  %v8733_v4 = vadd.f32 %v8732_v51, %v8731_v63  ;;  %v8487_v48 = vadd.f32 %v8486_v3, %v8485_v47  ;;  %v8492_v51 = vsel %vm8408_vm2, %v8369_v56, 0.0  ;;  %v8619_v3 = vmul.f32 %v8370_v22, %v8370_v22  ;;  %v24066_v63 = vld [vmem:[#allocation19_spill] sm:$0xff]  ;;  %24067 = vst [vmem:[#allocation80_spill] sm:$0xff] %v21031_v12 }
 0x99b   :  { %v21009_v2 = vadd.f32 %v7656_v43, %v24058_v34  ;;  %v13283_v19 = vpop.f32.mrb[115].mxu1  ;;  %v8736_v34 = vsel %vm8408_vm2, %v8616_v38, 0.0  ;;  %v8372_v47 = vmul.f32 %v20804_v7, %v24066_v63  ;;  %v8496_v1 = vsel %vm8408_vm2, %v8371_v20, 0.0  ;;  %v24072_v7 = vld [vmem:[#allocation22_spill] sm:$0xff] }
 0x99c   :  { %v8735_v19 = vadd.f32 %v8734_v32, %v8733_v4  ;;  %v8489_v49 = vadd.f32 %v8488_v40, %v8487_v48  ;;  %v24068_v32 = vld [vmem:[#allocation114_spill] sm:$0xff]  ;;  %v21039_v48 = vpop.permute.xlu0 %9132 }
 0x99d   :  { %24059 = vst [vmem:[#allocation228_spill] sm:$0xff] %v21009_v2  ;;  %v8373_v40 = vmul.f32 %v20819_v5, %v24068_v32  ;;  %24070 = vst [vmem:[#allocation229_spill] sm:$0xff] %v21039_v48  ;;  %v8375_v32 = vmul.f32 %v20845_v31, %v24072_v7  ;;  %v21052_v48 = vpop.permute.xlu1 %9134  ;;  %v24076_v7 = vld [vmem:[#allocation21_spill] sm:$0xff] }
 0x99e   :  { %v7661_v43 = vpop.f32.mrb[116].mxu1  ;;  %v8737_v38 = vadd.f32 %v8736_v34, %v8735_v19  ;;  %v8491_v33 = vadd.f32 %v8490_v8, %v8489_v49  ;;  %v8742_v49 = vsel %vm8408_vm2, %v8619_v3, 0.0  ;;  %v8621_v8 = vmul.f32 %v8372_v47, %v8372_v47  ;;  %v24071_v19 = vld [vmem:[#allocation194_spill] sm:$0xff]  ;;  %24075 = vst [vmem:[#allocation232_spill] sm:$0xff] %v21052_v48 }
 0x99f   :  { %v21024_v11 = vadd.f32 %v7661_v43, %v24064_v50  ;;  %v13286_v46 = vpop.f32.mrb[117].mxu1  ;;  %v8494_v43 = vsel %vm8408_vm2, %v8370_v22, 0.0  ;;  %v8620_v50 = vmul.f32 %v8371_v20, %v8371_v20  ;;  %v8374_v22 = vmul.f32 %v20832_v55, %v24071_v19 }
 0x9a0   :  { %v8739_v46 = vadd.f32 %v8738_v30, %v8737_v38  ;;  %v8493_v34 = vadd.f32 %v8492_v51, %v8491_v33  ;;  %v8622_v30 = vmul.f32 %v8373_v40, %v8373_v40  ;;  %v24073_v33 = vld [vmem:[#allocation27_spill] sm:$0xff]  ;;  %v8624_v31 = vmul.f32 %v8375_v32, %v8375_v32 }
 0x9a1   :  { %24065 = vst [vmem:[#allocation117_spill] sm:$0xff] %v21024_v11 }
 0x9a2   :  { %v7666_v24 = vpop.f32.mrb[118].mxu1  ;;  %v8741_v63 = vadd.f32 %v8740_v14, %v8739_v46  ;;  %v8495_v12 = vadd.f32 %v8494_v43, %v8493_v34  ;;  %v8746_v14 = vsel %vm8408_vm2, %v8621_v8, 0.0  ;;  %v8500_v43 = vsel %vm8408_vm2, %v8373_v40, 0.0  ;;  %v24079_v8 = vld [vmem:[#allocation29_spill] sm:$0xff] }
 0x9a3   :  { %v21037_v4 = vadd.f32 %v7666_v24, %v24069_v26  ;;  %v13289_v56 = vpop.f32.mrb[119].mxu1  ;;  %v8744_v26 = vsel %vm8408_vm2, %v8620_v50, 0.0  ;;  %v8623_v46 = vmul.f32 %v8374_v22, %v8374_v22  ;;  %v8376_v34 = vmul.f32 %v20860_v10, %v24076_v7  ;;  %v21058_v50 = vpop.permute.xlu0 %9136 }
 0x9a4   :  { %v8498_v56 = vsel %vm8408_vm2, %v8372_v47, 0.0  ;;  %v8743_v20 = vadd.f32 %v8742_v49, %v8741_v63  ;;  %v8497_v38 = vadd.f32 %v8496_v1, %v8495_v12  ;;  %24077 = vst [vmem:[#allocation125_spill] sm:$0xff] %v21058_v50  ;;  %v8502_v12 = vsel %vm8408_vm2, %v8374_v22, 0.0  ;;  %v24078_v49 = vld [vmem:[#allocation24_spill] sm:$0xff] }
 0x9a5   :  { %v8377_v1 = vmul.f32 %v20873_v57, %v24078_v49  ;;  %v8750_v7 = vsel %vm8408_vm2, %v8623_v46, 0.0  ;;  %v8752_v22 = vsel %vm8408_vm2, %v8624_v31, 0.0  ;;  %v21072_v49 = vpop.permute.xlu1 %9138  ;;  %v24083_v46 = vld [vmem:[#allocation31_spill] sm:$0xff] }
 0x9a6   :  { %v7671_v24 = vpop.f32.mrb[120].mxu1  ;;  %v8745_v47 = vadd.f32 %v8744_v26, %v8743_v20  ;;  %v8499_v19 = vadd.f32 %v8498_v56, %v8497_v38  ;;  %v8504_v26 = vsel %vm8408_vm2, %v8375_v32, 0.0  ;;  %v8625_v56 = vmul.f32 %v8376_v34, %v8376_v34  ;;  %v24080_v20 = vld [vmem:[#allocation195_spill] sm:$0xff]  ;;  %24081 = vst [vmem:[#allocation82_spill] sm:$0xff] %v21072_v49 }
 0x9a7   :  { %v21050_v51 = vadd.f32 %v7671_v24, %v24073_v33  ;;  %v13292_v3 = vpop.f32.mrb[121].mxu1  ;;  %v8748_v33 = vsel %vm8408_vm2, %v8622_v30, 0.0  ;;  %v8378_v38 = vmul.f32 %v20886_v60, %v24080_v20  ;;  %v8508_v31 = vsel %vm8408_vm2, %v8377_v1, 0.0  ;;  %v24086_v60 = vld [vmem:[#allocation26_spill] sm:$0xff] }
 0x9a8   :  { %v8747_v3 = vadd.f32 %v8746_v14, %v8745_v47  ;;  %v8501_v48 = vadd.f32 %v8500_v43, %v8499_v19  ;;  %v24082_v14 = vld [vmem:[#allocation23_spill] sm:$0xff]  ;;  %v21080_v19 = vpop.permute.xlu0 %9140 }
 0x9a9   :  { %24074 = vst [vmem:[#allocation116_spill] sm:$0xff] %v21050_v51  ;;  %v8379_v43 = vmul.f32 %v20901_v25, %v24082_v14  ;;  %24084 = vst [vmem:[#allocation231_spill] sm:$0xff] %v21080_v19  ;;  %v8381_v14 = vmul.f32 %v20927_v59, %v24086_v60  ;;  %v21093_v19 = vpop.permute.xlu1 %9142  ;;  %v24090_v60 = vld [vmem:[#allocation198_spill] sm:$0xff] }
 0x9aa   :  { %v7676_v24 = vpop.f32.mrb[122].mxu1  ;;  %v8749_v30 = vadd.f32 %v8748_v33, %v8747_v3  ;;  %v8503_v50 = vadd.f32 %v8502_v12, %v8501_v48  ;;  %v8754_v48 = vsel %vm8408_vm2, %v8625_v56, 0.0  ;;  %v8627_v12 = vmul.f32 %v8378_v38, %v8378_v38  ;;  %v24085_v3 = vld [vmem:[#allocation197_spill] sm:$0xff]  ;;  %24089 = vst [vmem:[#allocation85_spill] sm:$0xff] %v21093_v19 }
 0x9ab   :  { %v21065_v63 = vadd.f32 %v7676_v24, %v24079_v8  ;;  %v13295_v40 = vpop.f32.mrb[123].mxu1  ;;  %v8506_v24 = vsel %vm8408_vm2, %v8376_v34, 0.0  ;;  %v8626_v8 = vmul.f32 %v8377_v1, %v8377_v1  ;;  %v8380_v34 = vmul.f32 %v20914_v16, %v24085_v3 }
 0x9ac   :  { %v8751_v40 = vadd.f32 %v8750_v7, %v8749_v30  ;;  %v8505_v33 = vadd.f32 %v8504_v26, %v8503_v50  ;;  %v8628_v7 = vmul.f32 %v8379_v43, %v8379_v43  ;;  %v24087_v50 = vld [vmem:[#allocation32_spill] sm:$0xff]  ;;  %v8630_v59 = vmul.f32 %v8381_v14, %v8381_v14 }
 0x9ae   :  { %v7681_v10 = vpop.f32.mrb[124].mxu1  ;;  %v8753_v20 = vadd.f32 %v8752_v22, %v8751_v40  ;;  %v8507_v49 = vadd.f32 %v8506_v24, %v8505_v33  ;;  %v8758_v22 = vsel %vm8408_vm2, %v8627_v12, 0.0  ;;  %v8512_v24 = vsel %vm8408_vm2, %v8379_v43, 0.0  ;;  %v24093_v12 = vld [vmem:[#allocation33_spill] sm:$0xff] }
 0x9af   :  { %v21078_v47 = vadd.f32 %v7681_v10, %v24083_v46  ;;  %v13298_v32 = vpop.f32.mrb[125].mxu1  ;;  %v8756_v46 = vsel %vm8408_vm2, %v8626_v8, 0.0  ;;  %v8629_v40 = vmul.f32 %v8380_v34, %v8380_v34  ;;  %v8382_v33 = vmul.f32 %v20942_v18, %v24090_v60  ;;  %v21099_v8 = vpop.permute.xlu0 %9144 }
 0x9b0   :  { %v8510_v32 = vsel %vm8408_vm2, %v8378_v38, 0.0  ;;  %v8755_v1 = vadd.f32 %v8754_v48, %v8753_v20  ;;  %v8509_v30 = vadd.f32 %v8508_v31, %v8507_v49  ;;  %24091 = vst [vmem:[#allocation234_spill] sm:$0xff] %v21099_v8  ;;  %v8514_v49 = vsel %vm8408_vm2, %v8380_v34, 0.0  ;;  %v24092_v48 = vld [vmem:[#allocation25_spill] sm:$0xff] }
 0x9b1   :  { %v8383_v31 = vmul.f32 %v20955_v45, %v24092_v48  ;;  %v8762_v60 = vsel %vm8408_vm2, %v8629_v40, 0.0  ;;  %v8764_v34 = vsel %vm8408_vm2, %v8630_v59, 0.0  ;;  %v21113_v48 = vpop.permute.xlu1 %9146  ;;  %v24098_v40 = vld [vmem:[#allocation34_spill] sm:$0xff] }
 0x9b2   :  { %v7686_v10 = vpop.f32.mrb[126].mxu1  ;;  %v8757_v38 = vadd.f32 %v8756_v46, %v8755_v1  ;;  %v8511_v3 = vadd.f32 %v8510_v32, %v8509_v30  ;;  %v8516_v46 = vsel %vm8408_vm2, %v8381_v14, 0.0  ;;  %v8631_v32 = vmul.f32 %v8382_v33, %v8382_v33  ;;  %v24095_v1 = vld [vmem:[#allocation199_spill] sm:$0xff]  ;;  %24096 = vst [vmem:[#allocation84_spill] sm:$0xff] %v21113_v48 }
 0x9b3   :  { %v21091_v26 = vadd.f32 %v7686_v10, %v24087_v50  ;;  %v13301_v56 = vpop.f32.mrb[127].mxu1  ;;  %v8760_v50 = vsel %vm8408_vm2, %v8628_v7, 0.0  ;;  %v8384_v30 = vmul.f32 %v20968_v42, %v24095_v1  ;;  %v8520_v59 = vsel %vm8408_vm2, %v8383_v31, 0.0  ;;  %v24101_v42 = vld [vmem:[#allocation30_spill] sm:$0xff] }
 0x9b4   :  { %v8759_v56 = vadd.f32 %v8758_v22, %v8757_v38  ;;  %v8513_v19 = vadd.f32 %v8512_v24, %v8511_v3  ;;  %v24097_v22 = vld [vmem:[#allocation28_spill] sm:$0xff]  ;;  %v21121_v3 = vpop.permute.xlu0 %9148 }
 0x9b5   :  { %24088 = vst [vmem:[#allocation123_spill] sm:$0xff] %v21091_v26  ;;  %v8385_v24 = vmul.f32 %v20983_v13, %v24097_v22  ;;  %24099 = vst [vmem:[#allocation233_spill] sm:$0xff] %v21121_v3  ;;  %v8387_v22 = vmul.f32 %v21009_v2, %v24101_v42  ;;  %v21134_v3 = vpop.permute.xlu1 %9150  ;;  %v24104_v42 = vld [vmem:[#allocation120_spill] sm:$0xff] }
 0x9b6   :  { %v7691_v10 = vpop.f32.mrb[128].mxu1  ;;  %v8761_v7 = vadd.f32 %v8760_v50, %v8759_v56  ;;  %v8515_v8 = vadd.f32 %v8514_v49, %v8513_v19  ;;  %v8766_v19 = vsel %vm8408_vm2, %v8631_v32, 0.0  ;;  %v8633_v49 = vmul.f32 %v8384_v30, %v8384_v30  ;;  %v24100_v56 = vld [vmem:[#allocation200_spill] sm:$0xff]  ;;  %24103 = vst [vmem:[#allocation128_spill] sm:$0xff] %v21134_v3 }
 0x9b7   :  { %v21106_v20 = vadd.f32 %v7691_v10, %v24093_v12  ;;  %v13304_v43 = vpop.f32.mrb[129].mxu1  ;;  %v8518_v10 = vsel %vm8408_vm2, %v8382_v33, 0.0  ;;  %v8632_v12 = vmul.f32 %v8383_v31, %v8383_v31  ;;  %v8386_v33 = vmul.f32 %v20996_v9, %v24100_v56 }
 0x9b8   :  { %v8763_v43 = vadd.f32 %v8762_v60, %v8761_v7  ;;  %v8517_v50 = vadd.f32 %v8516_v46, %v8515_v8  ;;  %v8634_v60 = vmul.f32 %v8385_v24, %v8385_v24  ;;  %v24102_v8 = vld [vmem:[#allocation76_spill] sm:$0xff]  ;;  %v8636_v2 = vmul.f32 %v8387_v22, %v8387_v22 }
 0x9b9   :  { %24094 = vst [vmem:[#allocation130_spill] sm:$0xff] %v21106_v20 }
 0x9ba   :  { %v7696_v18 = vpop.f32.mrb[130].mxu1  ;;  %v8765_v1 = vadd.f32 %v8764_v34, %v8763_v43  ;;  %v8519_v48 = vadd.f32 %v8518_v10, %v8517_v50  ;;  %v8770_v34 = vsel %vm8408_vm2, %v8633_v49, 0.0  ;;  %v8524_v10 = vsel %vm8408_vm2, %v8385_v24, 0.0  ;;  %v24107_v49 = vld [vmem:[#allocation16_spill] sm:$0xff] }
 0x9bb   :  { %v21119_v38 = vadd.f32 %v7696_v18, %v24098_v40  ;;  %v13307_v14 = vpop.f32.mrb[131].mxu1  ;;  %v8768_v40 = vsel %vm8408_vm2, %v8632_v12, 0.0  ;;  %v8635_v43 = vmul.f32 %v8386_v33, %v8386_v33  ;;  %v8388_v50 = vmul.f32 %v21024_v11, %v24104_v42  ;;  %v21140_v12 = vpop.permute.xlu0 %9152 }
 0x9bc   :  { %v8522_v14 = vsel %vm8408_vm2, %v8384_v30, 0.0  ;;  %v8767_v31 = vadd.f32 %v8766_v19, %v8765_v1  ;;  %v8521_v7 = vadd.f32 %v8520_v59, %v8519_v48  ;;  %24105 = vst [vmem:[#allocation88_spill] sm:$0xff] %v21140_v12  ;;  %v8526_v48 = vsel %vm8408_vm2, %v8386_v33, 0.0  ;;  %v24106_v19 = vld [vmem:[#allocation119_spill] sm:$0xff] }
 0x9bd   :  { %v8389_v59 = vmul.f32 %v21037_v4, %v24106_v19  ;;  %v8774_v42 = vsel %vm8408_vm2, %v8635_v43, 0.0  ;;  %v8776_v33 = vsel %vm8408_vm2, %v8636_v2, 0.0  ;;  %v21154_v19 = vpop.permute.xlu1 %9154  ;;  %v24111_v43 = vld [vmem:[#allocation78_spill] sm:$0xff] }
 0x9be   :  { %v7701_v18 = vpop.f32.mrb[132].mxu1  ;;  %v8769_v30 = vadd.f32 %v8768_v40, %v8767_v31  ;;  %v8523_v56 = vadd.f32 %v8522_v14, %v8521_v7  ;;  %v8528_v40 = vsel %vm8408_vm2, %v8387_v22, 0.0  ;;  %v8637_v14 = vmul.f32 %v8388_v50, %v8388_v50  ;;  %v24108_v31 = vld [vmem:[#allocation112_spill] sm:$0xff]  ;;  %24109 = vst [vmem:[#allocation236_spill] sm:$0xff] %v21154_v19 }
 0x9bf   :  { %v21132_v46 = vadd.f32 %v7701_v18, %v24102_v8  ;;  %v13310_v32 = vpop.f32.mrb[133].mxu1  ;;  %v8772_v8 = vsel %vm8408_vm2, %v8634_v60, 0.0  ;;  %v8390_v7 = vmul.f32 %v21050_v51, %v24108_v31  ;;  %v8532_v2 = vsel %vm8408_vm2, %v8389_v59, 0.0  ;;  %v24114_v51 = vld [vmem:[#allocation153_spill] sm:$0xff] }
 0x9c0   :  { %v8771_v32 = vadd.f32 %v8770_v34, %v8769_v30  ;;  %v8525_v3 = vadd.f32 %v8524_v10, %v8523_v56  ;;  %v24110_v34 = vld [vmem:[#allocation53_spill] sm:$0xff]  ;;  %v21162_v56 = vpop.permute.xlu0 %9156 }
 0x9c1   :  { %v8391_v10 = vmul.f32 %v21065_v63, %v24110_v34  ;;  %24112 = vst [vmem:[#allocation133_spill] sm:$0xff] %v21162_v56  ;;  %v8393_v34 = vmul.f32 %v21091_v26, %v24114_v51  ;;  %v21175_v56 = vpop.permute.xlu1 %9158  ;;  %v24117_v51 = vld [vmem:[#allocation210_spill] sm:$0xff] }
 0x9c2   :  { %v7706_v18 = vpop.f32.mrb[134].mxu1  ;;  %v8773_v60 = vadd.f32 %v8772_v8, %v8771_v32  ;;  %v8527_v12 = vadd.f32 %v8526_v48, %v8525_v3  ;;  %v8778_v3 = vsel %vm8408_vm2, %v8637_v14, 0.0  ;;  %v8639_v48 = vmul.f32 %v8390_v7, %v8390_v7  ;;  %v24113_v32 = vld [vmem:[#allocation211_spill] sm:$0xff]  ;;  %24116 = vst [vmem:[#allocation87_spill] sm:$0xff] %v21175_v56 }
 0x9c3   :  { %v21147_v1 = vadd.f32 %v7706_v18, %v24107_v49  ;;  %v13313_v24 = vpop.f32.mrb[135].mxu1  ;;  %v8530_v18 = vsel %vm8408_vm2, %v8388_v50, 0.0  ;;  %v8638_v49 = vmul.f32 %v8389_v59, %v8389_v59  ;;  %v8392_v50 = vmul.f32 %v21078_v47, %v24113_v32 }
 0x9c4   :  { %v8775_v24 = vadd.f32 %v8774_v42, %v8773_v60  ;;  %v8529_v8 = vadd.f32 %v8528_v40, %v8527_v12  ;;  %v8640_v42 = vmul.f32 %v8391_v10, %v8391_v10  ;;  %v24115_v12 = vld [vmem:[#allocation77_spill] sm:$0xff]  ;;  %v8642_v26 = vmul.f32 %v8393_v34, %v8393_v34 }
 0x9c6   :  { %v7711_v11 = vpop.f32.mrb[136].mxu1  ;;  %v8777_v31 = vadd.f32 %v8776_v33, %v8775_v24  ;;  %v8531_v19 = vadd.f32 %v8530_v18, %v8529_v8  ;;  %v8782_v33 = vsel %vm8408_vm2, %v8639_v48, 0.0  ;;  %v8536_v18 = vsel %vm8408_vm2, %v8391_v10, 0.0  ;;  %v24120_v48 = vld [vmem:[#allocation41_spill] sm:$0xff] }
 0x9c7   :  { %v21160_v30 = vadd.f32 %v7711_v11, %v24111_v43  ;;  %v13316_v22 = vpop.f32.mrb[137].mxu1  ;;  %v8780_v43 = vsel %vm8408_vm2, %v8638_v49, 0.0  ;;  %v8641_v24 = vmul.f32 %v8392_v50, %v8392_v50  ;;  %v8394_v8 = vmul.f32 %v21106_v20, %v24117_v51  ;;  %v21181_v49 = vpop.permute.xlu0 %9160 }
 0x9c8   :  { %v8534_v22 = vsel %vm8408_vm2, %v8390_v7, 0.0  ;;  %v8779_v59 = vadd.f32 %v8778_v3, %v8777_v31  ;;  %v8533_v60 = vadd.f32 %v8532_v2, %v8531_v19  ;;  %24118 = vst [vmem:[#allocation235_spill] sm:$0xff] %v21181_v49  ;;  %v8538_v19 = vsel %vm8408_vm2, %v8392_v50, 0.0  ;;  %v24119_v3 = vld [vmem:[#allocation156_spill] sm:$0xff] }
 0x9c9   :  { %v8395_v2 = vmul.f32 %v21119_v38, %v24119_v3  ;;  %v8786_v51 = vsel %vm8408_vm2, %v8641_v24, 0.0  ;;  %v8788_v50 = vsel %vm8408_vm2, %v8642_v26, 0.0  ;;  %v21195_v3 = vpop.permute.xlu1 %9162  ;;  %v24124_v24 = vld [vmem:[#allocation141_spill] sm:$0xff] }
 0x9ca   :  { %v7716_v11 = vpop.f32.mrb[138].mxu1  ;;  %v8781_v7 = vadd.f32 %v8780_v43, %v8779_v59  ;;  %v8535_v32 = vadd.f32 %v8534_v22, %v8533_v60  ;;  %v8540_v43 = vsel %vm8408_vm2, %v8393_v34, 0.0  ;;  %v8643_v22 = vmul.f32 %v8394_v8, %v8394_v8  ;;  %v24121_v59 = vld [vmem:[#allocation60_spill] sm:$0xff]  ;;  %24122 = vst [vmem:[#allocation132_spill] sm:$0xff] %v21195_v3 }
 0x9cb   :  { %v21173_v40 = vadd.f32 %v7716_v11, %v24115_v12  ;;  %v13319_v14 = vpop.f32.mrb[139].mxu1  ;;  %v8784_v12 = vsel %vm8408_vm2, %v8640_v42, 0.0  ;;  %v8396_v60 = vmul.f32 %v21132_v46, %v24121_v59  ;;  %v8544_v26 = vsel %vm8408_vm2, %v8395_v2, 0.0 }
 0x9cc   :  { %v8783_v14 = vadd.f32 %v8782_v33, %v8781_v7  ;;  %v8537_v56 = vadd.f32 %v8536_v18, %v8535_v32  ;;  %v24123_v33 = vld [vmem:[#allocation212_spill] sm:$0xff]  ;;  %v21203_v32 = vpop.permute.xlu0 %9164 }
 0x9cd   :  { %v8397_v18 = vmul.f32 %v21147_v1, %v24123_v33  ;;  %24125 = vst [vmem:[#allocation238_spill] sm:$0xff] %v21203_v32  ;;  %v8399_v33 = vmul.f32 %v21173_v40, %v20743_v37  ;;  %v21216_v32 = vpop.permute.xlu1 %9166 }
 0x9ce   :  { %v7721_v11 = vpop.f32.mrb[140].mxu1  ;;  %v8785_v42 = vadd.f32 %v8784_v12, %v8783_v14  ;;  %v8539_v49 = vadd.f32 %v8538_v19, %v8537_v56  ;;  %v8790_v56 = vsel %vm8408_vm2, %v8643_v22, 0.0  ;;  %v8645_v19 = vmul.f32 %v8396_v60, %v8396_v60  ;;  %24127 = vst [vmem:[#allocation91_spill] sm:$0xff] %v21216_v32  ;;  %v24175_v32 = vld [vmem:[#allocation40_spill] sm:$0xff] }
 0x9cf   :  { %v21188_v31 = vadd.f32 %v7721_v11, %v24120_v48  ;;  %v13322_v10 = vpop.f32.mrb[141].mxu1  ;;  %v8542_v11 = vsel %vm8408_vm2, %v8394_v8, 0.0  ;;  %v8644_v48 = vmul.f32 %v8395_v2, %v8395_v2  ;;  %v8398_v8 = vmul.f32 %v21160_v30, %v20734_v53 }
 0x9d0   :  { %v8787_v10 = vadd.f32 %v8786_v51, %v8785_v42  ;;  %v8541_v12 = vadd.f32 %v8540_v43, %v8539_v49  ;;  %v8646_v51 = vmul.f32 %v8397_v18, %v8397_v18  ;;  %v24126_v49 = vld [vmem:[#allocation202_spill] sm:$0xff]  ;;  %v8794_v53 = vsel %vm8408_vm2, %v8645_v19, 0.0 }
 0x9d1   :  { %v8400_v37 = vmul.f32 %v21188_v31, %v20749_v28  ;;  %v24129_v19 = vld [vmem:[#allocation42_spill] sm:$0xff] }
 0x9d2   :  { %v7726_v20 = vpop.f32.mrb[142].mxu1  ;;  %v8789_v14 = vadd.f32 %v8788_v50, %v8787_v10  ;;  %v8543_v59 = vadd.f32 %v8542_v11, %v8541_v12  ;;  %v8548_v50 = vsel %vm8408_vm2, %v8397_v18, 0.0  ;;  %v8647_v11 = vmul.f32 %v8398_v8, %v8398_v8 }
 0x9d3   :  { %v21201_v7 = vadd.f32 %v7726_v20, %v24124_v24  ;;  %v13325_v34 = vpop.f32.mrb[143].mxu1  ;;  %v8792_v24 = vsel %vm8408_vm2, %v8644_v48, 0.0  ;;  %v21222_v48 = vpop.permute.xlu0 %9168  ;;  %v8648_v12 = vmul.f32 %v8399_v33, %v8399_v33 }
 0x9d4   :  { %v8546_v34 = vsel %vm8408_vm2, %v8396_v60, 0.0  ;;  %v8791_v2 = vadd.f32 %v8790_v56, %v8789_v14  ;;  %v8545_v42 = vadd.f32 %v8544_v26, %v8543_v59  ;;  %24128 = vst [vmem:[#allocation89_spill] sm:$0xff] %v21222_v48  ;;  %v8550_v56 = vsel %vm8408_vm2, %v8398_v8, 0.0 }
 0x9d5   :  { %v8401_v26 = vmul.f32 %v21201_v7, %v20758_v17  ;;  %v8798_v28 = vsel %vm8408_vm2, %v8647_v11, 0.0  ;;  %v8800_v8 = vsel %vm8408_vm2, %v8648_v12, 0.0  ;;  %v21236_v17 = vpop.permute.xlu1 %9170  ;;  %v24132_v11 = vld [vmem:[#allocation35_spill] sm:$0xff] }
 0x9d6   :  { %v7731_v20 = vpop.f32.mrb[144].mxu1  ;;  %v8793_v60 = vadd.f32 %v8792_v24, %v8791_v2  ;;  %v8547_v10 = vadd.f32 %v8546_v34, %v8545_v42  ;;  %v8552_v24 = vsel %vm8408_vm2, %v8399_v33, 0.0  ;;  %v8649_v34 = vmul.f32 %v8400_v37, %v8400_v37  ;;  %24130 = vst [vmem:[#allocation237_spill] sm:$0xff] %v21236_v17 }
 0x9d7   :  { %v21214_v43 = vadd.f32 %v7731_v20, %v24126_v49  ;;  %v13328_v22 = vpop.f32.mrb[145].mxu1  ;;  %v8796_v49 = vsel %vm8408_vm2, %v8646_v51, 0.0  ;;  %v8556_v12 = vsel %vm8408_vm2, %v8401_v26, 0.0 }
 0x9d8   :  { %v8795_v59 = vadd.f32 %v8794_v53, %v8793_v60  ;;  %v8549_v22 = vadd.f32 %v8548_v50, %v8547_v10  ;;  %v24131_v53 = vld [vmem:[#allocation63_spill] sm:$0xff]  ;;  %v21244_v10 = vpop.permute.xlu0 %9172 }
 0x9d9   :  { %v8402_v2 = vmul.f32 %v21214_v43, %v20763_v54  ;;  %24133 = vst [vmem:[#allocation86_spill] sm:$0xff] %v21244_v10 }
 0x9da   :  { %v7736_v20 = vpop.f32.mrb[146].mxu1  ;;  %v8797_v51 = vadd.f32 %v8796_v49, %v8795_v59  ;;  %v8551_v42 = vadd.f32 %v8550_v56, %v8549_v22  ;;  %v8802_v56 = vsel %vm8408_vm2, %v8649_v34, 0.0 }
 0x9db   :  { %v21229_v14 = vadd.f32 %v7736_v20, %v24129_v19  ;;  %v13331_v18 = vpop.f32.mrb[147].mxu1  ;;  %v8554_v20 = vsel %vm8408_vm2, %v8400_v37, 0.0  ;;  %v8650_v19 = vmul.f32 %v8401_v26, %v8401_v26 }
 0x9dc   :  { %v8799_v54 = vadd.f32 %v8798_v28, %v8797_v51  ;;  %v8553_v49 = vadd.f32 %v8552_v24, %v8551_v42  ;;  %v8651_v18 = vmul.f32 %v8402_v2, %v8402_v2  ;;  %v21255_v51 = vpop.permute.xlu1 %9174 }
 0x9dd   :  { %v8403_v50 = vmul.f32 %v21229_v14, %v24131_v53  ;;  %v8804_v53 = vsel %vm8408_vm2, %v8650_v19, 0.0  ;;  %24135 = vst [vmem:[#allocation174_spill] sm:$0xff] %v21255_v51  ;;  %v21261_v19 = vpop.permute.xlu0 %9176  ;;  %v24139_v51 = vld [vmem:[#allocation59_spill] sm:$0xff] }
 0x9de   :  { %v7741_v48 = vpop.f32.mrb[148].mxu1  ;;  %v8801_v59 = vadd.f32 %v8800_v8, %v8799_v54  ;;  %v8555_v22 = vadd.f32 %v8554_v20, %v8553_v49  ;;  %v8806_v26 = vsel %vm8408_vm2, %v8651_v18, 0.0  ;;  %v24136_v8 = vld [vmem:[#allocation214_spill] sm:$0xff]  ;;  %24137 = vst [vmem:[#allocation240_spill] sm:$0xff] %v21261_v19 }
 0x9df   :  { %v21242_v60 = vadd.f32 %v7741_v48, %v24132_v11  ;;  %v13334_v33 = vpop.f32.mrb[149].mxu1  ;;  %v8558_v48 = vsel %vm8408_vm2, %v8402_v2, 0.0  ;;  %v8652_v11 = vmul.f32 %v8403_v50, %v8403_v50 }
 0x9e0   :  { %v24134_v33 = vld [vmem:[#allocation43_spill] sm:$0xff]  ;;  %v8803_v24 = vadd.f32 %v8802_v56, %v8801_v59  ;;  %v8557_v34 = vadd.f32 %v8556_v12, %v8555_v22 }
 0x9e1   :  { %v8404_v37 = vmul.f32 %v21242_v60, %v20780_v35  ;;  %v8560_v35 = vsel %vm8408_vm2, %v8403_v50, 0.0  ;;  %v24138_v59 = vld [vmem:[#allocation143_spill] sm:$0xff] }
 0x9e2   :  { %v7746_v17 = vpop.f32.mrb[150].mxu1  ;;  %v8805_v2 = vadd.f32 %v8804_v53, %v8803_v24  ;;  %v8559_v54 = vadd.f32 %v8558_v48, %v8557_v34 }
 0x9e3   :  { %v21253_v10 = vadd.f32 %v7746_v17, %v24134_v33  ;;  %v13337_v28 = vpop.f32.mrb[151].mxu1  ;;  %v8653_v42 = vmul.f32 %v8404_v37, %v8404_v37  ;;  %v8808_v17 = vsel %vm8408_vm2, %v8652_v11, 0.0  ;;  %v8562_v56 = vsel %vm8408_vm2, %v8404_v37, 0.0 }
 0x9e4   :  { %v8807_v33 = vadd.f32 %v8806_v26, %v8805_v2  ;;  %v8561_v50 = vadd.f32 %v8560_v35, %v8559_v54  ;;  %v21277_v35 = vpop.permute.xlu1 %9178  ;;  %v24143_v54 = vld [vmem:[#allocation65_spill] sm:$0xff] }
 0x9e5   :  { %v8405_v20 = vmul.f32 %v21253_v10, %v24136_v8  ;;  %v8810_v28 = vsel %vm8408_vm2, %v8653_v42, 0.0  ;;  %24141 = vst [vmem:[#allocation136_spill] sm:$0xff] %v21277_v35  ;;  %v21279_v42 = vpop.permute.xlu0 %9180  ;;  %v24172_v35 = vld [vmem:[#allocation39_spill] sm:$0xff] }
 0x9e6   :  { %v7751_v49 = vpop.f32.mrb[152].mxu1  ;;  %v8809_v48 = vadd.f32 %v8808_v17, %v8807_v33  ;;  %v8563_v24 = vadd.f32 %v8562_v56, %v8561_v50  ;;  %24142 = vst [vmem:[#allocation173_spill] sm:$0xff] %v21279_v42 }
 0x9e7   :  { %v8654_v12 = vmul.f32 %v8405_v20, %v8405_v20  ;;  %v21266_v22 = vadd.f32 %v7751_v49, %v24138_v59  ;;  %v13340_v18 = vpop.f32.mrb[153].mxu1  ;;  %v8564_v8 = vsel %vm8408_vm2, %v8405_v20, 0.0  ;;  %v24140_v49 = vld [vmem:[#allocation203_spill] sm:$0xff] }
 0x9e8   :  { %v8811_v20 = vadd.f32 %v8810_v28, %v8809_v48  ;;  %v8565_v2 = vadd.f32 %v8564_v8, %v8563_v24 }
 0x9e9   :  { %v8406_v53 = vmul.f32 %v21266_v22, %v24139_v51  ;;  %v8812_v11 = vsel %vm8408_vm2, %v8654_v12, 0.0 }
 0x9ea   :  { %v7756_v34 = vpop.f32.mrb[154].mxu1  ;;  %v8813_v56 = vadd.f32 %v8812_v11, %v8811_v20 }
 0x9eb   :  { %v8566_v37 = vsel %vm8408_vm2, %v8406_v53, 0.0  ;;  %v8655_v19 = vmul.f32 %v8406_v53, %v8406_v53  ;;  %v21275_v59 = vadd.f32 %v7756_v34, %v24140_v49  ;;  %v13343_v26 = vpop.f32.mrb[155].mxu1  ;;  %v21286_v49 = vpop.permute.xlu1 %9182 }
 0x9ec   :  { %v8567_v12 = vadd.f32 %v8566_v37, %v8565_v2  ;;  %24144 = vst [vmem:[#allocation239_spill] sm:$0xff] %v21286_v49  ;;  %v21288_v26 = vpop.permute.xlu0 %9184  ;;  %v24171_v49 = vld [vmem:[#allocation38_spill] sm:$0xff] }
 0x9ed   :  { %v8814_v51 = vsel %vm8408_vm2, %v8655_v19, 0.0  ;;  %v8407_v17 = vmul.f32 %v21275_v59, %v24143_v54  ;;  %24145 = vst [vmem:[#allocation113_spill] sm:$0xff] %v21288_v26  ;;  %v24170_v26 = vld [vmem:[#allocation48_spill] sm:$0xff] }
 0x9ee   :  { %v8815_v50 = vadd.f32 %v8814_v51, %v8813_v56 }
 0x9ef   :  { %v8568_v18 = vsel %vm8408_vm2, %v8407_v17, 0.0  ;;  %v8656_v33 = vmul.f32 %v8407_v17, %v8407_v17  ;;  %v21290_v54 = vpop.permute.xlu1 %9186 }
 0x9f0   :  { %v8569_v53 = vadd.f32 %v8568_v18, %v8567_v12  ;;  %24146 = vst [vmem:[#allocation176_spill] sm:$0xff] %v21290_v54  ;;  %v21292_v11 = vpop.permute.xlu0 %9188  ;;  %v24169_v54 = vld [vmem:[#allocation205_spill] sm:$0xff] }
 0x9f1   :  { %v8816_v34 = vsel %vm8408_vm2, %v8656_v33, 0.0  ;;  %24147 = vst [vmem:[#allocation242_spill] sm:$0xff] %v21292_v11 }
 0x9f2   :  { %v8570_v28 = vrot.slane %v8569_v53, 4  ;;  %v8817_v8 = vadd.f32 %v8816_v34, %v8815_v50 }
 0x9f3   :  { %v21294_v12 = vpop.permute.xlu1 %9190 }
 0x9f4   :  { %v8571_v48 = vadd.f32 %v8570_v28, %v8569_v53  ;;  %v8818_v19 = vrot.slane %v8817_v8, 4  ;;  %24148 = vst [vmem:[#allocation162_spill] sm:$0xff] %v21294_v12  ;;  %v21296_v18 = vpop.permute.xlu0 %9192  ;;  %v24168_v12 = vld [vmem:[#allocation147_spill] sm:$0xff] }
 0x9f5   :  { %24149 = vst [vmem:[#allocation175_spill] sm:$0xff] %v21296_v18  ;;  %v24167_v18 = vld [vmem:[#allocation50_spill] sm:$0xff] }
 0x9f6   :  { %v8572_v24 = vrot.slane %v8571_v48, 2  ;;  %v8819_v42 = vadd.f32 %v8818_v19, %v8817_v8 }
 0x9f7   :  { %v21298_v8 = vpop.permute.xlu1 %9194 }
 0x9f8   :  { %v8573_v37 = vadd.f32 %v8572_v24, %v8571_v48  ;;  %v8820_v20 = vrot.slane %v8819_v42, 2  ;;  %24150 = vst [vmem:[#allocation241_spill] sm:$0xff] %v21298_v8  ;;  %v21300_v19 = vpop.permute.xlu0 %9196  ;;  %v8830_v24 = vld [vmem:[%s22741_s7] sm:$0x1]  ;;  %v24166_v8 = vld [vmem:[#allocation206_spill] sm:$0xff] }
 0x9f9   :  { %24151 = vst [vmem:[#allocation157_spill] sm:$0xff] %v21300_v19  ;;  %v24165_v19 = vld [vmem:[#allocation46_spill] sm:$0xff] }
 0x9fa   :  { %v8574_v2 = vrot.slane %v8573_v37, 1  ;;  %v8821_v51 = vadd.f32 %v8820_v20, %v8819_v42 }
 0x9fb   :  { %v21302_v48 = vpop.permute.xlu1 %9198 }
 0x9fc   :  { %v8575_v17 = vadd.f32 %v8574_v2, %v8573_v37  ;;  %v8822_v56 = vrot.slane %v8821_v51, 1  ;;  %24152 = vst [vmem:[#allocation105_spill] sm:$0xff] %v21302_v48  ;;  %v21304_v42 = vpop.permute.xlu0 %9200 }
 0x9fd   :  { %24153 = vst [vmem:[#allocation179_spill] sm:$0xff] %v21304_v42 }
 0x9fe   :  { %v8823_v33 = vadd.f32 %v8822_v56, %v8821_v51  ;;  %v8824_v50 = vmul.f32 0.001953125, %v8575_v17  ;;  %v21316_v17 = vld [vmem:[%s22742_s8] sm:$0x1]  ;;  %v24156_v56 = vld [vmem:[#allocation118_spill] sm:$0xff] }
 0x9ff   :  { %v21309_v20 = vpop.permute.xlu1 %9202 }
 0xa00   :  { %v8825_v53 = vmul.f32 0.001953125, %v8823_v33  ;;  %v8826_v34 = vmul.f32 %v8824_v50, %v8824_v50  ;;  %24154 = vst [vmem:[#allocation245_spill] sm:$0xff] %v21309_v20  ;;  %v21311_v2 = vpop.permute.xlu0 %9204 }
 0xa01   :  { %24155 = vst [vmem:[#allocation177_spill] sm:$0xff] %v21311_v2  ;;  %v24159_v2 = vld [vmem:[#allocation44_spill] sm:$0xff] }
 0xa02   :  { %v8827_v28 = vsub.f32 %v8825_v53, %v8826_v34 }
 0xa03   :  { %v21323_v53 = vpop.permute.xlu1 %9206 }
 0xa04   :  { %v8828_v11 = vadd.f32 1e-05, %v8827_v28  ;;  %24157 = vst [vmem:[#allocation178_spill] sm:$0xff] %v21323_v53  ;;  %v21325_v34 = vpop.permute.xlu0 %9208  ;;  %v24164_v28 = vld [vmem:[#allocation204_spill] sm:$0xff] }
 0xa05   :  { %24158 = vst [vmem:[#allocation244_spill] sm:$0xff] %v21325_v34  ;;  %v24163_v34 = vld [vmem:[#allocation37_spill] sm:$0xff] }
 0xa06   :  { %14806 = vrsqrt.f32 %v8828_v11 }
 0xa07   :  { %v21417_v3 = vpop.permute.xlu1 %9210 }
 0xa08   :  { %24176 = vst [vmem:[#allocation131_spill] sm:$0xff] %v21417_v3 }
 0xa10   :  { %v14807_v37 = vpop.eup %14806 }
 0xa11   :  { %v8831_v51 = vmul.f32 %v14807_v37, %v8830_v24  ;;  %v24160_v37 = vld [vmem:[#allocation45_spill] sm:$0xff] }
 0xa13   :  { %v21318_v11 = vmul.f32 %v8831_v51, %v8824_v50  ;;  %v21321_v33 = vrot.slane %v8831_v51, %v24156_v56  ;;  %v24161_v50 = vld [vmem:[#allocation145_spill] sm:$0xff]  ;;  %v24162_v51 = vld [vmem:[#allocation36_spill] sm:$0xff] }
 0xa15   :  { %v21331_v24 = vmul.f32 %v24159_v2, %v21321_v33  ;;  %v21335_v20 = vmul.f32 %v24160_v37, %v21321_v33  ;;  %v21339_v42 = vmul.f32 %v24161_v50, %v21321_v33  ;;  %v21343_v53 = vmul.f32 %v24162_v51, %v21321_v33 }
 0xa16   :  { %v21347_v48 = vmul.f32 %v24163_v34, %v21321_v33  ;;  %v21351_v2 = vmul.f32 %v24164_v28, %v21321_v33  ;;  %v21355_v37 = vmul.f32 %v24165_v19, %v21321_v33  ;;  %v21359_v50 = vmul.f32 %v24166_v8, %v21321_v33 }
 0xa17   :  { %v21363_v51 = vmul.f32 %v24167_v18, %v21321_v33  ;;  %v21367_v34 = vmul.f32 %v24168_v12, %v21321_v33  ;;  %v21371_v28 = vmul.f32 %v24169_v54, %v21321_v33  ;;  %v21375_v19 = vmul.f32 %v24170_v26, %v21321_v33 }
 0xa18   :  { %v21379_v8 = vmul.f32 %v24171_v49, %v21321_v33  ;;  %v21383_v18 = vmul.f32 %v24172_v35, %v21321_v33  ;;  %v21387_v12 = vmul.f32 %v20608_v36, %v21321_v33  ;;  %v21391_v54 = vmul.f32 %v20613_v39, %v21321_v33 }
 0xa19   :  { %v21395_v26 = vmul.f32 %v20618_v15, %v21321_v33  ;;  %v21399_v49 = vmul.f32 %v20623_v44, %v21321_v33  ;;  %v21403_v35 = vmul.f32 %v20628_v21, %v21321_v33  ;;  %v21407_v36 = vmul.f32 %v20633_v61, %v21321_v33  ;;  %v21419_v44 = vpop.permute.xlu0 %9212 }
 0xa1a   :  { %v21411_v39 = vmul.f32 %v20638_v62, %v21321_v33  ;;  %v21415_v15 = vmul.f32 %v24175_v32, %v21321_v33  ;;  %24177 = vst [vmem:[#allocation196_spill] sm:$0xff] %v21419_v44  ;;  %v21423_v21 = vmul.f32 %v20648_v0, %v21321_v33  ;;  %v21427_v61 = vmul.f32 %v20653_v6, %v21321_v33  ;;  %v24184_v44 = vld [vmem:[#allocation207_spill] sm:$0xff] }
 0xa1b   :  { %24173 = vst [vmem:[#allocation172_spill] sm:$0xff] %v21407_v36  ;;  %v24179_v36 = vld [vmem:[#allocation54_spill] sm:$0xff]  ;;  %v21439_v3 = vmul.f32 %v20668_v23, %v21321_v33  ;;  %v21443_v0 = vmul.f32 %v24184_v44, %v21321_v33  ;;  %v21447_v6 = vmul.f32 %v20676_v58, %v21321_v33 }
 0xa1c   :  { %24174 = vst [vmem:[#allocation129_spill] sm:$0xff] %v21411_v39  ;;  %24178 = vst [vmem:[#allocation103_spill] sm:$0xff] %v21427_v61  ;;  %v21431_v62 = vmul.f32 %v24179_v36, %v21321_v33  ;;  %v24181_v39 = vld [vmem:[#allocation149_spill] sm:$0xff]  ;;  %v24187_v61 = vld [vmem:[#allocation52_spill] sm:$0xff] }
 0xa1d   :  { %v21435_v32 = vmul.f32 %v24181_v39, %v21321_v33  ;;  %24183 = vst [vmem:[#allocation142_spill] sm:$0xff] %v21439_v3  ;;  %24185 = vst [vmem:[#allocation144_spill] sm:$0xff] %v21443_v0  ;;  %v21451_v36 = vmul.f32 %v24187_v61, %v21321_v33  ;;  %v24193_v3 = vld [vmem:[#allocation151_spill] sm:$0xff]  ;;  %v24194_v0 = vld [vmem:[#allocation208_spill] sm:$0xff] }
 0xa1e   :  { %24180 = vst [vmem:[#allocation107_spill] sm:$0xff] %v21431_v62  ;;  %24186 = vst [vmem:[#allocation146_spill] sm:$0xff] %v21447_v6  ;;  %v24189_v62 = vld [vmem:[#allocation209_spill] sm:$0xff]  ;;  %v21463_v44 = vmul.f32 %v24193_v3, %v21321_v33  ;;  %v21467_v58 = vmul.f32 %v24194_v0, %v21321_v33  ;;  %v24196_v6 = vld [vmem:[#allocation154_spill] sm:$0xff]  ;;  %v21487_v0 = vmul.f32 %v24049_v41, %v21321_v33 }
 0xa1f   :  { %24182 = vst [vmem:[#allocation109_spill] sm:$0xff] %v21435_v32  ;;  %24188 = vst [vmem:[#allocation148_spill] sm:$0xff] %v21451_v36  ;;  %v21455_v39 = vmul.f32 %v24189_v62, %v21321_v33  ;;  %v24191_v32 = vld [vmem:[#allocation56_spill] sm:$0xff]  ;;  %v21471_v61 = vmul.f32 %v24196_v6, %v21321_v33  ;;  %v24197_v36 = vld [vmem:[#allocation58_spill] sm:$0xff] }
 0xa20   :  { %v21459_v23 = vmul.f32 %v24191_v32, %v21321_v33  ;;  %24195 = vst [vmem:[#allocation164_spill] sm:$0xff] %v21467_v58  ;;  %v21475_v62 = vmul.f32 %v24197_v36, %v21321_v33  ;;  %v24202_v58 = vld [vmem:[#allocation57_spill] sm:$0xff]  ;;  %v21495_v36 = vmul.f32 %v20747_v52, %v21321_v33 }
 0xa21   :  { %24190 = vst [vmem:[#allocation150_spill] sm:$0xff] %v21455_v39  ;;  %v24198_v39 = vld [vmem:[#allocation55_spill] sm:$0xff]  ;;  %v21491_v6 = vmul.f32 %v24202_v58, %v21321_v33  ;;  %v21511_v58 = vmul.f32 %v20789_v27, %v21321_v33 }
 0xa22   :  { %24192 = vst [vmem:[#allocation159_spill] sm:$0xff] %v21459_v23  ;;  %v21479_v32 = vmul.f32 %v24198_v39, %v21321_v33  ;;  %v24200_v23 = vld [vmem:[#allocation213_spill] sm:$0xff]  ;;  %24204 = vst [vmem:[#allocation79_spill] sm:$0xff] %v21495_v36  ;;  %v21499_v39 = vmul.f32 %v20756_v29, %v21321_v33  ;;  %v21517_v36 = vpop.permute.xlu1 %9214  ;;  %v21519_v29 = vpop.permute.xlu0 %9216 }
 0xa23   :  { %v21483_v3 = vmul.f32 %v24200_v23, %v21321_v33  ;;  %24203 = vst [vmem:[#allocation170_spill] sm:$0xff] %v21491_v6  ;;  %24208 = vst [vmem:[#allocation83_spill] sm:$0xff] %v21511_v58  ;;  %v24209_v6 = vld [vmem:[#allocation161_spill] sm:$0xff]  ;;  %v24214_v58 = vld [vmem:[#allocation163_spill] sm:$0xff] }
 0xa24   :  { %24199 = vst [vmem:[#allocation225_spill] sm:$0xff] %v21479_v32  ;;  %v24205_v32 = vld [vmem:[#allocation215_spill] sm:$0xff]  ;;  %v21515_v52 = vmul.f32 %v24209_v6, %v21321_v33  ;;  %24210 = vst [vmem:[#allocation90_spill] sm:$0xff] %v21517_v36  ;;  %v21535_v6 = vmul.f32 %v24214_v58, %v21321_v33  ;;  %v21539_v36 = vmul.f32 %v20873_v57, %v21321_v33 }
 0xa25   :  { %24201 = vst [vmem:[#allocation168_spill] sm:$0xff] %v21483_v3  ;;  %v21503_v23 = vmul.f32 %v24205_v32, %v21321_v33  ;;  %v24206_v3 = vld [vmem:[#allocation158_spill] sm:$0xff]  ;;  %24211 = vst [vmem:[#allocation180_spill] sm:$0xff] %v21519_v29  ;;  %v21523_v32 = vmul.f32 %v20819_v5, %v21321_v33 }
 0xa26   :  { %v21507_v41 = vmul.f32 %v24206_v3, %v21321_v33  ;;  %v21527_v3 = vmul.f32 %v20832_v55, %v21321_v33  ;;  %24215 = vst [vmem:[#allocation181_spill] sm:$0xff] %v21535_v6  ;;  %v24216_v29 = vld [vmem:[#allocation222_spill] sm:$0xff]  ;;  %v21547_v55 = vmul.f32 %v20901_v25, %v21321_v33  ;;  %v24220_v6 = vld [vmem:[#allocation71_spill] sm:$0xff] }
 0xa27   :  { %v21543_v5 = vmul.f32 %v24216_v29, %v21321_v33  ;;  %v21559_v57 = vmul.f32 %v24220_v6, %v21321_v33  ;;  %v21563_v29 = vmul.f32 %v20955_v45, %v21321_v33 }
 0xa28   :  { %24207 = vst [vmem:[#allocation81_spill] sm:$0xff] %v21507_v41  ;;  %v24212_v41 = vld [vmem:[#allocation61_spill] sm:$0xff] }
 0xa29   :  { %v21531_v27 = vmul.f32 %v24212_v41, %v21321_v33  ;;  %24217 = vst [vmem:[#allocation49_spill] sm:$0xff] %v21543_v5  ;;  %v21551_v41 = vmul.f32 %v20914_v16, %v21321_v33  ;;  %24221 = vst [vmem:[#allocation98_spill] sm:$0xff] %v21559_v57  ;;  %v24222_v5 = vld [vmem:[#allocation169_spill] sm:$0xff]  ;;  %v21571_v16 = vmul.f32 %v20983_v13, %v21321_v33 }
 0xa2a   :  { %v21567_v25 = vmul.f32 %v24222_v5, %v21321_v33  ;;  %v24226_v57 = vld [vmem:[#allocation117_spill] sm:$0xff]  ;;  %v21587_v5 = vmul.f32 %v21037_v4, %v21321_v33 }
 0xa2b   :  { %24213 = vst [vmem:[#allocation47_spill] sm:$0xff] %v21531_v27  ;;  %v24218_v27 = vld [vmem:[#allocation72_spill] sm:$0xff]  ;;  %v21583_v45 = vmul.f32 %v24226_v57, %v21321_v33 }
 0xa2c   :  { %v21555_v58 = vmul.f32 %v24218_v27, %v21321_v33  ;;  %24223 = vst [vmem:[#allocation100_spill] sm:$0xff] %v21567_v25  ;;  %v21575_v27 = vmul.f32 %v20996_v9, %v21321_v33  ;;  %v24228_v25 = vld [vmem:[#allocation116_spill] sm:$0xff]  ;;  %v21595_v9 = vmul.f32 %v21065_v63, %v21321_v33  ;;  %v21615_v63 = vmul.f32 %v21132_v46, %v21321_v33 }
 0xa2d   :  { %24227 = vst [vmem:[#allocation104_spill] sm:$0xff] %v21583_v45  ;;  %v21591_v13 = vmul.f32 %v24228_v25, %v21321_v33  ;;  %v24231_v45 = vld [vmem:[#allocation130_spill] sm:$0xff]  ;;  %v21611_v25 = vmul.f32 %v21119_v38, %v21321_v33  ;;  %v21631_v38 = vmul.f32 %v21173_v40, %v21321_v33  ;;  %v21635_v46 = vmul.f32 %v21188_v31, %v21321_v33 }
 0xa2e   :  { %24219 = vst [vmem:[#allocation96_spill] sm:$0xff] %v21555_v58  ;;  %v24224_v58 = vld [vmem:[#allocation228_spill] sm:$0xff]  ;;  %24229 = vst [vmem:[#allocation106_spill] sm:$0xff] %v21595_v9  ;;  %v21607_v4 = vmul.f32 %v24231_v45, %v21321_v33  ;;  %v21617_v9 = vpop.permute.xlu1 %9218  ;;  %v21627_v45 = vmul.f32 %v21160_v30, %v21321_v33  ;;  %v21647_v30 = vmul.f32 %v21275_v59, %v21321_v33 }
 0xa2f   :  { %v21579_v6 = vmul.f32 %v24224_v58, %v21321_v33  ;;  %v21599_v58 = vmul.f32 %v21078_v47, %v21321_v33  ;;  %24232 = vst [vmem:[#allocation108_spill] sm:$0xff] %v21617_v9  ;;  %v21619_v47 = vpop.permute.xlu0 %9220  ;;  %v21639_v9 = vmul.f32 %v21201_v7, %v21321_v33  ;;  %v24234_v40 = vsub.f32 %v21316_v17, %v21318_v11 }
 0xa30   :  { %24233 = vst [vmem:[#allocation110_spill] sm:$0xff] %v21619_v47  ;;  %v21657_v31 = vmul.f32 %v21214_v43, %v21321_v33  ;;  %v21661_v7 = vmul.f32 %v21229_v14, %v21321_v33  ;;  %v21669_v59 = vmul.f32 %v21253_v10, %v21321_v33 }
 0xa31   :  { %24225 = vst [vmem:[#allocation102_spill] sm:$0xff] %v21579_v6  ;;  %v24230_v6 = vld [vmem:[#allocation123_spill] sm:$0xff]  ;;  %v21653_v47 = vrot.slane %v24234_v40, %v24156_v56  ;;  %v24239_v40 = vld [vmem:[#allocation129_spill] sm:$0xff] }
 0xa32   :  { %v21603_v57 = vmul.f32 %v24230_v6, %v21321_v33  ;;  %v21623_v6 = vmul.f32 %v21147_v1, %v21321_v33  ;;  %v21643_v1 = vmul.f32 %v21266_v22, %v21321_v33  ;;  %v21665_v22 = vmul.f32 %v21242_v60, %v21321_v33 }
 0xa33   :  { %v21673_v17 = vadd.f32 %v21653_v47, %v21331_v24  ;;  %v21677_v43 = vadd.f32 %v21653_v47, %v21335_v20  ;;  %v21681_v14 = vadd.f32 %v21653_v47, %v21339_v42  ;;  %v21685_v60 = vadd.f32 %v21653_v47, %v21343_v53  ;;  %v21719_v24 = vpop.permute.xlu1 %9222 }
 0xa34   :  { %v21689_v10 = vadd.f32 %v21653_v47, %v21347_v48  ;;  %v21693_v11 = vadd.f32 %v21653_v47, %v21351_v2  ;;  %v21697_v20 = vadd.f32 %v21653_v47, %v21355_v37  ;;  %v21701_v42 = vadd.f32 %v21653_v47, %v21359_v50  ;;  %24235 = vst [vmem:[#allocation218_spill] sm:$0xff] %v21719_v24  ;;  %v21721_v2 = vpop.permute.xlu0 %9224  ;;  %v24245_v24 = vld [vmem:[#allocation107_spill] sm:$0xff] }
 0xa35   :  { %v21705_v56 = vadd.f32 %v21653_v47, %v21363_v51  ;;  %v21709_v48 = vadd.f32 %v21653_v47, %v21367_v34  ;;  %v21713_v33 = vadd.f32 %v21653_v47, %v21371_v28  ;;  %v21717_v53 = vadd.f32 %v21653_v47, %v21375_v19  ;;  %24236 = vst [vmem:[#allocation201_spill] sm:$0xff] %v21721_v2  ;;  %v24243_v2 = vld [vmem:[#allocation103_spill] sm:$0xff] }
 0xa36   :  { %v21725_v37 = vadd.f32 %v21653_v47, %v21379_v8  ;;  %v21729_v50 = vadd.f32 %v21653_v47, %v21383_v18  ;;  %v21733_v51 = vadd.f32 %v21653_v47, %v21387_v12  ;;  %v21737_v34 = vadd.f32 %v21653_v47, %v21391_v54  ;;  %v24237_v18 = vld [vmem:[#allocation172_spill] sm:$0xff] }
 0xa37   :  { %v21741_v28 = vadd.f32 %v21653_v47, %v21395_v26  ;;  %v21745_v19 = vadd.f32 %v21653_v47, %v21399_v49  ;;  %v21749_v8 = vadd.f32 %v21653_v47, %v21403_v35  ;;  %v21753_v12 = vadd.f32 %v21653_v47, %v24237_v18 }
 0xa38   :  { %v21757_v54 = vadd.f32 %v21653_v47, %v24239_v40  ;;  %v21761_v26 = vadd.f32 %v21653_v47, %v21415_v15  ;;  %v21765_v49 = vadd.f32 %v21653_v47, %v21423_v21  ;;  %v21769_v35 = vadd.f32 %v21653_v47, %v24243_v2 }
 0xa39   :  { %24238 = vst [vmem:[#allocation223_spill] sm:$0xff] %v21753_v12  ;;  %v21773_v18 = vadd.f32 %v21653_v47, %v24245_v24  ;;  %v24247_v12 = vld [vmem:[#allocation109_spill] sm:$0xff] }
 0xa3a   :  { %24240 = vst [vmem:[#allocation243_spill] sm:$0xff] %v21757_v54  ;;  %24241 = vst [vmem:[#allocation246_spill] sm:$0xff] %v21761_v26  ;;  %v21777_v40 = vadd.f32 %v21653_v47, %v24247_v12  ;;  %v24249_v54 = vld [vmem:[#allocation142_spill] sm:$0xff]  ;;  %v24250_v26 = vld [vmem:[#allocation144_spill] sm:$0xff] }
 0xa3b   :  { %24242 = vst [vmem:[#allocation92_spill] sm:$0xff] %v21765_v49  ;;  %24244 = vst [vmem:[#allocation93_spill] sm:$0xff] %v21769_v35  ;;  %v21781_v15 = vadd.f32 %v21653_v47, %v24249_v54  ;;  %v21785_v21 = vadd.f32 %v21653_v47, %v24250_v26  ;;  %v24252_v49 = vld [vmem:[#allocation146_spill] sm:$0xff]  ;;  %v24253_v35 = vld [vmem:[#allocation148_spill] sm:$0xff]  ;;  %v21805_v26 = vadd.f32 %v21653_v47, %v21463_v44 }
 0xa3c   :  { %24246 = vst [vmem:[#allocation95_spill] sm:$0xff] %v21773_v18  ;;  %24248 = vst [vmem:[#allocation97_spill] sm:$0xff] %v21777_v40  ;;  %v21789_v2 = vadd.f32 %v21653_v47, %v24252_v49  ;;  %v21793_v24 = vadd.f32 %v21653_v47, %v24253_v35  ;;  %v24254_v18 = vld [vmem:[#allocation150_spill] sm:$0xff]  ;;  %v24256_v40 = vld [vmem:[#allocation159_spill] sm:$0xff]  ;;  %v21813_v35 = vadd.f32 %v21653_v47, %v21471_v61 }
 0xa3d   :  { %24251 = vst [vmem:[#allocation99_spill] sm:$0xff] %v21785_v21  ;;  %v21797_v12 = vadd.f32 %v21653_v47, %v24254_v18  ;;  %v21801_v54 = vadd.f32 %v21653_v47, %v24256_v40  ;;  %24258 = vst [vmem:[#allocation115_spill] sm:$0xff] %v21805_v26  ;;  %v24259_v21 = vld [vmem:[#allocation164_spill] sm:$0xff]  ;;  %v21817_v18 = vadd.f32 %v21653_v47, %v21475_v62  ;;  %v21821_v40 = vpop.permute.xlu0 %9228 }
 0xa3e   :  { %v21809_v49 = vadd.f32 %v21653_v47, %v24259_v21  ;;  %24260 = vst [vmem:[#allocation134_spill] sm:$0xff] %v21813_v35  ;;  %24263 = vst [vmem:[#allocation138_spill] sm:$0xff] %v21821_v40  ;;  %v24265_v26 = vld [vmem:[#allocation168_spill] sm:$0xff]  ;;  %v21833_v61 = vadd.f32 %v21653_v47, %v21487_v0  ;;  %v24267_v35 = vld [vmem:[#allocation170_spill] sm:$0xff] }
 0xa3f   :  { %24255 = vst [vmem:[#allocation101_spill] sm:$0xff] %v21797_v12  ;;  %24257 = vst [vmem:[#allocation111_spill] sm:$0xff] %v21801_v54  ;;  %v21819_v12 = vpop.permute.xlu1 %9226  ;;  %v24264_v54 = vld [vmem:[#allocation225_spill] sm:$0xff]  ;;  %v21829_v21 = vadd.f32 %v21653_v47, %v24265_v26  ;;  %v21837_v62 = vadd.f32 %v21653_v47, %v24267_v35  ;;  %v21849_v26 = vadd.f32 %v21653_v47, %v21503_v23 }
 0xa40   :  { %24261 = vst [vmem:[#allocation135_spill] sm:$0xff] %v21817_v18  ;;  %24262 = vst [vmem:[#allocation137_spill] sm:$0xff] %v21819_v12  ;;  %v21825_v44 = vadd.f32 %v21653_v47, %v24264_v54  ;;  %v24268_v18 = vld [vmem:[#allocation79_spill] sm:$0xff]  ;;  %v21845_v54 = vadd.f32 %v21653_v47, %v21499_v39  ;;  %v24270_v40 = vld [vmem:[#allocation81_spill] sm:$0xff]  ;;  %v21865_v39 = vadd.f32 %v21653_v47, %v21523_v32 }
 0xa41   :  { %24266 = vst [vmem:[#allocation139_spill] sm:$0xff] %v21833_v61  ;;  %v21841_v12 = vadd.f32 %v21653_v47, %v24268_v18  ;;  %24269 = vst [vmem:[#allocation140_spill] sm:$0xff] %v21849_v26  ;;  %v21853_v0 = vadd.f32 %v21653_v47, %v24270_v40  ;;  %v24272_v61 = vld [vmem:[#allocation83_spill] sm:$0xff]  ;;  %v21861_v18 = vadd.f32 %v21653_v47, %v21515_v52 }
 0xa42   :  { %v21857_v35 = vadd.f32 %v21653_v47, %v24272_v61  ;;  %v21869_v23 = vadd.f32 %v21653_v47, %v21527_v3  ;;  %v24274_v26 = vld [vmem:[#allocation47_spill] sm:$0xff]  ;;  %v21881_v52 = vadd.f32 %v21653_v47, %v21539_v36  ;;  %v21889_v3 = vadd.f32 %v21653_v47, %v21547_v55 }
 0xa43   :  { %24271 = vst [vmem:[#allocation152_spill] sm:$0xff] %v21853_v0  ;;  %24273 = vst [vmem:[#allocation166_spill] sm:$0xff] %v21861_v18  ;;  %v21873_v40 = vadd.f32 %v21653_v47, %v24274_v26  ;;  %v24276_v0 = vld [vmem:[#allocation181_spill] sm:$0xff]  ;;  %v21893_v26 = vadd.f32 %v21653_v47, %v21551_v41  ;;  %v21913_v41 = vadd.f32 %v21653_v47, %v21571_v16 }
 0xa44   :  { %v21877_v61 = vadd.f32 %v21653_v47, %v24276_v0  ;;  %v24278_v18 = vld [vmem:[#allocation49_spill] sm:$0xff]  ;;  %v21933_v16 = vadd.f32 %v21653_v47, %v21587_v5  ;;  %v21953_v5 = vadd.f32 %v21653_v47, %v21607_v4  ;;  %v21973_v4 = vadd.f32 %v21653_v47, %v21631_v38 }
 0xa45   :  { %24275 = vst [vmem:[#allocation182_spill] sm:$0xff] %v21873_v40  ;;  %v21885_v32 = vadd.f32 %v21653_v47, %v24278_v18  ;;  %v24280_v40 = vld [vmem:[#allocation96_spill] sm:$0xff]  ;;  %v21905_v18 = vadd.f32 %v21653_v47, %v21563_v29  ;;  %v21993_v38 = vadd.f32 %v21653_v47, %v21665_v22 }
 0xa46   :  { %24277 = vst [vmem:[#allocation51_spill] sm:$0xff] %v21877_v61  ;;  %v21897_v0 = vadd.f32 %v21653_v47, %v24280_v40  ;;  %v24282_v61 = vld [vmem:[#allocation98_spill] sm:$0xff]  ;;  %v21917_v40 = vadd.f32 %v21653_v47, %v21575_v27  ;;  %v21937_v27 = vadd.f32 %v21653_v47, %v21591_v13  ;;  %v21957_v13 = vadd.f32 %v21653_v47, %v21611_v25 }
 0xa47   :  { %24279 = vst [vmem:[#allocation62_spill] sm:$0xff] %v21885_v32  ;;  %v21901_v36 = vadd.f32 %v21653_v47, %v24282_v61  ;;  %24284 = vst [vmem:[#allocation124_spill] sm:$0xff] %v21905_v18  ;;  %v24285_v32 = vld [vmem:[#allocation100_spill] sm:$0xff]  ;;  %v21921_v61 = vpop.permute.xlu0 %9232  ;;  %v21977_v25 = vadd.f32 %v21653_v47, %v21635_v46  ;;  %v21997_v46 = vadd.f32 %v21653_v47, %v21669_v59 }
 0xa48   :  { %24281 = vst [vmem:[#allocation183_spill] sm:$0xff] %v21897_v0  ;;  %v21909_v55 = vadd.f32 %v21653_v47, %v24285_v32  ;;  %24286 = vst [vmem:[#allocation94_spill] sm:$0xff] %v21917_v40  ;;  %v21919_v0 = vpop.permute.xlu1 %9230  ;;  %v24289_v18 = vld [vmem:[#allocation104_spill] sm:$0xff]  ;;  %v24290_v40 = vld [vmem:[#allocation106_spill] sm:$0xff] }
 0xa49   :  { %24283 = vst [vmem:[#allocation3_spill] sm:$0xff] %v21901_v36  ;;  %24287 = vst [vmem:[#allocation184_spill] sm:$0xff] %v21919_v0  ;;  %v24288_v36 = vld [vmem:[#allocation102_spill] sm:$0xff]  ;;  %v21929_v32 = vadd.f32 %v21653_v47, %v24289_v18  ;;  %v21941_v0 = vadd.f32 %v21653_v47, %v24290_v40  ;;  %v21949_v18 = vadd.f32 %v21653_v47, %v21603_v57 }
 0xa4a   :  { %v21925_v29 = vadd.f32 %v21653_v47, %v24288_v36  ;;  %v21945_v36 = vadd.f32 %v21653_v47, %v21599_v58  ;;  %v21961_v40 = vadd.f32 %v21653_v47, %v21615_v63  ;;  %v21965_v58 = vadd.f32 %v21653_v47, %v21623_v6  ;;  %24293 = vst [vmem:[#allocation185_spill] sm:$0xff] %v21993_v38  ;;  %v24299_v38 = vld [vmem:[#allocation216_spill] sm:$0xff] }
 0xa4b   :  { %v21969_v57 = vadd.f32 %v21653_v47, %v21627_v45  ;;  %v21981_v63 = vadd.f32 %v21653_v47, %v21639_v9  ;;  %v21985_v6 = vadd.f32 %v21653_v47, %v21657_v31  ;;  %v21989_v45 = vadd.f32 %v21653_v47, %v21661_v7  ;;  %24294 = vst [vmem:[#allocation70_spill] sm:$0xff] %v21997_v46 }
 0xa4c   :  { %v22001_v9 = vadd.f32 %v21653_v47, %v21643_v1  ;;  %v22005_v31 = vadd.f32 %v21653_v47, %v21647_v30  ;;  %v22017_v59 = vadd.f32 %v24299_v38, %v21681_v14  ;;  %v22019_v46 = vpop.permute.xlu1 %9234  ;;  %v22021_v1 = vpop.permute.xlu0 %9236  ;;  %v24302_v30 = vld [vmem:[#allocation69_spill] sm:$0xff]  ;;  %v24305_v38 = vld [vmem:[#allocation4_spill] sm:$0xff] }
 0xa4d   :  { %24291 = vst [vmem:[#allocation66_spill] sm:$0xff] %v21985_v6  ;;  %24292 = vst [vmem:[#allocation5_spill] sm:$0xff] %v21989_v45  ;;  %v24296_v6 = vld [vmem:[#allocation217_spill] sm:$0xff]  ;;  %v24297_v45 = vld [vmem:[#allocation160_spill] sm:$0xff] }
 0xa4e   :  { %24295 = vst [vmem:[#allocation6_spill] sm:$0xff] %v22001_v9  ;;  %v22009_v7 = vadd.f32 %v24296_v6, %v21673_v17  ;;  %v22013_v22 = vadd.f32 %v24297_v45, %v21677_v43  ;;  %24300 = vst [vmem:[#allocation68_spill] sm:$0xff] %v22017_v59  ;;  %v24301_v9 = vld [vmem:[#allocation220_spill] sm:$0xff]  ;;  %v22029_v17 = vadd.f32 %v24302_v30, %v21689_v10  ;;  %v24303_v6 = vld [vmem:[#allocation219_spill] sm:$0xff] }
 0xa4f   :  { %v22025_v47 = vadd.f32 %v24301_v9, %v21685_v60  ;;  %v22033_v43 = vadd.f32 %v24303_v6, %v21693_v11  ;;  %v24304_v45 = vld [vmem:[#allocation64_spill] sm:$0xff]  ;;  %v22041_v59 = vadd.f32 %v24305_v38, %v21701_v42  ;;  %v24307_v9 = vld [vmem:[#allocation221_spill] sm:$0xff]  ;;  %v24308_v30 = vld [vmem:[#allocation67_spill] sm:$0xff] }
 0xa50   :  { %24298 = vst [vmem:[#allocation186_spill] sm:$0xff] %v22013_v22  ;;  %v22037_v14 = vadd.f32 %v24304_v45, %v21697_v20  ;;  %v24306_v22 = vld [vmem:[#allocation165_spill] sm:$0xff]  ;;  %v22049_v10 = vadd.f32 %v24307_v9, %v21709_v48  ;;  %v22053_v11 = vadd.f32 %v24308_v30, %v21713_v33  ;;  %v24309_v6 = vld [vmem:[#allocation167_spill] sm:$0xff]  ;;  %v24310_v45 = vld [vmem:[#allocation224_spill] sm:$0xff] }
 0xa51   :  { %v22045_v60 = vadd.f32 %v24306_v22, %v21705_v56  ;;  %v22057_v20 = vadd.f32 %v24309_v6, %v21717_v53  ;;  %v22061_v42 = vadd.f32 %v24310_v45, %v21725_v37  ;;  %v24311_v38 = vld [vmem:[#allocation227_spill] sm:$0xff]  ;;  %v24313_v22 = vld [vmem:[#allocation12_spill] sm:$0xff]  ;;  %v24315_v9 = vld [vmem:[#allocation226_spill] sm:$0xff] }
 0xa52   :  { %v22065_v56 = vadd.f32 %v24311_v38, %v21729_v50  ;;  %v22069_v48 = vadd.f32 %v24313_v22, %v21733_v51  ;;  %v22073_v33 = vadd.f32 %v24315_v9, %v21737_v34  ;;  %v24317_v30 = vld [vmem:[#allocation7_spill] sm:$0xff]  ;;  %v24328_v9 = vld [vmem:[#allocation246_spill] sm:$0xff] }
 0xa53   :  { %v22077_v53 = vadd.f32 %v24317_v30, %v21741_v28  ;;  %v24319_v6 = vld [vmem:[#allocation75_spill] sm:$0xff]  ;;  %v24331_v30 = vld [vmem:[#allocation92_spill] sm:$0xff] }
 0xa54   :  { %24312 = vst [vmem:[#allocation10_spill] sm:$0xff] %v22065_v56  ;;  %24314 = vst [vmem:[#allocation187_spill] sm:$0xff] %v22069_v48  ;;  %v22081_v37 = vadd.f32 %v24319_v6, %v21745_v19  ;;  %v24321_v45 = vld [vmem:[#allocation171_spill] sm:$0xff]  ;;  %v24324_v56 = vld [vmem:[#allocation73_spill] sm:$0xff] }
 0xa55   :  { %24316 = vst [vmem:[#allocation15_spill] sm:$0xff] %v22073_v33  ;;  %24318 = vst [vmem:[#allocation8_spill] sm:$0xff] %v22077_v53  ;;  %v22085_v50 = vadd.f32 %v24321_v45, %v21749_v8  ;;  %v24323_v38 = vld [vmem:[#allocation223_spill] sm:$0xff]  ;;  %v24327_v48 = vld [vmem:[#allocation230_spill] sm:$0xff] }
 0xa56   :  { %24320 = vst [vmem:[#allocation188_spill] sm:$0xff] %v22081_v37  ;;  %v22089_v51 = vadd.f32 %v24324_v56, %v24323_v38  ;;  %v24326_v22 = vld [vmem:[#allocation243_spill] sm:$0xff]  ;;  %v24329_v33 = vld [vmem:[#allocation80_spill] sm:$0xff]  ;;  %v24332_v53 = vld [vmem:[#allocation229_spill] sm:$0xff] }
 0xa57   :  { %24322 = vst [vmem:[#allocation11_spill] sm:$0xff] %v22085_v50  ;;  %v22093_v34 = vadd.f32 %v24327_v48, %v24326_v22  ;;  %v22097_v28 = vadd.f32 %v24329_v33, %v24328_v9  ;;  %v22101_v19 = vadd.f32 %v24332_v53, %v24331_v30  ;;  %v24334_v6 = vld [vmem:[#allocation93_spill] sm:$0xff]  ;;  %v24335_v37 = vld [vmem:[#allocation232_spill] sm:$0xff]  ;;  %v24337_v45 = vld [vmem:[#allocation95_spill] sm:$0xff]  ;;  %v9239_v9 = vpop.permute.xlu1 %9238 }
 0xa58   :  { %24325 = vst [vmem:[#allocation14_spill] sm:$0xff] %v22089_v51  ;;  %v22105_v8 = vadd.f32 %v24335_v37, %v24334_v6  ;;  %v24338_v50 = vld [vmem:[#allocation125_spill] sm:$0xff]  ;;  %v24341_v51 = vld [vmem:[#allocation82_spill] sm:$0xff]  ;;  %v24343_v22 = vld [vmem:[#allocation231_spill] sm:$0xff] }
 0xa59   :  { %24330 = vst [vmem:[#allocation189_spill] sm:$0xff] %v22097_v28  ;;  %24333 = vst [vmem:[#allocation126_spill] sm:$0xff] %v22101_v19  ;;  %v22109_v56 = vadd.f32 %v24338_v50, %v24337_v45  ;;  %v24340_v38 = vld [vmem:[#allocation97_spill] sm:$0xff]  ;;  %v22117_v33 = vadd.f32 %v24343_v22, %v21781_v15  ;;  %v9241_v28 = vpop.permute.xlu0 %9240  ;;  %v24345_v53 = vld [vmem:[#allocation99_spill] sm:$0xff] }
 0xa5a   :  { %24336 = vst [vmem:[#allocation13_spill] sm:$0xff] %v22105_v8  ;;  %v22113_v48 = vadd.f32 %v24341_v51, %v24340_v38  ;;  %v24346_v30 = vld [vmem:[#allocation85_spill] sm:$0xff]  ;;  %v24347_v37 = vld [vmem:[#allocation234_spill] sm:$0xff]  ;;  %v24349_v50 = vld [vmem:[#allocation84_spill] sm:$0xff] }
 0xa5b   :  { %24339 = vst [vmem:[#allocation190_spill] sm:$0xff] %v22109_v56  ;;  %24344 = vst [vmem:[#allocation74_spill] sm:$0xff] %v22117_v33  ;;  %v22121_v19 = vadd.f32 %v24346_v30, %v24345_v53  ;;  %v22125_v6 = vadd.f32 %v24347_v37, %v21789_v2  ;;  %v22129_v45 = vadd.f32 %v24349_v50, %v21793_v24  ;;  %v24351_v51 = vld [vmem:[#allocation101_spill] sm:$0xff]  ;;  %v24353_v15 = vld [vmem:[#allocation111_spill] sm:$0xff] }
 0xa5c   :  { %24342 = vst [vmem:[#allocation155_spill] sm:$0xff] %v22113_v48  ;;  %v24352_v38 = vld [vmem:[#allocation233_spill] sm:$0xff]  ;;  %v24354_v22 = vld [vmem:[#allocation128_spill] sm:$0xff]  ;;  %v24355_v56 = vld [vmem:[#allocation115_spill] sm:$0xff] }
 0xa5d   :  { %24348 = vst [vmem:[#allocation18_spill] sm:$0xff] %v22125_v6  ;;  %24350 = vst [vmem:[#allocation191_spill] sm:$0xff] %v22129_v45  ;;  %v22133_v48 = vadd.f32 %v24352_v38, %v24351_v51  ;;  %v22137_v33 = vadd.f32 %v24354_v22, %v24353_v15  ;;  %v24356_v8 = vld [vmem:[#allocation88_spill] sm:$0xff]  ;;  %v24359_v37 = vld [vmem:[#allocation134_spill] sm:$0xff] }
 0xa5e   :  { %v22141_v53 = vadd.f32 %v24356_v8, %v24355_v56  ;;  %v24358_v30 = vld [vmem:[#allocation236_spill] sm:$0xff]  ;;  %v24360_v6 = vld [vmem:[#allocation133_spill] sm:$0xff]  ;;  %v24361_v50 = vld [vmem:[#allocation135_spill] sm:$0xff] }
 0xa5f   :  { %v22145_v2 = vadd.f32 %v24358_v30, %v21809_v49  ;;  %v22149_v24 = vadd.f32 %v24360_v6, %v24359_v37  ;;  %v24362_v45 = vld [vmem:[#allocation87_spill] sm:$0xff]  ;;  %v24365_v22 = vld [vmem:[#allocation132_spill] sm:$0xff]  ;;  %v24371_v37 = vld [vmem:[#allocation89_spill] sm:$0xff] }
 0xa60   :  { %24357 = vst [vmem:[#allocation122_spill] sm:$0xff] %v22141_v53  ;;  %v22153_v51 = vadd.f32 %v24362_v45, %v24361_v50  ;;  %v24363_v38 = vld [vmem:[#allocation235_spill] sm:$0xff]  ;;  %v22161_v8 = vadd.f32 %v24365_v22, %v21829_v21  ;;  %v24368_v53 = vld [vmem:[#allocation238_spill] sm:$0xff]  ;;  %v22173_v45 = vadd.f32 %v24371_v37, %v21841_v12  ;;  %v24372_v50 = vld [vmem:[#allocation237_spill] sm:$0xff] }
 0xa61   :  { %v22157_v15 = vadd.f32 %v24363_v38, %v21825_v44  ;;  %v24367_v56 = vld [vmem:[#allocation139_spill] sm:$0xff]  ;;  %v22177_v44 = vadd.f32 %v24372_v50, %v21845_v54  ;;  %v24373_v38 = vld [vmem:[#allocation140_spill] sm:$0xff]  ;;  %v24383_v37 = vld [vmem:[#allocation173_spill] sm:$0xff] }
 0xa62   :  { %24366 = vst [vmem:[#allocation192_spill] sm:$0xff] %v22161_v8  ;;  %v22165_v49 = vadd.f32 %v24368_v53, %v24367_v56  ;;  %v24369_v30 = vld [vmem:[#allocation91_spill] sm:$0xff]  ;;  %v24376_v22 = vld [vmem:[#allocation152_spill] sm:$0xff]  ;;  %v24377_v8 = vld [vmem:[#allocation174_spill] sm:$0xff]  ;;  %v22197_v54 = vadd.f32 %v24383_v37, %v21865_v39 }
 0xa63   :  { %24364 = vst [vmem:[#allocation17_spill] sm:$0xff] %v22157_v15  ;;  %v22169_v6 = vadd.f32 %v24369_v30, %v21837_v62  ;;  %v24374_v15 = vld [vmem:[#allocation86_spill] sm:$0xff]  ;;  %v22185_v53 = vadd.f32 %v24377_v8, %v24376_v22  ;;  %v24379_v56 = vld [vmem:[#allocation240_spill] sm:$0xff]  ;;  %v24385_v50 = vld [vmem:[#allocation239_spill] sm:$0xff] }
 0xa64   :  { %v22181_v21 = vadd.f32 %v24374_v15, %v24373_v38  ;;  %v22189_v62 = vadd.f32 %v24379_v56, %v21857_v35  ;;  %v24380_v30 = vld [vmem:[#allocation166_spill] sm:$0xff]  ;;  %24384 = vst [vmem:[#allocation19_spill] sm:$0xff] %v22197_v54  ;;  %v22201_v15 = vadd.f32 %v24385_v50, %v21869_v23  ;;  %v24390_v22 = vld [vmem:[#allocation51_spill] sm:$0xff] }
 0xa65   :  { %24370 = vst [vmem:[#allocation121_spill] sm:$0xff] %v22169_v6  ;;  %24378 = vst [vmem:[#allocation193_spill] sm:$0xff] %v22185_v53  ;;  %v24381_v6 = vld [vmem:[#allocation136_spill] sm:$0xff]  ;;  %v24387_v38 = vld [vmem:[#allocation182_spill] sm:$0xff] }
 0xa66   :  { %24375 = vst [vmem:[#allocation20_spill] sm:$0xff] %v22181_v21  ;;  %v22193_v12 = vadd.f32 %v24381_v6, %v24380_v30  ;;  %24386 = vst [vmem:[#allocation114_spill] sm:$0xff] %v22201_v15  ;;  %v24388_v21 = vld [vmem:[#allocation113_spill] sm:$0xff]  ;;  %v24391_v53 = vld [vmem:[#allocation176_spill] sm:$0xff]  ;;  %v9243_v30 = vpop.permute.xlu1 %9242 }
 0xa67   :  { %v22205_v8 = vadd.f32 %v24388_v21, %v24387_v38  ;;  %v22209_v35 = vadd.f32 %v24391_v53, %v24390_v22  ;;  %v24393_v56 = vld [vmem:[#allocation242_spill] sm:$0xff]  ;;  %v24397_v23 = vld [vmem:[#allocation175_spill] sm:$0xff]  ;;  %v24398_v21 = vld [vmem:[#allocation241_spill] sm:$0xff] }
 0xa68   :  { %24382 = vst [vmem:[#allocation127_spill] sm:$0xff] %v22193_v12  ;;  %v22213_v6 = vadd.f32 %v24393_v56, %v21881_v52  ;;  %v9245_v12 = vpop.permute.xlu0 %9244  ;;  %v24395_v39 = vld [vmem:[#allocation62_spill] sm:$0xff]  ;;  %v22221_v50 = vadd.f32 %v24397_v23, %v21889_v3  ;;  %v22225_v38 = vadd.f32 %v24398_v21, %v21893_v26  ;;  %v24400_v53 = vld [vmem:[#allocation183_spill] sm:$0xff]  ;;  %v24401_v22 = vld [vmem:[#allocation157_spill] sm:$0xff] }
 0xa69   :  { %24389 = vst [vmem:[#allocation9_spill] sm:$0xff] %v22205_v8  ;;  %24392 = vst [vmem:[#allocation194_spill] sm:$0xff] %v22209_v35  ;;  %v24396_v37 = vld [vmem:[#allocation162_spill] sm:$0xff]  ;;  %v22229_v35 = vadd.f32 %v24401_v22, %v24400_v53  ;;  %v24402_v52 = vld [vmem:[#allocation3_spill] sm:$0xff] }
 0xa6a   :  { %24394 = vst [vmem:[#allocation22_spill] sm:$0xff] %v22213_v6  ;;  %v22217_v54 = vadd.f32 %v24396_v37, %v24395_v39  ;;  %24399 = vst [vmem:[#allocation27_spill] sm:$0xff] %v22225_v38  ;;  %v24403_v56 = vld [vmem:[#allocation105_spill] sm:$0xff]  ;;  %v24404_v8 = vld [vmem:[#allocation124_spill] sm:$0xff] }
 0xa6b   :  { %v22233_v6 = vadd.f32 %v24403_v56, %v24402_v52  ;;  %v24405_v15 = vld [vmem:[#allocation179_spill] sm:$0xff]  ;;  %v24406_v37 = vld [vmem:[#allocation245_spill] sm:$0xff]  ;;  %v24408_v21 = vld [vmem:[#allocation94_spill] sm:$0xff] }
 0xa6c   :  { %v22237_v39 = vadd.f32 %v24405_v15, %v24404_v8  ;;  %v22241_v3 = vadd.f32 %v24406_v37, %v21909_v55  ;;  %v24407_v23 = vld [vmem:[#allocation177_spill] sm:$0xff]  ;;  %v24409_v38 = vld [vmem:[#allocation178_spill] sm:$0xff]  ;;  %v24410_v22 = vld [vmem:[#allocation244_spill] sm:$0xff] }
 0xa6d   :  { %v22245_v26 = vadd.f32 %v24407_v23, %v21913_v41  ;;  %v22249_v53 = vadd.f32 %v24409_v38, %v24408_v21  ;;  %v22253_v52 = vadd.f32 %v24410_v22, %v21925_v29  ;;  %v24411_v56 = vld [vmem:[#allocation131_spill] sm:$0xff]  ;;  %v24412_v8 = vld [vmem:[#allocation196_spill] sm:$0xff]  ;;  %v24413_v37 = vld [vmem:[#allocation90_spill] sm:$0xff] }
 0xa6e   :  { %v22257_v15 = vadd.f32 %v24411_v56, %v21929_v32  ;;  %v22261_v55 = vadd.f32 %v24412_v8, %v21933_v16  ;;  %v22265_v41 = vadd.f32 %v24413_v37, %v21937_v27  ;;  %v24414_v23 = vld [vmem:[#allocation180_spill] sm:$0xff]  ;;  %v24416_v22 = vld [vmem:[#allocation110_spill] sm:$0xff]  ;;  %v24418_v8 = vld [vmem:[#allocation201_spill] sm:$0xff] }
 0xa6f   :  { %v22269_v38 = vadd.f32 %v24414_v23, %v21941_v0  ;;  %v24415_v21 = vld [vmem:[#allocation108_spill] sm:$0xff]  ;;  %v22277_v32 = vadd.f32 %v24416_v22, %v21949_v18  ;;  %v24417_v56 = vld [vmem:[#allocation218_spill] sm:$0xff]  ;;  %v22285_v27 = vadd.f32 %v24418_v8, %v21957_v13  ;;  %v24419_v37 = vld [vmem:[#allocation137_spill] sm:$0xff]  ;;  %v22305_v13 = vadd.f32 %v22019_v46, %v21977_v25  ;;  %v9247_v22 = vpop.permute.xlu1 %9246 }
 0xa70   :  { %v22273_v29 = vadd.f32 %v24415_v21, %v21945_v36  ;;  %v22281_v16 = vadd.f32 %v24417_v56, %v21953_v5  ;;  %v22289_v0 = vadd.f32 %v24419_v37, %v21961_v40  ;;  %v24420_v23 = vld [vmem:[#allocation138_spill] sm:$0xff]  ;;  %v24421_v21 = vld [vmem:[#allocation184_spill] sm:$0xff]  ;;  %v22301_v5 = vadd.f32 %v21921_v61, %v21973_v4  ;;  %v9249_v56 = vpop.permute.xlu0 %9248  ;;  %v24425_v37 = vld [vmem:[#allocation5_spill] sm:$0xff] }
 0xa71   :  { %v22293_v36 = vadd.f32 %v24420_v23, %v21965_v58  ;;  %v22297_v18 = vadd.f32 %v24421_v21, %v21969_v57  ;;  %v22309_v40 = vadd.f32 %v22021_v1, %v21981_v63  ;;  %v24423_v58 = vld [vmem:[#allocation66_spill] sm:$0xff]  ;;  %v22315_v57 = vadd.f32 %v9241_v28, %v24425_v37  ;;  %v24426_v23 = vld [vmem:[#allocation185_spill] sm:$0xff] }
 0xa72   :  { %v22312_v8 = vadd.f32 %v9239_v9, %v24423_v58  ;;  %v22318_v21 = vadd.f32 %v9243_v30, %v24426_v23  ;;  %v24427_v61 = vld [vmem:[#allocation70_spill] sm:$0xff]  ;;  %v22327_v63 = vadd.f32 %v9249_v56, %v22005_v31  ;;  %v9412_v1 = vmax.f32 %v22009_v7, 0.0  ;;  %v24430_v58 = vld [vmem:[#allocation68_spill] sm:$0xff] }
 0xa73   :  { %24422 = vst [vmem:[#allocation21_spill] sm:$0xff] %v22309_v40  ;;  %v22321_v4 = vadd.f32 %v9245_v12, %v24427_v61  ;;  %v24428_v25 = vld [vmem:[#allocation6_spill] sm:$0xff]  ;;  %v9415_v28 = vmax.f32 %v22025_v47, 0.0  ;;  %v9416_v30 = vmax.f32 %v22029_v17, 0.0  ;;  %v9417_v37 = vmax.f32 %v22033_v43, 0.0 }
 0xa74   :  { %24424 = vst [vmem:[#allocation24_spill] sm:$0xff] %v22312_v8  ;;  %v22324_v46 = vadd.f32 %v9247_v22, %v24428_v25  ;;  %v24429_v40 = vld [vmem:[#allocation186_spill] sm:$0xff]  ;;  %v9414_v8 = vmax.f32 %v24430_v58, 0.0  ;;  %v9418_v12 = vmax.f32 %v22037_v14, 0.0  ;;  %v9419_v22 = vmax.f32 %v22041_v59, 0.0  ;;  %9493 = vst.msk [vmem:[%s22743_s9] sm:$0xff] %vm8408_vm2, %v9412_v1 }
 0xa75   :  { %v9413_v9 = vmax.f32 %v24429_v40, 0.0  ;;  %v9420_v23 = vmax.f32 %v22045_v60, 0.0  ;;  %v9421_v31 = vmax.f32 %v22049_v10, 0.0  ;;  %v9422_v7 = vmax.f32 %v22053_v11, 0.0  ;;  %v24431_v17 = vld [vmem:[#allocation10_spill] sm:$0xff]  ;;  %9496 = vst.msk [vmem:[%s22743_s9 + $0x18] sm:$0xff] %vm8408_vm2, %v9415_v28 }
 0xa76   :  { %v9423_v47 = vmax.f32 %v22057_v20, 0.0  ;;  %v9424_v59 = vmax.f32 %v22061_v42, 0.0  ;;  %v9425_v43 = vmax.f32 %v24431_v17, 0.0  ;;  %9495 = vst.msk [vmem:[%s22743_s9 + $0x10] sm:$0xff] %vm8408_vm2, %v9414_v8  ;;  %9497 = vst.msk [vmem:[%s22743_s9 + $0x20] sm:$0xff] %vm8408_vm2, %v9416_v30  ;;  %v24432_v14 = vld [vmem:[#allocation187_spill] sm:$0xff] }
 0xa77   :  { %9494 = vst.msk [vmem:[%s22743_s9 + $0x8] sm:$0xff] %vm8408_vm2, %v9413_v9  ;;  %9498 = vst.msk [vmem:[%s22743_s9 + $0x28] sm:$0xff] %vm8408_vm2, %v9417_v37  ;;  %v9426_v60 = vmax.f32 %v24432_v14, 0.0  ;;  %v24433_v10 = vld [vmem:[#allocation15_spill] sm:$0xff]  ;;  %v24434_v20 = vld [vmem:[#allocation8_spill] sm:$0xff]  ;;  %v9432_v9 = vmax.f32 %v22093_v34, 0.0 }
 0xa78   :  { %v9427_v11 = vmax.f32 %v24433_v10, 0.0  ;;  %v9428_v42 = vmax.f32 %v24434_v20, 0.0  ;;  %v24435_v40 = vld [vmem:[#allocation188_spill] sm:$0xff]  ;;  %9499 = vst.msk [vmem:[%s22743_s9 + $0x30] sm:$0xff] %vm8408_vm2, %v9418_v12  ;;  %9500 = vst.msk [vmem:[%s22743_s9 + $0x38] sm:$0xff] %vm8408_vm2, %v9419_v22  ;;  %v24436_v8 = vld [vmem:[#allocation11_spill] sm:$0xff] }
 0xa79   :  { %v9429_v56 = vmax.f32 %v24435_v40, 0.0  ;;  %9501 = vst.msk [vmem:[%s22743_s9 + $0x40] sm:$0xff] %vm8408_vm2, %v9420_v23  ;;  %9502 = vst.msk [vmem:[%s22743_s9 + $0x48] sm:$0xff] %vm8408_vm2, %v9421_v31  ;;  %v9430_v61 = vmax.f32 %v24436_v8, 0.0  ;;  %v24437_v25 = vld [vmem:[#allocation14_spill] sm:$0xff]  ;;  %v24438_v58 = vld [vmem:[#allocation189_spill] sm:$0xff] }
 0xa7a   :  { %v9431_v1 = vmax.f32 %v24437_v25, 0.0  ;;  %v9433_v28 = vmax.f32 %v24438_v58, 0.0  ;;  %9503 = vst.msk [vmem:[%s22743_s9 + $0x50] sm:$0xff] %vm8408_vm2, %v9422_v7  ;;  %9504 = vst.msk [vmem:[%s22743_s9 + $0x58] sm:$0xff] %vm8408_vm2, %v9423_v47  ;;  %v24439_v34 = vld [vmem:[#allocation126_spill] sm:$0xff]  ;;  %v24440_v37 = vld [vmem:[#allocation13_spill] sm:$0xff] }
 0xa7b   :  { %9505 = vst.msk [vmem:[%s22743_s9 + $0x60] sm:$0xff] %vm8408_vm2, %v9424_v59  ;;  %9506 = vst.msk [vmem:[%s22743_s9 + $0x68] sm:$0xff] %vm8408_vm2, %v9425_v43  ;;  %v9434_v30 = vmax.f32 %v24439_v34, 0.0  ;;  %v9435_v12 = vmax.f32 %v24440_v37, 0.0  ;;  %v24441_v22 = vld [vmem:[#allocation190_spill] sm:$0xff]  ;;  %v24442_v31 = vld [vmem:[#allocation155_spill] sm:$0xff] }
 0xa7c   :  { %v9436_v23 = vmax.f32 %v24441_v22, 0.0  ;;  %v9437_v7 = vmax.f32 %v24442_v31, 0.0  ;;  %9507 = vst.msk [vmem:[%s22743_s9 + $0x70] sm:$0xff] %vm8408_vm2, %v9426_v60  ;;  %9508 = vst.msk [vmem:[%s22743_s9 + $0x78] sm:$0xff] %vm8408_vm2, %v9427_v11  ;;  %v24443_v47 = vld [vmem:[#allocation74_spill] sm:$0xff]  ;;  %v9439_v17 = vmax.f32 %v22121_v19, 0.0 }
 0xa7d   :  { %9509 = vst.msk [vmem:[%s22743_s9 + $0x80] sm:$0xff] %vm8408_vm2, %v9428_v42  ;;  %9510 = vst.msk [vmem:[%s22743_s9 + $0x88] sm:$0xff] %vm8408_vm2, %v9429_v56  ;;  %v9438_v59 = vmax.f32 %v24443_v47, 0.0  ;;  %v24444_v43 = vld [vmem:[#allocation18_spill] sm:$0xff]  ;;  %v24445_v60 = vld [vmem:[#allocation191_spill] sm:$0xff]  ;;  %v9442_v19 = vmax.f32 %v22133_v48, 0.0 }
 0xa7e   :  { %v9440_v14 = vmax.f32 %v24444_v43, 0.0  ;;  %v9441_v10 = vmax.f32 %v24445_v60, 0.0  ;;  %9511 = vst.msk [vmem:[%s22743_s9 + $0x90] sm:$0xff] %vm8408_vm2, %v9430_v61  ;;  %9512 = vst.msk [vmem:[%s22743_s9 + $0x98] sm:$0xff] %vm8408_vm2, %v9431_v1  ;;  %v9443_v11 = vmax.f32 %v22137_v33, 0.0  ;;  %v24446_v20 = vld [vmem:[#allocation122_spill] sm:$0xff] }
 0xa7f   :  { %9513 = vst.msk [vmem:[%s22743_s9 + $0xa0] sm:$0xff] %vm8408_vm2, %v9432_v9  ;;  %9514 = vst.msk [vmem:[%s22743_s9 + $0xa8] sm:$0xff] %vm8408_vm2, %v9433_v28  ;;  %v9444_v42 = vmax.f32 %v24446_v20, 0.0  ;;  %v9445_v40 = vmax.f32 %v22145_v2, 0.0  ;;  %v9446_v48 = vmax.f32 %v22149_v24, 0.0  ;;  %v9447_v33 = vmax.f32 %v22153_v51, 0.0 }
 0xa80   :  { %9515 = vst.msk [vmem:[%s22743_s9 + $0xb0] sm:$0xff] %vm8408_vm2, %v9434_v30  ;;  %9516 = vst.msk [vmem:[%s22743_s9 + $0xb8] sm:$0xff] %vm8408_vm2, %v9435_v12  ;;  %v24447_v2 = vld [vmem:[#allocation17_spill] sm:$0xff]  ;;  %v24448_v8 = vld [vmem:[#allocation192_spill] sm:$0xff]  ;;  %v9450_v24 = vmax.f32 %v22165_v49, 0.0  ;;  %v9452_v1 = vmax.f32 %v22173_v45, 0.0 }
 0xa81   :  { %9517 = vst.msk [vmem:[%s22743_s9 + $0xc0] sm:$0xff] %vm8408_vm2, %v9436_v23  ;;  %9518 = vst.msk [vmem:[%s22743_s9 + $0xc8] sm:$0xff] %vm8408_vm2, %v9437_v7  ;;  %v9448_v56 = vmax.f32 %v24447_v2, 0.0  ;;  %v9449_v61 = vmax.f32 %v24448_v8, 0.0  ;;  %v24449_v51 = vld [vmem:[#allocation121_spill] sm:$0xff]  ;;  %v9453_v9 = vmax.f32 %v22177_v44, 0.0 }
 0xa82   :  { %9519 = vst.msk [vmem:[%s22743_s9 + $0xd0] sm:$0xff] %vm8408_vm2, %v9438_v59  ;;  %9520 = vst.msk [vmem:[%s22743_s9 + $0xd8] sm:$0xff] %vm8408_vm2, %v9439_v17  ;;  %v9451_v25 = vmax.f32 %v24449_v51, 0.0  ;;  %v24450_v49 = vld [vmem:[#allocation20_spill] sm:$0xff]  ;;  %v24451_v44 = vld [vmem:[#allocation193_spill] sm:$0xff]  ;;  %v9456_v28 = vmax.f32 %v22189_v62, 0.0 }
 0xa83   :  { %9521 = vst.msk [vmem:[%s22743_s9 + $0xe0] sm:$0xff] %vm8408_vm2, %v9440_v14  ;;  %9522 = vst.msk [vmem:[%s22743_s9 + $0xe8] sm:$0xff] %vm8408_vm2, %v9441_v10  ;;  %v9454_v45 = vmax.f32 %v24450_v49, 0.0  ;;  %v9455_v58 = vmax.f32 %v24451_v44, 0.0  ;;  %v24452_v34 = vld [vmem:[#allocation127_spill] sm:$0xff]  ;;  %v24454_v12 = vld [vmem:[#allocation114_spill] sm:$0xff] }
 0xa84   :  { %9523 = vst.msk [vmem:[%s22743_s9 + $0xf0] sm:$0xff] %vm8408_vm2, %v9442_v19  ;;  %9524 = vst.msk [vmem:[%s22743_s9 + $0xf8] sm:$0xff] %vm8408_vm2, %v9443_v11  ;;  %v9457_v30 = vmax.f32 %v24452_v34, 0.0  ;;  %v24453_v62 = vld [vmem:[#allocation19_spill] sm:$0xff]  ;;  %v9459_v22 = vmax.f32 %v24454_v12, 0.0  ;;  %v24455_v23 = vld [vmem:[#allocation9_spill] sm:$0xff] }
 0xa85   :  { %9525 = vst.msk [vmem:[%s22743_s9 + $0x100] sm:$0xff] %vm8408_vm2, %v9444_v42  ;;  %9526 = vst.msk [vmem:[%s22743_s9 + $0x108] sm:$0xff] %vm8408_vm2, %v9445_v40  ;;  %v9458_v37 = vmax.f32 %v24453_v62, 0.0  ;;  %v9460_v31 = vmax.f32 %v24455_v23, 0.0  ;;  %v24456_v7 = vld [vmem:[#allocation194_spill] sm:$0xff]  ;;  %v9463_v43 = vmax.f32 %v22217_v54, 0.0 }
 0xa86   :  { %9527 = vst.msk [vmem:[%s22743_s9 + $0x110] sm:$0xff] %vm8408_vm2, %v9446_v48  ;;  %9528 = vst.msk [vmem:[%s22743_s9 + $0x118] sm:$0xff] %vm8408_vm2, %v9447_v33  ;;  %v9461_v47 = vmax.f32 %v24456_v7, 0.0  ;;  %v24457_v59 = vld [vmem:[#allocation22_spill] sm:$0xff]  ;;  %v9464_v14 = vmax.f32 %v22221_v50, 0.0  ;;  %v24458_v60 = vld [vmem:[#allocation27_spill] sm:$0xff] }
 0xa87   :  { %9529 = vst.msk [vmem:[%s22743_s9 + $0x120] sm:$0xff] %vm8408_vm2, %v9448_v56  ;;  %9530 = vst.msk [vmem:[%s22743_s9 + $0x128] sm:$0xff] %vm8408_vm2, %v9449_v61  ;;  %v9462_v17 = vmax.f32 %v24457_v59, 0.0  ;;  %v9465_v10 = vmax.f32 %v24458_v60, 0.0  ;;  %v9466_v54 = vmax.f32 %v22229_v35, 0.0  ;;  %v9467_v50 = vmax.f32 %v22233_v6, 0.0 }
 0xa88   :  { %9531 = vst.msk [vmem:[%s22743_s9 + $0x130] sm:$0xff] %vm8408_vm2, %v9450_v24  ;;  %9532 = vst.msk [vmem:[%s22743_s9 + $0x138] sm:$0xff] %vm8408_vm2, %v9451_v25  ;;  %v9468_v19 = vmax.f32 %v22237_v39, 0.0  ;;  %v9469_v11 = vmax.f32 %v22241_v3, 0.0  ;;  %v9470_v35 = vmax.f32 %v22245_v26, 0.0  ;;  %v9471_v6 = vmax.f32 %v22249_v53, 0.0 }
 0xa89   :  { %9533 = vst.msk [vmem:[%s22743_s9 + $0x140] sm:$0xff] %vm8408_vm2, %v9452_v1  ;;  %9534 = vst.msk [vmem:[%s22743_s9 + $0x148] sm:$0xff] %vm8408_vm2, %v9453_v9  ;;  %v9472_v39 = vmax.f32 %v22253_v52, 0.0  ;;  %v9473_v3 = vmax.f32 %v22257_v15, 0.0  ;;  %v9474_v26 = vmax.f32 %v22261_v55, 0.0  ;;  %v9475_v53 = vmax.f32 %v22265_v41, 0.0 }
 0xa8a   :  { %9535 = vst.msk [vmem:[%s22743_s9 + $0x150] sm:$0xff] %vm8408_vm2, %v9454_v45  ;;  %9536 = vst.msk [vmem:[%s22743_s9 + $0x158] sm:$0xff] %vm8408_vm2, %v9455_v58  ;;  %v9476_v52 = vmax.f32 %v22269_v38, 0.0  ;;  %v9477_v15 = vmax.f32 %v22273_v29, 0.0  ;;  %v9478_v55 = vmax.f32 %v22277_v32, 0.0  ;;  %v9479_v41 = vmax.f32 %v22281_v16, 0.0 }
 0xa8b   :  { %9537 = vst.msk [vmem:[%s22743_s9 + $0x160] sm:$0xff] %vm8408_vm2, %v9456_v28  ;;  %9538 = vst.msk [vmem:[%s22743_s9 + $0x168] sm:$0xff] %vm8408_vm2, %v9457_v30  ;;  %v9480_v38 = vmax.f32 %v22285_v27, 0.0  ;;  %v9481_v29 = vmax.f32 %v22289_v0, 0.0  ;;  %v9482_v32 = vmax.f32 %v22293_v36, 0.0  ;;  %v9483_v16 = vmax.f32 %v22297_v18, 0.0 }
 0xa8c   :  { %9539 = vst.msk [vmem:[%s22743_s9 + $0x170] sm:$0xff] %vm8408_vm2, %v9458_v37  ;;  %9540 = vst.msk [vmem:[%s22743_s9 + $0x178] sm:$0xff] %vm8408_vm2, %v9459_v22  ;;  %v9484_v27 = vmax.f32 %v22301_v5, 0.0  ;;  %v9485_v0 = vmax.f32 %v22305_v13, 0.0  ;;  %v24459_v36 = vld [vmem:[#allocation21_spill] sm:$0xff]  ;;  %v24460_v5 = vld [vmem:[#allocation24_spill] sm:$0xff] }
 0xa8d   :  { %9541 = vst.msk [vmem:[%s22743_s9 + $0x180] sm:$0xff] %vm8408_vm2, %v9460_v31  ;;  %9542 = vst.msk [vmem:[%s22743_s9 + $0x188] sm:$0xff] %vm8408_vm2, %v9461_v47  ;;  %v9486_v18 = vmax.f32 %v24459_v36, 0.0  ;;  %v9487_v13 = vmax.f32 %v24460_v5, 0.0  ;;  %v9488_v20 = vmax.f32 %v22315_v57, 0.0  ;;  %v9489_v42 = vmax.f32 %v22318_v21, 0.0 }
 0xa8e   :  { %9543 = vst.msk [vmem:[%s22743_s9 + $0x190] sm:$0xff] %vm8408_vm2, %v9462_v17  ;;  %9544 = vst.msk [vmem:[%s22743_s9 + $0x198] sm:$0xff] %vm8408_vm2, %v9463_v43  ;;  %v9490_v57 = vmax.f32 %v22321_v4, 0.0  ;;  %v9491_v21 = vmax.f32 %v22324_v46, 0.0  ;;  %v9492_v40 = vmax.f32 %v22327_v63, 0.0 }
 0xa8f   :  { %9545 = vst.msk [vmem:[%s22743_s9 + $0x1a0] sm:$0xff] %vm8408_vm2, %v9464_v14  ;;  %9546 = vst.msk [vmem:[%s22743_s9 + $0x1a8] sm:$0xff] %vm8408_vm2, %v9465_v10 }
 0xa90   :  { %9547 = vst.msk [vmem:[%s22743_s9 + $0x1b0] sm:$0xff] %vm8408_vm2, %v9466_v54  ;;  %9548 = vst.msk [vmem:[%s22743_s9 + $0x1b8] sm:$0xff] %vm8408_vm2, %v9467_v50 }
 0xa91   :  { %9549 = vst.msk [vmem:[%s22743_s9 + $0x1c0] sm:$0xff] %vm8408_vm2, %v9468_v19  ;;  %9550 = vst.msk [vmem:[%s22743_s9 + $0x1c8] sm:$0xff] %vm8408_vm2, %v9469_v11 }
 0xa92   :  { %9551 = vst.msk [vmem:[%s22743_s9 + $0x1d0] sm:$0xff] %vm8408_vm2, %v9470_v35  ;;  %9552 = vst.msk [vmem:[%s22743_s9 + $0x1d8] sm:$0xff] %vm8408_vm2, %v9471_v6 }
 0xa93   :  { %9553 = vst.msk [vmem:[%s22743_s9 + $0x1e0] sm:$0xff] %vm8408_vm2, %v9472_v39  ;;  %9554 = vst.msk [vmem:[%s22743_s9 + $0x1e8] sm:$0xff] %vm8408_vm2, %v9473_v3 }
 0xa94   :  { %9555 = vst.msk [vmem:[%s22743_s9 + $0x1f0] sm:$0xff] %vm8408_vm2, %v9474_v26  ;;  %9556 = vst.msk [vmem:[%s22743_s9 + $0x1f8] sm:$0xff] %vm8408_vm2, %v9475_v53 }
 0xa95   :  { %9557 = vst.msk [vmem:[%s22743_s9 + $0x200] sm:$0xff] %vm8408_vm2, %v9476_v52  ;;  %9558 = vst.msk [vmem:[%s22743_s9 + $0x208] sm:$0xff] %vm8408_vm2, %v9477_v15 }
 0xa96   :  { %9559 = vst.msk [vmem:[%s22743_s9 + $0x210] sm:$0xff] %vm8408_vm2, %v9478_v55  ;;  %9560 = vst.msk [vmem:[%s22743_s9 + $0x218] sm:$0xff] %vm8408_vm2, %v9479_v41 }
 0xa97   :  { %9561 = vst.msk [vmem:[%s22743_s9 + $0x220] sm:$0xff] %vm8408_vm2, %v9480_v38  ;;  %9562 = vst.msk [vmem:[%s22743_s9 + $0x228] sm:$0xff] %vm8408_vm2, %v9481_v29 }
 0xa98   :  { %9563 = vst.msk [vmem:[%s22743_s9 + $0x230] sm:$0xff] %vm8408_vm2, %v9482_v32  ;;  %9564 = vst.msk [vmem:[%s22743_s9 + $0x238] sm:$0xff] %vm8408_vm2, %v9483_v16 }
 0xa99   :  { %9565 = vst.msk [vmem:[%s22743_s9 + $0x240] sm:$0xff] %vm8408_vm2, %v9484_v27  ;;  %9566 = vst.msk [vmem:[%s22743_s9 + $0x248] sm:$0xff] %vm8408_vm2, %v9485_v0 }
 0xa9a   :  { %9567 = vst.msk [vmem:[%s22743_s9 + $0x250] sm:$0xff] %vm8408_vm2, %v9486_v18  ;;  %9568 = vst.msk [vmem:[%s22743_s9 + $0x258] sm:$0xff] %vm8408_vm2, %v9487_v13 }
 0xa9b   :  { %9569 = vst.msk [vmem:[%s22743_s9 + $0x260] sm:$0xff] %vm8408_vm2, %v9488_v20  ;;  %9570 = vst.msk [vmem:[%s22743_s9 + $0x268] sm:$0xff] %vm8408_vm2, %v9489_v42 }
 0xa9c   :  { %9571 = vst.msk [vmem:[%s22743_s9 + $0x270] sm:$0xff] %vm8408_vm2, %v9490_v57  ;;  %9572 = vst.msk [vmem:[%s22743_s9 + $0x278] sm:$0xff] %vm8408_vm2, %v9491_v21 }
 0xa9d   :  { %9573 = vst.msk [vmem:[%s22743_s9 + $0x280] sm:$0xff] %vm8408_vm2, %v9492_v40 }

</bundles_post_ra>
